<compile_context>
chip_gen: v5e
topology: v5e:2x2
jax: 0.10.0
libtpu: 0.0.40
codegen_flags: <defaults>
</compile_context>

<pallas_src>
import functools
import math

import jax
import jax.numpy as jnp
from jax.experimental import pallas as pl
from jax.experimental.pallas import tpu as pltpu


# ----------------------------------------------------------------------------
# Helpers
# ----------------------------------------------------------------------------
def _round_up(x, m):
    return (x + m - 1) // m * m


def _pick_tile(dim, pref, align):
    """Return (padded_dim, tile) with padded_dim % tile == 0 and TPU-aligned tile."""
    if dim >= pref:
        return _round_up(dim, pref), pref
    p = _round_up(dim, align)
    return p, p


def _pad2(a, r, c):
    if a.shape == (r, c):
        return a
    return jnp.pad(a, ((0, r - a.shape[0]), (0, c - a.shape[1])))


def _erf_f32(x):
    # Abramowitz & Stegun 7.1.26 (|err| < 1.5e-7): keeps nn.GELU (exact erf) semantics at
    # float32 precision while using only VPU/EUP-friendly ops inside the Mosaic kernel.
    p = 0.3275911
    a1, a2, a3, a4, a5 = (0.254829592, -0.284496736, 1.421413741,
                          -1.453152027, 1.061405429)
    s = jnp.where(x >= 0.0, 1.0, -1.0)
    z = jnp.abs(x)
    t = 1.0 / (1.0 + p * z)
    poly = ((((a5 * t + a4) * t + a3) * t + a2) * t + a1) * t
    return s * (1.0 - poly * jnp.exp(-z * z))


def _gelu_exact(x):
    return 0.5 * x * (1.0 + _erf_f32(x * 0.7071067811865476))


# ----------------------------------------------------------------------------
# Pallas kernel: 3-D tiled bf16 matmul, f32 VMEM-scratch accumulator, fused
# scale/bias (+residual) (+ReLU / exact GELU) epilogue, out_dtype selectable
# ----------------------------------------------------------------------------
def _matmul_kernel(*refs, act, has_res):
    if has_res:
        x_ref, w_ref, s_ref, b_ref, r_ref, o_ref, acc_ref = refs
    else:
        x_ref, w_ref, s_ref, b_ref, o_ref, acc_ref = refs
        r_ref = None

    k = pl.program_id(2)

    @pl.when(k == 0)
    def _():
        acc_ref[...] = jnp.zeros_like(acc_ref)

    acc_ref[...] += jnp.dot(x_ref[...], w_ref[...],
                            preferred_element_type=jnp.float32)

    @pl.when(k == pl.num_programs(2) - 1)
    def _():
        y = acc_ref[...] * s_ref[...] + b_ref[...]
        if has_res:
            y = y + r_ref[...].astype(jnp.float32)
        if act == "relu":
            y = jnp.maximum(y, 0.0)
        elif act == "gelu":
            y = _gelu_exact(y)
        o_ref[...] = y.astype(o_ref.dtype)


def matmul_pallas(x, w, scale=None, bias=None, act="none", residual=None,
                  out_dtype=jnp.float32, scale_on="n"):
    """y = act((x @ w) * scale + bias [+ residual]); residual added before the activation.

    x: (M, K), w: (K, N); scale/bias broadcast over N ("n") or M ("m"); residual: (M, N).
    MXU operands are bf16; accumulation + epilogue stay f32; output written in out_dtype.
    """
    M, K = x.shape
    K2, N = w.shape
    assert K == K2
    Mp, TM = _pick_tile(M, 512, 16)
    Kp, TK = _pick_tile(K, 256, 128)
    Np, TN = _pick_tile(N, 512, 128)

    xb = _pad2(x.astype(jnp.bfloat16), Mp, Kp)
    wb = _pad2(w.astype(jnp.bfloat16), Kp, Np)

    if scale_on == "n":
        s = jnp.ones((N,), jnp.float32) if scale is None else scale.astype(jnp.float32)
        b = jnp.zeros((N,), jnp.float32) if bias is None else bias.astype(jnp.float32)
        sp = _pad2(s.reshape(1, N), 1, Np)
        bp = _pad2(b.reshape(1, N), 1, Np)
        sb_spec = pl.BlockSpec((1, TN), lambda i, j, k: (0, j))
    else:  # per-row (per-output-channel) scale/bias for transposed-orientation convs
        s = jnp.ones((M,), jnp.float32) if scale is None else scale.astype(jnp.float32)
        b = jnp.zeros((M,), jnp.float32) if bias is None else bias.astype(jnp.float32)
        sp = _pad2(s.reshape(M, 1), Mp, 1)
        bp = _pad2(b.reshape(M, 1), Mp, 1)
        sb_spec = pl.BlockSpec((TM, 1), lambda i, j, k: (i, 0))

    in_specs = [
        pl.BlockSpec((TM, TK), lambda i, j, k: (i, k)),
        pl.BlockSpec((TK, TN), lambda i, j, k: (k, j)),
        sb_spec, sb_spec,
    ]
    args = [xb, wb, sp, bp]
    has_res = residual is not None
    if has_res:
        args.append(_pad2(residual, Mp, Np))
        in_specs.append(pl.BlockSpec((TM, TN), lambda i, j, k: (i, j)))

    out = pl.pallas_call(
        functools.partial(_matmul_kernel, act=act, has_res=has_res),
        out_shape=jax.ShapeDtypeStruct((Mp, Np), out_dtype),
        grid=(Mp // TM, Np // TN, Kp // TK),
        in_specs=in_specs,
        out_specs=pl.BlockSpec((TM, TN), lambda i, j, k: (i, j)),
        scratch_shapes=[pltpu.VMEM((TM, TN), jnp.float32)],
        compiler_params=pltpu.CompilerParams(
            dimension_semantics=("parallel", "parallel", "arbitrary"),
            vmem_limit_bytes=32 * 1024 * 1024),
    )(*args)
    # NOTE: padded rows/cols hold bias/activation values; the slice below removes them.
    return out[:M, :N]


# ----------------------------------------------------------------------------
# Pallas kernel: LayerNorm (eps=1e-6, matches nn.LayerNorm), row-tiled, out_dtype selectable
# ----------------------------------------------------------------------------
def _layernorm_kernel(x_ref, g_ref, b_ref, o_ref, *, eps):
    x = x_ref[...]
    mu = jnp.mean(x, axis=-1, keepdims=True)
    xc = x - mu
    var = jnp.mean(xc * xc, axis=-1, keepdims=True)
    o_ref[...] = (xc * jax.lax.rsqrt(var + eps) * g_ref[...]
                  + b_ref[...]).astype(o_ref.dtype)


def layernorm_pallas(x, gamma, beta, eps=1e-6, out_dtype=jnp.float32):
    # TODO(synk): with D < 128 (toy config) the output stores are masked vst.msk;
    # production D=768 is lane-dense.
    shp = x.shape
    D = shp[-1]
    x2 = x.reshape(-1, D).astype(jnp.float32)
    R = x2.shape[0]
    Rp, TR = _pick_tile(R, 512, 16)
    if Rp != R:
        x2 = jnp.pad(x2, ((0, Rp - R), (0, 0)))
    out = pl.pallas_call(
        functools.partial(_layernorm_kernel, eps=eps),
        out_shape=jax.ShapeDtypeStruct((Rp, D), out_dtype),
        grid=(Rp // TR,),
        in_specs=[pl.BlockSpec((TR, D), lambda i: (i, 0)),
                  pl.BlockSpec((1, D), lambda i: (0, 0)),
                  pl.BlockSpec((1, D), lambda i: (0, 0))],
        out_specs=pl.BlockSpec((TR, D), lambda i: (i, 0)),
        compiler_params=pltpu.CompilerParams(dimension_semantics=("parallel",)),
    )(x2, gamma.reshape(1, D).astype(jnp.float32),
      beta.reshape(1, D).astype(jnp.float32))
    return out[:R].reshape(shp)


# ----------------------------------------------------------------------------
# Pallas kernel: softmax attention (bf16 MXU, f32 softmax), G (batch*head) slices per step
# ----------------------------------------------------------------------------
def _attn_kernel(q_ref, k_ref, v_ref, o_ref, *, scale):
    q = q_ref[...]
    k = k_ref[...]
    v = v_ref[...]
    s = jnp.einsum("gtd,gsd->gts", q, k,
                   preferred_element_type=jnp.float32) * scale
    m = jnp.max(s, axis=-1, keepdims=True)
    p = jnp.exp(s - m)
    p = p / jnp.sum(p, axis=-1, keepdims=True)
    o = jnp.einsum("gts,gsd->gtd", p.astype(v.dtype), v,
                   preferred_element_type=jnp.float32)
    o_ref[...] = o.astype(o_ref.dtype)


def _attn_group(bh):
    # keep >=2 grid blocks where possible (v7x megacore) and bound the per-step VMEM footprint
    for g in (16, 8, 4, 2, 1):
        if g <= bh and bh % g == 0 and (bh // g >= 2 or bh == 1):
            return g
    return 1


def attention_pallas(q, k, v, scale):
    # TODO(synk): materializes the full (G,T,T) score block; switch to K/V-tiled online-softmax
    # (flash-style) before scaling T to production sizes (v7x VMEM is 64 MiB).
    BH, T, Dh = q.shape
    G = _attn_group(BH)
    spec = pl.BlockSpec((G, T, Dh), lambda i: (i, 0, 0))
    return pl.pallas_call(
        functools.partial(_attn_kernel, scale=scale),
        out_shape=jax.ShapeDtypeStruct((BH, T, Dh), jnp.bfloat16),
        grid=(BH // G,),
        in_specs=[spec, spec, spec],
        out_specs=spec,
        compiler_params=pltpu.CompilerParams(dimension_semantics=("parallel",)),
    )(q.astype(jnp.bfloat16), k.astype(jnp.bfloat16), v.astype(jnp.bfloat16))


# ----------------------------------------------------------------------------
# Pallas kernel: max over rotations (torch.max(..., dim=-1)[0]) as a grid reduction, bf16
# ----------------------------------------------------------------------------
def _max_rot_kernel(x_ref, o_ref):
    r = pl.program_id(1)
    cur = x_ref[0]

    @pl.when(r == 0)
    def _():
        o_ref[...] = cur

    @pl.when(r > 0)
    def _():
        o_ref[...] = jnp.maximum(o_ref[...], cur)


def max_over_rotations_pallas(x):
    R, B, C, H, W = x.shape
    x = x.astype(jnp.bfloat16)
    total = B * C * H * W
    LANE = 128
    rows = -(-total // LANE)
    rowsp, TR = _pick_tile(rows, 512, 16)
    padded = rowsp * LANE
    xf = x.reshape(R, total)
    if padded != total:
        xf = jnp.pad(xf, ((0, 0), (0, padded - total)))
    x3 = xf.reshape(R, rowsp, LANE)
    out = pl.pallas_call(
        _max_rot_kernel,
        out_shape=jax.ShapeDtypeStruct((rowsp, LANE), jnp.bfloat16),
        grid=(rowsp // TR, R),
        in_specs=[pl.BlockSpec((1, TR, LANE), lambda i, r: (r, i, 0))],
        out_specs=pl.BlockSpec((TR, LANE), lambda i, r: (i, 0)),
        compiler_params=pltpu.CompilerParams(
            dimension_semantics=("parallel", "arbitrary")),
    )(x3)
    return out.reshape(-1)[:total].reshape(B, C, H, W)


# ----------------------------------------------------------------------------
# Pallas kernel: channel-wise L2 normalization (F.normalize(dim=1)) — NCHW, no transposes
# ----------------------------------------------------------------------------
def _l2norm_kernel(x_ref, o_ref, *, eps):
    x = x_ref[...]                                      # (1, C, TS): reduce over C
    n = jnp.sqrt(jnp.sum(x * x, axis=1, keepdims=True))
    o_ref[...] = (x / jnp.maximum(n, eps)).astype(o_ref.dtype)


def l2_normalize_channels_pallas(x, eps=1e-12, out_dtype=jnp.bfloat16):
    B, C, H, W = x.shape
    HW = H * W
    HWp, TS = _pick_tile(HW, 512, 128)
    x3 = x.reshape(B, C, HW).astype(jnp.float32)
    if HWp != HW:
        x3 = jnp.pad(x3, ((0, 0), (0, 0), (0, HWp - HW)))
    out = pl.pallas_call(
        functools.partial(_l2norm_kernel, eps=eps),
        out_shape=jax.ShapeDtypeStruct((B, C, HWp), out_dtype),
        grid=(B, HWp // TS),
        in_specs=[pl.BlockSpec((1, C, TS), lambda b, i: (b, 0, i))],
        out_specs=pl.BlockSpec((1, C, TS), lambda b, i: (b, 0, i)),
        compiler_params=pltpu.CompilerParams(
            dimension_semantics=("parallel", "parallel")),
    )(x3)
    return out[:, :, :HW].reshape(B, C, H, W)


# ----------------------------------------------------------------------------
# Pallas kernel: sigmoid gating + token mean   x = (x + x*sigmoid(logits)).mean(1)
# ----------------------------------------------------------------------------
def _gate_mean_kernel(x_ref, l_ref, o_ref):
    x = x_ref[...]                                      # (1, N, D)
    p = 1.0 / (1.0 + jnp.exp(-l_ref[...]))              # (1, N, ncls)
    o_ref[...] = jnp.mean(x + x * p, axis=1, keepdims=True)


def gated_token_mean_pallas(x, logits):
    B, N, D = x.shape
    ncls = logits.shape[-1]
    out = pl.pallas_call(
        _gate_mean_kernel,
        out_shape=jax.ShapeDtypeStruct((B, 1, D), jnp.float32),
        grid=(B,),
        in_specs=[pl.BlockSpec((1, N, D), lambda b: (b, 0, 0)),
                  pl.BlockSpec((1, N, ncls), lambda b: (b, 0, 0))],
        out_specs=pl.BlockSpec((1, 1, D), lambda b: (b, 0, 0)),
        compiler_params=pltpu.CompilerParams(dimension_semantics=("parallel",)),
    )(x.astype(jnp.float32), logits.astype(jnp.float32))
    return out[:, 0, :]


# ----------------------------------------------------------------------------
# JAX glue: affine_grid / bicubic grid_sample (align_corners=True, zeros padding)
# ----------------------------------------------------------------------------
def affine_grid(theta, B, Hout, Wout):
    # F.affine_grid semantics with align_corners=True; theta: (2, 3)
    xs = jnp.linspace(-1.0, 1.0, Wout)
    ys = jnp.linspace(-1.0, 1.0, Hout)
    gx, gy = jnp.meshgrid(xs, ys)
    gridx = theta[0, 0] * gx + theta[0, 1] * gy + theta[0, 2]
    gridy = theta[1, 0] * gx + theta[1, 1] * gy + theta[1, 2]
    grid = jnp.stack([gridx, gridy], axis=-1)
    return jnp.broadcast_to(grid[None], (B, Hout, Wout, 2))


def _cubic_weights(t, A=-0.75):
    t = t.astype(jnp.float32)
    w0 = ((A * (t + 1.0) - 5.0 * A) * (t + 1.0) + 8.0 * A) * (t + 1.0) - 4.0 * A
    w1 = ((A + 2.0) * t - (A + 3.0)) * t * t + 1.0
    u = 1.0 - t
    w2 = ((A + 2.0) * u - (A + 3.0)) * u * u + 1.0
    v = 2.0 - t
    w3 = ((A * v - 5.0 * A) * v + 8.0 * A) * v - 4.0 * A
    return (w0, w1, w2, w3)


# TODO(synk): bicubic grid_sample is a data-dependent gather; kept in plain JAX glue
# (a scalar-prefetch Pallas gather of the 4 source rows per output tile is future work).
def grid_sample_bicubic(im, grid, out_dtype=jnp.float32):
    B, C, H, W = im.shape
    Ho, Wo = grid.shape[1:3]
    ix = (grid[..., 0] + 1.0) * 0.5 * (W - 1)
    iy = (grid[..., 1] + 1.0) * 0.5 * (H - 1)
    ix0 = jnp.floor(ix)
    iy0 = jnp.floor(iy)
    wx = _cubic_weights(ix - ix0)
    wy = _cubic_weights(iy - iy0)
    ix0 = ix0.astype(jnp.int32)
    iy0 = iy0.astype(jnp.int32)
    imf = im.reshape(B, C, H * W)

    def gather(yy, xx):
        valid = (yy >= 0) & (yy < H) & (xx >= 0) & (xx < W)
        yc = jnp.clip(yy, 0, H - 1)
        xc = jnp.clip(xx, 0, W - 1)
        idx = (yc * W + xc).reshape(B, Ho * Wo)
        vals = jax.vmap(lambda a, i: a[:, i])(imf, idx).reshape(B, C, Ho, Wo)
        return vals * valid[:, None, :, :].astype(im.dtype)

    out = jnp.zeros((B, C, Ho, Wo), jnp.float32)
    for m in range(4):
        yy = iy0 - 1 + m
        for n in range(4):
            xx = ix0 - 1 + n
            out = out + (wy[m] * wx[n])[:, None, :, :] * gather(yy, xx)
    return out.astype(out_dtype)


# ----------------------------------------------------------------------------
# Conv2d in CBHW layout: bf16 im2col (glue) + transposed-orientation Pallas matmul;
# BN / bias / activation / residual fused into the matmul epilogue.
# ----------------------------------------------------------------------------
def im2col_cbhw(x, kh, kw, stride, pad):
    # TODO(synk): full im2col->matmul fusion (grid axis over the kh*kw taps accumulating
    # shifted matmuls into the resident accumulator) is future work; patches are bf16 and
    # built without transposes thanks to the CBHW layout.
    C, B, H, W = x.shape
    xp = jnp.pad(x, ((0, 0), (0, 0), (pad, pad), (pad, pad)))
    Ho = (H + 2 * pad - kh) // stride + 1
    Wo = (W + 2 * pad - kw) // stride + 1
    cols = []
    for i in range(kh):
        for j in range(kw):
            cols.append(xp[:, :, i:i + stride * Ho:stride, j:j + stride * Wo:stride])
    patches = jnp.stack(cols, axis=1)                    # (C, kh*kw, B, Ho, Wo)
    patches = patches.reshape(C * kh * kw, B * Ho * Wo)
    return patches, B, Ho, Wo


def conv2d_cbhw(x, cp, stride, pad, act="none", residual=None,
                out_dtype=jnp.bfloat16):
    """x: (Cin, B, H, W) bf16; cp: prepared conv params; returns (Cout, B, Ho, Wo)."""
    w4 = cp["w"]                                         # (Cout, Cin, kh, kw) bf16
    Cout, Cin, kh, kw = w4.shape
    w2 = w4.reshape(Cout, Cin * kh * kw)
    patches, B, Ho, Wo = im2col_cbhw(x.astype(jnp.bfloat16), kh, kw, stride, pad)
    y = matmul_pallas(w2, patches, scale=cp["scale"], bias=cp["bias"], act=act,
                      residual=residual, out_dtype=out_dtype, scale_on="m")
    return y.reshape(Cout, B, Ho, Wo)


def maxpool_3x3_s2_p1_cbhw(x):
    return jax.lax.reduce_window(
        x, jnp.asarray(-jnp.inf, x.dtype), jax.lax.max,
        (1, 1, 3, 3), (1, 1, 2, 2),
        ((0, 0), (0, 0), (1, 1), (1, 1)))


def bn_scale_bias(bn, eps=1e-5):
    # inference-mode BatchNorm folded to per-channel scale/bias
    scale = bn["gamma"] / jnp.sqrt(bn["var"] + eps)
    bias = bn["beta"] - bn["mean"] * scale
    return scale, bias


# ----------------------------------------------------------------------------
# ResNet-34 prefix (children[:-4]): conv1/bn/relu/maxpool + layer1 + layer2 (CBHW, bf16)
# ----------------------------------------------------------------------------
def basic_block(x, bp, stride):
    identity = x
    h = conv2d_cbhw(x, bp["conv1"], stride, 1, act="relu")
    if "down" in bp:
        identity = conv2d_cbhw(x, bp["down"], stride, 0, act="none")
    # conv2 + BN + residual add + ReLU fused into one matmul epilogue
    res = identity.reshape(identity.shape[0], -1)
    return conv2d_cbhw(h, bp["conv2"], 1, 1, act="relu", residual=res)


def resnet_encoder(x_bchw, rp):
    x = jnp.transpose(x_bchw, (1, 0, 2, 3)).astype(jnp.bfloat16)   # -> CBHW
    x = conv2d_cbhw(x, rp["conv1"], 2, 3, act="relu")
    x = maxpool_3x3_s2_p1_cbhw(x)
    for bp in rp["layer1"]:
        x = basic_block(x, bp, 1)
    x = basic_block(x, rp["layer2"][0], 2)
    for bp in rp["layer2"][1:]:
        x = basic_block(x, bp, 1)
    return jnp.transpose(x, (1, 0, 2, 3))                           # back to BCHW (bf16)


# ----------------------------------------------------------------------------
# ViT encoder (ConvStem patch embed + transformer blocks)
# ----------------------------------------------------------------------------
def conv_stem(x_bchw, sp, patch_stride):
    # TODO(synk): ConvStem source not provided; implemented as 3x(conv3x3+BN+ReLU)
    # followed by a patch-stride projection conv, flattened to tokens.
    x = jnp.transpose(x_bchw, (1, 0, 2, 3)).astype(jnp.bfloat16)    # -> CBHW
    h = conv2d_cbhw(x, sp["c1"], 1, 1, act="relu")
    h = conv2d_cbhw(h, sp["c2"], 1, 1, act="relu")
    skip = conv2d_cbhw(h, sp["c3"], 1, 1, act="relu")
    tok = conv2d_cbhw(skip, sp["proj"], patch_stride, 0, out_dtype=jnp.float32)
    D, B, gh, gw = tok.shape
    tokens = jnp.transpose(tok.reshape(D, B, gh * gw), (1, 2, 0))   # (B, T, D) f32
    return tokens, skip


def resize_pos_embed(pe, grid_old, grid_new, num_extra):
    # TODO(synk): PyTorch F.interpolate(bilinear) approximated with jax.image.resize.
    extra = pe[:, :num_extra]
    D = pe.shape[-1]
    g = pe[:, num_extra:].reshape(1, grid_old[0], grid_old[1], D)
    g = jax.image.resize(g, (1, grid_new[0], grid_new[1], D), method="bilinear")
    return jnp.concatenate([extra, g.reshape(1, -1, D)], axis=1)


def mhsa(x, p, n_heads, ls, residual):
    B, T, D = x.shape
    Dh = D // n_heads
    qkv = matmul_pallas(x.reshape(B * T, D), p["qkv_w"], bias=p["qkv_b"],
                        out_dtype=jnp.bfloat16)
    # TODO(synk): the qkv / head-merge transposes stay in XLA; writing head-packed layouts
    # directly from the matmul out_specs is future work.
    qkv = qkv.reshape(B, T, 3, n_heads, Dh).transpose(2, 0, 3, 1, 4)
    q = qkv[0].reshape(B * n_heads, T, Dh)
    k = qkv[1].reshape(B * n_heads, T, Dh)
    v = qkv[2].reshape(B * n_heads, T, Dh)
    o = attention_pallas(q, k, v, scale=1.0 / math.sqrt(Dh))
    o = o.reshape(B, n_heads, T, Dh).transpose(0, 2, 1, 3).reshape(B * T, D)
    # fused epilogue: out = residual + ls1 * (o @ proj_w + proj_b); residual stream stays f32
    out = matmul_pallas(o, p["proj_w"], scale=ls, bias=p["proj_b"] * ls,
                        residual=residual.reshape(B * T, D), out_dtype=jnp.float32)
    return out.reshape(B, T, D)


def mlp(x, p, ls, residual):
    B, T, D = x.shape
    # exact-erf GELU fused into the fc1 matmul epilogue; bf16 intermediate
    h = matmul_pallas(x.reshape(B * T, D), p["fc1_w"], bias=p["fc1_b"], act="gelu",
                      out_dtype=jnp.bfloat16)
    # fused epilogue: out = residual + ls2 * (h @ fc2_w + fc2_b)
    out = matmul_pallas(h, p["fc2_w"], scale=ls, bias=p["fc2_b"] * ls,
                        residual=residual.reshape(B * T, D), out_dtype=jnp.float32)
    return out.reshape(B, T, D)


def vit_block(x, p, n_heads):
    # dropout / drop_path = identity (eval semantics); LayerScale init_values=1.0
    h = layernorm_pallas(x, p["ln1_g"], p["ln1_b"], out_dtype=jnp.bfloat16)
    x = mhsa(h, p, n_heads, p["ls1"], x)
    h = layernorm_pallas(x, p["ln2_g"], p["ln2_b"], out_dtype=jnp.bfloat16)
    x = mlp(h, p, p["ls2"], x)
    return x


def vit_encoder(im, p, cfg):
    B, C, H, W = im.shape
    tokens, _stem_skip = conv_stem(im, p["stem"], cfg["patch_stride"])
    cls = jnp.broadcast_to(p["cls_token"], (B, 1, cfg["d_model"]))
    x = jnp.concatenate([cls, tokens], axis=1)
    pos = p["pos_embed"]
    if x.shape[1] != pos.shape[1]:
        gh, gw = H // cfg["patch_stride"], W // cfg["patch_stride"]
        pos = resize_pos_embed(pos, cfg["stem_grid"], (gh, gw), 1)
    x = x + pos
    for bp in p["blocks"]:
        x = vit_block(x, bp, cfg["n_heads"])
    x = layernorm_pallas(x, p["norm_g"], p["norm_b"], out_dtype=jnp.float32)
    # VisionTransformer.forward returns (x, im): the encoder input is the decoder "skip"
    return x, im


# ----------------------------------------------------------------------------
# Full ImageFeatureExtractor_bev forward (== RangeViT.forward)
# ----------------------------------------------------------------------------
def image_feature_extractor_bev_forward(im, params, cfg):
    B, C, H, W = im.shape
    R = cfg["rotations"]
    # angles = -torch.arange(0, 359.00001, 360/R) / 180 * pi
    angles = [-(i * 360.0 / R) * math.pi / 180.0 for i in range(R)]

    def rot_theta(a):
        return jnp.array([[math.cos(a), math.sin(a), 0.0],
                          [-math.sin(a), math.cos(a), 0.0]], jnp.float32)

    # --- rotate image, resnet-encode, rotate features back (rotations folded into batch) ---
    grids_fwd = jnp.concatenate(
        [affine_grid(rot_theta(-angles[i]), B, H, W) for i in range(R)], axis=0)
    im_rep = jnp.broadcast_to(im[None], (R, B, C, H, W)).reshape(R * B, C, H, W)
    warped = grid_sample_bicubic(im_rep, grids_fwd, out_dtype=jnp.bfloat16)
    feat = resnet_encoder(warped, params["resnet"])               # (R*B, Cf, Hf, Wf) bf16
    Cf, Hf, Wf = feat.shape[1:]
    grids_bwd = jnp.concatenate(
        [affine_grid(rot_theta(angles[i]), B, Hf, Wf) for i in range(R)], axis=0)
    feat = grid_sample_bicubic(feat, grids_bwd, out_dtype=jnp.bfloat16)
    equ = feat.reshape(R, B, Cf, Hf, Wf)

    # --- max over rotations (Pallas grid reduction, bf16) ---
    equ_max = max_over_rotations_pallas(equ)                      # (B, Cf, Hf, Wf) bf16

    # --- identity-grid bicubic resample to (H//8+1, W//8+1) + channel L2 norm ---
    Ho, Wo = H // 8 + 1, W // 8 + 1
    ident = jnp.array([[1.0, 0.0, 0.0], [0.0, 1.0, 0.0]], jnp.float32)
    out1 = grid_sample_bicubic(equ_max, affine_grid(ident, B, Ho, Wo))
    out1 = l2_normalize_channels_pallas(out1)                     # bf16, feeds bf16 convs

    # --- pad to patch multiple, ViT encoder ---
    ph, pw = cfg["patch_size"]
    pad_h = (-Ho) % ph
    pad_w = (-Wo) % pw
    imv = jnp.pad(out1, ((0, 0), (0, 0), (0, pad_h), (0, pad_w)))
    x, _skip = vit_encoder(imv, params["vit"], cfg)

    # --- decoder head + sigmoid gating + token mean ---
    x = x[:, 1:]                                                  # drop cls token
    B2, N, D = x.shape
    # TODO(synk): DecoderLinear_bev source not provided; implemented as a per-token linear
    # head (d_encoder -> n_cls), consistent with the downstream (x + x*pred_mask) broadcast.
    logits = matmul_pallas(x.reshape(B2 * N, D), params["dec"]["w"],
                           bias=params["dec"]["b"]).reshape(B2, N, -1)
    return gated_token_mean_pallas(x, logits)                     # (B, d_model)


# ----------------------------------------------------------------------------
# Deterministic synthetic parameter initialization + inference-time preparation
# ----------------------------------------------------------------------------
class _Init:
    def __init__(self, seed=0):
        self.key = jax.random.PRNGKey(seed)
        self.count = 0

    def normal(self, shape, scale=0.05):
        self.count += 1
        return scale * jax.random.normal(jax.random.fold_in(self.key, self.count),
                                         shape, jnp.float32)

    def bn(self, c):
        return {"gamma": 1.0 + self.normal((c,), 0.1),
                "beta": self.normal((c,), 0.05),
                "mean": self.normal((c,), 0.05),
                "var": 1.0 + jnp.abs(self.normal((c,), 0.1))}


def init_params(cfg, rng):
    rb, sb, D = cfg["resnet_base"], cfg["stem_base"], cfg["d_model"]
    Cin, dff, ncls = cfg["in_channels"], cfg["d_ff"], cfg["n_cls"]
    ph, pw = cfg["patch_size"]

    def res_block(cin, cout, down=False):
        p = {"conv1_w": rng.normal((cout, cin, 3, 3)), "bn1": rng.bn(cout),
             "conv2_w": rng.normal((cout, cout, 3, 3)), "bn2": rng.bn(cout)}
        if down:
            p["down_w"] = rng.normal((cout, cin, 1, 1))
            p["down_bn"] = rng.bn(cout)
        return p

    resnet = {
        "conv1_w": rng.normal((rb, Cin, 7, 7)), "bn1": rng.bn(rb),
        "layer1": [res_block(rb, rb) for _ in range(3)],
        "layer2": [res_block(rb, 2 * rb, down=True)] + [res_block(2 * rb, 2 * rb) for _ in range(3)],
    }

    cstem_in = 2 * rb  # ViT stem consumes the ResNet layer2 features
    stem = {
        "c1_w": rng.normal((sb, cstem_in, 3, 3)), "bn1": rng.bn(sb),
        "c2_w": rng.normal((2 * sb, sb, 3, 3)), "bn2": rng.bn(2 * sb),
        "c3_w": rng.normal((4 * sb, 2 * sb, 3, 3)), "bn3": rng.bn(4 * sb),
        "proj_w": rng.normal((D, 4 * sb, ph, pw)), "proj_b": rng.normal((D,)),
    }

    def vit_block_p():
        return {"ln1_g": jnp.ones((D,)), "ln1_b": jnp.zeros((D,)),
                "qkv_w": rng.normal((D, 3 * D)), "qkv_b": rng.normal((3 * D,)),
                "proj_w": rng.normal((D, D)), "proj_b": rng.normal((D,)),
                "ls1": jnp.ones((D,)),
                "ln2_g": jnp.ones((D,)), "ln2_b": jnp.zeros((D,)),
                "fc1_w": rng.normal((D, dff)), "fc1_b": rng.normal((dff,)),
                "fc2_w": rng.normal((dff, D)), "fc2_b": rng.normal((D,)),
                "ls2": jnp.ones((D,))}

    gh, gw = cfg["stem_grid"]
    vit = {"cls_token": jnp.zeros((1, 1, D)),                 # nn.Parameter(torch.zeros(...))
           "pos_embed": rng.normal((1, gh * gw + 1, D), 0.02),
           "blocks": [vit_block_p() for _ in range(cfg["n_layers"])],
           "norm_g": jnp.ones((D,)), "norm_b": jnp.zeros((D,)),
           "stem": stem}

    dec = {"w": rng.normal((D, ncls)), "b": rng.normal((ncls,))}
    return {"resnet": resnet, "vit": vit, "dec": dec}


def _prep_conv(w, bn=None, bias=None):
    """Fold BN and pre-cast the conv weight to bf16 once (outside the jitted forward)."""
    if bn is not None:
        scale, b = bn_scale_bias(bn)
    else:
        scale, b = None, (None if bias is None else bias.astype(jnp.float32))
    return {"w": w.astype(jnp.bfloat16), "scale": scale, "bias": b}


def prepare_params(params):
    rn = params["resnet"]

    def blockp(bp):
        q = {"conv1": _prep_conv(bp["conv1_w"], bp["bn1"]),
             "conv2": _prep_conv(bp["conv2_w"], bp["bn2"])}
        if "down_w" in bp:
            q["down"] = _prep_conv(bp["down_w"], bp["down_bn"])
        return q

    resnet = {"conv1": _prep_conv(rn["conv1_w"], rn["bn1"]),
              "layer1": [blockp(b) for b in rn["layer1"]],
              "layer2": [blockp(b) for b in rn["layer2"]]}

    sr = params["vit"]["stem"]
    stem = {"c1": _prep_conv(sr["c1_w"], sr["bn1"]),
            "c2": _prep_conv(sr["c2_w"], sr["bn2"]),
            "c3": _prep_conv(sr["c3_w"], sr["bn3"]),
            "proj": _prep_conv(sr["proj_w"], None, sr["proj_b"])}

    def vitb(bp):
        q = dict(bp)
        for k in ("qkv_w", "proj_w", "fc1_w", "fc2_w"):
            q[k] = bp[k].astype(jnp.bfloat16)
        return q

    vit = {"cls_token": params["vit"]["cls_token"],
           "pos_embed": params["vit"]["pos_embed"],
           "blocks": [vitb(b) for b in params["vit"]["blocks"]],
           "norm_g": params["vit"]["norm_g"], "norm_b": params["vit"]["norm_b"],
           "stem": stem}

    dec = {"w": params["dec"]["w"].astype(jnp.bfloat16), "b": params["dec"]["b"]}
    return {"resnet": resnet, "vit": vit, "dec": dec}


# ----------------------------------------------------------------------------
# Main
# ----------------------------------------------------------------------------
CFG = dict(
    in_channels=3,
    image_size=(32, 32),
    rotations=8,
    resnet_base=16,          # scaled-down resnet34 width (orig 64)
    stem_base=8,             # scaled-down ConvStem base channels (orig 32)
    d_model=64, n_heads=4, n_layers=2, d_ff=256,   # scaled ViT (orig 768 / 12 / 12)
    patch_size=(4, 4), patch_stride=4,
    n_cls=1,
)
CFG["stem_grid"] = (CFG["image_size"][0] // CFG["patch_stride"],
                    CFG["image_size"][1] // CFG["patch_stride"])


if __name__ == "__main__":
    rng = _Init(seed=0)
    raw_params = init_params(CFG, rng)
    params = prepare_params(raw_params)   # bf16 weights + folded BN, done once outside jit

    key = jax.random.PRNGKey(0)
    im = jax.random.normal(key, (2, CFG["in_channels"],
                                 CFG["image_size"][0], CFG["image_size"][1]), jnp.float32)

    fwd = jax.jit(functools.partial(image_feature_extractor_bev_forward, cfg=CFG))
    out = fwd(im, params)
    out = jax.block_until_ready(out)

    assert out.shape == (2, CFG["d_model"]), out.shape
    assert bool(jnp.all(jnp.isfinite(out)))
    print("KERNEL_OK")
</pallas_src>

<mosaic_0001>
module attributes {stable_mosaic.version = 11 : i64} {
  func.func @_matmul_kernel(%arg0: i32, %arg1: i32, %arg2: i32, %arg3: memref<16x256xbf16, #tpu.memory_space<vmem>>, %arg4: memref<256x512xbf16, #tpu.memory_space<vmem>>, %arg5: memref<16x1xf32, #tpu.memory_space<vmem>>, %arg6: memref<16x1xf32, #tpu.memory_space<vmem>>, %arg7: memref<16x512xbf16, #tpu.memory_space<vmem>>, %arg8: memref<16x512xf32, #tpu.memory_space<vmem>>) attributes {dimension_semantics = [#tpu.dimension_semantics<parallel>, #tpu.dimension_semantics<parallel>, #tpu.dimension_semantics<arbitrary>], iteration_bounds = array<i64: 1, 8, 1>, scalar_prefetch = 0 : i64, scratch_operands = 1 : i64, tpu.core_type = #tpu.core_type<tc>, window_params = [{transform_indices = @transform_0, window_bounds = array<i64: 16, 256>}, {transform_indices = @transform_1, window_bounds = array<i64: 256, 512>}, {transform_indices = @transform_2, window_bounds = array<i64: 16, 1>}, {transform_indices = @transform_3, window_bounds = array<i64: 16, 1>}, {transform_indices = @transform_4, window_bounds = array<i64: 16, 512>}]} {
    %c0_i32 = arith.constant 0 : i32
    %0 = arith.cmpi eq, %arg2, %c0_i32 : i32
    %1 = arith.extui %0 : i1 to i32
    %c0_i32_0 = arith.constant 0 : i32
    %2 = arith.cmpi ne, %1, %c0_i32_0 : i32
    scf.if %2 {
      %cst_10 = arith.constant 0.000000e+00 : f32
      %12 = vector.broadcast %cst_10 : f32 to vector<16x512xf32>
      %c0_11 = arith.constant 0 : index
      %c0_12 = arith.constant 0 : index
      %13 = vector.load %arg8[%c0_11, %c0_12] : memref<16x512xf32, #tpu.memory_space<vmem>>, vector<16x512xf32>
      tpu.vector_store %arg8[%c0_11, %c0_12], %12 {strides = array<i32>} : memref<16x512xf32, #tpu.memory_space<vmem>>, vector<16x512xf32>,
    } else {
    }
    %c0 = arith.constant 0 : index
    %c0_1 = arith.constant 0 : index
    %3 = vector.load %arg8[%c0, %c0_1] : memref<16x512xf32, #tpu.memory_space<vmem>>, vector<16x512xf32>
    %c0_2 = arith.constant 0 : index
    %c0_3 = arith.constant 0 : index
    %4 = vector.load %arg3[%c0_2, %c0_3] : memref<16x256xbf16, #tpu.memory_space<vmem>>, vector<16x256xbf16>
    %c0_4 = arith.constant 0 : index
    %c0_5 = arith.constant 0 : index
    %5 = vector.load %arg4[%c0_4, %c0_5] : memref<256x512xbf16, #tpu.memory_space<vmem>>, vector<256x512xbf16>
    %cst = arith.constant dense<0.000000e+00> : vector<16x512xf32>
    %6 = tpu.matmul %4, %5, %cst {dimension_numbers = #tpu.dot_dimension_numbers<[1], [0], [0], [1], [0, 0, 1, 1], [], []>} : vector<16x256xbf16>, vector<256x512xbf16>, vector<16x512xf32> -> vector<16x512xf32>
    %7 = arith.addf %3, %6 : vector<16x512xf32>
    %c0_6 = arith.constant 0 : index
    %c0_7 = arith.constant 0 : index
    %8 = vector.load %arg8[%c0_6, %c0_7] : memref<16x512xf32, #tpu.memory_space<vmem>>, vector<16x512xf32>
    tpu.vector_store %arg8[%c0_6, %c0_7], %7 {strides = array<i32>} : memref<16x512xf32, #tpu.memory_space<vmem>>, vector<16x512xf32>,
    %c0_i32_8 = arith.constant 0 : i32
    %9 = arith.cmpi eq, %arg2, %c0_i32_8 : i32
    %10 = arith.extui %9 : i1 to i32
    %c0_i32_9 = arith.constant 0 : i32
    %11 = arith.cmpi ne, %10, %c0_i32_9 : i32
    scf.if %11 {
      %c0_10 = arith.constant 0 : index
      %c0_11 = arith.constant 0 : index
      %12 = vector.load %arg8[%c0_10, %c0_11] : memref<16x512xf32, #tpu.memory_space<vmem>>, vector<16x512xf32>
      %c0_12 = arith.constant 0 : index
      %c0_13 = arith.constant 0 : index
      %13 = vector.load %arg5[%c0_12, %c0_13] : memref<16x1xf32, #tpu.memory_space<vmem>>, vector<16x1xf32>
      %14 = vector.broadcast %13 : vector<16x1xf32> to vector<16x512xf32>
      %15 = arith.mulf %12, %14 : vector<16x512xf32>
      %c0_14 = arith.constant 0 : index
      %c0_15 = arith.constant 0 : index
      %16 = vector.load %arg6[%c0_14, %c0_15] : memref<16x1xf32, #tpu.memory_space<vmem>>, vector<16x1xf32>
      %17 = vector.broadcast %16 : vector<16x1xf32> to vector<16x512xf32>
      %18 = arith.addf %15, %17 : vector<16x512xf32>
      %cst_16 = arith.constant 0.000000e+00 : f32
      %19 = vector.broadcast %cst_16 : f32 to vector<16x512xf32>
      %20 = arith.maximumf %18, %19 : vector<16x512xf32>
      %21 = arith.truncf %20 : vector<16x512xf32> to vector<16x512xbf16>
      %c0_17 = arith.constant 0 : index
      %c0_18 = arith.constant 0 : index
      %22 = vector.load %arg7[%c0_17, %c0_18] : memref<16x512xbf16, #tpu.memory_space<vmem>>, vector<16x512xbf16>
      tpu.vector_store %arg7[%c0_17, %c0_18], %21 {strides = array<i32>} : memref<16x512xbf16, #tpu.memory_space<vmem>>, vector<16x512xbf16>,
    } else {
    }
    return
  }
  func.func @transform_0(%arg0: i32, %arg1: i32, %arg2: i32) -> (i32, i32) {
    %c0_i32 = arith.constant 0 : i32
    return %arg0, %arg2 : i32, i32
  }
  func.func @transform_1(%arg0: i32, %arg1: i32, %arg2: i32) -> (i32, i32) {
    %c0_i32 = arith.constant 0 : i32
    return %arg2, %arg1 : i32, i32
  }
  func.func @transform_2(%arg0: i32, %arg1: i32, %arg2: i32) -> (i32, i32) {
    %c0_i32 = arith.constant 0 : i32
    %c0_i32_0 = arith.constant 0 : i32
    return %arg0, %c0_i32 : i32, i32
  }
  func.func @transform_3(%arg0: i32, %arg1: i32, %arg2: i32) -> (i32, i32) {
    %c0_i32 = arith.constant 0 : i32
    %c0_i32_0 = arith.constant 0 : i32
    return %arg0, %c0_i32 : i32, i32
  }
  func.func @transform_4(%arg0: i32, %arg1: i32, %arg2: i32) -> (i32, i32) {
    %c0_i32 = arith.constant 0 : i32
    return %arg0, %arg1 : i32, i32
  }
}

module attributes {stable_mosaic.version = 11 : i64} {
  func.func @_matmul_kernel(%arg0: i32, %arg1: i32, %arg2: i32, %arg3: memref<16x256xbf16, #tpu.memory_space<vmem>>, %arg4: memref<256x512xbf16, #tpu.memory_space<vmem>>, %arg5: memref<16x1xf32, #tpu.memory_space<vmem>>, %arg6: memref<16x1xf32, #tpu.memory_space<vmem>>, %arg7: memref<16x512xbf16, #tpu.memory_space<vmem>>, %arg8: memref<16x512xf32, #tpu.memory_space<vmem>>) attributes {dimension_semantics = [#tpu.dimension_semantics<parallel>, #tpu.dimension_semantics<parallel>, #tpu.dimension_semantics<arbitrary>], iteration_bounds = array<i64: 1, 2, 1>, scalar_prefetch = 0 : i64, scratch_operands = 1 : i64, tpu.core_type = #tpu.core_type<tc>, window_params = [{transform_indices = @transform_0, window_bounds = array<i64: 16, 256>}, {transform_indices = @transform_1, window_bounds = array<i64: 256, 512>}, {transform_indices = @transform_2, window_bounds = array<i64: 16, 1>}, {transform_indices = @transform_3, window_bounds = array<i64: 16, 1>}, {transform_indices = @transform_4, window_bounds = array<i64: 16, 512>}]} {
    %c0_i32 = arith.constant 0 : i32
    %0 = arith.cmpi eq, %arg2, %c0_i32 : i32
    %1 = arith.extui %0 : i1 to i32
    %c0_i32_0 = arith.constant 0 : i32
    %2 = arith.cmpi ne, %1, %c0_i32_0 : i32
    scf.if %2 {
      %cst_10 = arith.constant 0.000000e+00 : f32
      %12 = vector.broadcast %cst_10 : f32 to vector<16x512xf32>
      %c0_11 = arith.constant 0 : index
      %c0_12 = arith.constant 0 : index
      %13 = vector.load %arg8[%c0_11, %c0_12] : memref<16x512xf32, #tpu.memory_space<vmem>>, vector<16x512xf32>
      tpu.vector_store %arg8[%c0_11, %c0_12], %12 {strides = array<i32>} : memref<16x512xf32, #tpu.memory_space<vmem>>, vector<16x512xf32>,
    } else {
    }
    %c0 = arith.constant 0 : index
    %c0_1 = arith.constant 0 : index
    %3 = vector.load %arg8[%c0, %c0_1] : memref<16x512xf32, #tpu.memory_space<vmem>>, vector<16x512xf32>
    %c0_2 = arith.constant 0 : index
    %c0_3 = arith.constant 0 : index
    %4 = vector.load %arg3[%c0_2, %c0_3] : memref<16x256xbf16, #tpu.memory_space<vmem>>, vector<16x256xbf16>
    %c0_4 = arith.constant 0 : index
    %c0_5 = arith.constant 0 : index
    %5 = vector.load %arg4[%c0_4, %c0_5] : memref<256x512xbf16, #tpu.memory_space<vmem>>, vector<256x512xbf16>
    %cst = arith.constant dense<0.000000e+00> : vector<16x512xf32>
    %6 = tpu.matmul %4, %5, %cst {dimension_numbers = #tpu.dot_dimension_numbers<[1], [0], [0], [1], [0, 0, 1, 1], [], []>} : vector<16x256xbf16>, vector<256x512xbf16>, vector<16x512xf32> -> vector<16x512xf32>
    %7 = arith.addf %3, %6 : vector<16x512xf32>
    %c0_6 = arith.constant 0 : index
    %c0_7 = arith.constant 0 : index
    %8 = vector.load %arg8[%c0_6, %c0_7] : memref<16x512xf32, #tpu.memory_space<vmem>>, vector<16x512xf32>
    tpu.vector_store %arg8[%c0_6, %c0_7], %7 {strides = array<i32>} : memref<16x512xf32, #tpu.memory_space<vmem>>, vector<16x512xf32>,
    %c0_i32_8 = arith.constant 0 : i32
    %9 = arith.cmpi eq, %arg2, %c0_i32_8 : i32
    %10 = arith.extui %9 : i1 to i32
    %c0_i32_9 = arith.constant 0 : i32
    %11 = arith.cmpi ne, %10, %c0_i32_9 : i32
    scf.if %11 {
      %c0_10 = arith.constant 0 : index
      %c0_11 = arith.constant 0 : index
      %12 = vector.load %arg8[%c0_10, %c0_11] : memref<16x512xf32, #tpu.memory_space<vmem>>, vector<16x512xf32>
      %c0_12 = arith.constant 0 : index
      %c0_13 = arith.constant 0 : index
      %13 = vector.load %arg5[%c0_12, %c0_13] : memref<16x1xf32, #tpu.memory_space<vmem>>, vector<16x1xf32>
      %14 = vector.broadcast %13 : vector<16x1xf32> to vector<16x512xf32>
      %15 = arith.mulf %12, %14 : vector<16x512xf32>
      %c0_14 = arith.constant 0 : index
      %c0_15 = arith.constant 0 : index
      %16 = vector.load %arg6[%c0_14, %c0_15] : memref<16x1xf32, #tpu.memory_space<vmem>>, vector<16x1xf32>
      %17 = vector.broadcast %16 : vector<16x1xf32> to vector<16x512xf32>
      %18 = arith.addf %15, %17 : vector<16x512xf32>
      %cst_16 = arith.constant 0.000000e+00 : f32
      %19 = vector.broadcast %cst_16 : f32 to vector<16x512xf32>
      %20 = arith.maximumf %18, %19 : vector<16x512xf32>
      %21 = arith.truncf %20 : vector<16x512xf32> to vector<16x512xbf16>
      %c0_17 = arith.constant 0 : index
      %c0_18 = arith.constant 0 : index
      %22 = vector.load %arg7[%c0_17, %c0_18] : memref<16x512xbf16, #tpu.memory_space<vmem>>, vector<16x512xbf16>
      tpu.vector_store %arg7[%c0_17, %c0_18], %21 {strides = array<i32>} : memref<16x512xbf16, #tpu.memory_space<vmem>>, vector<16x512xbf16>,
    } else {
    }
    return
  }
  func.func @transform_0(%arg0: i32, %arg1: i32, %arg2: i32) -> (i32, i32) {
    %c0_i32 = arith.constant 0 : i32
    return %arg0, %arg2 : i32, i32
  }
  func.func @transform_1(%arg0: i32, %arg1: i32, %arg2: i32) -> (i32, i32) {
    %c0_i32 = arith.constant 0 : i32
    return %arg2, %arg1 : i32, i32
  }
  func.func @transform_2(%arg0: i32, %arg1: i32, %arg2: i32) -> (i32, i32) {
    %c0_i32 = arith.constant 0 : i32
    %c0_i32_0 = arith.constant 0 : i32
    return %arg0, %c0_i32 : i32, i32
  }
  func.func @transform_3(%arg0: i32, %arg1: i32, %arg2: i32) -> (i32, i32) {
    %c0_i32 = arith.constant 0 : i32
    %c0_i32_0 = arith.constant 0 : i32
    return %arg0, %c0_i32 : i32, i32
  }
  func.func @transform_4(%arg0: i32, %arg1: i32, %arg2: i32) -> (i32, i32) {
    %c0_i32 = arith.constant 0 : i32
    return %arg0, %arg1 : i32, i32
  }
}

module attributes {stable_mosaic.version = 11 : i64} {
  func.func @_matmul_kernel(%arg0: i32, %arg1: i32, %arg2: i32, %arg3: memref<16x256xbf16, #tpu.memory_space<vmem>>, %arg4: memref<256x512xbf16, #tpu.memory_space<vmem>>, %arg5: memref<16x1xf32, #tpu.memory_space<vmem>>, %arg6: memref<16x1xf32, #tpu.memory_space<vmem>>, %arg7: memref<16x512xbf16, #tpu.memory_space<vmem>>, %arg8: memref<16x512xbf16, #tpu.memory_space<vmem>>, %arg9: memref<16x512xf32, #tpu.memory_space<vmem>>) attributes {dimension_semantics = [#tpu.dimension_semantics<parallel>, #tpu.dimension_semantics<parallel>, #tpu.dimension_semantics<arbitrary>], iteration_bounds = array<i64: 1, 2, 1>, scalar_prefetch = 0 : i64, scratch_operands = 1 : i64, tpu.core_type = #tpu.core_type<tc>, window_params = [{transform_indices = @transform_0, window_bounds = array<i64: 16, 256>}, {transform_indices = @transform_1, window_bounds = array<i64: 256, 512>}, {transform_indices = @transform_2, window_bounds = array<i64: 16, 1>}, {transform_indices = @transform_3, window_bounds = array<i64: 16, 1>}, {transform_indices = @transform_4, window_bounds = array<i64: 16, 512>}, {transform_indices = @transform_5, window_bounds = array<i64: 16, 512>}]} {
    %c0_i32 = arith.constant 0 : i32
    %0 = arith.cmpi eq, %arg2, %c0_i32 : i32
    %1 = arith.extui %0 : i1 to i32
    %c0_i32_0 = arith.constant 0 : i32
    %2 = arith.cmpi ne, %1, %c0_i32_0 : i32
    scf.if %2 {
      %cst_10 = arith.constant 0.000000e+00 : f32
      %12 = vector.broadcast %cst_10 : f32 to vector<16x512xf32>
      %c0_11 = arith.constant 0 : index
      %c0_12 = arith.constant 0 : index
      %13 = vector.load %arg9[%c0_11, %c0_12] : memref<16x512xf32, #tpu.memory_space<vmem>>, vector<16x512xf32>
      tpu.vector_store %arg9[%c0_11, %c0_12], %12 {strides = array<i32>} : memref<16x512xf32, #tpu.memory_space<vmem>>, vector<16x512xf32>,
    } else {
    }
    %c0 = arith.constant 0 : index
    %c0_1 = arith.constant 0 : index
    %3 = vector.load %arg9[%c0, %c0_1] : memref<16x512xf32, #tpu.memory_space<vmem>>, vector<16x512xf32>
    %c0_2 = arith.constant 0 : index
    %c0_3 = arith.constant 0 : index
    %4 = vector.load %arg3[%c0_2, %c0_3] : memref<16x256xbf16, #tpu.memory_space<vmem>>, vector<16x256xbf16>
    %c0_4 = arith.constant 0 : index
    %c0_5 = arith.constant 0 : index
    %5 = vector.load %arg4[%c0_4, %c0_5] : memref<256x512xbf16, #tpu.memory_space<vmem>>, vector<256x512xbf16>
    %cst = arith.constant dense<0.000000e+00> : vector<16x512xf32>
    %6 = tpu.matmul %4, %5, %cst {dimension_numbers = #tpu.dot_dimension_numbers<[1], [0], [0], [1], [0, 0, 1, 1], [], []>} : vector<16x256xbf16>, vector<256x512xbf16>, vector<16x512xf32> -> vector<16x512xf32>
    %7 = arith.addf %3, %6 : vector<16x512xf32>
    %c0_6 = arith.constant 0 : index
    %c0_7 = arith.constant 0 : index
    %8 = vector.load %arg9[%c0_6, %c0_7] : memref<16x512xf32, #tpu.memory_space<vmem>>, vector<16x512xf32>
    tpu.vector_store %arg9[%c0_6, %c0_7], %7 {strides = array<i32>} : memref<16x512xf32, #tpu.memory_space<vmem>>, vector<16x512xf32>,
    %c0_i32_8 = arith.constant 0 : i32
    %9 = arith.cmpi eq, %arg2, %c0_i32_8 : i32
    %10 = arith.extui %9 : i1 to i32
    %c0_i32_9 = arith.constant 0 : i32
    %11 = arith.cmpi ne, %10, %c0_i32_9 : i32
    scf.if %11 {
      %c0_10 = arith.constant 0 : index
      %c0_11 = arith.constant 0 : index
      %12 = vector.load %arg9[%c0_10, %c0_11] : memref<16x512xf32, #tpu.memory_space<vmem>>, vector<16x512xf32>
      %c0_12 = arith.constant 0 : index
      %c0_13 = arith.constant 0 : index
      %13 = vector.load %arg5[%c0_12, %c0_13] : memref<16x1xf32, #tpu.memory_space<vmem>>, vector<16x1xf32>
      %14 = vector.broadcast %13 : vector<16x1xf32> to vector<16x512xf32>
      %15 = arith.mulf %12, %14 : vector<16x512xf32>
      %c0_14 = arith.constant 0 : index
      %c0_15 = arith.constant 0 : index
      %16 = vector.load %arg6[%c0_14, %c0_15] : memref<16x1xf32, #tpu.memory_space<vmem>>, vector<16x1xf32>
      %17 = vector.broadcast %16 : vector<16x1xf32> to vector<16x512xf32>
      %18 = arith.addf %15, %17 : vector<16x512xf32>
      %c0_16 = arith.constant 0 : index
      %c0_17 = arith.constant 0 : index
      %19 = vector.load %arg7[%c0_16, %c0_17] : memref<16x512xbf16, #tpu.memory_space<vmem>>, vector<16x512xbf16>
      %20 = arith.extf %19 : vector<16x512xbf16> to vector<16x512xf32>
      %21 = arith.addf %18, %20 : vector<16x512xf32>
      %cst_18 = arith.constant 0.000000e+00 : f32
      %22 = vector.broadcast %cst_18 : f32 to vector<16x512xf32>
      %23 = arith.maximumf %21, %22 : vector<16x512xf32>
      %24 = arith.truncf %23 : vector<16x512xf32> to vector<16x512xbf16>
      %c0_19 = arith.constant 0 : index
      %c0_20 = arith.constant 0 : index
      %25 = vector.load %arg8[%c0_19, %c0_20] : memref<16x512xbf16, #tpu.memory_space<vmem>>, vector<16x512xbf16>
      tpu.vector_store %arg8[%c0_19, %c0_20], %24 {strides = array<i32>} : memref<16x512xbf16, #tpu.memory_space<vmem>>, vector<16x512xbf16>,
    } else {
    }
    return
  }
  func.func @transform_0(%arg0: i32, %arg1: i32, %arg2: i32) -> (i32, i32) {
    %c0_i32 = arith.constant 0 : i32
    return %arg0, %arg2 : i32, i32
  }
  func.func @transform_1(%arg0: i32, %arg1: i32, %arg2: i32) -> (i32, i32) {
    %c0_i32 = arith.constant 0 : i32
    return %arg2, %arg1 : i32, i32
  }
  func.func @transform_2(%arg0: i32, %arg1: i32, %arg2: i32) -> (i32, i32) {
    %c0_i32 = arith.constant 0 : i32
    %c0_i32_0 = arith.constant 0 : i32
    return %arg0, %c0_i32 : i32, i32
  }
  func.func @transform_3(%arg0: i32, %arg1: i32, %arg2: i32) -> (i32, i32) {
    %c0_i32 = arith.constant 0 : i32
    %c0_i32_0 = arith.constant 0 : i32
    return %arg0, %c0_i32 : i32, i32
  }
  func.func @transform_4(%arg0: i32, %arg1: i32, %arg2: i32) -> (i32, i32) {
    %c0_i32 = arith.constant 0 : i32
    return %arg0, %arg1 : i32, i32
  }
  func.func @transform_5(%arg0: i32, %arg1: i32, %arg2: i32) -> (i32, i32) {
    %c0_i32 = arith.constant 0 : i32
    return %arg0, %arg1 : i32, i32
  }
}

module attributes {stable_mosaic.version = 11 : i64} {
  func.func @_matmul_kernel(%arg0: i32, %arg1: i32, %arg2: i32, %arg3: memref<32x256xbf16, #tpu.memory_space<vmem>>, %arg4: memref<256x256xbf16, #tpu.memory_space<vmem>>, %arg5: memref<32x1xf32, #tpu.memory_space<vmem>>, %arg6: memref<32x1xf32, #tpu.memory_space<vmem>>, %arg7: memref<32x256xbf16, #tpu.memory_space<vmem>>, %arg8: memref<32x256xf32, #tpu.memory_space<vmem>>) attributes {dimension_semantics = [#tpu.dimension_semantics<parallel>, #tpu.dimension_semantics<parallel>, #tpu.dimension_semantics<arbitrary>], iteration_bounds = array<i64: 1, 1, 1>, scalar_prefetch = 0 : i64, scratch_operands = 1 : i64, tpu.core_type = #tpu.core_type<tc>, window_params = [{transform_indices = @transform_0, window_bounds = array<i64: 32, 256>}, {transform_indices = @transform_1, window_bounds = array<i64: 256, 256>}, {transform_indices = @transform_2, window_bounds = array<i64: 32, 1>}, {transform_indices = @transform_3, window_bounds = array<i64: 32, 1>}, {transform_indices = @transform_4, window_bounds = array<i64: 32, 256>}]} {
    %c0_i32 = arith.constant 0 : i32
    %0 = arith.cmpi eq, %arg2, %c0_i32 : i32
    %1 = arith.extui %0 : i1 to i32
    %c0_i32_0 = arith.constant 0 : i32
    %2 = arith.cmpi ne, %1, %c0_i32_0 : i32
    scf.if %2 {
      %cst_10 = arith.constant 0.000000e+00 : f32
      %12 = vector.broadcast %cst_10 : f32 to vector<32x256xf32>
      %c0_11 = arith.constant 0 : index
      %c0_12 = arith.constant 0 : index
      %13 = vector.load %arg8[%c0_11, %c0_12] : memref<32x256xf32, #tpu.memory_space<vmem>>, vector<32x256xf32>
      tpu.vector_store %arg8[%c0_11, %c0_12], %12 {strides = array<i32>} : memref<32x256xf32, #tpu.memory_space<vmem>>, vector<32x256xf32>,
    } else {
    }
    %c0 = arith.constant 0 : index
    %c0_1 = arith.constant 0 : index
    %3 = vector.load %arg8[%c0, %c0_1] : memref<32x256xf32, #tpu.memory_space<vmem>>, vector<32x256xf32>
    %c0_2 = arith.constant 0 : index
    %c0_3 = arith.constant 0 : index
    %4 = vector.load %arg3[%c0_2, %c0_3] : memref<32x256xbf16, #tpu.memory_space<vmem>>, vector<32x256xbf16>
    %c0_4 = arith.constant 0 : index
    %c0_5 = arith.constant 0 : index
    %5 = vector.load %arg4[%c0_4, %c0_5] : memref<256x256xbf16, #tpu.memory_space<vmem>>, vector<256x256xbf16>
    %cst = arith.constant dense<0.000000e+00> : vector<32x256xf32>
    %6 = tpu.matmul %4, %5, %cst {dimension_numbers = #tpu.dot_dimension_numbers<[1], [0], [0], [1], [0, 0, 1, 1], [], []>} : vector<32x256xbf16>, vector<256x256xbf16>, vector<32x256xf32> -> vector<32x256xf32>
    %7 = arith.addf %3, %6 : vector<32x256xf32>
    %c0_6 = arith.constant 0 : index
    %c0_7 = arith.constant 0 : index
    %8 = vector.load %arg8[%c0_6, %c0_7] : memref<32x256xf32, #tpu.memory_space<vmem>>, vector<32x256xf32>
    tpu.vector_store %arg8[%c0_6, %c0_7], %7 {strides = array<i32>} : memref<32x256xf32, #tpu.memory_space<vmem>>, vector<32x256xf32>,
    %c0_i32_8 = arith.constant 0 : i32
    %9 = arith.cmpi eq, %arg2, %c0_i32_8 : i32
    %10 = arith.extui %9 : i1 to i32
    %c0_i32_9 = arith.constant 0 : i32
    %11 = arith.cmpi ne, %10, %c0_i32_9 : i32
    scf.if %11 {
      %c0_10 = arith.constant 0 : index
      %c0_11 = arith.constant 0 : index
      %12 = vector.load %arg8[%c0_10, %c0_11] : memref<32x256xf32, #tpu.memory_space<vmem>>, vector<32x256xf32>
      %c0_12 = arith.constant 0 : index
      %c0_13 = arith.constant 0 : index
      %13 = vector.load %arg5[%c0_12, %c0_13] : memref<32x1xf32, #tpu.memory_space<vmem>>, vector<32x1xf32>
      %14 = vector.broadcast %13 : vector<32x1xf32> to vector<32x256xf32>
      %15 = arith.mulf %12, %14 : vector<32x256xf32>
      %c0_14 = arith.constant 0 : index
      %c0_15 = arith.constant 0 : index
      %16 = vector.load %arg6[%c0_14, %c0_15] : memref<32x1xf32, #tpu.memory_space<vmem>>, vector<32x1xf32>
      %17 = vector.broadcast %16 : vector<32x1xf32> to vector<32x256xf32>
      %18 = arith.addf %15, %17 : vector<32x256xf32>
      %cst_16 = arith.constant 0.000000e+00 : f32
      %19 = vector.broadcast %cst_16 : f32 to vector<32x256xf32>
      %20 = arith.maximumf %18, %19 : vector<32x256xf32>
      %21 = arith.truncf %20 : vector<32x256xf32> to vector<32x256xbf16>
      %c0_17 = arith.constant 0 : index
      %c0_18 = arith.constant 0 : index
      %22 = vector.load %arg7[%c0_17, %c0_18] : memref<32x256xbf16, #tpu.memory_space<vmem>>, vector<32x256xbf16>
      tpu.vector_store %arg7[%c0_17, %c0_18], %21 {strides = array<i32>} : memref<32x256xbf16, #tpu.memory_space<vmem>>, vector<32x256xbf16>,
    } else {
    }
    return
  }
  func.func @transform_0(%arg0: i32, %arg1: i32, %arg2: i32) -> (i32, i32) {
    %c0_i32 = arith.constant 0 : i32
    return %arg0, %arg2 : i32, i32
  }
  func.func @transform_1(%arg0: i32, %arg1: i32, %arg2: i32) -> (i32, i32) {
    %c0_i32 = arith.constant 0 : i32
    return %arg2, %arg1 : i32, i32
  }
  func.func @transform_2(%arg0: i32, %arg1: i32, %arg2: i32) -> (i32, i32) {
    %c0_i32 = arith.constant 0 : i32
    %c0_i32_0 = arith.constant 0 : i32
    return %arg0, %c0_i32 : i32, i32
  }
  func.func @transform_3(%arg0: i32, %arg1: i32, %arg2: i32) -> (i32, i32) {
    %c0_i32 = arith.constant 0 : i32
    %c0_i32_0 = arith.constant 0 : i32
    return %arg0, %c0_i32 : i32, i32
  }
  func.func @transform_4(%arg0: i32, %arg1: i32, %arg2: i32) -> (i32, i32) {
    %c0_i32 = arith.constant 0 : i32
    return %arg0, %arg1 : i32, i32
  }
}

module attributes {stable_mosaic.version = 11 : i64} {
  func.func @_matmul_kernel(%arg0: i32, %arg1: i32, %arg2: i32, %arg3: memref<32x128xbf16, #tpu.memory_space<vmem>>, %arg4: memref<128x256xbf16, #tpu.memory_space<vmem>>, %arg5: memref<32x1xf32, #tpu.memory_space<vmem>>, %arg6: memref<32x1xf32, #tpu.memory_space<vmem>>, %arg7: memref<32x256xbf16, #tpu.memory_space<vmem>>, %arg8: memref<32x256xf32, #tpu.memory_space<vmem>>) attributes {dimension_semantics = [#tpu.dimension_semantics<parallel>, #tpu.dimension_semantics<parallel>, #tpu.dimension_semantics<arbitrary>], iteration_bounds = array<i64: 1, 1, 1>, scalar_prefetch = 0 : i64, scratch_operands = 1 : i64, tpu.core_type = #tpu.core_type<tc>, window_params = [{transform_indices = @transform_0, window_bounds = array<i64: 32, 128>}, {transform_indices = @transform_1, window_bounds = array<i64: 128, 256>}, {transform_indices = @transform_2, window_bounds = array<i64: 32, 1>}, {transform_indices = @transform_3, window_bounds = array<i64: 32, 1>}, {transform_indices = @transform_4, window_bounds = array<i64: 32, 256>}]} {
    %c0_i32 = arith.constant 0 : i32
    %0 = arith.cmpi eq, %arg2, %c0_i32 : i32
    %1 = arith.extui %0 : i1 to i32
    %c0_i32_0 = arith.constant 0 : i32
    %2 = arith.cmpi ne, %1, %c0_i32_0 : i32
    scf.if %2 {
      %cst_10 = arith.constant 0.000000e+00 : f32
      %12 = vector.broadcast %cst_10 : f32 to vector<32x256xf32>
      %c0_11 = arith.constant 0 : index
      %c0_12 = arith.constant 0 : index
      %13 = vector.load %arg8[%c0_11, %c0_12] : memref<32x256xf32, #tpu.memory_space<vmem>>, vector<32x256xf32>
      tpu.vector_store %arg8[%c0_11, %c0_12], %12 {strides = array<i32>} : memref<32x256xf32, #tpu.memory_space<vmem>>, vector<32x256xf32>,
    } else {
    }
    %c0 = arith.constant 0 : index
    %c0_1 = arith.constant 0 : index
    %3 = vector.load %arg8[%c0, %c0_1] : memref<32x256xf32, #tpu.memory_space<vmem>>, vector<32x256xf32>
    %c0_2 = arith.constant 0 : index
    %c0_3 = arith.constant 0 : index
    %4 = vector.load %arg3[%c0_2, %c0_3] : memref<32x128xbf16, #tpu.memory_space<vmem>>, vector<32x128xbf16>
    %c0_4 = arith.constant 0 : index
    %c0_5 = arith.constant 0 : index
    %5 = vector.load %arg4[%c0_4, %c0_5] : memref<128x256xbf16, #tpu.memory_space<vmem>>, vector<128x256xbf16>
    %cst = arith.constant dense<0.000000e+00> : vector<32x256xf32>
    %6 = tpu.matmul %4, %5, %cst {dimension_numbers = #tpu.dot_dimension_numbers<[1], [0], [0], [1], [0, 0, 1, 1], [], []>} : vector<32x128xbf16>, vector<128x256xbf16>, vector<32x256xf32> -> vector<32x256xf32>
    %7 = arith.addf %3, %6 : vector<32x256xf32>
    %c0_6 = arith.constant 0 : index
    %c0_7 = arith.constant 0 : index
    %8 = vector.load %arg8[%c0_6, %c0_7] : memref<32x256xf32, #tpu.memory_space<vmem>>, vector<32x256xf32>
    tpu.vector_store %arg8[%c0_6, %c0_7], %7 {strides = array<i32>} : memref<32x256xf32, #tpu.memory_space<vmem>>, vector<32x256xf32>,
    %c0_i32_8 = arith.constant 0 : i32
    %9 = arith.cmpi eq, %arg2, %c0_i32_8 : i32
    %10 = arith.extui %9 : i1 to i32
    %c0_i32_9 = arith.constant 0 : i32
    %11 = arith.cmpi ne, %10, %c0_i32_9 : i32
    scf.if %11 {
      %c0_10 = arith.constant 0 : index
      %c0_11 = arith.constant 0 : index
      %12 = vector.load %arg8[%c0_10, %c0_11] : memref<32x256xf32, #tpu.memory_space<vmem>>, vector<32x256xf32>
      %c0_12 = arith.constant 0 : index
      %c0_13 = arith.constant 0 : index
      %13 = vector.load %arg5[%c0_12, %c0_13] : memref<32x1xf32, #tpu.memory_space<vmem>>, vector<32x1xf32>
      %14 = vector.broadcast %13 : vector<32x1xf32> to vector<32x256xf32>
      %15 = arith.mulf %12, %14 : vector<32x256xf32>
      %c0_14 = arith.constant 0 : index
      %c0_15 = arith.constant 0 : index
      %16 = vector.load %arg6[%c0_14, %c0_15] : memref<32x1xf32, #tpu.memory_space<vmem>>, vector<32x1xf32>
      %17 = vector.broadcast %16 : vector<32x1xf32> to vector<32x256xf32>
      %18 = arith.addf %15, %17 : vector<32x256xf32>
      %19 = arith.truncf %18 : vector<32x256xf32> to vector<32x256xbf16>
      %c0_16 = arith.constant 0 : index
      %c0_17 = arith.constant 0 : index
      %20 = vector.load %arg7[%c0_16, %c0_17] : memref<32x256xbf16, #tpu.memory_space<vmem>>, vector<32x256xbf16>
      tpu.vector_store %arg7[%c0_16, %c0_17], %19 {strides = array<i32>} : memref<32x256xbf16, #tpu.memory_space<vmem>>, vector<32x256xbf16>,
    } else {
    }
    return
  }
  func.func @transform_0(%arg0: i32, %arg1: i32, %arg2: i32) -> (i32, i32) {
    %c0_i32 = arith.constant 0 : i32
    return %arg0, %arg2 : i32, i32
  }
  func.func @transform_1(%arg0: i32, %arg1: i32, %arg2: i32) -> (i32, i32) {
    %c0_i32 = arith.constant 0 : i32
    return %arg2, %arg1 : i32, i32
  }
  func.func @transform_2(%arg0: i32, %arg1: i32, %arg2: i32) -> (i32, i32) {
    %c0_i32 = arith.constant 0 : i32
    %c0_i32_0 = arith.constant 0 : i32
    return %arg0, %c0_i32 : i32, i32
  }
  func.func @transform_3(%arg0: i32, %arg1: i32, %arg2: i32) -> (i32, i32) {
    %c0_i32 = arith.constant 0 : i32
    %c0_i32_0 = arith.constant 0 : i32
    return %arg0, %c0_i32 : i32, i32
  }
  func.func @transform_4(%arg0: i32, %arg1: i32, %arg2: i32) -> (i32, i32) {
    %c0_i32 = arith.constant 0 : i32
    return %arg0, %arg1 : i32, i32
  }
}

module attributes {stable_mosaic.version = 11 : i64} {
  func.func @_matmul_kernel(%arg0: i32, %arg1: i32, %arg2: i32, %arg3: memref<32x256xbf16, #tpu.memory_space<vmem>>, %arg4: memref<256x256xbf16, #tpu.memory_space<vmem>>, %arg5: memref<32x1xf32, #tpu.memory_space<vmem>>, %arg6: memref<32x1xf32, #tpu.memory_space<vmem>>, %arg7: memref<32x256xbf16, #tpu.memory_space<vmem>>, %arg8: memref<32x256xbf16, #tpu.memory_space<vmem>>, %arg9: memref<32x256xf32, #tpu.memory_space<vmem>>) attributes {dimension_semantics = [#tpu.dimension_semantics<parallel>, #tpu.dimension_semantics<parallel>, #tpu.dimension_semantics<arbitrary>], iteration_bounds = array<i64: 1, 1, 2>, scalar_prefetch = 0 : i64, scratch_operands = 1 : i64, tpu.core_type = #tpu.core_type<tc>, window_params = [{transform_indices = @transform_0, window_bounds = array<i64: 32, 256>}, {transform_indices = @transform_1, window_bounds = array<i64: 256, 256>}, {transform_indices = @transform_2, window_bounds = array<i64: 32, 1>}, {transform_indices = @transform_3, window_bounds = array<i64: 32, 1>}, {transform_indices = @transform_4, window_bounds = array<i64: 32, 256>}, {transform_indices = @transform_5, window_bounds = array<i64: 32, 256>}]} {
    %c0_i32 = arith.constant 0 : i32
    %0 = arith.cmpi eq, %arg2, %c0_i32 : i32
    %1 = arith.extui %0 : i1 to i32
    %c0_i32_0 = arith.constant 0 : i32
    %2 = arith.cmpi ne, %1, %c0_i32_0 : i32
    scf.if %2 {
      %cst_9 = arith.constant 0.000000e+00 : f32
      %12 = vector.broadcast %cst_9 : f32 to vector<32x256xf32>
      %c0_10 = arith.constant 0 : index
      %c0_11 = arith.constant 0 : index
      %13 = vector.load %arg9[%c0_10, %c0_11] : memref<32x256xf32, #tpu.memory_space<vmem>>, vector<32x256xf32>
      tpu.vector_store %arg9[%c0_10, %c0_11], %12 {strides = array<i32>} : memref<32x256xf32, #tpu.memory_space<vmem>>, vector<32x256xf32>,
    } else {
    }
    %c0 = arith.constant 0 : index
    %c0_1 = arith.constant 0 : index
    %3 = vector.load %arg9[%c0, %c0_1] : memref<32x256xf32, #tpu.memory_space<vmem>>, vector<32x256xf32>
    %c0_2 = arith.constant 0 : index
    %c0_3 = arith.constant 0 : index
    %4 = vector.load %arg3[%c0_2, %c0_3] : memref<32x256xbf16, #tpu.memory_space<vmem>>, vector<32x256xbf16>
    %c0_4 = arith.constant 0 : index
    %c0_5 = arith.constant 0 : index
    %5 = vector.load %arg4[%c0_4, %c0_5] : memref<256x256xbf16, #tpu.memory_space<vmem>>, vector<256x256xbf16>
    %cst = arith.constant dense<0.000000e+00> : vector<32x256xf32>
    %6 = tpu.matmul %4, %5, %cst {dimension_numbers = #tpu.dot_dimension_numbers<[1], [0], [0], [1], [0, 0, 1, 1], [], []>} : vector<32x256xbf16>, vector<256x256xbf16>, vector<32x256xf32> -> vector<32x256xf32>
    %7 = arith.addf %3, %6 : vector<32x256xf32>
    %c0_6 = arith.constant 0 : index
    %c0_7 = arith.constant 0 : index
    %8 = vector.load %arg9[%c0_6, %c0_7] : memref<32x256xf32, #tpu.memory_space<vmem>>, vector<32x256xf32>
    tpu.vector_store %arg9[%c0_6, %c0_7], %7 {strides = array<i32>} : memref<32x256xf32, #tpu.memory_space<vmem>>, vector<32x256xf32>,
    %c1_i32 = arith.constant 1 : i32
    %9 = arith.cmpi eq, %arg2, %c1_i32 : i32
    %10 = arith.extui %9 : i1 to i32
    %c0_i32_8 = arith.constant 0 : i32
    %11 = arith.cmpi ne, %10, %c0_i32_8 : i32
    scf.if %11 {
      %c0_9 = arith.constant 0 : index
      %c0_10 = arith.constant 0 : index
      %12 = vector.load %arg9[%c0_9, %c0_10] : memref<32x256xf32, #tpu.memory_space<vmem>>, vector<32x256xf32>
      %c0_11 = arith.constant 0 : index
      %c0_12 = arith.constant 0 : index
      %13 = vector.load %arg5[%c0_11, %c0_12] : memref<32x1xf32, #tpu.memory_space<vmem>>, vector<32x1xf32>
      %14 = vector.broadcast %13 : vector<32x1xf32> to vector<32x256xf32>
      %15 = arith.mulf %12, %14 : vector<32x256xf32>
      %c0_13 = arith.constant 0 : index
      %c0_14 = arith.constant 0 : index
      %16 = vector.load %arg6[%c0_13, %c0_14] : memref<32x1xf32, #tpu.memory_space<vmem>>, vector<32x1xf32>
      %17 = vector.broadcast %16 : vector<32x1xf32> to vector<32x256xf32>
      %18 = arith.addf %15, %17 : vector<32x256xf32>
      %c0_15 = arith.constant 0 : index
      %c0_16 = arith.constant 0 : index
      %19 = vector.load %arg7[%c0_15, %c0_16] : memref<32x256xbf16, #tpu.memory_space<vmem>>, vector<32x256xbf16>
      %20 = arith.extf %19 : vector<32x256xbf16> to vector<32x256xf32>
      %21 = arith.addf %18, %20 : vector<32x256xf32>
      %cst_17 = arith.constant 0.000000e+00 : f32
      %22 = vector.broadcast %cst_17 : f32 to vector<32x256xf32>
      %23 = arith.maximumf %21, %22 : vector<32x256xf32>
      %24 = arith.truncf %23 : vector<32x256xf32> to vector<32x256xbf16>
      %c0_18 = arith.constant 0 : index
      %c0_19 = arith.constant 0 : index
      %25 = vector.load %arg8[%c0_18, %c0_19] : memref<32x256xbf16, #tpu.memory_space<vmem>>, vector<32x256xbf16>
      tpu.vector_store %arg8[%c0_18, %c0_19], %24 {strides = array<i32>} : memref<32x256xbf16, #tpu.memory_space<vmem>>, vector<32x256xbf16>,
    } else {
    }
    return
  }
  func.func @transform_0(%arg0: i32, %arg1: i32, %arg2: i32) -> (i32, i32) {
    %c0_i32 = arith.constant 0 : i32
    return %arg0, %arg2 : i32, i32
  }
  func.func @transform_1(%arg0: i32, %arg1: i32, %arg2: i32) -> (i32, i32) {
    %c0_i32 = arith.constant 0 : i32
    return %arg2, %arg1 : i32, i32
  }
  func.func @transform_2(%arg0: i32, %arg1: i32, %arg2: i32) -> (i32, i32) {
    %c0_i32 = arith.constant 0 : i32
    %c0_i32_0 = arith.constant 0 : i32
    return %arg0, %c0_i32 : i32, i32
  }
  func.func @transform_3(%arg0: i32, %arg1: i32, %arg2: i32) -> (i32, i32) {
    %c0_i32 = arith.constant 0 : i32
    %c0_i32_0 = arith.constant 0 : i32
    return %arg0, %c0_i32 : i32, i32
  }
  func.func @transform_4(%arg0: i32, %arg1: i32, %arg2: i32) -> (i32, i32) {
    %c0_i32 = arith.constant 0 : i32
    return %arg0, %arg1 : i32, i32
  }
  func.func @transform_5(%arg0: i32, %arg1: i32, %arg2: i32) -> (i32, i32) {
    %c0_i32 = arith.constant 0 : i32
    return %arg0, %arg1 : i32, i32
  }
}

module attributes {stable_mosaic.version = 11 : i64} {
  func.func @_matmul_kernel(%arg0: i32, %arg1: i32, %arg2: i32, %arg3: memref<32x256xbf16, #tpu.memory_space<vmem>>, %arg4: memref<256x256xbf16, #tpu.memory_space<vmem>>, %arg5: memref<32x1xf32, #tpu.memory_space<vmem>>, %arg6: memref<32x1xf32, #tpu.memory_space<vmem>>, %arg7: memref<32x256xbf16, #tpu.memory_space<vmem>>, %arg8: memref<32x256xf32, #tpu.memory_space<vmem>>) attributes {dimension_semantics = [#tpu.dimension_semantics<parallel>, #tpu.dimension_semantics<parallel>, #tpu.dimension_semantics<arbitrary>], iteration_bounds = array<i64: 1, 1, 2>, scalar_prefetch = 0 : i64, scratch_operands = 1 : i64, tpu.core_type = #tpu.core_type<tc>, window_params = [{transform_indices = @transform_0, window_bounds = array<i64: 32, 256>}, {transform_indices = @transform_1, window_bounds = array<i64: 256, 256>}, {transform_indices = @transform_2, window_bounds = array<i64: 32, 1>}, {transform_indices = @transform_3, window_bounds = array<i64: 32, 1>}, {transform_indices = @transform_4, window_bounds = array<i64: 32, 256>}]} {
    %c0_i32 = arith.constant 0 : i32
    %0 = arith.cmpi eq, %arg2, %c0_i32 : i32
    %1 = arith.extui %0 : i1 to i32
    %c0_i32_0 = arith.constant 0 : i32
    %2 = arith.cmpi ne, %1, %c0_i32_0 : i32
    scf.if %2 {
      %cst_9 = arith.constant 0.000000e+00 : f32
      %12 = vector.broadcast %cst_9 : f32 to vector<32x256xf32>
      %c0_10 = arith.constant 0 : index
      %c0_11 = arith.constant 0 : index
      %13 = vector.load %arg8[%c0_10, %c0_11] : memref<32x256xf32, #tpu.memory_space<vmem>>, vector<32x256xf32>
      tpu.vector_store %arg8[%c0_10, %c0_11], %12 {strides = array<i32>} : memref<32x256xf32, #tpu.memory_space<vmem>>, vector<32x256xf32>,
    } else {
    }
    %c0 = arith.constant 0 : index
    %c0_1 = arith.constant 0 : index
    %3 = vector.load %arg8[%c0, %c0_1] : memref<32x256xf32, #tpu.memory_space<vmem>>, vector<32x256xf32>
    %c0_2 = arith.constant 0 : index
    %c0_3 = arith.constant 0 : index
    %4 = vector.load %arg3[%c0_2, %c0_3] : memref<32x256xbf16, #tpu.memory_space<vmem>>, vector<32x256xbf16>
    %c0_4 = arith.constant 0 : index
    %c0_5 = arith.constant 0 : index
    %5 = vector.load %arg4[%c0_4, %c0_5] : memref<256x256xbf16, #tpu.memory_space<vmem>>, vector<256x256xbf16>
    %cst = arith.constant dense<0.000000e+00> : vector<32x256xf32>
    %6 = tpu.matmul %4, %5, %cst {dimension_numbers = #tpu.dot_dimension_numbers<[1], [0], [0], [1], [0, 0, 1, 1], [], []>} : vector<32x256xbf16>, vector<256x256xbf16>, vector<32x256xf32> -> vector<32x256xf32>
    %7 = arith.addf %3, %6 : vector<32x256xf32>
    %c0_6 = arith.constant 0 : index
    %c0_7 = arith.constant 0 : index
    %8 = vector.load %arg8[%c0_6, %c0_7] : memref<32x256xf32, #tpu.memory_space<vmem>>, vector<32x256xf32>
    tpu.vector_store %arg8[%c0_6, %c0_7], %7 {strides = array<i32>} : memref<32x256xf32, #tpu.memory_space<vmem>>, vector<32x256xf32>,
    %c1_i32 = arith.constant 1 : i32
    %9 = arith.cmpi eq, %arg2, %c1_i32 : i32
    %10 = arith.extui %9 : i1 to i32
    %c0_i32_8 = arith.constant 0 : i32
    %11 = arith.cmpi ne, %10, %c0_i32_8 : i32
    scf.if %11 {
      %c0_9 = arith.constant 0 : index
      %c0_10 = arith.constant 0 : index
      %12 = vector.load %arg8[%c0_9, %c0_10] : memref<32x256xf32, #tpu.memory_space<vmem>>, vector<32x256xf32>
      %c0_11 = arith.constant 0 : index
      %c0_12 = arith.constant 0 : index
      %13 = vector.load %arg5[%c0_11, %c0_12] : memref<32x1xf32, #tpu.memory_space<vmem>>, vector<32x1xf32>
      %14 = vector.broadcast %13 : vector<32x1xf32> to vector<32x256xf32>
      %15 = arith.mulf %12, %14 : vector<32x256xf32>
      %c0_13 = arith.constant 0 : index
      %c0_14 = arith.constant 0 : index
      %16 = vector.load %arg6[%c0_13, %c0_14] : memref<32x1xf32, #tpu.memory_space<vmem>>, vector<32x1xf32>
      %17 = vector.broadcast %16 : vector<32x1xf32> to vector<32x256xf32>
      %18 = arith.addf %15, %17 : vector<32x256xf32>
      %cst_15 = arith.constant 0.000000e+00 : f32
      %19 = vector.broadcast %cst_15 : f32 to vector<32x256xf32>
      %20 = arith.maximumf %18, %19 : vector<32x256xf32>
      %21 = arith.truncf %20 : vector<32x256xf32> to vector<32x256xbf16>
      %c0_16 = arith.constant 0 : index
      %c0_17 = arith.constant 0 : index
      %22 = vector.load %arg7[%c0_16, %c0_17] : memref<32x256xbf16, #tpu.memory_space<vmem>>, vector<32x256xbf16>
      tpu.vector_store %arg7[%c0_16, %c0_17], %21 {strides = array<i32>} : memref<32x256xbf16, #tpu.memory_space<vmem>>, vector<32x256xbf16>,
    } else {
    }
    return
  }
  func.func @transform_0(%arg0: i32, %arg1: i32, %arg2: i32) -> (i32, i32) {
    %c0_i32 = arith.constant 0 : i32
    return %arg0, %arg2 : i32, i32
  }
  func.func @transform_1(%arg0: i32, %arg1: i32, %arg2: i32) -> (i32, i32) {
    %c0_i32 = arith.constant 0 : i32
    return %arg2, %arg1 : i32, i32
  }
  func.func @transform_2(%arg0: i32, %arg1: i32, %arg2: i32) -> (i32, i32) {
    %c0_i32 = arith.constant 0 : i32
    %c0_i32_0 = arith.constant 0 : i32
    return %arg0, %c0_i32 : i32, i32
  }
  func.func @transform_3(%arg0: i32, %arg1: i32, %arg2: i32) -> (i32, i32) {
    %c0_i32 = arith.constant 0 : i32
    %c0_i32_0 = arith.constant 0 : i32
    return %arg0, %c0_i32 : i32, i32
  }
  func.func @transform_4(%arg0: i32, %arg1: i32, %arg2: i32) -> (i32, i32) {
    %c0_i32 = arith.constant 0 : i32
    return %arg0, %arg1 : i32, i32
  }
}

module attributes {stable_mosaic.version = 11 : i64} {
  func.func @_max_rot_kernel(%arg0: i32, %arg1: i32, %arg2: memref<1x16x128xbf16, #tpu.memory_space<vmem>>, %arg3: memref<16x128xbf16, #tpu.memory_space<vmem>>) attributes {dimension_semantics = [#tpu.dimension_semantics<parallel>, #tpu.dimension_semantics<arbitrary>], iteration_bounds = array<i64: 1, 8>, scalar_prefetch = 0 : i64, scratch_operands = 0 : i64, tpu.core_type = #tpu.core_type<tc>, window_params = [{transform_indices = @transform_0, window_bounds = array<i64: 1, 16, 128>}, {transform_indices = @transform_1, window_bounds = array<i64: 16, 128>}]} {
    %c0 = arith.constant 0 : index
    %c0_0 = arith.constant 0 : index
    %c0_1 = arith.constant 0 : index
    %0 = vector.load %arg2[%c0, %c0_0, %c0_1] : memref<1x16x128xbf16, #tpu.memory_space<vmem>>, vector<1x16x128xbf16>
    %1 = vector.shape_cast %0 : vector<1x16x128xbf16> to vector<16x128xbf16>
    %c0_i32 = arith.constant 0 : i32
    %2 = arith.cmpi eq, %arg1, %c0_i32 : i32
    %3 = arith.extui %2 : i1 to i32
    %c0_i32_2 = arith.constant 0 : i32
    %4 = arith.cmpi ne, %3, %c0_i32_2 : i32
    scf.if %4 {
      %c0_5 = arith.constant 0 : index
      %c0_6 = arith.constant 0 : index
      %8 = vector.load %arg3[%c0_5, %c0_6] : memref<16x128xbf16, #tpu.memory_space<vmem>>, vector<16x128xbf16>
      tpu.vector_store %arg3[%c0_5, %c0_6], %1 {strides = array<i32>} : memref<16x128xbf16, #tpu.memory_space<vmem>>, vector<16x128xbf16>,
    } else {
    }
    %c0_i32_3 = arith.constant 0 : i32
    %5 = arith.cmpi sgt, %arg1, %c0_i32_3 : i32
    %6 = arith.extui %5 : i1 to i32
    %c0_i32_4 = arith.constant 0 : i32
    %7 = arith.cmpi ne, %6, %c0_i32_4 : i32
    scf.if %7 {
      %c0_5 = arith.constant 0 : index
      %c0_6 = arith.constant 0 : index
      %8 = vector.load %arg3[%c0_5, %c0_6] : memref<16x128xbf16, #tpu.memory_space<vmem>>, vector<16x128xbf16>
      %9 = arith.maximumf %8, %1 : vector<16x128xbf16>
      %c0_7 = arith.constant 0 : index
      %c0_8 = arith.constant 0 : index
      %10 = vector.load %arg3[%c0_7, %c0_8] : memref<16x128xbf16, #tpu.memory_space<vmem>>, vector<16x128xbf16>
      tpu.vector_store %arg3[%c0_7, %c0_8], %9 {strides = array<i32>} : memref<16x128xbf16, #tpu.memory_space<vmem>>, vector<16x128xbf16>,
    } else {
    }
    return
  }
  func.func @transform_0(%arg0: i32, %arg1: i32) -> (i32, i32, i32) {
    %c0_i32 = arith.constant 0 : i32
    %c0_i32_0 = arith.constant 0 : i32
    return %arg1, %arg0, %c0_i32 : i32, i32, i32
  }
  func.func @transform_1(%arg0: i32, %arg1: i32) -> (i32, i32) {
    %c0_i32 = arith.constant 0 : i32
    %c0_i32_0 = arith.constant 0 : i32
    return %arg0, %c0_i32 : i32, i32
  }
}

module attributes {stable_mosaic.version = 11 : i64} {
  func.func @_l2norm_kernel(%arg0: i32, %arg1: i32, %arg2: memref<1x32x128xf32, #tpu.memory_space<vmem>>, %arg3: memref<1x32x128xbf16, #tpu.memory_space<vmem>>) attributes {dimension_semantics = [#tpu.dimension_semantics<parallel>, #tpu.dimension_semantics<parallel>], iteration_bounds = array<i64: 2, 1>, scalar_prefetch = 0 : i64, scratch_operands = 0 : i64, tpu.core_type = #tpu.core_type<tc>, window_params = [{transform_indices = @transform_0, window_bounds = array<i64: 1, 32, 128>}, {transform_indices = @transform_1, window_bounds = array<i64: 1, 32, 128>}]} {
    %c0 = arith.constant 0 : index
    %c0_0 = arith.constant 0 : index
    %c0_1 = arith.constant 0 : index
    %0 = vector.load %arg2[%c0, %c0_0, %c0_1] : memref<1x32x128xf32, #tpu.memory_space<vmem>>, vector<1x32x128xf32>
    %1 = arith.mulf %0, %0 : vector<1x32x128xf32>
    %cst = arith.constant dense<0.000000e+00> : vector<1x128xf32>
    %2 = vector.multi_reduction <add>, %1, %cst [1] : vector<1x32x128xf32> to vector<1x128xf32>
    %3 = vector.shape_cast %2 : vector<1x128xf32> to vector<1x1x128xf32>
    %4 = math.sqrt %3 : vector<1x1x128xf32>
    %cst_2 = arith.constant 9.99999996E-13 : f32
    %5 = vector.broadcast %cst_2 : f32 to vector<1x1x128xf32>
    %6 = arith.maximumf %4, %5 : vector<1x1x128xf32>
    %7 = vector.broadcast %6 : vector<1x1x128xf32> to vector<1x32x128xf32>
    %8 = arith.divf %0, %7 : vector<1x32x128xf32>
    %9 = arith.truncf %8 : vector<1x32x128xf32> to vector<1x32x128xbf16>
    %c0_3 = arith.constant 0 : index
    %c0_4 = arith.constant 0 : index
    %c0_5 = arith.constant 0 : index
    %10 = vector.load %arg3[%c0_3, %c0_4, %c0_5] : memref<1x32x128xbf16, #tpu.memory_space<vmem>>, vector<1x32x128xbf16>
    tpu.vector_store %arg3[%c0_3, %c0_4, %c0_5], %9 {strides = array<i32>} : memref<1x32x128xbf16, #tpu.memory_space<vmem>>, vector<1x32x128xbf16>,
    return
  }
  func.func @transform_0(%arg0: i32, %arg1: i32) -> (i32, i32, i32) {
    %c0_i32 = arith.constant 0 : i32
    %c0_i32_0 = arith.constant 0 : i32
    return %arg0, %c0_i32, %arg1 : i32, i32, i32
  }
  func.func @transform_1(%arg0: i32, %arg1: i32) -> (i32, i32, i32) {
    %c0_i32 = arith.constant 0 : i32
    %c0_i32_0 = arith.constant 0 : i32
    return %arg0, %c0_i32, %arg1 : i32, i32, i32
  }
}

module attributes {stable_mosaic.version = 11 : i64} {
  func.func @_matmul_kernel(%arg0: i32, %arg1: i32, %arg2: i32, %arg3: memref<16x256xbf16, #tpu.memory_space<vmem>>, %arg4: memref<256x128xbf16, #tpu.memory_space<vmem>>, %arg5: memref<16x1xf32, #tpu.memory_space<vmem>>, %arg6: memref<16x1xf32, #tpu.memory_space<vmem>>, %arg7: memref<16x128xbf16, #tpu.memory_space<vmem>>, %arg8: memref<16x128xf32, #tpu.memory_space<vmem>>) attributes {dimension_semantics = [#tpu.dimension_semantics<parallel>, #tpu.dimension_semantics<parallel>, #tpu.dimension_semantics<arbitrary>], iteration_bounds = array<i64: 1, 1, 2>, scalar_prefetch = 0 : i64, scratch_operands = 1 : i64, tpu.core_type = #tpu.core_type<tc>, window_params = [{transform_indices = @transform_0, window_bounds = array<i64: 16, 256>}, {transform_indices = @transform_1, window_bounds = array<i64: 256, 128>}, {transform_indices = @transform_2, window_bounds = array<i64: 16, 1>}, {transform_indices = @transform_3, window_bounds = array<i64: 16, 1>}, {transform_indices = @transform_4, window_bounds = array<i64: 16, 128>}]} {
    %c0_i32 = arith.constant 0 : i32
    %0 = arith.cmpi eq, %arg2, %c0_i32 : i32
    %1 = arith.extui %0 : i1 to i32
    %c0_i32_0 = arith.constant 0 : i32
    %2 = arith.cmpi ne, %1, %c0_i32_0 : i32
    scf.if %2 {
      %cst_9 = arith.constant 0.000000e+00 : f32
      %12 = vector.broadcast %cst_9 : f32 to vector<16x128xf32>
      %c0_10 = arith.constant 0 : index
      %c0_11 = arith.constant 0 : index
      %13 = vector.load %arg8[%c0_10, %c0_11] : memref<16x128xf32, #tpu.memory_space<vmem>>, vector<16x128xf32>
      tpu.vector_store %arg8[%c0_10, %c0_11], %12 {strides = array<i32>} : memref<16x128xf32, #tpu.memory_space<vmem>>, vector<16x128xf32>,
    } else {
    }
    %c0 = arith.constant 0 : index
    %c0_1 = arith.constant 0 : index
    %3 = vector.load %arg8[%c0, %c0_1] : memref<16x128xf32, #tpu.memory_space<vmem>>, vector<16x128xf32>
    %c0_2 = arith.constant 0 : index
    %c0_3 = arith.constant 0 : index
    %4 = vector.load %arg3[%c0_2, %c0_3] : memref<16x256xbf16, #tpu.memory_space<vmem>>, vector<16x256xbf16>
    %c0_4 = arith.constant 0 : index
    %c0_5 = arith.constant 0 : index
    %5 = vector.load %arg4[%c0_4, %c0_5] : memref<256x128xbf16, #tpu.memory_space<vmem>>, vector<256x128xbf16>
    %cst = arith.constant dense<0.000000e+00> : vector<16x128xf32>
    %6 = tpu.matmul %4, %5, %cst {dimension_numbers = #tpu.dot_dimension_numbers<[1], [0], [0], [1], [0, 0, 1, 1], [], []>} : vector<16x256xbf16>, vector<256x128xbf16>, vector<16x128xf32> -> vector<16x128xf32>
    %7 = arith.addf %3, %6 : vector<16x128xf32>
    %c0_6 = arith.constant 0 : index
    %c0_7 = arith.constant 0 : index
    %8 = vector.load %arg8[%c0_6, %c0_7] : memref<16x128xf32, #tpu.memory_space<vmem>>, vector<16x128xf32>
    tpu.vector_store %arg8[%c0_6, %c0_7], %7 {strides = array<i32>} : memref<16x128xf32, #tpu.memory_space<vmem>>, vector<16x128xf32>,
    %c1_i32 = arith.constant 1 : i32
    %9 = arith.cmpi eq, %arg2, %c1_i32 : i32
    %10 = arith.extui %9 : i1 to i32
    %c0_i32_8 = arith.constant 0 : i32
    %11 = arith.cmpi ne, %10, %c0_i32_8 : i32
    scf.if %11 {
      %c0_9 = arith.constant 0 : index
      %c0_10 = arith.constant 0 : index
      %12 = vector.load %arg8[%c0_9, %c0_10] : memref<16x128xf32, #tpu.memory_space<vmem>>, vector<16x128xf32>
      %c0_11 = arith.constant 0 : index
      %c0_12 = arith.constant 0 : index
      %13 = vector.load %arg5[%c0_11, %c0_12] : memref<16x1xf32, #tpu.memory_space<vmem>>, vector<16x1xf32>
      %14 = vector.broadcast %13 : vector<16x1xf32> to vector<16x128xf32>
      %15 = arith.mulf %12, %14 : vector<16x128xf32>
      %c0_13 = arith.constant 0 : index
      %c0_14 = arith.constant 0 : index
      %16 = vector.load %arg6[%c0_13, %c0_14] : memref<16x1xf32, #tpu.memory_space<vmem>>, vector<16x1xf32>
      %17 = vector.broadcast %16 : vector<16x1xf32> to vector<16x128xf32>
      %18 = arith.addf %15, %17 : vector<16x128xf32>
      %cst_15 = arith.constant 0.000000e+00 : f32
      %19 = vector.broadcast %cst_15 : f32 to vector<16x128xf32>
      %20 = arith.maximumf %18, %19 : vector<16x128xf32>
      %21 = arith.truncf %20 : vector<16x128xf32> to vector<16x128xbf16>
      %c0_16 = arith.constant 0 : index
      %c0_17 = arith.constant 0 : index
      %22 = vector.load %arg7[%c0_16, %c0_17] : memref<16x128xbf16, #tpu.memory_space<vmem>>, vector<16x128xbf16>
      tpu.vector_store %arg7[%c0_16, %c0_17], %21 {strides = array<i32>} : memref<16x128xbf16, #tpu.memory_space<vmem>>, vector<16x128xbf16>,
    } else {
    }
    return
  }
  func.func @transform_0(%arg0: i32, %arg1: i32, %arg2: i32) -> (i32, i32) {
    %c0_i32 = arith.constant 0 : i32
    return %arg0, %arg2 : i32, i32
  }
  func.func @transform_1(%arg0: i32, %arg1: i32, %arg2: i32) -> (i32, i32) {
    %c0_i32 = arith.constant 0 : i32
    return %arg2, %arg1 : i32, i32
  }
  func.func @transform_2(%arg0: i32, %arg1: i32, %arg2: i32) -> (i32, i32) {
    %c0_i32 = arith.constant 0 : i32
    %c0_i32_0 = arith.constant 0 : i32
    return %arg0, %c0_i32 : i32, i32
  }
  func.func @transform_3(%arg0: i32, %arg1: i32, %arg2: i32) -> (i32, i32) {
    %c0_i32 = arith.constant 0 : i32
    %c0_i32_0 = arith.constant 0 : i32
    return %arg0, %c0_i32 : i32, i32
  }
  func.func @transform_4(%arg0: i32, %arg1: i32, %arg2: i32) -> (i32, i32) {
    %c0_i32 = arith.constant 0 : i32
    return %arg0, %arg1 : i32, i32
  }
}

module attributes {stable_mosaic.version = 11 : i64} {
  func.func @_matmul_kernel(%arg0: i32, %arg1: i32, %arg2: i32, %arg3: memref<16x128xbf16, #tpu.memory_space<vmem>>, %arg4: memref<128x128xbf16, #tpu.memory_space<vmem>>, %arg5: memref<16x1xf32, #tpu.memory_space<vmem>>, %arg6: memref<16x1xf32, #tpu.memory_space<vmem>>, %arg7: memref<16x128xbf16, #tpu.memory_space<vmem>>, %arg8: memref<16x128xf32, #tpu.memory_space<vmem>>) attributes {dimension_semantics = [#tpu.dimension_semantics<parallel>, #tpu.dimension_semantics<parallel>, #tpu.dimension_semantics<arbitrary>], iteration_bounds = array<i64: 1, 1, 1>, scalar_prefetch = 0 : i64, scratch_operands = 1 : i64, tpu.core_type = #tpu.core_type<tc>, window_params = [{transform_indices = @transform_0, window_bounds = array<i64: 16, 128>}, {transform_indices = @transform_1, window_bounds = array<i64: 128, 128>}, {transform_indices = @transform_2, window_bounds = array<i64: 16, 1>}, {transform_indices = @transform_3, window_bounds = array<i64: 16, 1>}, {transform_indices = @transform_4, window_bounds = array<i64: 16, 128>}]} {
    %c0_i32 = arith.constant 0 : i32
    %0 = arith.cmpi eq, %arg2, %c0_i32 : i32
    %1 = arith.extui %0 : i1 to i32
    %c0_i32_0 = arith.constant 0 : i32
    %2 = arith.cmpi ne, %1, %c0_i32_0 : i32
    scf.if %2 {
      %cst_10 = arith.constant 0.000000e+00 : f32
      %12 = vector.broadcast %cst_10 : f32 to vector<16x128xf32>
      %c0_11 = arith.constant 0 : index
      %c0_12 = arith.constant 0 : index
      %13 = vector.load %arg8[%c0_11, %c0_12] : memref<16x128xf32, #tpu.memory_space<vmem>>, vector<16x128xf32>
      tpu.vector_store %arg8[%c0_11, %c0_12], %12 {strides = array<i32>} : memref<16x128xf32, #tpu.memory_space<vmem>>, vector<16x128xf32>,
    } else {
    }
    %c0 = arith.constant 0 : index
    %c0_1 = arith.constant 0 : index
    %3 = vector.load %arg8[%c0, %c0_1] : memref<16x128xf32, #tpu.memory_space<vmem>>, vector<16x128xf32>
    %c0_2 = arith.constant 0 : index
    %c0_3 = arith.constant 0 : index
    %4 = vector.load %arg3[%c0_2, %c0_3] : memref<16x128xbf16, #tpu.memory_space<vmem>>, vector<16x128xbf16>
    %c0_4 = arith.constant 0 : index
    %c0_5 = arith.constant 0 : index
    %5 = vector.load %arg4[%c0_4, %c0_5] : memref<128x128xbf16, #tpu.memory_space<vmem>>, vector<128x128xbf16>
    %cst = arith.constant dense<0.000000e+00> : vector<16x128xf32>
    %6 = tpu.matmul %4, %5, %cst {dimension_numbers = #tpu.dot_dimension_numbers<[1], [0], [0], [1], [0, 0, 1, 1], [], []>} : vector<16x128xbf16>, vector<128x128xbf16>, vector<16x128xf32> -> vector<16x128xf32>
    %7 = arith.addf %3, %6 : vector<16x128xf32>
    %c0_6 = arith.constant 0 : index
    %c0_7 = arith.constant 0 : index
    %8 = vector.load %arg8[%c0_6, %c0_7] : memref<16x128xf32, #tpu.memory_space<vmem>>, vector<16x128xf32>
    tpu.vector_store %arg8[%c0_6, %c0_7], %7 {strides = array<i32>} : memref<16x128xf32, #tpu.memory_space<vmem>>, vector<16x128xf32>,
    %c0_i32_8 = arith.constant 0 : i32
    %9 = arith.cmpi eq, %arg2, %c0_i32_8 : i32
    %10 = arith.extui %9 : i1 to i32
    %c0_i32_9 = arith.constant 0 : i32
    %11 = arith.cmpi ne, %10, %c0_i32_9 : i32
    scf.if %11 {
      %c0_10 = arith.constant 0 : index
      %c0_11 = arith.constant 0 : index
      %12 = vector.load %arg8[%c0_10, %c0_11] : memref<16x128xf32, #tpu.memory_space<vmem>>, vector<16x128xf32>
      %c0_12 = arith.constant 0 : index
      %c0_13 = arith.constant 0 : index
      %13 = vector.load %arg5[%c0_12, %c0_13] : memref<16x1xf32, #tpu.memory_space<vmem>>, vector<16x1xf32>
      %14 = vector.broadcast %13 : vector<16x1xf32> to vector<16x128xf32>
      %15 = arith.mulf %12, %14 : vector<16x128xf32>
      %c0_14 = arith.constant 0 : index
      %c0_15 = arith.constant 0 : index
      %16 = vector.load %arg6[%c0_14, %c0_15] : memref<16x1xf32, #tpu.memory_space<vmem>>, vector<16x1xf32>
      %17 = vector.broadcast %16 : vector<16x1xf32> to vector<16x128xf32>
      %18 = arith.addf %15, %17 : vector<16x128xf32>
      %cst_16 = arith.constant 0.000000e+00 : f32
      %19 = vector.broadcast %cst_16 : f32 to vector<16x128xf32>
      %20 = arith.maximumf %18, %19 : vector<16x128xf32>
      %21 = arith.truncf %20 : vector<16x128xf32> to vector<16x128xbf16>
      %c0_17 = arith.constant 0 : index
      %c0_18 = arith.constant 0 : index
      %22 = vector.load %arg7[%c0_17, %c0_18] : memref<16x128xbf16, #tpu.memory_space<vmem>>, vector<16x128xbf16>
      tpu.vector_store %arg7[%c0_17, %c0_18], %21 {strides = array<i32>} : memref<16x128xbf16, #tpu.memory_space<vmem>>, vector<16x128xbf16>,
    } else {
    }
    return
  }
  func.func @transform_0(%arg0: i32, %arg1: i32, %arg2: i32) -> (i32, i32) {
    %c0_i32 = arith.constant 0 : i32
    return %arg0, %arg2 : i32, i32
  }
  func.func @transform_1(%arg0: i32, %arg1: i32, %arg2: i32) -> (i32, i32) {
    %c0_i32 = arith.constant 0 : i32
    return %arg2, %arg1 : i32, i32
  }
  func.func @transform_2(%arg0: i32, %arg1: i32, %arg2: i32) -> (i32, i32) {
    %c0_i32 = arith.constant 0 : i32
    %c0_i32_0 = arith.constant 0 : i32
    return %arg0, %c0_i32 : i32, i32
  }
  func.func @transform_3(%arg0: i32, %arg1: i32, %arg2: i32) -> (i32, i32) {
    %c0_i32 = arith.constant 0 : i32
    %c0_i32_0 = arith.constant 0 : i32
    return %arg0, %c0_i32 : i32, i32
  }
  func.func @transform_4(%arg0: i32, %arg1: i32, %arg2: i32) -> (i32, i32) {
    %c0_i32 = arith.constant 0 : i32
    return %arg0, %arg1 : i32, i32
  }
}

module attributes {stable_mosaic.version = 11 : i64} {
  func.func @_matmul_kernel(%arg0: i32, %arg1: i32, %arg2: i32, %arg3: memref<32x256xbf16, #tpu.memory_space<vmem>>, %arg4: memref<256x128xbf16, #tpu.memory_space<vmem>>, %arg5: memref<32x1xf32, #tpu.memory_space<vmem>>, %arg6: memref<32x1xf32, #tpu.memory_space<vmem>>, %arg7: memref<32x128xbf16, #tpu.memory_space<vmem>>, %arg8: memref<32x128xf32, #tpu.memory_space<vmem>>) attributes {dimension_semantics = [#tpu.dimension_semantics<parallel>, #tpu.dimension_semantics<parallel>, #tpu.dimension_semantics<arbitrary>], iteration_bounds = array<i64: 1, 1, 1>, scalar_prefetch = 0 : i64, scratch_operands = 1 : i64, tpu.core_type = #tpu.core_type<tc>, window_params = [{transform_indices = @transform_0, window_bounds = array<i64: 32, 256>}, {transform_indices = @transform_1, window_bounds = array<i64: 256, 128>}, {transform_indices = @transform_2, window_bounds = array<i64: 32, 1>}, {transform_indices = @transform_3, window_bounds = array<i64: 32, 1>}, {transform_indices = @transform_4, window_bounds = array<i64: 32, 128>}]} {
    %c0_i32 = arith.constant 0 : i32
    %0 = arith.cmpi eq, %arg2, %c0_i32 : i32
    %1 = arith.extui %0 : i1 to i32
    %c0_i32_0 = arith.constant 0 : i32
    %2 = arith.cmpi ne, %1, %c0_i32_0 : i32
    scf.if %2 {
      %cst_10 = arith.constant 0.000000e+00 : f32
      %12 = vector.broadcast %cst_10 : f32 to vector<32x128xf32>
      %c0_11 = arith.constant 0 : index
      %c0_12 = arith.constant 0 : index
      %13 = vector.load %arg8[%c0_11, %c0_12] : memref<32x128xf32, #tpu.memory_space<vmem>>, vector<32x128xf32>
      tpu.vector_store %arg8[%c0_11, %c0_12], %12 {strides = array<i32>} : memref<32x128xf32, #tpu.memory_space<vmem>>, vector<32x128xf32>,
    } else {
    }
    %c0 = arith.constant 0 : index
    %c0_1 = arith.constant 0 : index
    %3 = vector.load %arg8[%c0, %c0_1] : memref<32x128xf32, #tpu.memory_space<vmem>>, vector<32x128xf32>
    %c0_2 = arith.constant 0 : index
    %c0_3 = arith.constant 0 : index
    %4 = vector.load %arg3[%c0_2, %c0_3] : memref<32x256xbf16, #tpu.memory_space<vmem>>, vector<32x256xbf16>
    %c0_4 = arith.constant 0 : index
    %c0_5 = arith.constant 0 : index
    %5 = vector.load %arg4[%c0_4, %c0_5] : memref<256x128xbf16, #tpu.memory_space<vmem>>, vector<256x128xbf16>
    %cst = arith.constant dense<0.000000e+00> : vector<32x128xf32>
    %6 = tpu.matmul %4, %5, %cst {dimension_numbers = #tpu.dot_dimension_numbers<[1], [0], [0], [1], [0, 0, 1, 1], [], []>} : vector<32x256xbf16>, vector<256x128xbf16>, vector<32x128xf32> -> vector<32x128xf32>
    %7 = arith.addf %3, %6 : vector<32x128xf32>
    %c0_6 = arith.constant 0 : index
    %c0_7 = arith.constant 0 : index
    %8 = vector.load %arg8[%c0_6, %c0_7] : memref<32x128xf32, #tpu.memory_space<vmem>>, vector<32x128xf32>
    tpu.vector_store %arg8[%c0_6, %c0_7], %7 {strides = array<i32>} : memref<32x128xf32, #tpu.memory_space<vmem>>, vector<32x128xf32>,
    %c0_i32_8 = arith.constant 0 : i32
    %9 = arith.cmpi eq, %arg2, %c0_i32_8 : i32
    %10 = arith.extui %9 : i1 to i32
    %c0_i32_9 = arith.constant 0 : i32
    %11 = arith.cmpi ne, %10, %c0_i32_9 : i32
    scf.if %11 {
      %c0_10 = arith.constant 0 : index
      %c0_11 = arith.constant 0 : index
      %12 = vector.load %arg8[%c0_10, %c0_11] : memref<32x128xf32, #tpu.memory_space<vmem>>, vector<32x128xf32>
      %c0_12 = arith.constant 0 : index
      %c0_13 = arith.constant 0 : index
      %13 = vector.load %arg5[%c0_12, %c0_13] : memref<32x1xf32, #tpu.memory_space<vmem>>, vector<32x1xf32>
      %14 = vector.broadcast %13 : vector<32x1xf32> to vector<32x128xf32>
      %15 = arith.mulf %12, %14 : vector<32x128xf32>
      %c0_14 = arith.constant 0 : index
      %c0_15 = arith.constant 0 : index
      %16 = vector.load %arg6[%c0_14, %c0_15] : memref<32x1xf32, #tpu.memory_space<vmem>>, vector<32x1xf32>
      %17 = vector.broadcast %16 : vector<32x1xf32> to vector<32x128xf32>
      %18 = arith.addf %15, %17 : vector<32x128xf32>
      %cst_16 = arith.constant 0.000000e+00 : f32
      %19 = vector.broadcast %cst_16 : f32 to vector<32x128xf32>
      %20 = arith.maximumf %18, %19 : vector<32x128xf32>
      %21 = arith.truncf %20 : vector<32x128xf32> to vector<32x128xbf16>
      %c0_17 = arith.constant 0 : index
      %c0_18 = arith.constant 0 : index
      %22 = vector.load %arg7[%c0_17, %c0_18] : memref<32x128xbf16, #tpu.memory_space<vmem>>, vector<32x128xbf16>
      tpu.vector_store %arg7[%c0_17, %c0_18], %21 {strides = array<i32>} : memref<32x128xbf16, #tpu.memory_space<vmem>>, vector<32x128xbf16>,
    } else {
    }
    return
  }
  func.func @transform_0(%arg0: i32, %arg1: i32, %arg2: i32) -> (i32, i32) {
    %c0_i32 = arith.constant 0 : i32
    return %arg0, %arg2 : i32, i32
  }
  func.func @transform_1(%arg0: i32, %arg1: i32, %arg2: i32) -> (i32, i32) {
    %c0_i32 = arith.constant 0 : i32
    return %arg2, %arg1 : i32, i32
  }
  func.func @transform_2(%arg0: i32, %arg1: i32, %arg2: i32) -> (i32, i32) {
    %c0_i32 = arith.constant 0 : i32
    %c0_i32_0 = arith.constant 0 : i32
    return %arg0, %c0_i32 : i32, i32
  }
  func.func @transform_3(%arg0: i32, %arg1: i32, %arg2: i32) -> (i32, i32) {
    %c0_i32 = arith.constant 0 : i32
    %c0_i32_0 = arith.constant 0 : i32
    return %arg0, %c0_i32 : i32, i32
  }
  func.func @transform_4(%arg0: i32, %arg1: i32, %arg2: i32) -> (i32, i32) {
    %c0_i32 = arith.constant 0 : i32
    return %arg0, %arg1 : i32, i32
  }
}

module attributes {stable_mosaic.version = 11 : i64} {
  func.func @_matmul_kernel(%arg0: i32, %arg1: i32, %arg2: i32, %arg3: memref<64x256xbf16, #tpu.memory_space<vmem>>, %arg4: memref<256x128xbf16, #tpu.memory_space<vmem>>, %arg5: memref<64x1xf32, #tpu.memory_space<vmem>>, %arg6: memref<64x1xf32, #tpu.memory_space<vmem>>, %arg7: memref<64x128xf32, #tpu.memory_space<vmem>>, %arg8: memref<64x128xf32, #tpu.memory_space<vmem>>) attributes {dimension_semantics = [#tpu.dimension_semantics<parallel>, #tpu.dimension_semantics<parallel>, #tpu.dimension_semantics<arbitrary>], iteration_bounds = array<i64: 1, 1, 2>, scalar_prefetch = 0 : i64, scratch_operands = 1 : i64, tpu.core_type = #tpu.core_type<tc>, window_params = [{transform_indices = @transform_0, window_bounds = array<i64: 64, 256>}, {transform_indices = @transform_1, window_bounds = array<i64: 256, 128>}, {transform_indices = @transform_2, window_bounds = array<i64: 64, 1>}, {transform_indices = @transform_3, window_bounds = array<i64: 64, 1>}, {transform_indices = @transform_4, window_bounds = array<i64: 64, 128>}]} {
    %c0_i32 = arith.constant 0 : i32
    %0 = arith.cmpi eq, %arg2, %c0_i32 : i32
    %1 = arith.extui %0 : i1 to i32
    %c0_i32_0 = arith.constant 0 : i32
    %2 = arith.cmpi ne, %1, %c0_i32_0 : i32
    scf.if %2 {
      %cst_9 = arith.constant 0.000000e+00 : f32
      %12 = vector.broadcast %cst_9 : f32 to vector<64x128xf32>
      %c0_10 = arith.constant 0 : index
      %c0_11 = arith.constant 0 : index
      %13 = vector.load %arg8[%c0_10, %c0_11] : memref<64x128xf32, #tpu.memory_space<vmem>>, vector<64x128xf32>
      tpu.vector_store %arg8[%c0_10, %c0_11], %12 {strides = array<i32>} : memref<64x128xf32, #tpu.memory_space<vmem>>, vector<64x128xf32>,
    } else {
    }
    %c0 = arith.constant 0 : index
    %c0_1 = arith.constant 0 : index
    %3 = vector.load %arg8[%c0, %c0_1] : memref<64x128xf32, #tpu.memory_space<vmem>>, vector<64x128xf32>
    %c0_2 = arith.constant 0 : index
    %c0_3 = arith.constant 0 : index
    %4 = vector.load %arg3[%c0_2, %c0_3] : memref<64x256xbf16, #tpu.memory_space<vmem>>, vector<64x256xbf16>
    %c0_4 = arith.constant 0 : index
    %c0_5 = arith.constant 0 : index
    %5 = vector.load %arg4[%c0_4, %c0_5] : memref<256x128xbf16, #tpu.memory_space<vmem>>, vector<256x128xbf16>
    %cst = arith.constant dense<0.000000e+00> : vector<64x128xf32>
    %6 = tpu.matmul %4, %5, %cst {dimension_numbers = #tpu.dot_dimension_numbers<[1], [0], [0], [1], [0, 0, 1, 1], [], []>} : vector<64x256xbf16>, vector<256x128xbf16>, vector<64x128xf32> -> vector<64x128xf32>
    %7 = arith.addf %3, %6 : vector<64x128xf32>
    %c0_6 = arith.constant 0 : index
    %c0_7 = arith.constant 0 : index
    %8 = vector.load %arg8[%c0_6, %c0_7] : memref<64x128xf32, #tpu.memory_space<vmem>>, vector<64x128xf32>
    tpu.vector_store %arg8[%c0_6, %c0_7], %7 {strides = array<i32>} : memref<64x128xf32, #tpu.memory_space<vmem>>, vector<64x128xf32>,
    %c1_i32 = arith.constant 1 : i32
    %9 = arith.cmpi eq, %arg2, %c1_i32 : i32
    %10 = arith.extui %9 : i1 to i32
    %c0_i32_8 = arith.constant 0 : i32
    %11 = arith.cmpi ne, %10, %c0_i32_8 : i32
    scf.if %11 {
      %c0_9 = arith.constant 0 : index
      %c0_10 = arith.constant 0 : index
      %12 = vector.load %arg8[%c0_9, %c0_10] : memref<64x128xf32, #tpu.memory_space<vmem>>, vector<64x128xf32>
      %c0_11 = arith.constant 0 : index
      %c0_12 = arith.constant 0 : index
      %13 = vector.load %arg5[%c0_11, %c0_12] : memref<64x1xf32, #tpu.memory_space<vmem>>, vector<64x1xf32>
      %14 = vector.broadcast %13 : vector<64x1xf32> to vector<64x128xf32>
      %15 = arith.mulf %12, %14 : vector<64x128xf32>
      %c0_13 = arith.constant 0 : index
      %c0_14 = arith.constant 0 : index
      %16 = vector.load %arg6[%c0_13, %c0_14] : memref<64x1xf32, #tpu.memory_space<vmem>>, vector<64x1xf32>
      %17 = vector.broadcast %16 : vector<64x1xf32> to vector<64x128xf32>
      %18 = arith.addf %15, %17 : vector<64x128xf32>
      %c0_15 = arith.constant 0 : index
      %c0_16 = arith.constant 0 : index
      %19 = vector.load %arg7[%c0_15, %c0_16] : memref<64x128xf32, #tpu.memory_space<vmem>>, vector<64x128xf32>
      tpu.vector_store %arg7[%c0_15, %c0_16], %18 {strides = array<i32>} : memref<64x128xf32, #tpu.memory_space<vmem>>, vector<64x128xf32>,
    } else {
    }
    return
  }
  func.func @transform_0(%arg0: i32, %arg1: i32, %arg2: i32) -> (i32, i32) {
    %c0_i32 = arith.constant 0 : i32
    return %arg0, %arg2 : i32, i32
  }
  func.func @transform_1(%arg0: i32, %arg1: i32, %arg2: i32) -> (i32, i32) {
    %c0_i32 = arith.constant 0 : i32
    return %arg2, %arg1 : i32, i32
  }
  func.func @transform_2(%arg0: i32, %arg1: i32, %arg2: i32) -> (i32, i32) {
    %c0_i32 = arith.constant 0 : i32
    %c0_i32_0 = arith.constant 0 : i32
    return %arg0, %c0_i32 : i32, i32
  }
  func.func @transform_3(%arg0: i32, %arg1: i32, %arg2: i32) -> (i32, i32) {
    %c0_i32 = arith.constant 0 : i32
    %c0_i32_0 = arith.constant 0 : i32
    return %arg0, %c0_i32 : i32, i32
  }
  func.func @transform_4(%arg0: i32, %arg1: i32, %arg2: i32) -> (i32, i32) {
    %c0_i32 = arith.constant 0 : i32
    return %arg0, %arg1 : i32, i32
  }
}

module attributes {stable_mosaic.version = 11 : i64} {
  func.func @_layernorm_kernel(%arg0: i32, %arg1: memref<16x64xf32, #tpu.memory_space<vmem>>, %arg2: memref<1x64xf32, #tpu.memory_space<vmem>>, %arg3: memref<1x64xf32, #tpu.memory_space<vmem>>, %arg4: memref<16x64xbf16, #tpu.memory_space<vmem>>) attributes {dimension_semantics = [#tpu.dimension_semantics<parallel>], iteration_bounds = array<i64: 1>, scalar_prefetch = 0 : i64, scratch_operands = 0 : i64, tpu.core_type = #tpu.core_type<tc>, window_params = [{transform_indices = @transform_0, window_bounds = array<i64: 16, 64>}, {pipeline_mode = #tpu.pipeline_mode<synchronous>, transform_indices = @transform_1, window_bounds = array<i64: 1, 64>}, {pipeline_mode = #tpu.pipeline_mode<synchronous>, transform_indices = @transform_2, window_bounds = array<i64: 1, 64>}, {transform_indices = @transform_3, window_bounds = array<i64: 16, 64>}]} {
    %c0 = arith.constant 0 : index
    %c0_0 = arith.constant 0 : index
    %0 = vector.load %arg1[%c0, %c0_0] : memref<16x64xf32, #tpu.memory_space<vmem>>, vector<16x64xf32>
    %cst = arith.constant dense<0.000000e+00> : vector<16xf32>
    %1 = vector.multi_reduction <add>, %0, %cst [1] : vector<16x64xf32> to vector<16xf32>
    %2 = vector.shape_cast %1 : vector<16xf32> to vector<16x1xf32>
    %cst_1 = arith.constant 6.400000e+01 : f32
    %3 = vector.broadcast %cst_1 : f32 to vector<16x1xf32>
    %4 = arith.divf %2, %3 : vector<16x1xf32>
    %5 = vector.broadcast %4 : vector<16x1xf32> to vector<16x64xf32>
    %6 = arith.subf %0, %5 : vector<16x64xf32>
    %7 = arith.mulf %6, %6 : vector<16x64xf32>
    %cst_2 = arith.constant dense<0.000000e+00> : vector<16xf32>
    %8 = vector.multi_reduction <add>, %7, %cst_2 [1] : vector<16x64xf32> to vector<16xf32>
    %9 = vector.shape_cast %8 : vector<16xf32> to vector<16x1xf32>
    %cst_3 = arith.constant 6.400000e+01 : f32
    %10 = vector.broadcast %cst_3 : f32 to vector<16x1xf32>
    %11 = arith.divf %9, %10 : vector<16x1xf32>
    %cst_4 = arith.constant 9.99999997E-7 : f32
    %12 = vector.broadcast %cst_4 : f32 to vector<16x1xf32>
    %13 = arith.addf %11, %12 : vector<16x1xf32>
    %14 = math.rsqrt %13 : vector<16x1xf32>
    %15 = vector.broadcast %14 : vector<16x1xf32> to vector<16x64xf32>
    %16 = arith.mulf %6, %15 : vector<16x64xf32>
    %c0_5 = arith.constant 0 : index
    %c0_6 = arith.constant 0 : index
    %17 = vector.load %arg2[%c0_5, %c0_6] : memref<1x64xf32, #tpu.memory_space<vmem>>, vector<1x64xf32>
    %18 = vector.broadcast %17 : vector<1x64xf32> to vector<16x64xf32>
    %19 = arith.mulf %16, %18 : vector<16x64xf32>
    %c0_7 = arith.constant 0 : index
    %c0_8 = arith.constant 0 : index
    %20 = vector.load %arg3[%c0_7, %c0_8] : memref<1x64xf32, #tpu.memory_space<vmem>>, vector<1x64xf32>
    %21 = vector.broadcast %20 : vector<1x64xf32> to vector<16x64xf32>
    %22 = arith.addf %19, %21 : vector<16x64xf32>
    %23 = arith.truncf %22 : vector<16x64xf32> to vector<16x64xbf16>
    %c0_9 = arith.constant 0 : index
    %c0_10 = arith.constant 0 : index
    %24 = vector.load %arg4[%c0_9, %c0_10] : memref<16x64xbf16, #tpu.memory_space<vmem>>, vector<16x64xbf16>
    tpu.vector_store %arg4[%c0_9, %c0_10], %23 {strides = array<i32>} : memref<16x64xbf16, #tpu.memory_space<vmem>>, vector<16x64xbf16>,
    return
  }
  func.func @transform_0(%arg0: i32) -> (i32, i32) {
    %c0_i32 = arith.constant 0 : i32
    %c0_i32_0 = arith.constant 0 : i32
    return %arg0, %c0_i32 : i32, i32
  }
  func.func @transform_1(%arg0: i32) -> (i32, i32) {
    %c0_i32 = arith.constant 0 : i32
    %c0_i32_0 = arith.constant 0 : i32
    %c0_i32_1 = arith.constant 0 : i32
    return %c0_i32, %c0_i32_0 : i32, i32
  }
  func.func @transform_2(%arg0: i32) -> (i32, i32) {
    %c0_i32 = arith.constant 0 : i32
    %c0_i32_0 = arith.constant 0 : i32
    %c0_i32_1 = arith.constant 0 : i32
    return %c0_i32, %c0_i32_0 : i32, i32
  }
  func.func @transform_3(%arg0: i32) -> (i32, i32) {
    %c0_i32 = arith.constant 0 : i32
    %c0_i32_0 = arith.constant 0 : i32
    return %arg0, %c0_i32 : i32, i32
  }
}

module attributes {stable_mosaic.version = 11 : i64} {
  func.func @_matmul_kernel(%arg0: i32, %arg1: i32, %arg2: i32, %arg3: memref<16x128xbf16, #tpu.memory_space<vmem>>, %arg4: memref<128x256xbf16, #tpu.memory_space<vmem>>, %arg5: memref<1x256xf32, #tpu.memory_space<vmem>>, %arg6: memref<1x256xf32, #tpu.memory_space<vmem>>, %arg7: memref<16x256xbf16, #tpu.memory_space<vmem>>, %arg8: memref<16x256xf32, #tpu.memory_space<vmem>>) attributes {dimension_semantics = [#tpu.dimension_semantics<parallel>, #tpu.dimension_semantics<parallel>, #tpu.dimension_semantics<arbitrary>], iteration_bounds = array<i64: 1, 1, 1>, scalar_prefetch = 0 : i64, scratch_operands = 1 : i64, tpu.core_type = #tpu.core_type<tc>, window_params = [{transform_indices = @transform_0, window_bounds = array<i64: 16, 128>}, {transform_indices = @transform_1, window_bounds = array<i64: 128, 256>}, {transform_indices = @transform_2, window_bounds = array<i64: 1, 256>}, {transform_indices = @transform_3, window_bounds = array<i64: 1, 256>}, {transform_indices = @transform_4, window_bounds = array<i64: 16, 256>}]} {
    %c0_i32 = arith.constant 0 : i32
    %0 = arith.cmpi eq, %arg2, %c0_i32 : i32
    %1 = arith.extui %0 : i1 to i32
    %c0_i32_0 = arith.constant 0 : i32
    %2 = arith.cmpi ne, %1, %c0_i32_0 : i32
    scf.if %2 {
      %cst_10 = arith.constant 0.000000e+00 : f32
      %12 = vector.broadcast %cst_10 : f32 to vector<16x256xf32>
      %c0_11 = arith.constant 0 : index
      %c0_12 = arith.constant 0 : index
      %13 = vector.load %arg8[%c0_11, %c0_12] : memref<16x256xf32, #tpu.memory_space<vmem>>, vector<16x256xf32>
      tpu.vector_store %arg8[%c0_11, %c0_12], %12 {strides = array<i32>} : memref<16x256xf32, #tpu.memory_space<vmem>>, vector<16x256xf32>,
    } else {
    }
    %c0 = arith.constant 0 : index
    %c0_1 = arith.constant 0 : index
    %3 = vector.load %arg8[%c0, %c0_1] : memref<16x256xf32, #tpu.memory_space<vmem>>, vector<16x256xf32>
    %c0_2 = arith.constant 0 : index
    %c0_3 = arith.constant 0 : index
    %4 = vector.load %arg3[%c0_2, %c0_3] : memref<16x128xbf16, #tpu.memory_space<vmem>>, vector<16x128xbf16>
    %c0_4 = arith.constant 0 : index
    %c0_5 = arith.constant 0 : index
    %5 = vector.load %arg4[%c0_4, %c0_5] : memref<128x256xbf16, #tpu.memory_space<vmem>>, vector<128x256xbf16>
    %cst = arith.constant dense<0.000000e+00> : vector<16x256xf32>
    %6 = tpu.matmul %4, %5, %cst {dimension_numbers = #tpu.dot_dimension_numbers<[1], [0], [0], [1], [0, 0, 1, 1], [], []>} : vector<16x128xbf16>, vector<128x256xbf16>, vector<16x256xf32> -> vector<16x256xf32>
    %7 = arith.addf %3, %6 : vector<16x256xf32>
    %c0_6 = arith.constant 0 : index
    %c0_7 = arith.constant 0 : index
    %8 = vector.load %arg8[%c0_6, %c0_7] : memref<16x256xf32, #tpu.memory_space<vmem>>, vector<16x256xf32>
    tpu.vector_store %arg8[%c0_6, %c0_7], %7 {strides = array<i32>} : memref<16x256xf32, #tpu.memory_space<vmem>>, vector<16x256xf32>,
    %c0_i32_8 = arith.constant 0 : i32
    %9 = arith.cmpi eq, %arg2, %c0_i32_8 : i32
    %10 = arith.extui %9 : i1 to i32
    %c0_i32_9 = arith.constant 0 : i32
    %11 = arith.cmpi ne, %10, %c0_i32_9 : i32
    scf.if %11 {
      %c0_10 = arith.constant 0 : index
      %c0_11 = arith.constant 0 : index
      %12 = vector.load %arg8[%c0_10, %c0_11] : memref<16x256xf32, #tpu.memory_space<vmem>>, vector<16x256xf32>
      %c0_12 = arith.constant 0 : index
      %c0_13 = arith.constant 0 : index
      %13 = vector.load %arg5[%c0_12, %c0_13] : memref<1x256xf32, #tpu.memory_space<vmem>>, vector<1x256xf32>
      %14 = vector.broadcast %13 : vector<1x256xf32> to vector<16x256xf32>
      %15 = arith.mulf %12, %14 : vector<16x256xf32>
      %c0_14 = arith.constant 0 : index
      %c0_15 = arith.constant 0 : index
      %16 = vector.load %arg6[%c0_14, %c0_15] : memref<1x256xf32, #tpu.memory_space<vmem>>, vector<1x256xf32>
      %17 = vector.broadcast %16 : vector<1x256xf32> to vector<16x256xf32>
      %18 = arith.addf %15, %17 : vector<16x256xf32>
      %19 = arith.truncf %18 : vector<16x256xf32> to vector<16x256xbf16>
      %c0_16 = arith.constant 0 : index
      %c0_17 = arith.constant 0 : index
      %20 = vector.load %arg7[%c0_16, %c0_17] : memref<16x256xbf16, #tpu.memory_space<vmem>>, vector<16x256xbf16>
      tpu.vector_store %arg7[%c0_16, %c0_17], %19 {strides = array<i32>} : memref<16x256xbf16, #tpu.memory_space<vmem>>, vector<16x256xbf16>,
    } else {
    }
    return
  }
  func.func @transform_0(%arg0: i32, %arg1: i32, %arg2: i32) -> (i32, i32) {
    %c0_i32 = arith.constant 0 : i32
    return %arg0, %arg2 : i32, i32
  }
  func.func @transform_1(%arg0: i32, %arg1: i32, %arg2: i32) -> (i32, i32) {
    %c0_i32 = arith.constant 0 : i32
    return %arg2, %arg1 : i32, i32
  }
  func.func @transform_2(%arg0: i32, %arg1: i32, %arg2: i32) -> (i32, i32) {
    %c0_i32 = arith.constant 0 : i32
    %c0_i32_0 = arith.constant 0 : i32
    return %c0_i32, %arg1 : i32, i32
  }
  func.func @transform_3(%arg0: i32, %arg1: i32, %arg2: i32) -> (i32, i32) {
    %c0_i32 = arith.constant 0 : i32
    %c0_i32_0 = arith.constant 0 : i32
    return %c0_i32, %arg1 : i32, i32
  }
  func.func @transform_4(%arg0: i32, %arg1: i32, %arg2: i32) -> (i32, i32) {
    %c0_i32 = arith.constant 0 : i32
    return %arg0, %arg1 : i32, i32
  }
}

module attributes {stable_mosaic.version = 11 : i64} {
  func.func @_attn_kernel(%arg0: i32, %arg1: memref<4x5x16xbf16, #tpu.memory_space<vmem>>, %arg2: memref<4x5x16xbf16, #tpu.memory_space<vmem>>, %arg3: memref<4x5x16xbf16, #tpu.memory_space<vmem>>, %arg4: memref<4x5x16xbf16, #tpu.memory_space<vmem>>) attributes {dimension_semantics = [#tpu.dimension_semantics<parallel>], iteration_bounds = array<i64: 2>, scalar_prefetch = 0 : i64, scratch_operands = 0 : i64, tpu.core_type = #tpu.core_type<tc>, window_params = [{transform_indices = @transform_0, window_bounds = array<i64: 4, 5, 16>}, {transform_indices = @transform_1, window_bounds = array<i64: 4, 5, 16>}, {transform_indices = @transform_2, window_bounds = array<i64: 4, 5, 16>}, {transform_indices = @transform_3, window_bounds = array<i64: 4, 5, 16>}]} {
    %c0 = arith.constant 0 : index
    %c0_0 = arith.constant 0 : index
    %c0_1 = arith.constant 0 : index
    %0 = vector.load %arg1[%c0, %c0_0, %c0_1] : memref<4x5x16xbf16, #tpu.memory_space<vmem>>, vector<4x5x16xbf16>
    %c0_2 = arith.constant 0 : index
    %c0_3 = arith.constant 0 : index
    %c0_4 = arith.constant 0 : index
    %1 = vector.load %arg2[%c0_2, %c0_3, %c0_4] : memref<4x5x16xbf16, #tpu.memory_space<vmem>>, vector<4x5x16xbf16>
    %c0_5 = arith.constant 0 : index
    %c0_6 = arith.constant 0 : index
    %c0_7 = arith.constant 0 : index
    %2 = vector.load %arg3[%c0_5, %c0_6, %c0_7] : memref<4x5x16xbf16, #tpu.memory_space<vmem>>, vector<4x5x16xbf16>
    "tpu.trace_start"() <{level = 10 : i32, message = "gtd,gsd->gts"}> : () -> ()
    %cst = arith.constant dense<0.000000e+00> : vector<4x5x5xf32>
    %3 = tpu.matmul %0, %1, %cst {dimension_numbers = #tpu.dot_dimension_numbers<[2], [2], [1], [1], [0, 0, 0, 1, 1, 1], [0], [0]>} : vector<4x5x16xbf16>, vector<4x5x16xbf16>, vector<4x5x5xf32> -> vector<4x5x5xf32>
    "tpu.trace_stop"() : () -> ()
    %cst_8 = arith.constant 2.500000e-01 : f32
    %4 = vector.broadcast %cst_8 : f32 to vector<4x5x5xf32>
    %5 = arith.mulf %3, %4 : vector<4x5x5xf32>
    %cst_9 = arith.constant dense<0xFF800000> : vector<4x5xf32>
    %6 = vector.multi_reduction <maximumf>, %5, %cst_9 [2] : vector<4x5x5xf32> to vector<4x5xf32>
    %7 = vector.shape_cast %6 : vector<4x5xf32> to vector<4x5x1xf32>
    %8 = vector.broadcast %7 : vector<4x5x1xf32> to vector<4x5x5xf32>
    %9 = arith.subf %5, %8 : vector<4x5x5xf32>
    %10 = math.exp %9 : vector<4x5x5xf32>
    %cst_10 = arith.constant dense<0.000000e+00> : vector<4x5xf32>
    %11 = vector.multi_reduction <add>, %10, %cst_10 [2] : vector<4x5x5xf32> to vector<4x5xf32>
    %12 = vector.shape_cast %11 : vector<4x5xf32> to vector<4x5x1xf32>
    %13 = vector.broadcast %12 : vector<4x5x1xf32> to vector<4x5x5xf32>
    %14 = arith.divf %10, %13 : vector<4x5x5xf32>
    %15 = arith.truncf %14 : vector<4x5x5xf32> to vector<4x5x5xbf16>
    "tpu.trace_start"() <{level = 10 : i32, message = "gts,gsd->gtd"}> : () -> ()
    %cst_11 = arith.constant dense<0.000000e+00> : vector<4x5x16xf32>
    %16 = tpu.matmul %15, %2, %cst_11 {dimension_numbers = #tpu.dot_dimension_numbers<[2], [1], [1], [2], [0, 0, 0, 1, 1, 2], [0], [0]>} : vector<4x5x5xbf16>, vector<4x5x16xbf16>, vector<4x5x16xf32> -> vector<4x5x16xf32>
    "tpu.trace_stop"() : () -> ()
    %17 = arith.truncf %16 : vector<4x5x16xf32> to vector<4x5x16xbf16>
    %c0_12 = arith.constant 0 : index
    %c0_13 = arith.constant 0 : index
    %c0_14 = arith.constant 0 : index
    %18 = vector.load %arg4[%c0_12, %c0_13, %c0_14] : memref<4x5x16xbf16, #tpu.memory_space<vmem>>, vector<4x5x16xbf16>
    tpu.vector_store %arg4[%c0_12, %c0_13, %c0_14], %17 {strides = array<i32>} : memref<4x5x16xbf16, #tpu.memory_space<vmem>>, vector<4x5x16xbf16>,
    return
  }
  func.func @transform_0(%arg0: i32) -> (i32, i32, i32) {
    %c0_i32 = arith.constant 0 : i32
    %c0_i32_0 = arith.constant 0 : i32
    %c0_i32_1 = arith.constant 0 : i32
    return %arg0, %c0_i32, %c0_i32_0 : i32, i32, i32
  }
  func.func @transform_1(%arg0: i32) -> (i32, i32, i32) {
    %c0_i32 = arith.constant 0 : i32
    %c0_i32_0 = arith.constant 0 : i32
    %c0_i32_1 = arith.constant 0 : i32
    return %arg0, %c0_i32, %c0_i32_0 : i32, i32, i32
  }
  func.func @transform_2(%arg0: i32) -> (i32, i32, i32) {
    %c0_i32 = arith.constant 0 : i32
    %c0_i32_0 = arith.constant 0 : i32
    %c0_i32_1 = arith.constant 0 : i32
    return %arg0, %c0_i32, %c0_i32_0 : i32, i32, i32
  }
  func.func @transform_3(%arg0: i32) -> (i32, i32, i32) {
    %c0_i32 = arith.constant 0 : i32
    %c0_i32_0 = arith.constant 0 : i32
    %c0_i32_1 = arith.constant 0 : i32
    return %arg0, %c0_i32, %c0_i32_0 : i32, i32, i32
  }
}

module attributes {stable_mosaic.version = 11 : i64} {
  func.func @_matmul_kernel(%arg0: i32, %arg1: i32, %arg2: i32, %arg3: memref<16x128xbf16, #tpu.memory_space<vmem>>, %arg4: memref<128x256xbf16, #tpu.memory_space<vmem>>, %arg5: memref<1x256xf32, #tpu.memory_space<vmem>>, %arg6: memref<1x256xf32, #tpu.memory_space<vmem>>, %arg7: memref<16x256xbf16, #tpu.memory_space<vmem>>, %arg8: memref<16x256xf32, #tpu.memory_space<vmem>>) attributes {dimension_semantics = [#tpu.dimension_semantics<parallel>, #tpu.dimension_semantics<parallel>, #tpu.dimension_semantics<arbitrary>], iteration_bounds = array<i64: 1, 1, 1>, scalar_prefetch = 0 : i64, scratch_operands = 1 : i64, tpu.core_type = #tpu.core_type<tc>, window_params = [{transform_indices = @transform_0, window_bounds = array<i64: 16, 128>}, {transform_indices = @transform_1, window_bounds = array<i64: 128, 256>}, {transform_indices = @transform_2, window_bounds = array<i64: 1, 256>}, {transform_indices = @transform_3, window_bounds = array<i64: 1, 256>}, {transform_indices = @transform_4, window_bounds = array<i64: 16, 256>}]} {
    %c0_i32 = arith.constant 0 : i32
    %0 = arith.cmpi eq, %arg2, %c0_i32 : i32
    %1 = arith.extui %0 : i1 to i32
    %c0_i32_0 = arith.constant 0 : i32
    %2 = arith.cmpi ne, %1, %c0_i32_0 : i32
    scf.if %2 {
      %cst_10 = arith.constant 0.000000e+00 : f32
      %12 = vector.broadcast %cst_10 : f32 to vector<16x256xf32>
      %c0_11 = arith.constant 0 : index
      %c0_12 = arith.constant 0 : index
      %13 = vector.load %arg8[%c0_11, %c0_12] : memref<16x256xf32, #tpu.memory_space<vmem>>, vector<16x256xf32>
      tpu.vector_store %arg8[%c0_11, %c0_12], %12 {strides = array<i32>} : memref<16x256xf32, #tpu.memory_space<vmem>>, vector<16x256xf32>,
    } else {
    }
    %c0 = arith.constant 0 : index
    %c0_1 = arith.constant 0 : index
    %3 = vector.load %arg8[%c0, %c0_1] : memref<16x256xf32, #tpu.memory_space<vmem>>, vector<16x256xf32>
    %c0_2 = arith.constant 0 : index
    %c0_3 = arith.constant 0 : index
    %4 = vector.load %arg3[%c0_2, %c0_3] : memref<16x128xbf16, #tpu.memory_space<vmem>>, vector<16x128xbf16>
    %c0_4 = arith.constant 0 : index
    %c0_5 = arith.constant 0 : index
    %5 = vector.load %arg4[%c0_4, %c0_5] : memref<128x256xbf16, #tpu.memory_space<vmem>>, vector<128x256xbf16>
    %cst = arith.constant dense<0.000000e+00> : vector<16x256xf32>
    %6 = tpu.matmul %4, %5, %cst {dimension_numbers = #tpu.dot_dimension_numbers<[1], [0], [0], [1], [0, 0, 1, 1], [], []>} : vector<16x128xbf16>, vector<128x256xbf16>, vector<16x256xf32> -> vector<16x256xf32>
    %7 = arith.addf %3, %6 : vector<16x256xf32>
    %c0_6 = arith.constant 0 : index
    %c0_7 = arith.constant 0 : index
    %8 = vector.load %arg8[%c0_6, %c0_7] : memref<16x256xf32, #tpu.memory_space<vmem>>, vector<16x256xf32>
    tpu.vector_store %arg8[%c0_6, %c0_7], %7 {strides = array<i32>} : memref<16x256xf32, #tpu.memory_space<vmem>>, vector<16x256xf32>,
    %c0_i32_8 = arith.constant 0 : i32
    %9 = arith.cmpi eq, %arg2, %c0_i32_8 : i32
    %10 = arith.extui %9 : i1 to i32
    %c0_i32_9 = arith.constant 0 : i32
    %11 = arith.cmpi ne, %10, %c0_i32_9 : i32
    scf.if %11 {
      %c0_10 = arith.constant 0 : index
      %c0_11 = arith.constant 0 : index
      %12 = vector.load %arg8[%c0_10, %c0_11] : memref<16x256xf32, #tpu.memory_space<vmem>>, vector<16x256xf32>
      %c0_12 = arith.constant 0 : index
      %c0_13 = arith.constant 0 : index
      %13 = vector.load %arg5[%c0_12, %c0_13] : memref<1x256xf32, #tpu.memory_space<vmem>>, vector<1x256xf32>
      %14 = vector.broadcast %13 : vector<1x256xf32> to vector<16x256xf32>
      %15 = arith.mulf %12, %14 : vector<16x256xf32>
      %c0_14 = arith.constant 0 : index
      %c0_15 = arith.constant 0 : index
      %16 = vector.load %arg6[%c0_14, %c0_15] : memref<1x256xf32, #tpu.memory_space<vmem>>, vector<1x256xf32>
      %17 = vector.broadcast %16 : vector<1x256xf32> to vector<16x256xf32>
      %18 = arith.addf %15, %17 : vector<16x256xf32>
      %cst_16 = arith.constant 5.000000e-01 : f32
      %19 = vector.broadcast %cst_16 : f32 to vector<16x256xf32>
      %20 = arith.mulf %19, %18 : vector<16x256xf32>
      %cst_17 = arith.constant 0.707106769 : f32
      %21 = vector.broadcast %cst_17 : f32 to vector<16x256xf32>
      %22 = arith.mulf %18, %21 : vector<16x256xf32>
      %cst_18 = arith.constant 0.000000e+00 : f32
      %23 = vector.broadcast %cst_18 : f32 to vector<16x256xf32>
      %24 = arith.cmpf oge, %22, %23 : vector<16x256xf32>
      %cst_19 = arith.constant 1.000000e+00 : f32
      %cst_20 = arith.constant -1.000000e+00 : f32
      %25 = vector.broadcast %cst_19 : f32 to vector<16x256xf32>
      %26 = vector.broadcast %cst_20 : f32 to vector<16x256xf32>
      %27 = arith.select %24, %25, %26 : vector<16x256xi1>, vector<16x256xf32>
      %28 = math.absf %22 : vector<16x256xf32>
      %cst_21 = arith.constant 0.327591091 : f32
      %29 = vector.broadcast %cst_21 : f32 to vector<16x256xf32>
      %30 = arith.mulf %29, %28 : vector<16x256xf32>
      %cst_22 = arith.constant 1.000000e+00 : f32
      %31 = vector.broadcast %cst_22 : f32 to vector<16x256xf32>
      %32 = arith.addf %31, %30 : vector<16x256xf32>
      %cst_23 = arith.constant 1.000000e+00 : f32
      %33 = vector.broadcast %cst_23 : f32 to vector<16x256xf32>
      %34 = arith.divf %33, %32 : vector<16x256xf32>
      %cst_24 = arith.constant 1.06140542 : f32
      %35 = vector.broadcast %cst_24 : f32 to vector<16x256xf32>
      %36 = arith.mulf %35, %34 : vector<16x256xf32>
      %cst_25 = arith.constant -1.45315206 : f32
      %37 = vector.broadcast %cst_25 : f32 to vector<16x256xf32>
      %38 = arith.addf %36, %37 : vector<16x256xf32>
      %39 = arith.mulf %38, %34 : vector<16x256xf32>
      %cst_26 = arith.constant 1.42141378 : f32
      %40 = vector.broadcast %cst_26 : f32 to vector<16x256xf32>
      %41 = arith.addf %39, %40 : vector<16x256xf32>
      %42 = arith.mulf %41, %34 : vector<16x256xf32>
      %cst_27 = arith.constant -0.284496725 : f32
      %43 = vector.broadcast %cst_27 : f32 to vector<16x256xf32>
      %44 = arith.addf %42, %43 : vector<16x256xf32>
      %45 = arith.mulf %44, %34 : vector<16x256xf32>
      %cst_28 = arith.constant 0.254829586 : f32
      %46 = vector.broadcast %cst_28 : f32 to vector<16x256xf32>
      %47 = arith.addf %45, %46 : vector<16x256xf32>
      %48 = arith.mulf %47, %34 : vector<16x256xf32>
      %cst_29 = arith.constant 0.000000e+00 : f32
      %49 = vector.broadcast %cst_29 : f32 to vector<16x256xf32>
      %50 = arith.subf %49, %28 : vector<16x256xf32>
      %51 = arith.mulf %50, %28 : vector<16x256xf32>
      %52 = math.exp %51 : vector<16x256xf32>
      %53 = arith.mulf %48, %52 : vector<16x256xf32>
      %cst_30 = arith.constant 1.000000e+00 : f32
      %54 = vector.broadcast %cst_30 : f32 to vector<16x256xf32>
      %55 = arith.subf %54, %53 : vector<16x256xf32>
      %56 = arith.mulf %27, %55 : vector<16x256xf32>
      %cst_31 = arith.constant 1.000000e+00 : f32
      %57 = vector.broadcast %cst_31 : f32 to vector<16x256xf32>
      %58 = arith.addf %57, %56 : vector<16x256xf32>
      %59 = arith.mulf %20, %58 : vector<16x256xf32>
      %60 = arith.truncf %59 : vector<16x256xf32> to vector<16x256xbf16>
      %c0_32 = arith.constant 0 : index
      %c0_33 = arith.constant 0 : index
      %61 = vector.load %arg7[%c0_32, %c0_33] : memref<16x256xbf16, #tpu.memory_space<vmem>>, vector<16x256xbf16>
      tpu.vector_store %arg7[%c0_32, %c0_33], %60 {strides = array<i32>} : memref<16x256xbf16, #tpu.memory_space<vmem>>, vector<16x256xbf16>,
    } else {
    }
    return
  }
  func.func @transform_0(%arg0: i32, %arg1: i32, %arg2: i32) -> (i32, i32) {
    %c0_i32 = arith.constant 0 : i32
    return %arg0, %arg2 : i32, i32
  }
  func.func @transform_1(%arg0: i32, %arg1: i32, %arg2: i32) -> (i32, i32) {
    %c0_i32 = arith.constant 0 : i32
    return %arg2, %arg1 : i32, i32
  }
  func.func @transform_2(%arg0: i32, %arg1: i32, %arg2: i32) -> (i32, i32) {
    %c0_i32 = arith.constant 0 : i32
    %c0_i32_0 = arith.constant 0 : i32
    return %c0_i32, %arg1 : i32, i32
  }
  func.func @transform_3(%arg0: i32, %arg1: i32, %arg2: i32) -> (i32, i32) {
    %c0_i32 = arith.constant 0 : i32
    %c0_i32_0 = arith.constant 0 : i32
    return %c0_i32, %arg1 : i32, i32
  }
  func.func @transform_4(%arg0: i32, %arg1: i32, %arg2: i32) -> (i32, i32) {
    %c0_i32 = arith.constant 0 : i32
    return %arg0, %arg1 : i32, i32
  }
}

module attributes {stable_mosaic.version = 11 : i64} {
  func.func @_matmul_kernel(%arg0: i32, %arg1: i32, %arg2: i32, %arg3: memref<16x128xbf16, #tpu.memory_space<vmem>>, %arg4: memref<128x128xbf16, #tpu.memory_space<vmem>>, %arg5: memref<1x128xf32, #tpu.memory_space<vmem>>, %arg6: memref<1x128xf32, #tpu.memory_space<vmem>>, %arg7: memref<16x128xf32, #tpu.memory_space<vmem>>, %arg8: memref<16x128xf32, #tpu.memory_space<vmem>>, %arg9: memref<16x128xf32, #tpu.memory_space<vmem>>) attributes {dimension_semantics = [#tpu.dimension_semantics<parallel>, #tpu.dimension_semantics<parallel>, #tpu.dimension_semantics<arbitrary>], iteration_bounds = array<i64: 1, 1, 1>, scalar_prefetch = 0 : i64, scratch_operands = 1 : i64, tpu.core_type = #tpu.core_type<tc>, window_params = [{transform_indices = @transform_0, window_bounds = array<i64: 16, 128>}, {transform_indices = @transform_1, window_bounds = array<i64: 128, 128>}, {transform_indices = @transform_2, window_bounds = array<i64: 1, 128>}, {transform_indices = @transform_3, window_bounds = array<i64: 1, 128>}, {transform_indices = @transform_4, window_bounds = array<i64: 16, 128>}, {transform_indices = @transform_5, window_bounds = array<i64: 16, 128>}]} {
    %c0_i32 = arith.constant 0 : i32
    %0 = arith.cmpi eq, %arg2, %c0_i32 : i32
    %1 = arith.extui %0 : i1 to i32
    %c0_i32_0 = arith.constant 0 : i32
    %2 = arith.cmpi ne, %1, %c0_i32_0 : i32
    scf.if %2 {
      %cst_10 = arith.constant 0.000000e+00 : f32
      %12 = vector.broadcast %cst_10 : f32 to vector<16x128xf32>
      %c0_11 = arith.constant 0 : index
      %c0_12 = arith.constant 0 : index
      %13 = vector.load %arg9[%c0_11, %c0_12] : memref<16x128xf32, #tpu.memory_space<vmem>>, vector<16x128xf32>
      tpu.vector_store %arg9[%c0_11, %c0_12], %12 {strides = array<i32>} : memref<16x128xf32, #tpu.memory_space<vmem>>, vector<16x128xf32>,
    } else {
    }
    %c0 = arith.constant 0 : index
    %c0_1 = arith.constant 0 : index
    %3 = vector.load %arg9[%c0, %c0_1] : memref<16x128xf32, #tpu.memory_space<vmem>>, vector<16x128xf32>
    %c0_2 = arith.constant 0 : index
    %c0_3 = arith.constant 0 : index
    %4 = vector.load %arg3[%c0_2, %c0_3] : memref<16x128xbf16, #tpu.memory_space<vmem>>, vector<16x128xbf16>
    %c0_4 = arith.constant 0 : index
    %c0_5 = arith.constant 0 : index
    %5 = vector.load %arg4[%c0_4, %c0_5] : memref<128x128xbf16, #tpu.memory_space<vmem>>, vector<128x128xbf16>
    %cst = arith.constant dense<0.000000e+00> : vector<16x128xf32>
    %6 = tpu.matmul %4, %5, %cst {dimension_numbers = #tpu.dot_dimension_numbers<[1], [0], [0], [1], [0, 0, 1, 1], [], []>} : vector<16x128xbf16>, vector<128x128xbf16>, vector<16x128xf32> -> vector<16x128xf32>
    %7 = arith.addf %3, %6 : vector<16x128xf32>
    %c0_6 = arith.constant 0 : index
    %c0_7 = arith.constant 0 : index
    %8 = vector.load %arg9[%c0_6, %c0_7] : memref<16x128xf32, #tpu.memory_space<vmem>>, vector<16x128xf32>
    tpu.vector_store %arg9[%c0_6, %c0_7], %7 {strides = array<i32>} : memref<16x128xf32, #tpu.memory_space<vmem>>, vector<16x128xf32>,
    %c0_i32_8 = arith.constant 0 : i32
    %9 = arith.cmpi eq, %arg2, %c0_i32_8 : i32
    %10 = arith.extui %9 : i1 to i32
    %c0_i32_9 = arith.constant 0 : i32
    %11 = arith.cmpi ne, %10, %c0_i32_9 : i32
    scf.if %11 {
      %c0_10 = arith.constant 0 : index
      %c0_11 = arith.constant 0 : index
      %12 = vector.load %arg9[%c0_10, %c0_11] : memref<16x128xf32, #tpu.memory_space<vmem>>, vector<16x128xf32>
      %c0_12 = arith.constant 0 : index
      %c0_13 = arith.constant 0 : index
      %13 = vector.load %arg5[%c0_12, %c0_13] : memref<1x128xf32, #tpu.memory_space<vmem>>, vector<1x128xf32>
      %14 = vector.broadcast %13 : vector<1x128xf32> to vector<16x128xf32>
      %15 = arith.mulf %12, %14 : vector<16x128xf32>
      %c0_14 = arith.constant 0 : index
      %c0_15 = arith.constant 0 : index
      %16 = vector.load %arg6[%c0_14, %c0_15] : memref<1x128xf32, #tpu.memory_space<vmem>>, vector<1x128xf32>
      %17 = vector.broadcast %16 : vector<1x128xf32> to vector<16x128xf32>
      %18 = arith.addf %15, %17 : vector<16x128xf32>
      %c0_16 = arith.constant 0 : index
      %c0_17 = arith.constant 0 : index
      %19 = vector.load %arg7[%c0_16, %c0_17] : memref<16x128xf32, #tpu.memory_space<vmem>>, vector<16x128xf32>
      %20 = arith.addf %18, %19 : vector<16x128xf32>
      %c0_18 = arith.constant 0 : index
      %c0_19 = arith.constant 0 : index
      %21 = vector.load %arg8[%c0_18, %c0_19] : memref<16x128xf32, #tpu.memory_space<vmem>>, vector<16x128xf32>
      tpu.vector_store %arg8[%c0_18, %c0_19], %20 {strides = array<i32>} : memref<16x128xf32, #tpu.memory_space<vmem>>, vector<16x128xf32>,
    } else {
    }
    return
  }
  func.func @transform_0(%arg0: i32, %arg1: i32, %arg2: i32) -> (i32, i32) {
    %c0_i32 = arith.constant 0 : i32
    return %arg0, %arg2 : i32, i32
  }
  func.func @transform_1(%arg0: i32, %arg1: i32, %arg2: i32) -> (i32, i32) {
    %c0_i32 = arith.constant 0 : i32
    return %arg2, %arg1 : i32, i32
  }
  func.func @transform_2(%arg0: i32, %arg1: i32, %arg2: i32) -> (i32, i32) {
    %c0_i32 = arith.constant 0 : i32
    %c0_i32_0 = arith.constant 0 : i32
    return %c0_i32, %arg1 : i32, i32
  }
  func.func @transform_3(%arg0: i32, %arg1: i32, %arg2: i32) -> (i32, i32) {
    %c0_i32 = arith.constant 0 : i32
    %c0_i32_0 = arith.constant 0 : i32
    return %c0_i32, %arg1 : i32, i32
  }
  func.func @transform_4(%arg0: i32, %arg1: i32, %arg2: i32) -> (i32, i32) {
    %c0_i32 = arith.constant 0 : i32
    return %arg0, %arg1 : i32, i32
  }
  func.func @transform_5(%arg0: i32, %arg1: i32, %arg2: i32) -> (i32, i32) {
    %c0_i32 = arith.constant 0 : i32
    return %arg0, %arg1 : i32, i32
  }
}

module attributes {stable_mosaic.version = 11 : i64} {
  func.func @_matmul_kernel(%arg0: i32, %arg1: i32, %arg2: i32, %arg3: memref<16x256xbf16, #tpu.memory_space<vmem>>, %arg4: memref<256x128xbf16, #tpu.memory_space<vmem>>, %arg5: memref<1x128xf32, #tpu.memory_space<vmem>>, %arg6: memref<1x128xf32, #tpu.memory_space<vmem>>, %arg7: memref<16x128xf32, #tpu.memory_space<vmem>>, %arg8: memref<16x128xf32, #tpu.memory_space<vmem>>, %arg9: memref<16x128xf32, #tpu.memory_space<vmem>>) attributes {dimension_semantics = [#tpu.dimension_semantics<parallel>, #tpu.dimension_semantics<parallel>, #tpu.dimension_semantics<arbitrary>], iteration_bounds = array<i64: 1, 1, 1>, scalar_prefetch = 0 : i64, scratch_operands = 1 : i64, tpu.core_type = #tpu.core_type<tc>, window_params = [{transform_indices = @transform_0, window_bounds = array<i64: 16, 256>}, {transform_indices = @transform_1, window_bounds = array<i64: 256, 128>}, {transform_indices = @transform_2, window_bounds = array<i64: 1, 128>}, {transform_indices = @transform_3, window_bounds = array<i64: 1, 128>}, {transform_indices = @transform_4, window_bounds = array<i64: 16, 128>}, {transform_indices = @transform_5, window_bounds = array<i64: 16, 128>}]} {
    %c0_i32 = arith.constant 0 : i32
    %0 = arith.cmpi eq, %arg2, %c0_i32 : i32
    %1 = arith.extui %0 : i1 to i32
    %c0_i32_0 = arith.constant 0 : i32
    %2 = arith.cmpi ne, %1, %c0_i32_0 : i32
    scf.if %2 {
      %cst_10 = arith.constant 0.000000e+00 : f32
      %12 = vector.broadcast %cst_10 : f32 to vector<16x128xf32>
      %c0_11 = arith.constant 0 : index
      %c0_12 = arith.constant 0 : index
      %13 = vector.load %arg9[%c0_11, %c0_12] : memref<16x128xf32, #tpu.memory_space<vmem>>, vector<16x128xf32>
      tpu.vector_store %arg9[%c0_11, %c0_12], %12 {strides = array<i32>} : memref<16x128xf32, #tpu.memory_space<vmem>>, vector<16x128xf32>,
    } else {
    }
    %c0 = arith.constant 0 : index
    %c0_1 = arith.constant 0 : index
    %3 = vector.load %arg9[%c0, %c0_1] : memref<16x128xf32, #tpu.memory_space<vmem>>, vector<16x128xf32>
    %c0_2 = arith.constant 0 : index
    %c0_3 = arith.constant 0 : index
    %4 = vector.load %arg3[%c0_2, %c0_3] : memref<16x256xbf16, #tpu.memory_space<vmem>>, vector<16x256xbf16>
    %c0_4 = arith.constant 0 : index
    %c0_5 = arith.constant 0 : index
    %5 = vector.load %arg4[%c0_4, %c0_5] : memref<256x128xbf16, #tpu.memory_space<vmem>>, vector<256x128xbf16>
    %cst = arith.constant dense<0.000000e+00> : vector<16x128xf32>
    %6 = tpu.matmul %4, %5, %cst {dimension_numbers = #tpu.dot_dimension_numbers<[1], [0], [0], [1], [0, 0, 1, 1], [], []>} : vector<16x256xbf16>, vector<256x128xbf16>, vector<16x128xf32> -> vector<16x128xf32>
    %7 = arith.addf %3, %6 : vector<16x128xf32>
    %c0_6 = arith.constant 0 : index
    %c0_7 = arith.constant 0 : index
    %8 = vector.load %arg9[%c0_6, %c0_7] : memref<16x128xf32, #tpu.memory_space<vmem>>, vector<16x128xf32>
    tpu.vector_store %arg9[%c0_6, %c0_7], %7 {strides = array<i32>} : memref<16x128xf32, #tpu.memory_space<vmem>>, vector<16x128xf32>,
    %c0_i32_8 = arith.constant 0 : i32
    %9 = arith.cmpi eq, %arg2, %c0_i32_8 : i32
    %10 = arith.extui %9 : i1 to i32
    %c0_i32_9 = arith.constant 0 : i32
    %11 = arith.cmpi ne, %10, %c0_i32_9 : i32
    scf.if %11 {
      %c0_10 = arith.constant 0 : index
      %c0_11 = arith.constant 0 : index
      %12 = vector.load %arg9[%c0_10, %c0_11] : memref<16x128xf32, #tpu.memory_space<vmem>>, vector<16x128xf32>
      %c0_12 = arith.constant 0 : index
      %c0_13 = arith.constant 0 : index
      %13 = vector.load %arg5[%c0_12, %c0_13] : memref<1x128xf32, #tpu.memory_space<vmem>>, vector<1x128xf32>
      %14 = vector.broadcast %13 : vector<1x128xf32> to vector<16x128xf32>
      %15 = arith.mulf %12, %14 : vector<16x128xf32>
      %c0_14 = arith.constant 0 : index
      %c0_15 = arith.constant 0 : index
      %16 = vector.load %arg6[%c0_14, %c0_15] : memref<1x128xf32, #tpu.memory_space<vmem>>, vector<1x128xf32>
      %17 = vector.broadcast %16 : vector<1x128xf32> to vector<16x128xf32>
      %18 = arith.addf %15, %17 : vector<16x128xf32>
      %c0_16 = arith.constant 0 : index
      %c0_17 = arith.constant 0 : index
      %19 = vector.load %arg7[%c0_16, %c0_17] : memref<16x128xf32, #tpu.memory_space<vmem>>, vector<16x128xf32>
      %20 = arith.addf %18, %19 : vector<16x128xf32>
      %c0_18 = arith.constant 0 : index
      %c0_19 = arith.constant 0 : index
      %21 = vector.load %arg8[%c0_18, %c0_19] : memref<16x128xf32, #tpu.memory_space<vmem>>, vector<16x128xf32>
      tpu.vector_store %arg8[%c0_18, %c0_19], %20 {strides = array<i32>} : memref<16x128xf32, #tpu.memory_space<vmem>>, vector<16x128xf32>,
    } else {
    }
    return
  }
  func.func @transform_0(%arg0: i32, %arg1: i32, %arg2: i32) -> (i32, i32) {
    %c0_i32 = arith.constant 0 : i32
    return %arg0, %arg2 : i32, i32
  }
  func.func @transform_1(%arg0: i32, %arg1: i32, %arg2: i32) -> (i32, i32) {
    %c0_i32 = arith.constant 0 : i32
    return %arg2, %arg1 : i32, i32
  }
  func.func @transform_2(%arg0: i32, %arg1: i32, %arg2: i32) -> (i32, i32) {
    %c0_i32 = arith.constant 0 : i32
    %c0_i32_0 = arith.constant 0 : i32
    return %c0_i32, %arg1 : i32, i32
  }
  func.func @transform_3(%arg0: i32, %arg1: i32, %arg2: i32) -> (i32, i32) {
    %c0_i32 = arith.constant 0 : i32
    %c0_i32_0 = arith.constant 0 : i32
    return %c0_i32, %arg1 : i32, i32
  }
  func.func @transform_4(%arg0: i32, %arg1: i32, %arg2: i32) -> (i32, i32) {
    %c0_i32 = arith.constant 0 : i32
    return %arg0, %arg1 : i32, i32
  }
  func.func @transform_5(%arg0: i32, %arg1: i32, %arg2: i32) -> (i32, i32) {
    %c0_i32 = arith.constant 0 : i32
    return %arg0, %arg1 : i32, i32
  }
}

module attributes {stable_mosaic.version = 11 : i64} {
  func.func @_layernorm_kernel(%arg0: i32, %arg1: memref<16x64xf32, #tpu.memory_space<vmem>>, %arg2: memref<1x64xf32, #tpu.memory_space<vmem>>, %arg3: memref<1x64xf32, #tpu.memory_space<vmem>>, %arg4: memref<16x64xbf16, #tpu.memory_space<vmem>>) attributes {dimension_semantics = [#tpu.dimension_semantics<parallel>], iteration_bounds = array<i64: 1>, scalar_prefetch = 0 : i64, scratch_operands = 0 : i64, tpu.core_type = #tpu.core_type<tc>, window_params = [{transform_indices = @transform_0, window_bounds = array<i64: 16, 64>}, {pipeline_mode = #tpu.pipeline_mode<synchronous>, transform_indices = @transform_1, window_bounds = array<i64: 1, 64>}, {pipeline_mode = #tpu.pipeline_mode<synchronous>, transform_indices = @transform_2, window_bounds = array<i64: 1, 64>}, {transform_indices = @transform_3, window_bounds = array<i64: 16, 64>}]} {
    %c0 = arith.constant 0 : index
    %c0_0 = arith.constant 0 : index
    %0 = vector.load %arg1[%c0, %c0_0] : memref<16x64xf32, #tpu.memory_space<vmem>>, vector<16x64xf32>
    %cst = arith.constant dense<0.000000e+00> : vector<16xf32>
    %1 = vector.multi_reduction <add>, %0, %cst [1] : vector<16x64xf32> to vector<16xf32>
    %2 = vector.shape_cast %1 : vector<16xf32> to vector<16x1xf32>
    %cst_1 = arith.constant 6.400000e+01 : f32
    %3 = vector.broadcast %cst_1 : f32 to vector<16x1xf32>
    %4 = arith.divf %2, %3 : vector<16x1xf32>
    %5 = vector.broadcast %4 : vector<16x1xf32> to vector<16x64xf32>
    %6 = arith.subf %0, %5 : vector<16x64xf32>
    %7 = arith.mulf %6, %6 : vector<16x64xf32>
    %cst_2 = arith.constant dense<0.000000e+00> : vector<16xf32>
    %8 = vector.multi_reduction <add>, %7, %cst_2 [1] : vector<16x64xf32> to vector<16xf32>
    %9 = vector.shape_cast %8 : vector<16xf32> to vector<16x1xf32>
    %cst_3 = arith.constant 6.400000e+01 : f32
    %10 = vector.broadcast %cst_3 : f32 to vector<16x1xf32>
    %11 = arith.divf %9, %10 : vector<16x1xf32>
    %cst_4 = arith.constant 9.99999997E-7 : f32
    %12 = vector.broadcast %cst_4 : f32 to vector<16x1xf32>
    %13 = arith.addf %11, %12 : vector<16x1xf32>
    %14 = math.rsqrt %13 : vector<16x1xf32>
    %15 = vector.broadcast %14 : vector<16x1xf32> to vector<16x64xf32>
    %16 = arith.mulf %6, %15 : vector<16x64xf32>
    %c0_5 = arith.constant 0 : index
    %c0_6 = arith.constant 0 : index
    %17 = vector.load %arg2[%c0_5, %c0_6] : memref<1x64xf32, #tpu.memory_space<vmem>>, vector<1x64xf32>
    %18 = vector.broadcast %17 : vector<1x64xf32> to vector<16x64xf32>
    %19 = arith.mulf %16, %18 : vector<16x64xf32>
    %c0_7 = arith.constant 0 : index
    %c0_8 = arith.constant 0 : index
    %20 = vector.load %arg3[%c0_7, %c0_8] : memref<1x64xf32, #tpu.memory_space<vmem>>, vector<1x64xf32>
    %21 = vector.broadcast %20 : vector<1x64xf32> to vector<16x64xf32>
    %22 = arith.addf %19, %21 : vector<16x64xf32>
    %23 = arith.truncf %22 : vector<16x64xf32> to vector<16x64xbf16>
    %c0_9 = arith.constant 0 : index
    %c0_10 = arith.constant 0 : index
    %24 = vector.load %arg4[%c0_9, %c0_10] : memref<16x64xbf16, #tpu.memory_space<vmem>>, vector<16x64xbf16>
    tpu.vector_store %arg4[%c0_9, %c0_10], %23 {strides = array<i32>} : memref<16x64xbf16, #tpu.memory_space<vmem>>, vector<16x64xbf16>,
    return
  }
  func.func @transform_0(%arg0: i32) -> (i32, i32) {
    %c0_i32 = arith.constant 0 : i32
    %c0_i32_0 = arith.constant 0 : i32
    return %arg0, %c0_i32 : i32, i32
  }
  func.func @transform_1(%arg0: i32) -> (i32, i32) {
    %c0_i32 = arith.constant 0 : i32
    %c0_i32_0 = arith.constant 0 : i32
    %c0_i32_1 = arith.constant 0 : i32
    return %c0_i32, %c0_i32_0 : i32, i32
  }
  func.func @transform_2(%arg0: i32) -> (i32, i32) {
    %c0_i32 = arith.constant 0 : i32
    %c0_i32_0 = arith.constant 0 : i32
    %c0_i32_1 = arith.constant 0 : i32
    return %c0_i32, %c0_i32_0 : i32, i32
  }
  func.func @transform_3(%arg0: i32) -> (i32, i32) {
    %c0_i32 = arith.constant 0 : i32
    %c0_i32_0 = arith.constant 0 : i32
    return %arg0, %c0_i32 : i32, i32
  }
}

module attributes {stable_mosaic.version = 11 : i64} {
  func.func @_layernorm_kernel(%arg0: i32, %arg1: memref<16x64xf32, #tpu.memory_space<vmem>>, %arg2: memref<1x64xf32, #tpu.memory_space<vmem>>, %arg3: memref<1x64xf32, #tpu.memory_space<vmem>>, %arg4: memref<16x64xbf16, #tpu.memory_space<vmem>>) attributes {dimension_semantics = [#tpu.dimension_semantics<parallel>], iteration_bounds = array<i64: 1>, scalar_prefetch = 0 : i64, scratch_operands = 0 : i64, tpu.core_type = #tpu.core_type<tc>, window_params = [{transform_indices = @transform_0, window_bounds = array<i64: 16, 64>}, {pipeline_mode = #tpu.pipeline_mode<synchronous>, transform_indices = @transform_1, window_bounds = array<i64: 1, 64>}, {pipeline_mode = #tpu.pipeline_mode<synchronous>, transform_indices = @transform_2, window_bounds = array<i64: 1, 64>}, {transform_indices = @transform_3, window_bounds = array<i64: 16, 64>}]} {
    %c0 = arith.constant 0 : index
    %c0_0 = arith.constant 0 : index
    %0 = vector.load %arg1[%c0, %c0_0] : memref<16x64xf32, #tpu.memory_space<vmem>>, vector<16x64xf32>
    %cst = arith.constant dense<0.000000e+00> : vector<16xf32>
    %1 = vector.multi_reduction <add>, %0, %cst [1] : vector<16x64xf32> to vector<16xf32>
    %2 = vector.shape_cast %1 : vector<16xf32> to vector<16x1xf32>
    %cst_1 = arith.constant 6.400000e+01 : f32
    %3 = vector.broadcast %cst_1 : f32 to vector<16x1xf32>
    %4 = arith.divf %2, %3 : vector<16x1xf32>
    %5 = vector.broadcast %4 : vector<16x1xf32> to vector<16x64xf32>
    %6 = arith.subf %0, %5 : vector<16x64xf32>
    %7 = arith.mulf %6, %6 : vector<16x64xf32>
    %cst_2 = arith.constant dense<0.000000e+00> : vector<16xf32>
    %8 = vector.multi_reduction <add>, %7, %cst_2 [1] : vector<16x64xf32> to vector<16xf32>
    %9 = vector.shape_cast %8 : vector<16xf32> to vector<16x1xf32>
    %cst_3 = arith.constant 6.400000e+01 : f32
    %10 = vector.broadcast %cst_3 : f32 to vector<16x1xf32>
    %11 = arith.divf %9, %10 : vector<16x1xf32>
    %cst_4 = arith.constant 9.99999997E-7 : f32
    %12 = vector.broadcast %cst_4 : f32 to vector<16x1xf32>
    %13 = arith.addf %11, %12 : vector<16x1xf32>
    %14 = math.rsqrt %13 : vector<16x1xf32>
    %15 = vector.broadcast %14 : vector<16x1xf32> to vector<16x64xf32>
    %16 = arith.mulf %6, %15 : vector<16x64xf32>
    %c0_5 = arith.constant 0 : index
    %c0_6 = arith.constant 0 : index
    %17 = vector.load %arg2[%c0_5, %c0_6] : memref<1x64xf32, #tpu.memory_space<vmem>>, vector<1x64xf32>
    %18 = vector.broadcast %17 : vector<1x64xf32> to vector<16x64xf32>
    %19 = arith.mulf %16, %18 : vector<16x64xf32>
    %c0_7 = arith.constant 0 : index
    %c0_8 = arith.constant 0 : index
    %20 = vector.load %arg3[%c0_7, %c0_8] : memref<1x64xf32, #tpu.memory_space<vmem>>, vector<1x64xf32>
    %21 = vector.broadcast %20 : vector<1x64xf32> to vector<16x64xf32>
    %22 = arith.addf %19, %21 : vector<16x64xf32>
    %23 = arith.truncf %22 : vector<16x64xf32> to vector<16x64xbf16>
    %c0_9 = arith.constant 0 : index
    %c0_10 = arith.constant 0 : index
    %24 = vector.load %arg4[%c0_9, %c0_10] : memref<16x64xbf16, #tpu.memory_space<vmem>>, vector<16x64xbf16>
    tpu.vector_store %arg4[%c0_9, %c0_10], %23 {strides = array<i32>} : memref<16x64xbf16, #tpu.memory_space<vmem>>, vector<16x64xbf16>,
    return
  }
  func.func @transform_0(%arg0: i32) -> (i32, i32) {
    %c0_i32 = arith.constant 0 : i32
    %c0_i32_0 = arith.constant 0 : i32
    return %arg0, %c0_i32 : i32, i32
  }
  func.func @transform_1(%arg0: i32) -> (i32, i32) {
    %c0_i32 = arith.constant 0 : i32
    %c0_i32_0 = arith.constant 0 : i32
    %c0_i32_1 = arith.constant 0 : i32
    return %c0_i32, %c0_i32_0 : i32, i32
  }
  func.func @transform_2(%arg0: i32) -> (i32, i32) {
    %c0_i32 = arith.constant 0 : i32
    %c0_i32_0 = arith.constant 0 : i32
    %c0_i32_1 = arith.constant 0 : i32
    return %c0_i32, %c0_i32_0 : i32, i32
  }
  func.func @transform_3(%arg0: i32) -> (i32, i32) {
    %c0_i32 = arith.constant 0 : i32
    %c0_i32_0 = arith.constant 0 : i32
    return %arg0, %c0_i32 : i32, i32
  }
}

module attributes {stable_mosaic.version = 11 : i64} {
  func.func @_layernorm_kernel(%arg0: i32, %arg1: memref<16x64xf32, #tpu.memory_space<vmem>>, %arg2: memref<1x64xf32, #tpu.memory_space<vmem>>, %arg3: memref<1x64xf32, #tpu.memory_space<vmem>>, %arg4: memref<16x64xf32, #tpu.memory_space<vmem>>) attributes {dimension_semantics = [#tpu.dimension_semantics<parallel>], iteration_bounds = array<i64: 1>, scalar_prefetch = 0 : i64, scratch_operands = 0 : i64, tpu.core_type = #tpu.core_type<tc>, window_params = [{transform_indices = @transform_0, window_bounds = array<i64: 16, 64>}, {pipeline_mode = #tpu.pipeline_mode<synchronous>, transform_indices = @transform_1, window_bounds = array<i64: 1, 64>}, {pipeline_mode = #tpu.pipeline_mode<synchronous>, transform_indices = @transform_2, window_bounds = array<i64: 1, 64>}, {transform_indices = @transform_3, window_bounds = array<i64: 16, 64>}]} {
    %c0 = arith.constant 0 : index
    %c0_0 = arith.constant 0 : index
    %0 = vector.load %arg1[%c0, %c0_0] : memref<16x64xf32, #tpu.memory_space<vmem>>, vector<16x64xf32>
    %cst = arith.constant dense<0.000000e+00> : vector<16xf32>
    %1 = vector.multi_reduction <add>, %0, %cst [1] : vector<16x64xf32> to vector<16xf32>
    %2 = vector.shape_cast %1 : vector<16xf32> to vector<16x1xf32>
    %cst_1 = arith.constant 6.400000e+01 : f32
    %3 = vector.broadcast %cst_1 : f32 to vector<16x1xf32>
    %4 = arith.divf %2, %3 : vector<16x1xf32>
    %5 = vector.broadcast %4 : vector<16x1xf32> to vector<16x64xf32>
    %6 = arith.subf %0, %5 : vector<16x64xf32>
    %7 = arith.mulf %6, %6 : vector<16x64xf32>
    %cst_2 = arith.constant dense<0.000000e+00> : vector<16xf32>
    %8 = vector.multi_reduction <add>, %7, %cst_2 [1] : vector<16x64xf32> to vector<16xf32>
    %9 = vector.shape_cast %8 : vector<16xf32> to vector<16x1xf32>
    %cst_3 = arith.constant 6.400000e+01 : f32
    %10 = vector.broadcast %cst_3 : f32 to vector<16x1xf32>
    %11 = arith.divf %9, %10 : vector<16x1xf32>
    %cst_4 = arith.constant 9.99999997E-7 : f32
    %12 = vector.broadcast %cst_4 : f32 to vector<16x1xf32>
    %13 = arith.addf %11, %12 : vector<16x1xf32>
    %14 = math.rsqrt %13 : vector<16x1xf32>
    %15 = vector.broadcast %14 : vector<16x1xf32> to vector<16x64xf32>
    %16 = arith.mulf %6, %15 : vector<16x64xf32>
    %c0_5 = arith.constant 0 : index
    %c0_6 = arith.constant 0 : index
    %17 = vector.load %arg2[%c0_5, %c0_6] : memref<1x64xf32, #tpu.memory_space<vmem>>, vector<1x64xf32>
    %18 = vector.broadcast %17 : vector<1x64xf32> to vector<16x64xf32>
    %19 = arith.mulf %16, %18 : vector<16x64xf32>
    %c0_7 = arith.constant 0 : index
    %c0_8 = arith.constant 0 : index
    %20 = vector.load %arg3[%c0_7, %c0_8] : memref<1x64xf32, #tpu.memory_space<vmem>>, vector<1x64xf32>
    %21 = vector.broadcast %20 : vector<1x64xf32> to vector<16x64xf32>
    %22 = arith.addf %19, %21 : vector<16x64xf32>
    %c0_9 = arith.constant 0 : index
    %c0_10 = arith.constant 0 : index
    %23 = vector.load %arg4[%c0_9, %c0_10] : memref<16x64xf32, #tpu.memory_space<vmem>>, vector<16x64xf32>
    tpu.vector_store %arg4[%c0_9, %c0_10], %22 {strides = array<i32>} : memref<16x64xf32, #tpu.memory_space<vmem>>, vector<16x64xf32>,
    return
  }
  func.func @transform_0(%arg0: i32) -> (i32, i32) {
    %c0_i32 = arith.constant 0 : i32
    %c0_i32_0 = arith.constant 0 : i32
    return %arg0, %c0_i32 : i32, i32
  }
  func.func @transform_1(%arg0: i32) -> (i32, i32) {
    %c0_i32 = arith.constant 0 : i32
    %c0_i32_0 = arith.constant 0 : i32
    %c0_i32_1 = arith.constant 0 : i32
    return %c0_i32, %c0_i32_0 : i32, i32
  }
  func.func @transform_2(%arg0: i32) -> (i32, i32) {
    %c0_i32 = arith.constant 0 : i32
    %c0_i32_0 = arith.constant 0 : i32
    %c0_i32_1 = arith.constant 0 : i32
    return %c0_i32, %c0_i32_0 : i32, i32
  }
  func.func @transform_3(%arg0: i32) -> (i32, i32) {
    %c0_i32 = arith.constant 0 : i32
    %c0_i32_0 = arith.constant 0 : i32
    return %arg0, %c0_i32 : i32, i32
  }
}

module attributes {stable_mosaic.version = 11 : i64} {
  func.func @_matmul_kernel(%arg0: i32, %arg1: i32, %arg2: i32, %arg3: memref<16x128xbf16, #tpu.memory_space<vmem>>, %arg4: memref<128x128xbf16, #tpu.memory_space<vmem>>, %arg5: memref<1x128xf32, #tpu.memory_space<vmem>>, %arg6: memref<1x128xf32, #tpu.memory_space<vmem>>, %arg7: memref<16x128xf32, #tpu.memory_space<vmem>>, %arg8: memref<16x128xf32, #tpu.memory_space<vmem>>) attributes {dimension_semantics = [#tpu.dimension_semantics<parallel>, #tpu.dimension_semantics<parallel>, #tpu.dimension_semantics<arbitrary>], iteration_bounds = array<i64: 1, 1, 1>, scalar_prefetch = 0 : i64, scratch_operands = 1 : i64, tpu.core_type = #tpu.core_type<tc>, window_params = [{transform_indices = @transform_0, window_bounds = array<i64: 16, 128>}, {transform_indices = @transform_1, window_bounds = array<i64: 128, 128>}, {transform_indices = @transform_2, window_bounds = array<i64: 1, 128>}, {transform_indices = @transform_3, window_bounds = array<i64: 1, 128>}, {transform_indices = @transform_4, window_bounds = array<i64: 16, 128>}]} {
    %c0_i32 = arith.constant 0 : i32
    %0 = arith.cmpi eq, %arg2, %c0_i32 : i32
    %1 = arith.extui %0 : i1 to i32
    %c0_i32_0 = arith.constant 0 : i32
    %2 = arith.cmpi ne, %1, %c0_i32_0 : i32
    scf.if %2 {
      %cst_10 = arith.constant 0.000000e+00 : f32
      %12 = vector.broadcast %cst_10 : f32 to vector<16x128xf32>
      %c0_11 = arith.constant 0 : index
      %c0_12 = arith.constant 0 : index
      %13 = vector.load %arg8[%c0_11, %c0_12] : memref<16x128xf32, #tpu.memory_space<vmem>>, vector<16x128xf32>
      tpu.vector_store %arg8[%c0_11, %c0_12], %12 {strides = array<i32>} : memref<16x128xf32, #tpu.memory_space<vmem>>, vector<16x128xf32>,
    } else {
    }
    %c0 = arith.constant 0 : index
    %c0_1 = arith.constant 0 : index
    %3 = vector.load %arg8[%c0, %c0_1] : memref<16x128xf32, #tpu.memory_space<vmem>>, vector<16x128xf32>
    %c0_2 = arith.constant 0 : index
    %c0_3 = arith.constant 0 : index
    %4 = vector.load %arg3[%c0_2, %c0_3] : memref<16x128xbf16, #tpu.memory_space<vmem>>, vector<16x128xbf16>
    %c0_4 = arith.constant 0 : index
    %c0_5 = arith.constant 0 : index
    %5 = vector.load %arg4[%c0_4, %c0_5] : memref<128x128xbf16, #tpu.memory_space<vmem>>, vector<128x128xbf16>
    %cst = arith.constant dense<0.000000e+00> : vector<16x128xf32>
    %6 = tpu.matmul %4, %5, %cst {dimension_numbers = #tpu.dot_dimension_numbers<[1], [0], [0], [1], [0, 0, 1, 1], [], []>} : vector<16x128xbf16>, vector<128x128xbf16>, vector<16x128xf32> -> vector<16x128xf32>
    %7 = arith.addf %3, %6 : vector<16x128xf32>
    %c0_6 = arith.constant 0 : index
    %c0_7 = arith.constant 0 : index
    %8 = vector.load %arg8[%c0_6, %c0_7] : memref<16x128xf32, #tpu.memory_space<vmem>>, vector<16x128xf32>
    tpu.vector_store %arg8[%c0_6, %c0_7], %7 {strides = array<i32>} : memref<16x128xf32, #tpu.memory_space<vmem>>, vector<16x128xf32>,
    %c0_i32_8 = arith.constant 0 : i32
    %9 = arith.cmpi eq, %arg2, %c0_i32_8 : i32
    %10 = arith.extui %9 : i1 to i32
    %c0_i32_9 = arith.constant 0 : i32
    %11 = arith.cmpi ne, %10, %c0_i32_9 : i32
    scf.if %11 {
      %c0_10 = arith.constant 0 : index
      %c0_11 = arith.constant 0 : index
      %12 = vector.load %arg8[%c0_10, %c0_11] : memref<16x128xf32, #tpu.memory_space<vmem>>, vector<16x128xf32>
      %c0_12 = arith.constant 0 : index
      %c0_13 = arith.constant 0 : index
      %13 = vector.load %arg5[%c0_12, %c0_13] : memref<1x128xf32, #tpu.memory_space<vmem>>, vector<1x128xf32>
      %14 = vector.broadcast %13 : vector<1x128xf32> to vector<16x128xf32>
      %15 = arith.mulf %12, %14 : vector<16x128xf32>
      %c0_14 = arith.constant 0 : index
      %c0_15 = arith.constant 0 : index
      %16 = vector.load %arg6[%c0_14, %c0_15] : memref<1x128xf32, #tpu.memory_space<vmem>>, vector<1x128xf32>
      %17 = vector.broadcast %16 : vector<1x128xf32> to vector<16x128xf32>
      %18 = arith.addf %15, %17 : vector<16x128xf32>
      %c0_16 = arith.constant 0 : index
      %c0_17 = arith.constant 0 : index
      %19 = vector.load %arg7[%c0_16, %c0_17] : memref<16x128xf32, #tpu.memory_space<vmem>>, vector<16x128xf32>
      tpu.vector_store %arg7[%c0_16, %c0_17], %18 {strides = array<i32>} : memref<16x128xf32, #tpu.memory_space<vmem>>, vector<16x128xf32>,
    } else {
    }
    return
  }
  func.func @transform_0(%arg0: i32, %arg1: i32, %arg2: i32) -> (i32, i32) {
    %c0_i32 = arith.constant 0 : i32
    return %arg0, %arg2 : i32, i32
  }
  func.func @transform_1(%arg0: i32, %arg1: i32, %arg2: i32) -> (i32, i32) {
    %c0_i32 = arith.constant 0 : i32
    return %arg2, %arg1 : i32, i32
  }
  func.func @transform_2(%arg0: i32, %arg1: i32, %arg2: i32) -> (i32, i32) {
    %c0_i32 = arith.constant 0 : i32
    %c0_i32_0 = arith.constant 0 : i32
    return %c0_i32, %arg1 : i32, i32
  }
  func.func @transform_3(%arg0: i32, %arg1: i32, %arg2: i32) -> (i32, i32) {
    %c0_i32 = arith.constant 0 : i32
    %c0_i32_0 = arith.constant 0 : i32
    return %c0_i32, %arg1 : i32, i32
  }
  func.func @transform_4(%arg0: i32, %arg1: i32, %arg2: i32) -> (i32, i32) {
    %c0_i32 = arith.constant 0 : i32
    return %arg0, %arg1 : i32, i32
  }
}

module attributes {stable_mosaic.version = 11 : i64} {
  func.func @_gate_mean_kernel(%arg0: i32, %arg1: memref<1x4x64xf32, #tpu.memory_space<vmem>>, %arg2: memref<1x4x1xf32, #tpu.memory_space<vmem>>, %arg3: memref<1x1x64xf32, #tpu.memory_space<vmem>>) attributes {dimension_semantics = [#tpu.dimension_semantics<parallel>], iteration_bounds = array<i64: 2>, scalar_prefetch = 0 : i64, scratch_operands = 0 : i64, tpu.core_type = #tpu.core_type<tc>, window_params = [{transform_indices = @transform_0, window_bounds = array<i64: 1, 4, 64>}, {transform_indices = @transform_1, window_bounds = array<i64: 1, 4, 1>}, {transform_indices = @transform_2, window_bounds = array<i64: 1, 1, 64>}]} {
    %c0 = arith.constant 0 : index
    %c0_0 = arith.constant 0 : index
    %c0_1 = arith.constant 0 : index
    %0 = vector.load %arg1[%c0, %c0_0, %c0_1] : memref<1x4x64xf32, #tpu.memory_space<vmem>>, vector<1x4x64xf32>
    %c0_2 = arith.constant 0 : index
    %c0_3 = arith.constant 0 : index
    %c0_4 = arith.constant 0 : index
    %1 = vector.load %arg2[%c0_2, %c0_3, %c0_4] : memref<1x4x1xf32, #tpu.memory_space<vmem>>, vector<1x4x1xf32>
    %cst = arith.constant 0.000000e+00 : f32
    %2 = vector.broadcast %cst : f32 to vector<1x4x1xf32>
    %3 = arith.subf %2, %1 : vector<1x4x1xf32>
    %4 = math.exp %3 : vector<1x4x1xf32>
    %cst_5 = arith.constant 1.000000e+00 : f32
    %5 = vector.broadcast %cst_5 : f32 to vector<1x4x1xf32>
    %6 = arith.addf %5, %4 : vector<1x4x1xf32>
    %cst_6 = arith.constant 1.000000e+00 : f32
    %7 = vector.broadcast %cst_6 : f32 to vector<1x4x1xf32>
    %8 = arith.divf %7, %6 : vector<1x4x1xf32>
    %9 = vector.broadcast %8 : vector<1x4x1xf32> to vector<1x4x64xf32>
    %10 = arith.mulf %0, %9 : vector<1x4x64xf32>
    %11 = arith.addf %0, %10 : vector<1x4x64xf32>
    %cst_7 = arith.constant dense<0.000000e+00> : vector<1x64xf32>
    %12 = vector.multi_reduction <add>, %11, %cst_7 [1] : vector<1x4x64xf32> to vector<1x64xf32>
    %13 = vector.shape_cast %12 : vector<1x64xf32> to vector<1x1x64xf32>
    %cst_8 = arith.constant 4.000000e+00 : f32
    %14 = vector.broadcast %cst_8 : f32 to vector<1x1x64xf32>
    %15 = arith.divf %13, %14 : vector<1x1x64xf32>
    %c0_9 = arith.constant 0 : index
    %c0_10 = arith.constant 0 : index
    %c0_11 = arith.constant 0 : index
    %16 = vector.load %arg3[%c0_9, %c0_10, %c0_11] : memref<1x1x64xf32, #tpu.memory_space<vmem>>, vector<1x1x64xf32>
    tpu.vector_store %arg3[%c0_9, %c0_10, %c0_11], %15 {strides = array<i32>} : memref<1x1x64xf32, #tpu.memory_space<vmem>>, vector<1x1x64xf32>,
    return
  }
  func.func @transform_0(%arg0: i32) -> (i32, i32, i32) {
    %c0_i32 = arith.constant 0 : i32
    %c0_i32_0 = arith.constant 0 : i32
    %c0_i32_1 = arith.constant 0 : i32
    return %arg0, %c0_i32, %c0_i32_0 : i32, i32, i32
  }
  func.func @transform_1(%arg0: i32) -> (i32, i32, i32) {
    %c0_i32 = arith.constant 0 : i32
    %c0_i32_0 = arith.constant 0 : i32
    %c0_i32_1 = arith.constant 0 : i32
    return %arg0, %c0_i32, %c0_i32_0 : i32, i32, i32
  }
  func.func @transform_2(%arg0: i32) -> (i32, i32, i32) {
    %c0_i32 = arith.constant 0 : i32
    %c0_i32_0 = arith.constant 0 : i32
    %c0_i32_1 = arith.constant 0 : i32
    return %arg0, %c0_i32, %c0_i32_0 : i32, i32, i32
  }
}

</mosaic_0001>

<bundles_post_ra>
// kernel: image_feature_extractor_bev_forward.39
= control target key start
LH: loop header
LB: loop body
LE: loop exit
PB: predicated region body
PF: predicated region fallthrough
CT: control target
= control target key end

     0   :  { %s1684_s15 = smov 0   ;;  %s1686_s16 = smov 0   ;;  %s2068_s0 = inlined_call_operand.vmem [shape: bf16[16,256], index: 0, kind: input, shape index: {}]   ;;  %s2069_s1 = inlined_call_operand.vmem [shape: bf16[256,4096], index: 1, kind: input, shape index: {}]   ;;  %s2070_s2 = inlined_call_operand.vmem [shape: f32[16,1], index: 2, kind: input, shape index: {}]   ;;  %s2071_s3 = inlined_call_operand.vmem [shape: f32[16,1], index: 3, kind: input, shape index: {}]   ;;  %s2072_s4 = inlined_call_operand.vmem [shape: bf16[16,4096], index: 4, kind: output, shape index: {}]  }
   0x1   :  { %s1688_s17 = smov 0   ;;  %s1690_s18 = smov 0  }
   0x2   :  { %s1692_s19 = smov 0  }
   0x3 LB: > { %s29_s20 = sadd.s32 1, %s1652_s18  ;;  %s1225_s21 = sadd.s32 4294967295, %s1656_s19   ;;  %s1656_s19 = sphi %s1692_s19, %s14_s19   ;;  %s1652_s18 = sphi %s1690_s18, %s2077_s18   ;;  %s1648_s17 = sphi %s1688_s17, %s2076_s17   ;;  %s1644_s16 = sphi %s1686_s16, %s2075_s16   ;;  %s1640_s15 = sphi %s1684_s15, %s2074_s15  }
   0x4   : > { %p31_p0 = scmp.ge.s32.totalorder %s29_s20, 8  ;;  %p77_p1 = scmp.ne.s32.totalorder %s1644_s16, %s1640_s15 }
   0x5   : > { %p78_p2 = scmp.eq.s32.totalorder %s1656_s19, 0  ;;  %p161_p4 = scmp.eq.s32.totalorder %s1225_s21, 7 }
   0x6   : > { %s2079_s20 = smov (%p31_p0, %s29_s20), 0  ;;  %s70_s23 = sadd.s32 1, %s1644_s16 }
   0x7   : > { %p79_p3 = por %p78_p2, %p77_p1  ;;  %s66_s22 = ssub.s32 %s1652_s18, %s2079_s20 }
   0x8   : > { %p68_p5 = scmp.eq.s32.totalorder %s66_s22, 0  ;;  %p1719_p6 = por %p161_p4, %p77_p1 }
   0x9   : > { %p1231_p7 = scmp.ge.s32.totalorder %s1656_s19, 8 }
   0xa   : > { %s1724_s25 = scalar_select %p68_p5, %s1644_s16, %s70_s23  }
   0xb   : > { %216 = sbr.rel (%p1231_p7) target bundleno = 84 (0x54), region = 28 }
  0x10   : > { %219 = sbr.rel (!%p79_p3) target bundleno = 84 (0x54), region = 32  ;;  %s221_s26 = sand.u32 (%p79_p3), 1, %s1644_s16  }
  0x11   : > { %s1507_s27 = sshll.u32 (%p79_p3), %s1652_s18, 4  ;;  %s1232_s28 = sshll.u32 (%p79_p3), %s221_s26, 9 }
  0x12   : > { %s1732_s5 = scalar_lea.vmem (%p79_p3), %s2069_s1, %s1507_s27  ;;  %s1737_s6 = scalar_lea.vmem (%p79_p3), [#allocation3], %s1232_s28 }
  0x13   : > { %v242_v0 = vld [vmem:[%s1732_s5] sm:$0xff] (%p79_p3)  ;;  %v244_v1 = vld [vmem:[%s1732_s5 + $0x8] sm:$0xff] (%p79_p3) }
  0x14   : > { %v246_v2 = vld [vmem:[%s1732_s5 + $0x80] sm:$0xff] (%p79_p3)  ;;  %243 = vst [vmem:[%s1737_s6] sm:$0xff] (%p79_p3), %v242_v0  ;;  %v248_v3 = vld [vmem:[%s1732_s5 + $0x88] sm:$0xff] (%p79_p3) }
  0x15   : > { %245 = vst [vmem:[%s1737_s6 + $0x8] sm:$0xff] %v244_v1  ;;  %v250_v4 = vld [vmem:[%s1732_s5 + $0x100] sm:$0xff]  ;;  %v252_v5 = vld [vmem:[%s1732_s5 + $0x108] sm:$0xff] }
  0x16   : > { %247 = vst [vmem:[%s1737_s6 + $0x10] sm:$0xff] %v246_v2  ;;  %v254_v6 = vld [vmem:[%s1732_s5 + $0x180] sm:$0xff]  ;;  %v256_v7 = vld [vmem:[%s1732_s5 + $0x188] sm:$0xff] }
  0x17   : > { %249 = vst [vmem:[%s1737_s6 + $0x18] sm:$0xff] %v248_v3  ;;  %v258_v8 = vld [vmem:[%s1732_s5 + $0x200] sm:$0xff]  ;;  %v260_v9 = vld [vmem:[%s1732_s5 + $0x208] sm:$0xff] }
  0x18   : > { %251 = vst [vmem:[%s1737_s6 + $0x20] sm:$0xff] %v250_v4  ;;  %v262_v10 = vld [vmem:[%s1732_s5 + $0x280] sm:$0xff]  ;;  %v264_v11 = vld [vmem:[%s1732_s5 + $0x288] sm:$0xff] }
  0x19   : > { %253 = vst [vmem:[%s1737_s6 + $0x28] sm:$0xff] %v252_v5  ;;  %v266_v12 = vld [vmem:[%s1732_s5 + $0x300] sm:$0xff]  ;;  %v268_v13 = vld [vmem:[%s1732_s5 + $0x308] sm:$0xff] }
  0x1a   : > { %255 = vst [vmem:[%s1737_s6 + $0x30] sm:$0xff] %v254_v6  ;;  %v270_v14 = vld [vmem:[%s1732_s5 + $0x380] sm:$0xff]  ;;  %v272_v15 = vld [vmem:[%s1732_s5 + $0x388] sm:$0xff] }
  0x1b   : > { %257 = vst [vmem:[%s1737_s6 + $0x38] sm:$0xff] %v256_v7  ;;  %v274_v16 = vld [vmem:[%s1732_s5 + $0x400] sm:$0xff]  ;;  %v276_v17 = vld [vmem:[%s1732_s5 + $0x408] sm:$0xff] }
  0x1c   : > { %259 = vst [vmem:[%s1737_s6 + $0x40] sm:$0xff] %v258_v8  ;;  %v278_v18 = vld [vmem:[%s1732_s5 + $0x480] sm:$0xff]  ;;  %v280_v19 = vld [vmem:[%s1732_s5 + $0x488] sm:$0xff] }
  0x1d   : > { %261 = vst [vmem:[%s1737_s6 + $0x48] sm:$0xff] %v260_v9  ;;  %v282_v20 = vld [vmem:[%s1732_s5 + $0x500] sm:$0xff]  ;;  %v284_v21 = vld [vmem:[%s1732_s5 + $0x508] sm:$0xff] }
  0x1e   : > { %263 = vst [vmem:[%s1737_s6 + $0x50] sm:$0xff] %v262_v10  ;;  %v286_v22 = vld [vmem:[%s1732_s5 + $0x580] sm:$0xff]  ;;  %v288_v23 = vld [vmem:[%s1732_s5 + $0x588] sm:$0xff] }
  0x1f   : > { %265 = vst [vmem:[%s1737_s6 + $0x58] sm:$0xff] %v264_v11  ;;  %v290_v24 = vld [vmem:[%s1732_s5 + $0x600] sm:$0xff]  ;;  %v292_v25 = vld [vmem:[%s1732_s5 + $0x608] sm:$0xff] }
  0x20   : > { %267 = vst [vmem:[%s1737_s6 + $0x60] sm:$0xff] %v266_v12  ;;  %v294_v26 = vld [vmem:[%s1732_s5 + $0x680] sm:$0xff]  ;;  %v296_v27 = vld [vmem:[%s1732_s5 + $0x688] sm:$0xff] }
  0x21   : > { %269 = vst [vmem:[%s1737_s6 + $0x68] sm:$0xff] %v268_v13  ;;  %v298_v28 = vld [vmem:[%s1732_s5 + $0x700] sm:$0xff]  ;;  %v300_v29 = vld [vmem:[%s1732_s5 + $0x708] sm:$0xff] }
  0x22   : > { %271 = vst [vmem:[%s1737_s6 + $0x70] sm:$0xff] %v270_v14  ;;  %v302_v30 = vld [vmem:[%s1732_s5 + $0x780] sm:$0xff]  ;;  %v304_v31 = vld [vmem:[%s1732_s5 + $0x788] sm:$0xff] }
  0x23   : > { %273 = vst [vmem:[%s1737_s6 + $0x78] sm:$0xff] %v272_v15  ;;  %v306_v32 = vld [vmem:[%s1732_s5 + $0x800] sm:$0xff]  ;;  %v308_v33 = vld [vmem:[%s1732_s5 + $0x808] sm:$0xff] }
  0x24   : > { %275 = vst [vmem:[%s1737_s6 + $0x80] sm:$0xff] %v274_v16  ;;  %v310_v34 = vld [vmem:[%s1732_s5 + $0x880] sm:$0xff]  ;;  %v312_v35 = vld [vmem:[%s1732_s5 + $0x888] sm:$0xff] }
  0x25   : > { %277 = vst [vmem:[%s1737_s6 + $0x88] sm:$0xff] %v276_v17  ;;  %v314_v36 = vld [vmem:[%s1732_s5 + $0x900] sm:$0xff]  ;;  %v316_v37 = vld [vmem:[%s1732_s5 + $0x908] sm:$0xff] }
  0x26   : > { %279 = vst [vmem:[%s1737_s6 + $0x90] sm:$0xff] %v278_v18  ;;  %v318_v38 = vld [vmem:[%s1732_s5 + $0x980] sm:$0xff]  ;;  %v320_v39 = vld [vmem:[%s1732_s5 + $0x988] sm:$0xff] }
  0x27   : > { %281 = vst [vmem:[%s1737_s6 + $0x98] sm:$0xff] %v280_v19  ;;  %v322_v40 = vld [vmem:[%s1732_s5 + $0xa00] sm:$0xff]  ;;  %v324_v41 = vld [vmem:[%s1732_s5 + $0xa08] sm:$0xff] }
  0x28   : > { %283 = vst [vmem:[%s1737_s6 + $0xa0] sm:$0xff] %v282_v20  ;;  %v326_v42 = vld [vmem:[%s1732_s5 + $0xa80] sm:$0xff]  ;;  %v328_v43 = vld [vmem:[%s1732_s5 + $0xa88] sm:$0xff] }
  0x29   : > { %285 = vst [vmem:[%s1737_s6 + $0xa8] sm:$0xff] %v284_v21  ;;  %v330_v44 = vld [vmem:[%s1732_s5 + $0xb00] sm:$0xff]  ;;  %v332_v45 = vld [vmem:[%s1732_s5 + $0xb08] sm:$0xff] }
  0x2a   : > { %287 = vst [vmem:[%s1737_s6 + $0xb0] sm:$0xff] %v286_v22  ;;  %v334_v46 = vld [vmem:[%s1732_s5 + $0xb80] sm:$0xff]  ;;  %v336_v47 = vld [vmem:[%s1732_s5 + $0xb88] sm:$0xff] }
  0x2b   : > { %289 = vst [vmem:[%s1737_s6 + $0xb8] sm:$0xff] %v288_v23  ;;  %v338_v48 = vld [vmem:[%s1732_s5 + $0xc00] sm:$0xff]  ;;  %v340_v49 = vld [vmem:[%s1732_s5 + $0xc08] sm:$0xff] }
  0x2c   : > { %291 = vst [vmem:[%s1737_s6 + $0xc0] sm:$0xff] %v290_v24  ;;  %v342_v50 = vld [vmem:[%s1732_s5 + $0xc80] sm:$0xff]  ;;  %v344_v51 = vld [vmem:[%s1732_s5 + $0xc88] sm:$0xff] }
  0x2d   : > { %293 = vst [vmem:[%s1737_s6 + $0xc8] sm:$0xff] %v292_v25  ;;  %v346_v52 = vld [vmem:[%s1732_s5 + $0xd00] sm:$0xff]  ;;  %v348_v53 = vld [vmem:[%s1732_s5 + $0xd08] sm:$0xff] }
  0x2e   : > { %295 = vst [vmem:[%s1737_s6 + $0xd0] sm:$0xff] %v294_v26  ;;  %v350_v54 = vld [vmem:[%s1732_s5 + $0xd80] sm:$0xff]  ;;  %v352_v55 = vld [vmem:[%s1732_s5 + $0xd88] sm:$0xff] }
  0x2f   : > { %297 = vst [vmem:[%s1737_s6 + $0xd8] sm:$0xff] %v296_v27  ;;  %v354_v56 = vld [vmem:[%s1732_s5 + $0xe00] sm:$0xff]  ;;  %v356_v57 = vld [vmem:[%s1732_s5 + $0xe08] sm:$0xff] }
  0x30   : > { %299 = vst [vmem:[%s1737_s6 + $0xe0] sm:$0xff] %v298_v28  ;;  %v358_v58 = vld [vmem:[%s1732_s5 + $0xe80] sm:$0xff]  ;;  %v360_v59 = vld [vmem:[%s1732_s5 + $0xe88] sm:$0xff] }
  0x31   : > { %301 = vst [vmem:[%s1737_s6 + $0xe8] sm:$0xff] %v300_v29  ;;  %v362_v60 = vld [vmem:[%s1732_s5 + $0xf00] sm:$0xff]  ;;  %v364_v61 = vld [vmem:[%s1732_s5 + $0xf08] sm:$0xff] }
  0x32   : > { %303 = vst [vmem:[%s1737_s6 + $0xf0] sm:$0xff] %v302_v30  ;;  %v366_v62 = vld [vmem:[%s1732_s5 + $0xf80] sm:$0xff]  ;;  %v368_v63 = vld [vmem:[%s1732_s5 + $0xf88] sm:$0xff] }
  0x33   : > { %305 = vst [vmem:[%s1737_s6 + $0xf8] sm:$0xff] %v304_v31 }
  0x34   : > { %307 = vst [vmem:[%s1737_s6 + $0x100] sm:$0xff] %v306_v32 }
  0x35   : > { %309 = vst [vmem:[%s1737_s6 + $0x108] sm:$0xff] %v308_v33 }
  0x36   : > { %311 = vst [vmem:[%s1737_s6 + $0x110] sm:$0xff] %v310_v34 }
  0x37   : > { %313 = vst [vmem:[%s1737_s6 + $0x118] sm:$0xff] %v312_v35 }
  0x38   : > { %315 = vst [vmem:[%s1737_s6 + $0x120] sm:$0xff] %v314_v36 }
  0x39   : > { %317 = vst [vmem:[%s1737_s6 + $0x128] sm:$0xff] %v316_v37 }
  0x3a   : > { %319 = vst [vmem:[%s1737_s6 + $0x130] sm:$0xff] %v318_v38 }
  0x3b   : > { %321 = vst [vmem:[%s1737_s6 + $0x138] sm:$0xff] %v320_v39 }
  0x3c   : > { %323 = vst [vmem:[%s1737_s6 + $0x140] sm:$0xff] %v322_v40 }
  0x3d   : > { %325 = vst [vmem:[%s1737_s6 + $0x148] sm:$0xff] %v324_v41 }
  0x3e   : > { %327 = vst [vmem:[%s1737_s6 + $0x150] sm:$0xff] %v326_v42 }
  0x3f   : > { %329 = vst [vmem:[%s1737_s6 + $0x158] sm:$0xff] %v328_v43 }
  0x40   : > { %331 = vst [vmem:[%s1737_s6 + $0x160] sm:$0xff] %v330_v44 }
  0x41   : > { %333 = vst [vmem:[%s1737_s6 + $0x168] sm:$0xff] %v332_v45 }
  0x42   : > { %335 = vst [vmem:[%s1737_s6 + $0x170] sm:$0xff] %v334_v46 }
  0x43   : > { %337 = vst [vmem:[%s1737_s6 + $0x178] sm:$0xff] %v336_v47 }
  0x44   : > { %339 = vst [vmem:[%s1737_s6 + $0x180] sm:$0xff] %v338_v48 }
  0x45   : > { %341 = vst [vmem:[%s1737_s6 + $0x188] sm:$0xff] %v340_v49 }
  0x46   : > { %343 = vst [vmem:[%s1737_s6 + $0x190] sm:$0xff] %v342_v50 }
  0x47   : > { %345 = vst [vmem:[%s1737_s6 + $0x198] sm:$0xff] %v344_v51 }
  0x48   : > { %347 = vst [vmem:[%s1737_s6 + $0x1a0] sm:$0xff] %v346_v52 }
  0x49   : > { %349 = vst [vmem:[%s1737_s6 + $0x1a8] sm:$0xff] %v348_v53 }
  0x4a   : > { %351 = vst [vmem:[%s1737_s6 + $0x1b0] sm:$0xff] %v350_v54 }
  0x4b   : > { %353 = vst [vmem:[%s1737_s6 + $0x1b8] sm:$0xff] %v352_v55 }
  0x4c   : > { %355 = vst [vmem:[%s1737_s6 + $0x1c0] sm:$0xff] %v354_v56 }
  0x4d   : > { %357 = vst [vmem:[%s1737_s6 + $0x1c8] sm:$0xff] %v356_v57 }
  0x4e   : > { %359 = vst [vmem:[%s1737_s6 + $0x1d0] sm:$0xff] %v358_v58 }
  0x4f   : > { %361 = vst [vmem:[%s1737_s6 + $0x1d8] sm:$0xff] %v360_v59 }
  0x50   : > { %363 = vst [vmem:[%s1737_s6 + $0x1e0] sm:$0xff] %v362_v60 }
  0x51   : > { %365 = vst [vmem:[%s1737_s6 + $0x1e8] sm:$0xff] %v364_v61 }
  0x52   : > { %367 = vst [vmem:[%s1737_s6 + $0x1f0] sm:$0xff] %v366_v62 }
  0x53   : > { %369 = vst [vmem:[%s1737_s6 + $0x1f8] sm:$0xff] %v368_v63 }
  0x54 PF: > { %p1235_p8 = scmp.ge.s32.totalorder %s1656_s19, 1  ;;  %p374_p9 = scmp.lt.s32.totalorder %s1656_s19, 9 }
  0x56   : > { %p375_p10 = pnand %p1235_p8, %p374_p9 }
  0x57   : > { %s381_s7 = sand.u32 (!%p375_p10), 1, %s1640_s15  }
  0x58   : > { %378 = sbr.rel (%p375_p10) target bundleno = 320 (0x140), region = 55  ;;  %s1236_s8 = sshll.u32 (!%p375_p10), %s381_s7, 9 }
  0x59   : > { %s1869_s9 = scalar_lea.vmem (!%p375_p10), [#allocation3], %s1236_s8 }
  0x5d   : > { %v1360_v0 = vld [vmem:[%s1869_s9 + $0xe0] sm:$0xf]  ;;  %v1540_v1 = vld [vmem:[%s1869_s9 + $0xec] sm:$0xf0]  ;;  %v1538_v5 = vld [vmem:[%s1869_s9 + $0xe4] sm:$0xf] }
  0x5e   : > { %v1488_v2 = vld [vmem:[%s1869_s9 + $0x1e0] sm:$0xf]  ;;  %v1361_v3 = vor.u32 %v1540_v1, %v1360_v0  ;;  %v1572_v4 = vld [vmem:[%s1869_s9 + $0x1ec] sm:$0xf0]  ;;  %v1362_v6 = vld [vmem:[%s1869_s9 + $0xf0] sm:$0xf0] }
  0x5f   : > { %v1489_v7 = vor.u32 %v1572_v4, %v1488_v2  ;;  %v1365_v8 = vor.u32 %v1538_v5, %v1362_v6  ;;  %v1570_v9 = vld [vmem:[%s1869_s9 + $0x1e4] sm:$0xf]  ;;  %v1490_v10 = vld [vmem:[%s1869_s9 + $0x1f0] sm:$0xf0]  ;;  %v1344_v11 = vld [vmem:[%s1869_s9 + $0xc0] sm:$0xf] }
  0x60   : > { %869 = vmatpush.bf16.msra.mxu0 %v1361_v3  ;;  %v1493_v12 = vor.u32 %v1570_v9, %v1490_v10  ;;  %v1536_v13 = vld [vmem:[%s1869_s9 + $0xcc] sm:$0xf0]  ;;  %v1472_v14 = vld [vmem:[%s1869_s9 + $0x1c0] sm:$0xf]  ;;  %v1534_v18 = vld [vmem:[%s1869_s9 + $0xc4] sm:$0xf] }
  0x61   : > { %v1568_v15 = vld [vmem:[%s1869_s9 + $0x1cc] sm:$0xf0]  ;;  %883 = vmatpush.bf16.msra.mxu1 %v1489_v7  ;;  %897 = vmatpush.bf16.msra.mxu2 %v1365_v8  ;;  %v1345_v16 = vor.u32 %v1536_v13, %v1344_v11  ;;  %v1346_v19 = vld [vmem:[%s1869_s9 + $0xd0] sm:$0xf0]  ;;  %v1566_v20 = vld [vmem:[%s1869_s9 + $0x1c4] sm:$0xf] }
  0x62   : > { %v1473_v17 = vor.u32 %v1568_v15, %v1472_v14  ;;  %911 = vmatpush.bf16.msra.mxu3 %v1493_v12  ;;  %v1349_v21 = vor.u32 %v1534_v18, %v1346_v19  ;;  %v1474_v22 = vld [vmem:[%s1869_s9 + $0x1d0] sm:$0xf0]  ;;  %v1328_v23 = vld [vmem:[%s1869_s9 + $0xa0] sm:$0xf]  ;;  %v1532_v24 = vld [vmem:[%s1869_s9 + $0xac] sm:$0xf0] }
  0x63   : > { %v1477_v25 = vor.u32 %v1566_v20, %v1474_v22  ;;  %v1456_v26 = vld [vmem:[%s1869_s9 + $0x1a0] sm:$0xf]  ;;  %v1564_v27 = vld [vmem:[%s1869_s9 + $0x1ac] sm:$0xf0]  ;;  %v1530_v28 = vld [vmem:[%s1869_s9 + $0xa4] sm:$0xf]  ;;  %v1329_v29 = vor.u32 %v1532_v24, %v1328_v23 }
  0x64   : > { %870 = vmatpush.bf16.msra.mxu0 %v1345_v16  ;;  %v1330_v30 = vld [vmem:[%s1869_s9 + $0xb0] sm:$0xf0]  ;;  %v1562_v31 = vld [vmem:[%s1869_s9 + $0x1a4] sm:$0xf]  ;;  %v1457_v33 = vor.u32 %v1564_v27, %v1456_v26  ;;  %v1312_v35 = vld [vmem:[%s1869_s9 + $0x80] sm:$0xf] }
  0x65   : > { %v1458_v32 = vld [vmem:[%s1869_s9 + $0x1b0] sm:$0xf0]  ;;  %884 = vmatpush.bf16.msra.mxu1 %v1473_v17  ;;  %898 = vmatpush.bf16.msra.mxu2 %v1349_v21  ;;  %v1333_v34 = vor.u32 %v1530_v28, %v1330_v30  ;;  %v1528_v36 = vld [vmem:[%s1869_s9 + $0x8c] sm:$0xf0]  ;;  %v1440_v37 = vld [vmem:[%s1869_s9 + $0x180] sm:$0xf] }
  0x66   : > { %912 = vmatpush.bf16.msra.mxu3 %v1477_v25  ;;  %v1461_v38 = vor.u32 %v1562_v31, %v1458_v32  ;;  %v1560_v39 = vld [vmem:[%s1869_s9 + $0x18c] sm:$0xf0]  ;;  %v1526_v40 = vld [vmem:[%s1869_s9 + $0x84] sm:$0xf]  ;;  %v1314_v41 = vld [vmem:[%s1869_s9 + $0x90] sm:$0xf0]  ;;  %v1313_v44 = vor.u32 %v1528_v36, %v1312_v35 }
  0x67   : > { %v1558_v42 = vld [vmem:[%s1869_s9 + $0x184] sm:$0xf]  ;;  %v1442_v43 = vld [vmem:[%s1869_s9 + $0x190] sm:$0xf0]  ;;  %v1441_v45 = vor.u32 %v1560_v39, %v1440_v37  ;;  %v1317_v46 = vor.u32 %v1526_v40, %v1314_v41  ;;  %v1296_v47 = vld [vmem:[%s1869_s9 + $0x60] sm:$0xf] }
  0x68   : > { %871 = vmatpush.bf16.msra.mxu0 %v1329_v29  ;;  %v1524_v48 = vld [vmem:[%s1869_s9 + $0x6c] sm:$0xf0]  ;;  %v1424_v49 = vld [vmem:[%s1869_s9 + $0x160] sm:$0xf]  ;;  %v1445_v50 = vor.u32 %v1558_v42, %v1442_v43  ;;  %v1522_v52 = vld [vmem:[%s1869_s9 + $0x64] sm:$0xf] }
  0x69   : > { %885 = vmatpush.bf16.msra.mxu1 %v1457_v33  ;;  %899 = vmatpush.bf16.msra.mxu2 %v1333_v34  ;;  %v1556_v51 = vld [vmem:[%s1869_s9 + $0x16c] sm:$0xf0]  ;;  %v1298_v53 = vld [vmem:[%s1869_s9 + $0x70] sm:$0xf0]  ;;  %v1554_v54 = vld [vmem:[%s1869_s9 + $0x164] sm:$0xf]  ;;  %v1297_v56 = vor.u32 %v1524_v48, %v1296_v47 }
  0x6a   : > { %913 = vmatpush.bf16.msra.mxu3 %v1461_v38  ;;  %v1426_v55 = vld [vmem:[%s1869_s9 + $0x170] sm:$0xf0]  ;;  %v1425_v57 = vor.u32 %v1556_v51, %v1424_v49  ;;  %v1301_v58 = vor.u32 %v1522_v52, %v1298_v53  ;;  %v1280_v59 = vld [vmem:[%s1869_s9 + $0x40] sm:$0xf]  ;;  %v1520_v60 = vld [vmem:[%s1869_s9 + $0x4c] sm:$0xf0] }
  0x6b   : > { %v1408_v61 = vld [vmem:[%s1869_s9 + $0x140] sm:$0xf]  ;;  %v1429_v62 = vor.u32 %v1554_v54, %v1426_v55  ;;  %v1552_v63 = vld [vmem:[%s1869_s9 + $0x14c] sm:$0xf0]  ;;  %v1518_v0 = vld [vmem:[%s1869_s9 + $0x44] sm:$0xf]  ;;  %v1281_v4 = vor.u32 %v1520_v60, %v1280_v59 }
  0x6c   : > { %872 = vmatpush.bf16.msra.mxu0 %v1313_v44  ;;  %v1282_v1 = vld [vmem:[%s1869_s9 + $0x50] sm:$0xf0]  ;;  %v1550_v2 = vld [vmem:[%s1869_s9 + $0x144] sm:$0xf]  ;;  %v1409_v5 = vor.u32 %v1552_v63, %v1408_v61  ;;  %v1264_v7 = vld [vmem:[%s1869_s9 + $0x20] sm:$0xf] }
  0x6d   : > { %886 = vmatpush.bf16.msra.mxu1 %v1441_v45  ;;  %900 = vmatpush.bf16.msra.mxu2 %v1317_v46  ;;  %v1410_v3 = vld [vmem:[%s1869_s9 + $0x150] sm:$0xf0]  ;;  %v1285_v6 = vor.u32 %v1518_v0, %v1282_v1  ;;  %v1516_v8 = vld [vmem:[%s1869_s9 + $0x2c] sm:$0xf0]  ;;  %v1392_v9 = vld [vmem:[%s1869_s9 + $0x120] sm:$0xf] }
  0x6e   : > { %914 = vmatpush.bf16.msra.mxu3 %v1445_v50  ;;  %v1413_v10 = vor.u32 %v1550_v2, %v1410_v3  ;;  %v1548_v11 = vld [vmem:[%s1869_s9 + $0x12c] sm:$0xf0]  ;;  %v1514_v12 = vld [vmem:[%s1869_s9 + $0x24] sm:$0xf]  ;;  %v1266_v13 = vld [vmem:[%s1869_s9 + $0x30] sm:$0xf0]  ;;  %v1265_v16 = vor.u32 %v1516_v8, %v1264_v7 }
  0x6f   : > { %v1546_v14 = vld [vmem:[%s1869_s9 + $0x124] sm:$0xf]  ;;  %v1394_v15 = vld [vmem:[%s1869_s9 + $0x130] sm:$0xf0]  ;;  %v1248_v17 = vld [vmem:[%s1869_s9] sm:$0xf]  ;;  %v1393_v20 = vor.u32 %v1548_v11, %v1392_v9  ;;  %v1269_v21 = vor.u32 %v1514_v12, %v1266_v13 }
  0x70   : > { %873 = vmatpush.bf16.msra.mxu0 %v1297_v56  ;;  %v1512_v18 = vld [vmem:[%s1869_s9 + $0xc] sm:$0xf0]  ;;  %v1376_v19 = vld [vmem:[%s1869_s9 + $0x100] sm:$0xf]  ;;  %v1510_v23 = vld [vmem:[%s1869_s9 + $0x4] sm:$0xf]  ;;  %v1397_v25 = vor.u32 %v1546_v14, %v1394_v15 }
  0x71   : > { %887 = vmatpush.bf16.msra.mxu1 %v1425_v57  ;;  %901 = vmatpush.bf16.msra.mxu2 %v1301_v58  ;;  %v1544_v22 = vld [vmem:[%s1869_s9 + $0x10c] sm:$0xf0]  ;;  %v1250_v24 = vld [vmem:[%s1869_s9 + $0x10] sm:$0xf0]  ;;  %v1542_v26 = vld [vmem:[%s1869_s9 + $0x104] sm:$0xf]  ;;  %v1249_v32 = vor.u32 %v1512_v18, %v1248_v17 }
  0x72   : > { %915 = vmatpush.bf16.msra.mxu3 %v1429_v62  ;;  %v1378_v27 = vld [vmem:[%s1869_s9 + $0x110] sm:$0xf0]  ;;  %v1368_v28 = vld [vmem:[%s1869_s9 + $0xe8] sm:$0xf]  ;;  %v1541_v29 = vld [vmem:[%s1869_s9 + $0xf4] sm:$0xf0]  ;;  %v1377_v36 = vor.u32 %v1544_v22, %v1376_v19  ;;  %v1253_v37 = vor.u32 %v1510_v23, %v1250_v24 }
  0x73   : > { %v1496_v30 = vld [vmem:[%s1869_s9 + $0x1e8] sm:$0xf]  ;;  %v1573_v31 = vld [vmem:[%s1869_s9 + $0x1f4] sm:$0xf0]  ;;  %v1539_v33 = vld [vmem:[%s1869_s9 + $0xec] sm:$0xf]  ;;  %v1381_v41 = vor.u32 %v1542_v26, %v1378_v27  ;;  %v1369_v42 = vor.u32 %v1541_v29, %v1368_v28 }
  0x74   : > { %874 = vmatpush.bf16.msra.mxu0 %v1281_v4  ;;  %v1370_v34 = vld [vmem:[%s1869_s9 + $0xf8] sm:$0xf0]  ;;  %v1571_v35 = vld [vmem:[%s1869_s9 + $0x1ec] sm:$0xf]  ;;  %v1240_v39 = vld [vmem:[%s2068_s0] sm:$0xf]  ;;  %v1497_v45 = vor.u32 %v1573_v31, %v1496_v30 }
  0x75   : > { %888 = vmatpush.bf16.msra.mxu1 %v1409_v5  ;;  %902 = vmatpush.bf16.msra.mxu2 %v1285_v6  ;;  %v1498_v38 = vld [vmem:[%s1869_s9 + $0x1f8] sm:$0xf0]  ;;  %v1509_v40 = vld [vmem:[%s2068_s0 + $0x4] sm:$0xf0]  ;;  %v1508_v43 = vld [vmem:[%s2068_s0 + $0x4] sm:$0xf]  ;;  %v1373_v46 = vor.u32 %v1539_v33, %v1370_v34 }
  0x76   : > { %916 = vmatpush.bf16.msra.mxu3 %v1413_v10  ;;  %v1242_v44 = vld [vmem:[%s2068_s0 + $0x8] sm:$0xf0]  ;;  %v1352_v47 = vld [vmem:[%s1869_s9 + $0xc8] sm:$0xf]  ;;  %v1537_v48 = vld [vmem:[%s1869_s9 + $0xd4] sm:$0xf0]  ;;  %v1501_v50 = vor.u32 %v1571_v35, %v1498_v38  ;;  %v1961_v54 = vor.u32 %v1509_v40, %v1240_v39 }
  0x77   : > { %v1480_v49 = vld [vmem:[%s1869_s9 + $0x1c8] sm:$0xf]  ;;  %v1569_v51 = vld [vmem:[%s1869_s9 + $0x1d4] sm:$0xf0]  ;;  %v1535_v52 = vld [vmem:[%s1869_s9 + $0xcc] sm:$0xf]  ;;  %v1965_v57 = vor.u32 %v1508_v43, %v1242_v44  ;;  %v1353_v58 = vor.u32 %v1537_v48, %v1352_v47 }
  0x78   : > { %875 = vmatpush.bf16.msra.mxu0 %v1265_v16  ;;  %v1354_v53 = vld [vmem:[%s1869_s9 + $0xd8] sm:$0xf0]  ;;  %v1567_v55 = vld [vmem:[%s1869_s9 + $0x1cc] sm:$0xf]  ;;  %v1481_v59 = vor.u32 %v1569_v51, %v1480_v49  ;;  %v1336_v61 = vld [vmem:[%s1869_s9 + $0xa8] sm:$0xf] }
  0x79   : > { %889 = vmatpush.bf16.msra.mxu1 %v1393_v20  ;;  %903 = vmatpush.bf16.msra.mxu2 %v1269_v21  ;;  %v1482_v56 = vld [vmem:[%s1869_s9 + $0x1d8] sm:$0xf0]  ;;  %v1357_v60 = vor.u32 %v1535_v52, %v1354_v53  ;;  %v1533_v62 = vld [vmem:[%s1869_s9 + $0xb4] sm:$0xf0]  ;;  %v1464_v63 = vld [vmem:[%s1869_s9 + $0x1a8] sm:$0xf] }
  0x7a   : > { %917 = vmatpush.bf16.msra.mxu3 %v1397_v25  ;;  %v1485_v0 = vor.u32 %v1567_v55, %v1482_v56  ;;  %v1565_v1 = vld [vmem:[%s1869_s9 + $0x1b4] sm:$0xf0]  ;;  %v1531_v2 = vld [vmem:[%s1869_s9 + $0xac] sm:$0xf]  ;;  %v1338_v3 = vld [vmem:[%s1869_s9 + $0xb8] sm:$0xf0]  ;;  %v1337_v6 = vor.u32 %v1533_v62, %v1336_v61 }
  0x7b   : > { %v1563_v4 = vld [vmem:[%s1869_s9 + $0x1ac] sm:$0xf]  ;;  %v1466_v5 = vld [vmem:[%s1869_s9 + $0x1b8] sm:$0xf0]  ;;  %v1465_v7 = vor.u32 %v1565_v1, %v1464_v63  ;;  %v1341_v8 = vor.u32 %v1531_v2, %v1338_v3  ;;  %v1320_v9 = vld [vmem:[%s1869_s9 + $0x88] sm:$0xf] }
  0x7c   : > { %876 = vmatpush.bf16.msra.mxu0 %v1249_v32  ;;  %v1529_v10 = vld [vmem:[%s1869_s9 + $0x94] sm:$0xf0]  ;;  %v1448_v11 = vld [vmem:[%s1869_s9 + $0x188] sm:$0xf]  ;;  %v1469_v12 = vor.u32 %v1563_v4, %v1466_v5  ;;  %v1527_v14 = vld [vmem:[%s1869_s9 + $0x8c] sm:$0xf] }
  0x7d   : > { %890 = vmatpush.bf16.msra.mxu1 %v1377_v36  ;;  %904 = vmatpush.bf16.msra.mxu2 %v1253_v37  ;;  %v1561_v13 = vld [vmem:[%s1869_s9 + $0x194] sm:$0xf0]  ;;  %v1322_v15 = vld [vmem:[%s1869_s9 + $0x98] sm:$0xf0]  ;;  %v1559_v16 = vld [vmem:[%s1869_s9 + $0x18c] sm:$0xf]  ;;  %v1321_v18 = vor.u32 %v1529_v10, %v1320_v9 }
  0x7e   : > { %918 = vmatpush.bf16.msra.mxu3 %v1381_v41  ;;  %v1450_v17 = vld [vmem:[%s1869_s9 + $0x198] sm:$0xf0]  ;;  %v1304_v19 = vld [vmem:[%s1869_s9 + $0x68] sm:$0xf]  ;;  %v1008_v20 = vld [vmem:[%s2070_s2] sm:$0xff]  ;;  %v1449_v21 = vor.u32 %v1561_v13, %v1448_v11  ;;  %v1325_v22 = vor.u32 %v1527_v14, %v1322_v15  ;;  %v1658_v30 = vmov 0  }
  0x7f   : > { %877 = vmatmul.bf16.vlgmr.msra.gmra.mxu0 %v1961_v54  ;;  %v1525_v23 = vld [vmem:[%s1869_s9 + $0x74] sm:$0xf0]  ;;  %v1432_v24 = vld [vmem:[%s1869_s9 + $0x168] sm:$0xf]  ;;  %v1028_v25 = vld [vmem:[%s2071_s3] sm:$0xff]  ;;  %v1453_v26 = vor.u32 %v1559_v16, %v1450_v17  ;;  %1616 = vset.pattern.permute.xlu0 %v1658_v30  ;;  %s1574_s15 = sshll.u32 (%p1719_p6), %s1648_s17, 4 }
  0x80   : > { %925 = vmatpush.bf16.msrb.mxu0 %v1369_v42  ;;  %905 = vmatmul.bf16.vlgmr.msra.gmra.mxu2 %v1961_v54  ;;  %v1557_v27 = vld [vmem:[%s1869_s9 + $0x174] sm:$0xf0]  ;;  %v1523_v28 = vld [vmem:[%s1869_s9 + $0x6c] sm:$0xf]  ;;  %v1306_v29 = vld [vmem:[%s1869_s9 + $0x78] sm:$0xf0]  ;;  %v1305_v33 = vor.u32 %v1525_v23, %v1304_v19  ;;  %s1076_s12 = scalar_lea.vmem (%p1719_p6), %s2072_s4, %s1574_s15 }
  0x81   : > { %939 = vmatpush.bf16.msrb.mxu1 %v1497_v45  ;;  %953 = vmatpush.bf16.msrb.mxu2 %v1373_v46  ;;  %v1555_v31 = vld [vmem:[%s1869_s9 + $0x16c] sm:$0xf]  ;;  %v1434_v32 = vld [vmem:[%s1869_s9 + $0x178] sm:$0xf0]  ;;  %v1433_v34 = vor.u32 %v1557_v27, %v1432_v24  ;;  %v1309_v35 = vor.u32 %v1523_v28, %v1306_v29  ;;  %v1288_v36 = vld [vmem:[%s1869_s9 + $0x48] sm:$0xf] }
  0x82   : > { %967 = vmatpush.bf16.msrb.mxu3 %v1501_v50  ;;  %891 = vmatmul.bf16.vlgmr.msra.gmra.mxu1 %v1965_v57  ;;  %v1521_v37 = vld [vmem:[%s1869_s9 + $0x54] sm:$0xf0]  ;;  %v1416_v38 = vld [vmem:[%s1869_s9 + $0x148] sm:$0xf]  ;;  %v1437_v39 = vor.u32 %v1555_v31, %v1434_v32  ;;  %v1519_v41 = vld [vmem:[%s1869_s9 + $0x4c] sm:$0xf] }
  0x83   : > { %919 = vmatmul.bf16.vlgmr.msra.gmra.mxu3 %v1965_v57  ;;  %1012 = vperm.xlu0 %1616, %v1008_v20   ;;  %v1553_v40 = vld [vmem:[%s1869_s9 + $0x154] sm:$0xf0]  ;;  %v1290_v42 = vld [vmem:[%s1869_s9 + $0x58] sm:$0xf0]  ;;  %v1551_v43 = vld [vmem:[%s1869_s9 + $0x14c] sm:$0xf]  ;;  %v1289_v45 = vor.u32 %v1521_v37, %v1288_v36 }
  0x84   : > { %926 = vmatpush.bf16.msrb.mxu0 %v1353_v58  ;;  %1617 = vset.pattern.permute.xlu1 %v1658_v30  ;;  %v1418_v44 = vld [vmem:[%s1869_s9 + $0x158] sm:$0xf0]  ;;  %v1272_v46 = vld [vmem:[%s1869_s9 + $0x28] sm:$0xf]  ;;  %v1417_v48 = vor.u32 %v1553_v40, %v1416_v38  ;;  %v1293_v49 = vor.u32 %v1519_v41, %v1290_v42  ;;  %v1517_v50 = vld [vmem:[%s1869_s9 + $0x34] sm:$0xf0] }
  0x85   : > { %940 = vmatpush.bf16.msrb.mxu1 %v1481_v59  ;;  %954 = vmatpush.bf16.msrb.mxu2 %v1357_v60  ;;  %v1009_v47 = vld [vmem:[%s2070_s2 + $0x8] sm:$0xff]  ;;  %v1421_v53 = vor.u32 %v1551_v43, %v1418_v44  ;;  %v1549_v55 = vld [vmem:[%s1869_s9 + $0x134] sm:$0xf0]  ;;  %v1274_v58 = vld [vmem:[%s1869_s9 + $0x38] sm:$0xf0]  ;;  %v1273_v61 = vor.u32 %v1517_v50, %v1272_v46 }
  0x86   : > { %968 = vmatpush.bf16.msrb.mxu3 %v1485_v0  ;;  %1032 = vperm.xlu1 %1617, %v1028_v25   ;;  %v1400_v51 = vld [vmem:[%s1869_s9 + $0x128] sm:$0xf]  ;;  %v1515_v56 = vld [vmem:[%s1869_s9 + $0x2c] sm:$0xf]  ;;  %v1402_v60 = vld [vmem:[%s1869_s9 + $0x138] sm:$0xf0] }
  0x87   : > { %v1029_v52 = vld [vmem:[%s2071_s3 + $0x8] sm:$0xff]  ;;  %v1401_v62 = vor.u32 %v1549_v55, %v1400_v51  ;;  %v1277_v63 = vor.u32 %v1515_v56, %v1274_v58  ;;  %v1513_v1 = vld [vmem:[%s1869_s9 + $0x14] sm:$0xf0] }
  0x88   : > { %927 = vmatpush.bf16.msrb.mxu0 %v1337_v6  ;;  %v1547_v59 = vld [vmem:[%s1869_s9 + $0x12c] sm:$0xf]  ;;  %v1256_v0 = vld [vmem:[%s1869_s9 + $0x8] sm:$0xf]  ;;  %v1545_v4 = vld [vmem:[%s1869_s9 + $0x114] sm:$0xf0] }
  0x89   : > { %941 = vmatpush.bf16.msrb.mxu1 %v1465_v7  ;;  %955 = vmatpush.bf16.msrb.mxu2 %v1341_v8  ;;  %v1384_v2 = vld [vmem:[%s1869_s9 + $0x108] sm:$0xf]  ;;  %v1405_v3 = vor.u32 %v1547_v59, %v1402_v60  ;;  %v1511_v5 = vld [vmem:[%s1869_s9 + $0xc] sm:$0xf]  ;;  %v1258_v6 = vld [vmem:[%s1869_s9 + $0x18] sm:$0xf0]  ;;  %v1257_v9 = vor.u32 %v1513_v1, %v1256_v0 }
  0x8a   : > { %969 = vmatpush.bf16.msrb.mxu3 %v1469_v12  ;;  %v1543_v7 = vld [vmem:[%s1869_s9 + $0x10c] sm:$0xf]  ;;  %v1386_v8 = vld [vmem:[%s1869_s9 + $0x118] sm:$0xf0]  ;;  %v1385_v10 = vor.u32 %v1545_v4, %v1384_v2  ;;  %v1261_v11 = vor.u32 %v1511_v5, %v1258_v6  ;;  %s1237_s9 = sshll.u32 %s381_s7, 5 }
  0x8b   : > { %1017 = vperm.xlu0 %1616, %v1009_v47   ;;  %v1389_v12 = vor.u32 %v1543_v7, %v1386_v8  ;;  %s2037_s10 = scalar_lea.vmem [#allocation4], %s1237_s9 }
  0x8c   : > { %928 = vmatpush.bf16.msrb.mxu0 %v1321_v18 }
  0x8d   : > { %942 = vmatpush.bf16.msrb.mxu1 %v1449_v21  ;;  %956 = vmatpush.bf16.msrb.mxu2 %v1325_v22 }
  0x8e   : > { %970 = vmatpush.bf16.msrb.mxu3 %v1453_v26  ;;  %1037 = vperm.xlu1 %1617, %v1029_v52  }
  0x90   : > { %929 = vmatpush.bf16.msrb.mxu0 %v1305_v33 }
  0x91   : > { %943 = vmatpush.bf16.msrb.mxu1 %v1433_v34  ;;  %957 = vmatpush.bf16.msrb.mxu2 %v1309_v35 }
  0x92   : > { %971 = vmatpush.bf16.msrb.mxu3 %v1437_v39 }
  0x94   : > { %930 = vmatpush.bf16.msrb.mxu0 %v1289_v45 }
  0x95   : > { %944 = vmatpush.bf16.msrb.mxu1 %v1417_v48  ;;  %958 = vmatpush.bf16.msrb.mxu2 %v1293_v49 }
  0x96   : > { %972 = vmatpush.bf16.msrb.mxu3 %v1421_v53 }
  0x98   : > { %931 = vmatpush.bf16.msrb.mxu0 %v1273_v61 }
  0x99   : > { %945 = vmatpush.bf16.msrb.mxu1 %v1401_v62  ;;  %959 = vmatpush.bf16.msrb.mxu2 %v1277_v63 }
  0x9a   : > { %973 = vmatpush.bf16.msrb.mxu3 %v1405_v3 }
  0x9c   : > { %932 = vmatpush.bf16.msrb.mxu0 %v1257_v9 }
  0x9d   : > { %946 = vmatpush.bf16.msrb.mxu1 %v1385_v10  ;;  %960 = vmatpush.bf16.msrb.mxu2 %v1261_v11 }
  0x9e   : > { %974 = vmatpush.bf16.msrb.mxu3 %v1389_v12 }
  0x9f   : > { %933 = vmatmul.bf16.vlgmr.msrb.gmra.mxu0 %v1961_v54 }
  0xa0   : > { %947 = vmatmul.bf16.vlgmr.msrb.gmra.mxu1 %v1965_v57  ;;  %961 = vmatmul.bf16.vlgmr.msrb.gmra.mxu2 %v1961_v54 }
  0xa1   : > { %975 = vmatmul.bf16.vlgmr.msrb.gmra.mxu3 %v1965_v57 }
  0xf5   : > { %v1013_v13 = vpop.permute.xlu0 %1012 }
  0xf8   : > { %v1033_v17 = vpop.permute.xlu1 %1032 }
  0xfc   : > { %v878_v14 = vpop.f32.mrf.mxu0 }
  0xfd   : > { %v1018_v26 = vpop.permute.xlu0 %1017 }
  0xff   : > { %v892_v15 = vpop.f32.mrf.mxu1 }
 0x100   : > { %v893_v16 = vadd.f32 %v892_v15, %v878_v14  ;;  %v1038_v29 = vpop.permute.xlu1 %1037 }
 0x102   : > { %v1020_v18 = vmul.f32 %v1013_v13, %v893_v16 }
 0x103   : > { %v906_v19 = vpop.f32.mrf.mxu2 }
 0x104   : > { %v1040_v22 = vadd.f32 %v1033_v17, %v1020_v18  ;;  %v880_v23 = vpop.f32.mrf.mxu0 }
 0x106   : > { %v920_v20 = vpop.f32.mrf.mxu3  ;;  %v1048_v57 = vmax.f32 %v1040_v22, 0.0 }
 0x107   : > { %v921_v21 = vadd.f32 %v920_v20, %v906_v19  ;;  %v894_v25 = vpop.f32.mrf.mxu1 }
 0x108   : > { %v895_v27 = vadd.f32 %v894_v25, %v880_v23 }
 0x109   : > { %v1021_v24 = vmul.f32 %v1013_v13, %v921_v21 }
 0x10a   : > { %v1024_v28 = vmul.f32 %v1018_v26, %v895_v27 }
 0x10b   : > { %v1041_v54 = vadd.f32 %v1033_v17, %v1021_v24  ;;  %v908_v31 = vpop.f32.mrf.mxu2 }
 0x10c   : > { %v1044_v35 = vadd.f32 %v1038_v29, %v1024_v28 }
 0x10d   : > { %v1049_v30 = vmax.f32 %v1041_v54, 0.0 }
 0x10e   : > { %v922_v32 = vpop.f32.mrf.mxu3  ;;  %v1052_v38 = vmax.f32 %v1044_v35, 0.0 }
 0x10f   : > { %v1056_v33 = vpack.c.bf16 %v1049_v30, %v1048_v57  ;;  %v923_v34 = vadd.f32 %v922_v32, %v908_v31 }
 0x111   : > { %1060 = vst [vmem:[%s2037_s10] sm:$0xff] %v1056_v33  ;;  %v1025_v36 = vmul.f32 %v1018_v26, %v923_v34 }
 0x113   : > { %v1045_v37 = vadd.f32 %v1038_v29, %v1025_v36 }
 0x115   : > { %v1053_v39 = vmax.f32 %v1045_v37, 0.0 }
 0x117   : > { %v1058_v40 = vpack.c.bf16 %v1053_v39, %v1052_v38 }
 0x118   : > { %v1089_v5 = vld [vmem:[%s2037_s10] sm:$0xff] (%p1719_p6) }
 0x119   : > { %1062 = vst [vmem:[%s2037_s10 + $0x10] sm:$0xff] %v1058_v40 }
 0x11a   : > { %1090 = vst [vmem:[%s1076_s12] sm:$0xff] (%p1719_p6), %v1089_v5 }
 0x11c   : > { %v934_v41 = vpop.f32.mrf.mxu0 }
 0x11d   : > { %v948_v42 = vpop.f32.mrf.mxu1 }
 0x11e   : > { %v949_v43 = vadd.f32 %v948_v42, %v934_v41 }
 0x120   : > { %v1022_v44 = vmul.f32 %v1013_v13, %v949_v43  ;;  %v1093_v7 = vld [vmem:[%s2037_s10 + $0x10] sm:$0xff] (%p1719_p6) }
 0x121   : > { %1094 = vst [vmem:[%s1076_s12 + $0x80] sm:$0xff] (%p1719_p6), %v1093_v7 }
 0x122   : > { %v1042_v48 = vadd.f32 %v1033_v17, %v1022_v44 }
 0x123   : > { %v962_v45 = vpop.f32.mrf.mxu2 }
 0x124   : > { %v976_v46 = vpop.f32.mrf.mxu3  ;;  %v936_v47 = vpop.f32.mrf.mxu0  ;;  %v1050_v53 = vmax.f32 %v1042_v48, 0.0 }
 0x125   : > { %v977_v49 = vadd.f32 %v976_v46, %v962_v45  ;;  %v950_v50 = vpop.f32.mrf.mxu1 }
 0x126   : > { %v951_v52 = vadd.f32 %v950_v50, %v936_v47 }
 0x127   : > { %v1023_v51 = vmul.f32 %v1013_v13, %v977_v49 }
 0x128   : > { %v1026_v58 = vmul.f32 %v1018_v26, %v951_v52 }
 0x129   : > { %v1043_v55 = vadd.f32 %v1033_v17, %v1023_v51 }
 0x12a   : > { %v1046_v63 = vadd.f32 %v1038_v29, %v1026_v58 }
 0x12b   : > { %v1051_v56 = vmax.f32 %v1043_v55, 0.0  ;;  %v964_v59 = vpop.f32.mrf.mxu2 }
 0x12c   : > { %v978_v60 = vpop.f32.mrf.mxu3  ;;  %v1054_v2 = vmax.f32 %v1046_v63, 0.0 }
 0x12d   : > { %v1057_v61 = vpack.c.bf16 %v1051_v56, %v1050_v53  ;;  %v979_v62 = vadd.f32 %v978_v60, %v964_v59 }
 0x12f   : > { %1061 = vst [vmem:[%s2037_s10 + $0x8] sm:$0xff] %v1057_v61  ;;  %v1027_v0 = vmul.f32 %v1018_v26, %v979_v62 }
 0x131   : > { %v1047_v1 = vadd.f32 %v1038_v29, %v1027_v0 }
 0x133   : > { %v1055_v3 = vmax.f32 %v1047_v1, 0.0  ;;  %1070 = sbr.rel (!%p1719_p6) target bundleno = 320 (0x140), region = 71 }
 0x135   : > { %v1059_v4 = vpack.c.bf16 %v1055_v3, %v1054_v2 }
 0x136   : > { %v1091_v6 = vld [vmem:[%s2037_s10 + $0x8] sm:$0xff] (%p1719_p6) }
 0x137   : > { %1063 = vst [vmem:[%s2037_s10 + $0x18] sm:$0xff] %v1059_v4 }
 0x138   : > { %1092 = vst [vmem:[%s1076_s12 + $0x8] sm:$0xff] %v1091_v6 }
 0x13e   : > { %v1095_v8 = vld [vmem:[%s2037_s10 + $0x18] sm:$0xff] }
 0x13f   : > { %1096 = vst [vmem:[%s1076_s12 + $0x88] sm:$0xff] %v1095_v8 }
 0x140 PF: > { %s14_s19 = sadd.s32 1, %s1656_s19   ;;  %s2074_s15 = smov %s1644_s16 }
 0x141   : > { %p11_p11 = scmp.ge.s32.totalorder %s14_s19, 10   ;;  %s2075_s16 = smov %s1724_s25 }
 0x142   : > { %s2076_s17 = smov %s1652_s18  ;;  %s2077_s18 = smov %s2079_s20 }
 0x143   :  { %13 = sbr.rel (!%p11_p11) target bundleno = 3 (0x3), region = 134 }

// kernel: image_feature_extractor_bev_forward.40
= control target key start
LH: loop header
LB: loop body
LE: loop exit
PB: predicated region body
PF: predicated region fallthrough
CT: control target
= control target key end

     0   :  { %s1684_s15 = smov 0   ;;  %s1686_s16 = smov 0   ;;  %s2068_s0 = inlined_call_operand.vmem [shape: bf16[16,256], index: 0, kind: input, shape index: {}]   ;;  %s2069_s1 = inlined_call_operand.vmem [shape: bf16[256,1024], index: 1, kind: input, shape index: {}]   ;;  %s2070_s2 = inlined_call_operand.vmem [shape: f32[16,1], index: 2, kind: input, shape index: {}]   ;;  %s2071_s3 = inlined_call_operand.vmem [shape: f32[16,1], index: 3, kind: input, shape index: {}]   ;;  %s2072_s4 = inlined_call_operand.vmem [shape: bf16[16,1024], index: 4, kind: output, shape index: {}]  }
   0x1   :  { %s1688_s17 = smov 0   ;;  %s1690_s18 = smov 0  }
   0x2   :  { %s1692_s19 = smov 0  }
   0x3 LB: > { %s29_s20 = sadd.s32 1, %s1652_s18  ;;  %s1225_s21 = sadd.s32 4294967295, %s1656_s19   ;;  %s1656_s19 = sphi %s1692_s19, %s14_s19   ;;  %s1652_s18 = sphi %s1690_s18, %s2077_s18   ;;  %s1648_s17 = sphi %s1688_s17, %s2076_s17   ;;  %s1644_s16 = sphi %s1686_s16, %s2075_s16   ;;  %s1640_s15 = sphi %s1684_s15, %s2074_s15  }
   0x4   : > { %p31_p0 = scmp.ge.s32.totalorder %s29_s20, 2  ;;  %p77_p1 = scmp.ne.s32.totalorder %s1644_s16, %s1640_s15 }
   0x5   : > { %p78_p2 = scmp.eq.s32.totalorder %s1656_s19, 0  ;;  %p161_p4 = scmp.eq.s32.totalorder %s1225_s21, 1 }
   0x6   : > { %s2079_s20 = smov (%p31_p0, %s29_s20), 0  ;;  %s70_s23 = sadd.s32 1, %s1644_s16 }
   0x7   : > { %p79_p3 = por %p78_p2, %p77_p1  ;;  %s66_s22 = ssub.s32 %s1652_s18, %s2079_s20 }
   0x8   : > { %p68_p5 = scmp.eq.s32.totalorder %s66_s22, 0  ;;  %p1719_p6 = por %p161_p4, %p77_p1 }
   0x9   : > { %p1231_p7 = scmp.ge.s32.totalorder %s1656_s19, 2 }
   0xa   : > { %s1724_s25 = scalar_select %p68_p5, %s1644_s16, %s70_s23  }
   0xb   : > { %216 = sbr.rel (%p1231_p7) target bundleno = 84 (0x54), region = 28 }
  0x10   : > { %219 = sbr.rel (!%p79_p3) target bundleno = 84 (0x54), region = 32  ;;  %s221_s26 = sand.u32 (%p79_p3), 1, %s1644_s16  }
  0x11   : > { %s1507_s27 = sshll.u32 (%p79_p3), %s1652_s18, 4  ;;  %s1232_s28 = sshll.u32 (%p79_p3), %s221_s26, 9 }
  0x12   : > { %s1732_s5 = scalar_lea.vmem (%p79_p3), %s2069_s1, %s1507_s27  ;;  %s1737_s6 = scalar_lea.vmem (%p79_p3), [#allocation3], %s1232_s28 }
  0x13   : > { %v242_v0 = vld [vmem:[%s1732_s5] sm:$0xff] (%p79_p3)  ;;  %v244_v1 = vld [vmem:[%s1732_s5 + $0x8] sm:$0xff] (%p79_p3) }
  0x14   : > { %v246_v2 = vld [vmem:[%s1732_s5 + $0x20] sm:$0xff] (%p79_p3)  ;;  %243 = vst [vmem:[%s1737_s6] sm:$0xff] (%p79_p3), %v242_v0  ;;  %v248_v3 = vld [vmem:[%s1732_s5 + $0x28] sm:$0xff] (%p79_p3) }
  0x15   : > { %245 = vst [vmem:[%s1737_s6 + $0x8] sm:$0xff] %v244_v1  ;;  %v250_v4 = vld [vmem:[%s1732_s5 + $0x40] sm:$0xff]  ;;  %v252_v5 = vld [vmem:[%s1732_s5 + $0x48] sm:$0xff] }
  0x16   : > { %247 = vst [vmem:[%s1737_s6 + $0x10] sm:$0xff] %v246_v2  ;;  %v254_v6 = vld [vmem:[%s1732_s5 + $0x60] sm:$0xff]  ;;  %v256_v7 = vld [vmem:[%s1732_s5 + $0x68] sm:$0xff] }
  0x17   : > { %249 = vst [vmem:[%s1737_s6 + $0x18] sm:$0xff] %v248_v3  ;;  %v258_v8 = vld [vmem:[%s1732_s5 + $0x80] sm:$0xff]  ;;  %v260_v9 = vld [vmem:[%s1732_s5 + $0x88] sm:$0xff] }
  0x18   : > { %251 = vst [vmem:[%s1737_s6 + $0x20] sm:$0xff] %v250_v4  ;;  %v262_v10 = vld [vmem:[%s1732_s5 + $0xa0] sm:$0xff]  ;;  %v264_v11 = vld [vmem:[%s1732_s5 + $0xa8] sm:$0xff] }
  0x19   : > { %253 = vst [vmem:[%s1737_s6 + $0x28] sm:$0xff] %v252_v5  ;;  %v266_v12 = vld [vmem:[%s1732_s5 + $0xc0] sm:$0xff]  ;;  %v268_v13 = vld [vmem:[%s1732_s5 + $0xc8] sm:$0xff] }
  0x1a   : > { %255 = vst [vmem:[%s1737_s6 + $0x30] sm:$0xff] %v254_v6  ;;  %v270_v14 = vld [vmem:[%s1732_s5 + $0xe0] sm:$0xff]  ;;  %v272_v15 = vld [vmem:[%s1732_s5 + $0xe8] sm:$0xff] }
  0x1b   : > { %257 = vst [vmem:[%s1737_s6 + $0x38] sm:$0xff] %v256_v7  ;;  %v274_v16 = vld [vmem:[%s1732_s5 + $0x100] sm:$0xff]  ;;  %v276_v17 = vld [vmem:[%s1732_s5 + $0x108] sm:$0xff] }
  0x1c   : > { %259 = vst [vmem:[%s1737_s6 + $0x40] sm:$0xff] %v258_v8  ;;  %v278_v18 = vld [vmem:[%s1732_s5 + $0x120] sm:$0xff]  ;;  %v280_v19 = vld [vmem:[%s1732_s5 + $0x128] sm:$0xff] }
  0x1d   : > { %261 = vst [vmem:[%s1737_s6 + $0x48] sm:$0xff] %v260_v9  ;;  %v282_v20 = vld [vmem:[%s1732_s5 + $0x140] sm:$0xff]  ;;  %v284_v21 = vld [vmem:[%s1732_s5 + $0x148] sm:$0xff] }
  0x1e   : > { %263 = vst [vmem:[%s1737_s6 + $0x50] sm:$0xff] %v262_v10  ;;  %v286_v22 = vld [vmem:[%s1732_s5 + $0x160] sm:$0xff]  ;;  %v288_v23 = vld [vmem:[%s1732_s5 + $0x168] sm:$0xff] }
  0x1f   : > { %265 = vst [vmem:[%s1737_s6 + $0x58] sm:$0xff] %v264_v11  ;;  %v290_v24 = vld [vmem:[%s1732_s5 + $0x180] sm:$0xff]  ;;  %v292_v25 = vld [vmem:[%s1732_s5 + $0x188] sm:$0xff] }
  0x20   : > { %267 = vst [vmem:[%s1737_s6 + $0x60] sm:$0xff] %v266_v12  ;;  %v294_v26 = vld [vmem:[%s1732_s5 + $0x1a0] sm:$0xff]  ;;  %v296_v27 = vld [vmem:[%s1732_s5 + $0x1a8] sm:$0xff] }
  0x21   : > { %269 = vst [vmem:[%s1737_s6 + $0x68] sm:$0xff] %v268_v13  ;;  %v298_v28 = vld [vmem:[%s1732_s5 + $0x1c0] sm:$0xff]  ;;  %v300_v29 = vld [vmem:[%s1732_s5 + $0x1c8] sm:$0xff] }
  0x22   : > { %271 = vst [vmem:[%s1737_s6 + $0x70] sm:$0xff] %v270_v14  ;;  %v302_v30 = vld [vmem:[%s1732_s5 + $0x1e0] sm:$0xff]  ;;  %v304_v31 = vld [vmem:[%s1732_s5 + $0x1e8] sm:$0xff] }
  0x23   : > { %273 = vst [vmem:[%s1737_s6 + $0x78] sm:$0xff] %v272_v15  ;;  %v306_v32 = vld [vmem:[%s1732_s5 + $0x200] sm:$0xff]  ;;  %v308_v33 = vld [vmem:[%s1732_s5 + $0x208] sm:$0xff] }
  0x24   : > { %275 = vst [vmem:[%s1737_s6 + $0x80] sm:$0xff] %v274_v16  ;;  %v310_v34 = vld [vmem:[%s1732_s5 + $0x220] sm:$0xff]  ;;  %v312_v35 = vld [vmem:[%s1732_s5 + $0x228] sm:$0xff] }
  0x25   : > { %277 = vst [vmem:[%s1737_s6 + $0x88] sm:$0xff] %v276_v17  ;;  %v314_v36 = vld [vmem:[%s1732_s5 + $0x240] sm:$0xff]  ;;  %v316_v37 = vld [vmem:[%s1732_s5 + $0x248] sm:$0xff] }
  0x26   : > { %279 = vst [vmem:[%s1737_s6 + $0x90] sm:$0xff] %v278_v18  ;;  %v318_v38 = vld [vmem:[%s1732_s5 + $0x260] sm:$0xff]  ;;  %v320_v39 = vld [vmem:[%s1732_s5 + $0x268] sm:$0xff] }
  0x27   : > { %281 = vst [vmem:[%s1737_s6 + $0x98] sm:$0xff] %v280_v19  ;;  %v322_v40 = vld [vmem:[%s1732_s5 + $0x280] sm:$0xff]  ;;  %v324_v41 = vld [vmem:[%s1732_s5 + $0x288] sm:$0xff] }
  0x28   : > { %283 = vst [vmem:[%s1737_s6 + $0xa0] sm:$0xff] %v282_v20  ;;  %v326_v42 = vld [vmem:[%s1732_s5 + $0x2a0] sm:$0xff]  ;;  %v328_v43 = vld [vmem:[%s1732_s5 + $0x2a8] sm:$0xff] }
  0x29   : > { %285 = vst [vmem:[%s1737_s6 + $0xa8] sm:$0xff] %v284_v21  ;;  %v330_v44 = vld [vmem:[%s1732_s5 + $0x2c0] sm:$0xff]  ;;  %v332_v45 = vld [vmem:[%s1732_s5 + $0x2c8] sm:$0xff] }
  0x2a   : > { %287 = vst [vmem:[%s1737_s6 + $0xb0] sm:$0xff] %v286_v22  ;;  %v334_v46 = vld [vmem:[%s1732_s5 + $0x2e0] sm:$0xff]  ;;  %v336_v47 = vld [vmem:[%s1732_s5 + $0x2e8] sm:$0xff] }
  0x2b   : > { %289 = vst [vmem:[%s1737_s6 + $0xb8] sm:$0xff] %v288_v23  ;;  %v338_v48 = vld [vmem:[%s1732_s5 + $0x300] sm:$0xff]  ;;  %v340_v49 = vld [vmem:[%s1732_s5 + $0x308] sm:$0xff] }
  0x2c   : > { %291 = vst [vmem:[%s1737_s6 + $0xc0] sm:$0xff] %v290_v24  ;;  %v342_v50 = vld [vmem:[%s1732_s5 + $0x320] sm:$0xff]  ;;  %v344_v51 = vld [vmem:[%s1732_s5 + $0x328] sm:$0xff] }
  0x2d   : > { %293 = vst [vmem:[%s1737_s6 + $0xc8] sm:$0xff] %v292_v25  ;;  %v346_v52 = vld [vmem:[%s1732_s5 + $0x340] sm:$0xff]  ;;  %v348_v53 = vld [vmem:[%s1732_s5 + $0x348] sm:$0xff] }
  0x2e   : > { %295 = vst [vmem:[%s1737_s6 + $0xd0] sm:$0xff] %v294_v26  ;;  %v350_v54 = vld [vmem:[%s1732_s5 + $0x360] sm:$0xff]  ;;  %v352_v55 = vld [vmem:[%s1732_s5 + $0x368] sm:$0xff] }
  0x2f   : > { %297 = vst [vmem:[%s1737_s6 + $0xd8] sm:$0xff] %v296_v27  ;;  %v354_v56 = vld [vmem:[%s1732_s5 + $0x380] sm:$0xff]  ;;  %v356_v57 = vld [vmem:[%s1732_s5 + $0x388] sm:$0xff] }
  0x30   : > { %299 = vst [vmem:[%s1737_s6 + $0xe0] sm:$0xff] %v298_v28  ;;  %v358_v58 = vld [vmem:[%s1732_s5 + $0x3a0] sm:$0xff]  ;;  %v360_v59 = vld [vmem:[%s1732_s5 + $0x3a8] sm:$0xff] }
  0x31   : > { %301 = vst [vmem:[%s1737_s6 + $0xe8] sm:$0xff] %v300_v29  ;;  %v362_v60 = vld [vmem:[%s1732_s5 + $0x3c0] sm:$0xff]  ;;  %v364_v61 = vld [vmem:[%s1732_s5 + $0x3c8] sm:$0xff] }
  0x32   : > { %303 = vst [vmem:[%s1737_s6 + $0xf0] sm:$0xff] %v302_v30  ;;  %v366_v62 = vld [vmem:[%s1732_s5 + $0x3e0] sm:$0xff]  ;;  %v368_v63 = vld [vmem:[%s1732_s5 + $0x3e8] sm:$0xff] }
  0x33   : > { %305 = vst [vmem:[%s1737_s6 + $0xf8] sm:$0xff] %v304_v31 }
  0x34   : > { %307 = vst [vmem:[%s1737_s6 + $0x100] sm:$0xff] %v306_v32 }
  0x35   : > { %309 = vst [vmem:[%s1737_s6 + $0x108] sm:$0xff] %v308_v33 }
  0x36   : > { %311 = vst [vmem:[%s1737_s6 + $0x110] sm:$0xff] %v310_v34 }
  0x37   : > { %313 = vst [vmem:[%s1737_s6 + $0x118] sm:$0xff] %v312_v35 }
  0x38   : > { %315 = vst [vmem:[%s1737_s6 + $0x120] sm:$0xff] %v314_v36 }
  0x39   : > { %317 = vst [vmem:[%s1737_s6 + $0x128] sm:$0xff] %v316_v37 }
  0x3a   : > { %319 = vst [vmem:[%s1737_s6 + $0x130] sm:$0xff] %v318_v38 }
  0x3b   : > { %321 = vst [vmem:[%s1737_s6 + $0x138] sm:$0xff] %v320_v39 }
  0x3c   : > { %323 = vst [vmem:[%s1737_s6 + $0x140] sm:$0xff] %v322_v40 }
  0x3d   : > { %325 = vst [vmem:[%s1737_s6 + $0x148] sm:$0xff] %v324_v41 }
  0x3e   : > { %327 = vst [vmem:[%s1737_s6 + $0x150] sm:$0xff] %v326_v42 }
  0x3f   : > { %329 = vst [vmem:[%s1737_s6 + $0x158] sm:$0xff] %v328_v43 }
  0x40   : > { %331 = vst [vmem:[%s1737_s6 + $0x160] sm:$0xff] %v330_v44 }
  0x41   : > { %333 = vst [vmem:[%s1737_s6 + $0x168] sm:$0xff] %v332_v45 }
  0x42   : > { %335 = vst [vmem:[%s1737_s6 + $0x170] sm:$0xff] %v334_v46 }
  0x43   : > { %337 = vst [vmem:[%s1737_s6 + $0x178] sm:$0xff] %v336_v47 }
  0x44   : > { %339 = vst [vmem:[%s1737_s6 + $0x180] sm:$0xff] %v338_v48 }
  0x45   : > { %341 = vst [vmem:[%s1737_s6 + $0x188] sm:$0xff] %v340_v49 }
  0x46   : > { %343 = vst [vmem:[%s1737_s6 + $0x190] sm:$0xff] %v342_v50 }
  0x47   : > { %345 = vst [vmem:[%s1737_s6 + $0x198] sm:$0xff] %v344_v51 }
  0x48   : > { %347 = vst [vmem:[%s1737_s6 + $0x1a0] sm:$0xff] %v346_v52 }
  0x49   : > { %349 = vst [vmem:[%s1737_s6 + $0x1a8] sm:$0xff] %v348_v53 }
  0x4a   : > { %351 = vst [vmem:[%s1737_s6 + $0x1b0] sm:$0xff] %v350_v54 }
  0x4b   : > { %353 = vst [vmem:[%s1737_s6 + $0x1b8] sm:$0xff] %v352_v55 }
  0x4c   : > { %355 = vst [vmem:[%s1737_s6 + $0x1c0] sm:$0xff] %v354_v56 }
  0x4d   : > { %357 = vst [vmem:[%s1737_s6 + $0x1c8] sm:$0xff] %v356_v57 }
  0x4e   : > { %359 = vst [vmem:[%s1737_s6 + $0x1d0] sm:$0xff] %v358_v58 }
  0x4f   : > { %361 = vst [vmem:[%s1737_s6 + $0x1d8] sm:$0xff] %v360_v59 }
  0x50   : > { %363 = vst [vmem:[%s1737_s6 + $0x1e0] sm:$0xff] %v362_v60 }
  0x51   : > { %365 = vst [vmem:[%s1737_s6 + $0x1e8] sm:$0xff] %v364_v61 }
  0x52   : > { %367 = vst [vmem:[%s1737_s6 + $0x1f0] sm:$0xff] %v366_v62 }
  0x53   : > { %369 = vst [vmem:[%s1737_s6 + $0x1f8] sm:$0xff] %v368_v63 }
  0x54 PF: > { %p1235_p8 = scmp.ge.s32.totalorder %s1656_s19, 1  ;;  %p374_p9 = scmp.lt.s32.totalorder %s1656_s19, 3 }
  0x56   : > { %p375_p10 = pnand %p1235_p8, %p374_p9 }
  0x57   : > { %s381_s7 = sand.u32 (!%p375_p10), 1, %s1640_s15  }
  0x58   : > { %378 = sbr.rel (%p375_p10) target bundleno = 320 (0x140), region = 55  ;;  %s1236_s8 = sshll.u32 (!%p375_p10), %s381_s7, 9 }
  0x59   : > { %s1869_s9 = scalar_lea.vmem (!%p375_p10), [#allocation3], %s1236_s8 }
  0x5d   : > { %v1360_v0 = vld [vmem:[%s1869_s9 + $0xe0] sm:$0xf]  ;;  %v1540_v1 = vld [vmem:[%s1869_s9 + $0xec] sm:$0xf0]  ;;  %v1538_v5 = vld [vmem:[%s1869_s9 + $0xe4] sm:$0xf] }
  0x5e   : > { %v1488_v2 = vld [vmem:[%s1869_s9 + $0x1e0] sm:$0xf]  ;;  %v1361_v3 = vor.u32 %v1540_v1, %v1360_v0  ;;  %v1572_v4 = vld [vmem:[%s1869_s9 + $0x1ec] sm:$0xf0]  ;;  %v1362_v6 = vld [vmem:[%s1869_s9 + $0xf0] sm:$0xf0] }
  0x5f   : > { %v1489_v7 = vor.u32 %v1572_v4, %v1488_v2  ;;  %v1365_v8 = vor.u32 %v1538_v5, %v1362_v6  ;;  %v1570_v9 = vld [vmem:[%s1869_s9 + $0x1e4] sm:$0xf]  ;;  %v1490_v10 = vld [vmem:[%s1869_s9 + $0x1f0] sm:$0xf0]  ;;  %v1344_v11 = vld [vmem:[%s1869_s9 + $0xc0] sm:$0xf] }
  0x60   : > { %869 = vmatpush.bf16.msra.mxu0 %v1361_v3  ;;  %v1493_v12 = vor.u32 %v1570_v9, %v1490_v10  ;;  %v1536_v13 = vld [vmem:[%s1869_s9 + $0xcc] sm:$0xf0]  ;;  %v1472_v14 = vld [vmem:[%s1869_s9 + $0x1c0] sm:$0xf]  ;;  %v1534_v18 = vld [vmem:[%s1869_s9 + $0xc4] sm:$0xf] }
  0x61   : > { %v1568_v15 = vld [vmem:[%s1869_s9 + $0x1cc] sm:$0xf0]  ;;  %883 = vmatpush.bf16.msra.mxu1 %v1489_v7  ;;  %897 = vmatpush.bf16.msra.mxu2 %v1365_v8  ;;  %v1345_v16 = vor.u32 %v1536_v13, %v1344_v11  ;;  %v1346_v19 = vld [vmem:[%s1869_s9 + $0xd0] sm:$0xf0]  ;;  %v1566_v20 = vld [vmem:[%s1869_s9 + $0x1c4] sm:$0xf] }
  0x62   : > { %v1473_v17 = vor.u32 %v1568_v15, %v1472_v14  ;;  %911 = vmatpush.bf16.msra.mxu3 %v1493_v12  ;;  %v1349_v21 = vor.u32 %v1534_v18, %v1346_v19  ;;  %v1474_v22 = vld [vmem:[%s1869_s9 + $0x1d0] sm:$0xf0]  ;;  %v1328_v23 = vld [vmem:[%s1869_s9 + $0xa0] sm:$0xf]  ;;  %v1532_v24 = vld [vmem:[%s1869_s9 + $0xac] sm:$0xf0] }
  0x63   : > { %v1477_v25 = vor.u32 %v1566_v20, %v1474_v22  ;;  %v1456_v26 = vld [vmem:[%s1869_s9 + $0x1a0] sm:$0xf]  ;;  %v1564_v27 = vld [vmem:[%s1869_s9 + $0x1ac] sm:$0xf0]  ;;  %v1530_v28 = vld [vmem:[%s1869_s9 + $0xa4] sm:$0xf]  ;;  %v1329_v29 = vor.u32 %v1532_v24, %v1328_v23 }
  0x64   : > { %870 = vmatpush.bf16.msra.mxu0 %v1345_v16  ;;  %v1330_v30 = vld [vmem:[%s1869_s9 + $0xb0] sm:$0xf0]  ;;  %v1562_v31 = vld [vmem:[%s1869_s9 + $0x1a4] sm:$0xf]  ;;  %v1457_v33 = vor.u32 %v1564_v27, %v1456_v26  ;;  %v1312_v35 = vld [vmem:[%s1869_s9 + $0x80] sm:$0xf] }
  0x65   : > { %v1458_v32 = vld [vmem:[%s1869_s9 + $0x1b0] sm:$0xf0]  ;;  %884 = vmatpush.bf16.msra.mxu1 %v1473_v17  ;;  %898 = vmatpush.bf16.msra.mxu2 %v1349_v21  ;;  %v1333_v34 = vor.u32 %v1530_v28, %v1330_v30  ;;  %v1528_v36 = vld [vmem:[%s1869_s9 + $0x8c] sm:$0xf0]  ;;  %v1440_v37 = vld [vmem:[%s1869_s9 + $0x180] sm:$0xf] }
  0x66   : > { %912 = vmatpush.bf16.msra.mxu3 %v1477_v25  ;;  %v1461_v38 = vor.u32 %v1562_v31, %v1458_v32  ;;  %v1560_v39 = vld [vmem:[%s1869_s9 + $0x18c] sm:$0xf0]  ;;  %v1526_v40 = vld [vmem:[%s1869_s9 + $0x84] sm:$0xf]  ;;  %v1314_v41 = vld [vmem:[%s1869_s9 + $0x90] sm:$0xf0]  ;;  %v1313_v44 = vor.u32 %v1528_v36, %v1312_v35 }
  0x67   : > { %v1558_v42 = vld [vmem:[%s1869_s9 + $0x184] sm:$0xf]  ;;  %v1442_v43 = vld [vmem:[%s1869_s9 + $0x190] sm:$0xf0]  ;;  %v1441_v45 = vor.u32 %v1560_v39, %v1440_v37  ;;  %v1317_v46 = vor.u32 %v1526_v40, %v1314_v41  ;;  %v1296_v47 = vld [vmem:[%s1869_s9 + $0x60] sm:$0xf] }
  0x68   : > { %871 = vmatpush.bf16.msra.mxu0 %v1329_v29  ;;  %v1524_v48 = vld [vmem:[%s1869_s9 + $0x6c] sm:$0xf0]  ;;  %v1424_v49 = vld [vmem:[%s1869_s9 + $0x160] sm:$0xf]  ;;  %v1445_v50 = vor.u32 %v1558_v42, %v1442_v43  ;;  %v1522_v52 = vld [vmem:[%s1869_s9 + $0x64] sm:$0xf] }
  0x69   : > { %885 = vmatpush.bf16.msra.mxu1 %v1457_v33  ;;  %899 = vmatpush.bf16.msra.mxu2 %v1333_v34  ;;  %v1556_v51 = vld [vmem:[%s1869_s9 + $0x16c] sm:$0xf0]  ;;  %v1298_v53 = vld [vmem:[%s1869_s9 + $0x70] sm:$0xf0]  ;;  %v1554_v54 = vld [vmem:[%s1869_s9 + $0x164] sm:$0xf]  ;;  %v1297_v56 = vor.u32 %v1524_v48, %v1296_v47 }
  0x6a   : > { %913 = vmatpush.bf16.msra.mxu3 %v1461_v38  ;;  %v1426_v55 = vld [vmem:[%s1869_s9 + $0x170] sm:$0xf0]  ;;  %v1425_v57 = vor.u32 %v1556_v51, %v1424_v49  ;;  %v1301_v58 = vor.u32 %v1522_v52, %v1298_v53  ;;  %v1280_v59 = vld [vmem:[%s1869_s9 + $0x40] sm:$0xf]  ;;  %v1520_v60 = vld [vmem:[%s1869_s9 + $0x4c] sm:$0xf0] }
  0x6b   : > { %v1408_v61 = vld [vmem:[%s1869_s9 + $0x140] sm:$0xf]  ;;  %v1429_v62 = vor.u32 %v1554_v54, %v1426_v55  ;;  %v1552_v63 = vld [vmem:[%s1869_s9 + $0x14c] sm:$0xf0]  ;;  %v1518_v0 = vld [vmem:[%s1869_s9 + $0x44] sm:$0xf]  ;;  %v1281_v4 = vor.u32 %v1520_v60, %v1280_v59 }
  0x6c   : > { %872 = vmatpush.bf16.msra.mxu0 %v1313_v44  ;;  %v1282_v1 = vld [vmem:[%s1869_s9 + $0x50] sm:$0xf0]  ;;  %v1550_v2 = vld [vmem:[%s1869_s9 + $0x144] sm:$0xf]  ;;  %v1409_v5 = vor.u32 %v1552_v63, %v1408_v61  ;;  %v1264_v7 = vld [vmem:[%s1869_s9 + $0x20] sm:$0xf] }
  0x6d   : > { %886 = vmatpush.bf16.msra.mxu1 %v1441_v45  ;;  %900 = vmatpush.bf16.msra.mxu2 %v1317_v46  ;;  %v1410_v3 = vld [vmem:[%s1869_s9 + $0x150] sm:$0xf0]  ;;  %v1285_v6 = vor.u32 %v1518_v0, %v1282_v1  ;;  %v1516_v8 = vld [vmem:[%s1869_s9 + $0x2c] sm:$0xf0]  ;;  %v1392_v9 = vld [vmem:[%s1869_s9 + $0x120] sm:$0xf] }
  0x6e   : > { %914 = vmatpush.bf16.msra.mxu3 %v1445_v50  ;;  %v1413_v10 = vor.u32 %v1550_v2, %v1410_v3  ;;  %v1548_v11 = vld [vmem:[%s1869_s9 + $0x12c] sm:$0xf0]  ;;  %v1514_v12 = vld [vmem:[%s1869_s9 + $0x24] sm:$0xf]  ;;  %v1266_v13 = vld [vmem:[%s1869_s9 + $0x30] sm:$0xf0]  ;;  %v1265_v16 = vor.u32 %v1516_v8, %v1264_v7 }
  0x6f   : > { %v1546_v14 = vld [vmem:[%s1869_s9 + $0x124] sm:$0xf]  ;;  %v1394_v15 = vld [vmem:[%s1869_s9 + $0x130] sm:$0xf0]  ;;  %v1248_v17 = vld [vmem:[%s1869_s9] sm:$0xf]  ;;  %v1393_v20 = vor.u32 %v1548_v11, %v1392_v9  ;;  %v1269_v21 = vor.u32 %v1514_v12, %v1266_v13 }
  0x70   : > { %873 = vmatpush.bf16.msra.mxu0 %v1297_v56  ;;  %v1512_v18 = vld [vmem:[%s1869_s9 + $0xc] sm:$0xf0]  ;;  %v1376_v19 = vld [vmem:[%s1869_s9 + $0x100] sm:$0xf]  ;;  %v1510_v23 = vld [vmem:[%s1869_s9 + $0x4] sm:$0xf]  ;;  %v1397_v25 = vor.u32 %v1546_v14, %v1394_v15 }
  0x71   : > { %887 = vmatpush.bf16.msra.mxu1 %v1425_v57  ;;  %901 = vmatpush.bf16.msra.mxu2 %v1301_v58  ;;  %v1544_v22 = vld [vmem:[%s1869_s9 + $0x10c] sm:$0xf0]  ;;  %v1250_v24 = vld [vmem:[%s1869_s9 + $0x10] sm:$0xf0]  ;;  %v1542_v26 = vld [vmem:[%s1869_s9 + $0x104] sm:$0xf]  ;;  %v1249_v32 = vor.u32 %v1512_v18, %v1248_v17 }
  0x72   : > { %915 = vmatpush.bf16.msra.mxu3 %v1429_v62  ;;  %v1378_v27 = vld [vmem:[%s1869_s9 + $0x110] sm:$0xf0]  ;;  %v1368_v28 = vld [vmem:[%s1869_s9 + $0xe8] sm:$0xf]  ;;  %v1541_v29 = vld [vmem:[%s1869_s9 + $0xf4] sm:$0xf0]  ;;  %v1377_v36 = vor.u32 %v1544_v22, %v1376_v19  ;;  %v1253_v37 = vor.u32 %v1510_v23, %v1250_v24 }
  0x73   : > { %v1496_v30 = vld [vmem:[%s1869_s9 + $0x1e8] sm:$0xf]  ;;  %v1573_v31 = vld [vmem:[%s1869_s9 + $0x1f4] sm:$0xf0]  ;;  %v1539_v33 = vld [vmem:[%s1869_s9 + $0xec] sm:$0xf]  ;;  %v1381_v41 = vor.u32 %v1542_v26, %v1378_v27  ;;  %v1369_v42 = vor.u32 %v1541_v29, %v1368_v28 }
  0x74   : > { %874 = vmatpush.bf16.msra.mxu0 %v1281_v4  ;;  %v1370_v34 = vld [vmem:[%s1869_s9 + $0xf8] sm:$0xf0]  ;;  %v1571_v35 = vld [vmem:[%s1869_s9 + $0x1ec] sm:$0xf]  ;;  %v1240_v39 = vld [vmem:[%s2068_s0] sm:$0xf]  ;;  %v1497_v45 = vor.u32 %v1573_v31, %v1496_v30 }
  0x75   : > { %888 = vmatpush.bf16.msra.mxu1 %v1409_v5  ;;  %902 = vmatpush.bf16.msra.mxu2 %v1285_v6  ;;  %v1498_v38 = vld [vmem:[%s1869_s9 + $0x1f8] sm:$0xf0]  ;;  %v1509_v40 = vld [vmem:[%s2068_s0 + $0x4] sm:$0xf0]  ;;  %v1508_v43 = vld [vmem:[%s2068_s0 + $0x4] sm:$0xf]  ;;  %v1373_v46 = vor.u32 %v1539_v33, %v1370_v34 }
  0x76   : > { %916 = vmatpush.bf16.msra.mxu3 %v1413_v10  ;;  %v1242_v44 = vld [vmem:[%s2068_s0 + $0x8] sm:$0xf0]  ;;  %v1352_v47 = vld [vmem:[%s1869_s9 + $0xc8] sm:$0xf]  ;;  %v1537_v48 = vld [vmem:[%s1869_s9 + $0xd4] sm:$0xf0]  ;;  %v1501_v50 = vor.u32 %v1571_v35, %v1498_v38  ;;  %v1961_v54 = vor.u32 %v1509_v40, %v1240_v39 }
  0x77   : > { %v1480_v49 = vld [vmem:[%s1869_s9 + $0x1c8] sm:$0xf]  ;;  %v1569_v51 = vld [vmem:[%s1869_s9 + $0x1d4] sm:$0xf0]  ;;  %v1535_v52 = vld [vmem:[%s1869_s9 + $0xcc] sm:$0xf]  ;;  %v1965_v57 = vor.u32 %v1508_v43, %v1242_v44  ;;  %v1353_v58 = vor.u32 %v1537_v48, %v1352_v47 }
  0x78   : > { %875 = vmatpush.bf16.msra.mxu0 %v1265_v16  ;;  %v1354_v53 = vld [vmem:[%s1869_s9 + $0xd8] sm:$0xf0]  ;;  %v1567_v55 = vld [vmem:[%s1869_s9 + $0x1cc] sm:$0xf]  ;;  %v1481_v59 = vor.u32 %v1569_v51, %v1480_v49  ;;  %v1336_v61 = vld [vmem:[%s1869_s9 + $0xa8] sm:$0xf] }
  0x79   : > { %889 = vmatpush.bf16.msra.mxu1 %v1393_v20  ;;  %903 = vmatpush.bf16.msra.mxu2 %v1269_v21  ;;  %v1482_v56 = vld [vmem:[%s1869_s9 + $0x1d8] sm:$0xf0]  ;;  %v1357_v60 = vor.u32 %v1535_v52, %v1354_v53  ;;  %v1533_v62 = vld [vmem:[%s1869_s9 + $0xb4] sm:$0xf0]  ;;  %v1464_v63 = vld [vmem:[%s1869_s9 + $0x1a8] sm:$0xf] }
  0x7a   : > { %917 = vmatpush.bf16.msra.mxu3 %v1397_v25  ;;  %v1485_v0 = vor.u32 %v1567_v55, %v1482_v56  ;;  %v1565_v1 = vld [vmem:[%s1869_s9 + $0x1b4] sm:$0xf0]  ;;  %v1531_v2 = vld [vmem:[%s1869_s9 + $0xac] sm:$0xf]  ;;  %v1338_v3 = vld [vmem:[%s1869_s9 + $0xb8] sm:$0xf0]  ;;  %v1337_v6 = vor.u32 %v1533_v62, %v1336_v61 }
  0x7b   : > { %v1563_v4 = vld [vmem:[%s1869_s9 + $0x1ac] sm:$0xf]  ;;  %v1466_v5 = vld [vmem:[%s1869_s9 + $0x1b8] sm:$0xf0]  ;;  %v1465_v7 = vor.u32 %v1565_v1, %v1464_v63  ;;  %v1341_v8 = vor.u32 %v1531_v2, %v1338_v3  ;;  %v1320_v9 = vld [vmem:[%s1869_s9 + $0x88] sm:$0xf] }
  0x7c   : > { %876 = vmatpush.bf16.msra.mxu0 %v1249_v32  ;;  %v1529_v10 = vld [vmem:[%s1869_s9 + $0x94] sm:$0xf0]  ;;  %v1448_v11 = vld [vmem:[%s1869_s9 + $0x188] sm:$0xf]  ;;  %v1469_v12 = vor.u32 %v1563_v4, %v1466_v5  ;;  %v1527_v14 = vld [vmem:[%s1869_s9 + $0x8c] sm:$0xf] }
  0x7d   : > { %890 = vmatpush.bf16.msra.mxu1 %v1377_v36  ;;  %904 = vmatpush.bf16.msra.mxu2 %v1253_v37  ;;  %v1561_v13 = vld [vmem:[%s1869_s9 + $0x194] sm:$0xf0]  ;;  %v1322_v15 = vld [vmem:[%s1869_s9 + $0x98] sm:$0xf0]  ;;  %v1559_v16 = vld [vmem:[%s1869_s9 + $0x18c] sm:$0xf]  ;;  %v1321_v18 = vor.u32 %v1529_v10, %v1320_v9 }
  0x7e   : > { %918 = vmatpush.bf16.msra.mxu3 %v1381_v41  ;;  %v1450_v17 = vld [vmem:[%s1869_s9 + $0x198] sm:$0xf0]  ;;  %v1304_v19 = vld [vmem:[%s1869_s9 + $0x68] sm:$0xf]  ;;  %v1008_v20 = vld [vmem:[%s2070_s2] sm:$0xff]  ;;  %v1449_v21 = vor.u32 %v1561_v13, %v1448_v11  ;;  %v1325_v22 = vor.u32 %v1527_v14, %v1322_v15  ;;  %v1658_v30 = vmov 0  }
  0x7f   : > { %877 = vmatmul.bf16.vlgmr.msra.gmra.mxu0 %v1961_v54  ;;  %v1525_v23 = vld [vmem:[%s1869_s9 + $0x74] sm:$0xf0]  ;;  %v1432_v24 = vld [vmem:[%s1869_s9 + $0x168] sm:$0xf]  ;;  %v1028_v25 = vld [vmem:[%s2071_s3] sm:$0xff]  ;;  %v1453_v26 = vor.u32 %v1559_v16, %v1450_v17  ;;  %1616 = vset.pattern.permute.xlu0 %v1658_v30  ;;  %s1574_s15 = sshll.u32 (%p1719_p6), %s1648_s17, 4 }
  0x80   : > { %925 = vmatpush.bf16.msrb.mxu0 %v1369_v42  ;;  %905 = vmatmul.bf16.vlgmr.msra.gmra.mxu2 %v1961_v54  ;;  %v1557_v27 = vld [vmem:[%s1869_s9 + $0x174] sm:$0xf0]  ;;  %v1523_v28 = vld [vmem:[%s1869_s9 + $0x6c] sm:$0xf]  ;;  %v1306_v29 = vld [vmem:[%s1869_s9 + $0x78] sm:$0xf0]  ;;  %v1305_v33 = vor.u32 %v1525_v23, %v1304_v19  ;;  %s1076_s12 = scalar_lea.vmem (%p1719_p6), %s2072_s4, %s1574_s15 }
  0x81   : > { %939 = vmatpush.bf16.msrb.mxu1 %v1497_v45  ;;  %953 = vmatpush.bf16.msrb.mxu2 %v1373_v46  ;;  %v1555_v31 = vld [vmem:[%s1869_s9 + $0x16c] sm:$0xf]  ;;  %v1434_v32 = vld [vmem:[%s1869_s9 + $0x178] sm:$0xf0]  ;;  %v1433_v34 = vor.u32 %v1557_v27, %v1432_v24  ;;  %v1309_v35 = vor.u32 %v1523_v28, %v1306_v29  ;;  %v1288_v36 = vld [vmem:[%s1869_s9 + $0x48] sm:$0xf] }
  0x82   : > { %967 = vmatpush.bf16.msrb.mxu3 %v1501_v50  ;;  %891 = vmatmul.bf16.vlgmr.msra.gmra.mxu1 %v1965_v57  ;;  %v1521_v37 = vld [vmem:[%s1869_s9 + $0x54] sm:$0xf0]  ;;  %v1416_v38 = vld [vmem:[%s1869_s9 + $0x148] sm:$0xf]  ;;  %v1437_v39 = vor.u32 %v1555_v31, %v1434_v32  ;;  %v1519_v41 = vld [vmem:[%s1869_s9 + $0x4c] sm:$0xf] }
  0x83   : > { %919 = vmatmul.bf16.vlgmr.msra.gmra.mxu3 %v1965_v57  ;;  %1012 = vperm.xlu0 %1616, %v1008_v20   ;;  %v1553_v40 = vld [vmem:[%s1869_s9 + $0x154] sm:$0xf0]  ;;  %v1290_v42 = vld [vmem:[%s1869_s9 + $0x58] sm:$0xf0]  ;;  %v1551_v43 = vld [vmem:[%s1869_s9 + $0x14c] sm:$0xf]  ;;  %v1289_v45 = vor.u32 %v1521_v37, %v1288_v36 }
  0x84   : > { %926 = vmatpush.bf16.msrb.mxu0 %v1353_v58  ;;  %1617 = vset.pattern.permute.xlu1 %v1658_v30  ;;  %v1418_v44 = vld [vmem:[%s1869_s9 + $0x158] sm:$0xf0]  ;;  %v1272_v46 = vld [vmem:[%s1869_s9 + $0x28] sm:$0xf]  ;;  %v1417_v48 = vor.u32 %v1553_v40, %v1416_v38  ;;  %v1293_v49 = vor.u32 %v1519_v41, %v1290_v42  ;;  %v1517_v50 = vld [vmem:[%s1869_s9 + $0x34] sm:$0xf0] }
  0x85   : > { %940 = vmatpush.bf16.msrb.mxu1 %v1481_v59  ;;  %954 = vmatpush.bf16.msrb.mxu2 %v1357_v60  ;;  %v1009_v47 = vld [vmem:[%s2070_s2 + $0x8] sm:$0xff]  ;;  %v1421_v53 = vor.u32 %v1551_v43, %v1418_v44  ;;  %v1549_v55 = vld [vmem:[%s1869_s9 + $0x134] sm:$0xf0]  ;;  %v1274_v58 = vld [vmem:[%s1869_s9 + $0x38] sm:$0xf0]  ;;  %v1273_v61 = vor.u32 %v1517_v50, %v1272_v46 }
  0x86   : > { %968 = vmatpush.bf16.msrb.mxu3 %v1485_v0  ;;  %1032 = vperm.xlu1 %1617, %v1028_v25   ;;  %v1400_v51 = vld [vmem:[%s1869_s9 + $0x128] sm:$0xf]  ;;  %v1515_v56 = vld [vmem:[%s1869_s9 + $0x2c] sm:$0xf]  ;;  %v1402_v60 = vld [vmem:[%s1869_s9 + $0x138] sm:$0xf0] }
  0x87   : > { %v1029_v52 = vld [vmem:[%s2071_s3 + $0x8] sm:$0xff]  ;;  %v1401_v62 = vor.u32 %v1549_v55, %v1400_v51  ;;  %v1277_v63 = vor.u32 %v1515_v56, %v1274_v58  ;;  %v1513_v1 = vld [vmem:[%s1869_s9 + $0x14] sm:$0xf0] }
  0x88   : > { %927 = vmatpush.bf16.msrb.mxu0 %v1337_v6  ;;  %v1547_v59 = vld [vmem:[%s1869_s9 + $0x12c] sm:$0xf]  ;;  %v1256_v0 = vld [vmem:[%s1869_s9 + $0x8] sm:$0xf]  ;;  %v1545_v4 = vld [vmem:[%s1869_s9 + $0x114] sm:$0xf0] }
  0x89   : > { %941 = vmatpush.bf16.msrb.mxu1 %v1465_v7  ;;  %955 = vmatpush.bf16.msrb.mxu2 %v1341_v8  ;;  %v1384_v2 = vld [vmem:[%s1869_s9 + $0x108] sm:$0xf]  ;;  %v1405_v3 = vor.u32 %v1547_v59, %v1402_v60  ;;  %v1511_v5 = vld [vmem:[%s1869_s9 + $0xc] sm:$0xf]  ;;  %v1258_v6 = vld [vmem:[%s1869_s9 + $0x18] sm:$0xf0]  ;;  %v1257_v9 = vor.u32 %v1513_v1, %v1256_v0 }
  0x8a   : > { %969 = vmatpush.bf16.msrb.mxu3 %v1469_v12  ;;  %v1543_v7 = vld [vmem:[%s1869_s9 + $0x10c] sm:$0xf]  ;;  %v1386_v8 = vld [vmem:[%s1869_s9 + $0x118] sm:$0xf0]  ;;  %v1385_v10 = vor.u32 %v1545_v4, %v1384_v2  ;;  %v1261_v11 = vor.u32 %v1511_v5, %v1258_v6  ;;  %s1237_s9 = sshll.u32 %s381_s7, 5 }
  0x8b   : > { %1017 = vperm.xlu0 %1616, %v1009_v47   ;;  %v1389_v12 = vor.u32 %v1543_v7, %v1386_v8  ;;  %s2037_s10 = scalar_lea.vmem [#allocation4], %s1237_s9 }
  0x8c   : > { %928 = vmatpush.bf16.msrb.mxu0 %v1321_v18 }
  0x8d   : > { %942 = vmatpush.bf16.msrb.mxu1 %v1449_v21  ;;  %956 = vmatpush.bf16.msrb.mxu2 %v1325_v22 }
  0x8e   : > { %970 = vmatpush.bf16.msrb.mxu3 %v1453_v26  ;;  %1037 = vperm.xlu1 %1617, %v1029_v52  }
  0x90   : > { %929 = vmatpush.bf16.msrb.mxu0 %v1305_v33 }
  0x91   : > { %943 = vmatpush.bf16.msrb.mxu1 %v1433_v34  ;;  %957 = vmatpush.bf16.msrb.mxu2 %v1309_v35 }
  0x92   : > { %971 = vmatpush.bf16.msrb.mxu3 %v1437_v39 }
  0x94   : > { %930 = vmatpush.bf16.msrb.mxu0 %v1289_v45 }
  0x95   : > { %944 = vmatpush.bf16.msrb.mxu1 %v1417_v48  ;;  %958 = vmatpush.bf16.msrb.mxu2 %v1293_v49 }
  0x96   : > { %972 = vmatpush.bf16.msrb.mxu3 %v1421_v53 }
  0x98   : > { %931 = vmatpush.bf16.msrb.mxu0 %v1273_v61 }
  0x99   : > { %945 = vmatpush.bf16.msrb.mxu1 %v1401_v62  ;;  %959 = vmatpush.bf16.msrb.mxu2 %v1277_v63 }
  0x9a   : > { %973 = vmatpush.bf16.msrb.mxu3 %v1405_v3 }
  0x9c   : > { %932 = vmatpush.bf16.msrb.mxu0 %v1257_v9 }
  0x9d   : > { %946 = vmatpush.bf16.msrb.mxu1 %v1385_v10  ;;  %960 = vmatpush.bf16.msrb.mxu2 %v1261_v11 }
  0x9e   : > { %974 = vmatpush.bf16.msrb.mxu3 %v1389_v12 }
  0x9f   : > { %933 = vmatmul.bf16.vlgmr.msrb.gmra.mxu0 %v1961_v54 }
  0xa0   : > { %947 = vmatmul.bf16.vlgmr.msrb.gmra.mxu1 %v1965_v57  ;;  %961 = vmatmul.bf16.vlgmr.msrb.gmra.mxu2 %v1961_v54 }
  0xa1   : > { %975 = vmatmul.bf16.vlgmr.msrb.gmra.mxu3 %v1965_v57 }
  0xf5   : > { %v1013_v13 = vpop.permute.xlu0 %1012 }
  0xf8   : > { %v1033_v17 = vpop.permute.xlu1 %1032 }
  0xfc   : > { %v878_v14 = vpop.f32.mrf.mxu0 }
  0xfd   : > { %v1018_v26 = vpop.permute.xlu0 %1017 }
  0xff   : > { %v892_v15 = vpop.f32.mrf.mxu1 }
 0x100   : > { %v893_v16 = vadd.f32 %v892_v15, %v878_v14  ;;  %v1038_v29 = vpop.permute.xlu1 %1037 }
 0x102   : > { %v1020_v18 = vmul.f32 %v1013_v13, %v893_v16 }
 0x103   : > { %v906_v19 = vpop.f32.mrf.mxu2 }
 0x104   : > { %v1040_v22 = vadd.f32 %v1033_v17, %v1020_v18  ;;  %v880_v23 = vpop.f32.mrf.mxu0 }
 0x106   : > { %v920_v20 = vpop.f32.mrf.mxu3  ;;  %v1048_v57 = vmax.f32 %v1040_v22, 0.0 }
 0x107   : > { %v921_v21 = vadd.f32 %v920_v20, %v906_v19  ;;  %v894_v25 = vpop.f32.mrf.mxu1 }
 0x108   : > { %v895_v27 = vadd.f32 %v894_v25, %v880_v23 }
 0x109   : > { %v1021_v24 = vmul.f32 %v1013_v13, %v921_v21 }
 0x10a   : > { %v1024_v28 = vmul.f32 %v1018_v26, %v895_v27 }
 0x10b   : > { %v1041_v54 = vadd.f32 %v1033_v17, %v1021_v24  ;;  %v908_v31 = vpop.f32.mrf.mxu2 }
 0x10c   : > { %v1044_v35 = vadd.f32 %v1038_v29, %v1024_v28 }
 0x10d   : > { %v1049_v30 = vmax.f32 %v1041_v54, 0.0 }
 0x10e   : > { %v922_v32 = vpop.f32.mrf.mxu3  ;;  %v1052_v38 = vmax.f32 %v1044_v35, 0.0 }
 0x10f   : > { %v1056_v33 = vpack.c.bf16 %v1049_v30, %v1048_v57  ;;  %v923_v34 = vadd.f32 %v922_v32, %v908_v31 }
 0x111   : > { %1060 = vst [vmem:[%s2037_s10] sm:$0xff] %v1056_v33  ;;  %v1025_v36 = vmul.f32 %v1018_v26, %v923_v34 }
 0x113   : > { %v1045_v37 = vadd.f32 %v1038_v29, %v1025_v36 }
 0x115   : > { %v1053_v39 = vmax.f32 %v1045_v37, 0.0 }
 0x117   : > { %v1058_v40 = vpack.c.bf16 %v1053_v39, %v1052_v38 }
 0x118   : > { %v1089_v5 = vld [vmem:[%s2037_s10] sm:$0xff] (%p1719_p6) }
 0x119   : > { %1062 = vst [vmem:[%s2037_s10 + $0x10] sm:$0xff] %v1058_v40 }
 0x11a   : > { %1090 = vst [vmem:[%s1076_s12] sm:$0xff] (%p1719_p6), %v1089_v5 }
 0x11c   : > { %v934_v41 = vpop.f32.mrf.mxu0 }
 0x11d   : > { %v948_v42 = vpop.f32.mrf.mxu1 }
 0x11e   : > { %v949_v43 = vadd.f32 %v948_v42, %v934_v41 }
 0x120   : > { %v1022_v44 = vmul.f32 %v1013_v13, %v949_v43  ;;  %v1093_v7 = vld [vmem:[%s2037_s10 + $0x10] sm:$0xff] (%p1719_p6) }
 0x121   : > { %1094 = vst [vmem:[%s1076_s12 + $0x20] sm:$0xff] (%p1719_p6), %v1093_v7 }
 0x122   : > { %v1042_v48 = vadd.f32 %v1033_v17, %v1022_v44 }
 0x123   : > { %v962_v45 = vpop.f32.mrf.mxu2 }
 0x124   : > { %v976_v46 = vpop.f32.mrf.mxu3  ;;  %v936_v47 = vpop.f32.mrf.mxu0  ;;  %v1050_v53 = vmax.f32 %v1042_v48, 0.0 }
 0x125   : > { %v977_v49 = vadd.f32 %v976_v46, %v962_v45  ;;  %v950_v50 = vpop.f32.mrf.mxu1 }
 0x126   : > { %v951_v52 = vadd.f32 %v950_v50, %v936_v47 }
 0x127   : > { %v1023_v51 = vmul.f32 %v1013_v13, %v977_v49 }
 0x128   : > { %v1026_v58 = vmul.f32 %v1018_v26, %v951_v52 }
 0x129   : > { %v1043_v55 = vadd.f32 %v1033_v17, %v1023_v51 }
 0x12a   : > { %v1046_v63 = vadd.f32 %v1038_v29, %v1026_v58 }
 0x12b   : > { %v1051_v56 = vmax.f32 %v1043_v55, 0.0  ;;  %v964_v59 = vpop.f32.mrf.mxu2 }
 0x12c   : > { %v978_v60 = vpop.f32.mrf.mxu3  ;;  %v1054_v2 = vmax.f32 %v1046_v63, 0.0 }
 0x12d   : > { %v1057_v61 = vpack.c.bf16 %v1051_v56, %v1050_v53  ;;  %v979_v62 = vadd.f32 %v978_v60, %v964_v59 }
 0x12f   : > { %1061 = vst [vmem:[%s2037_s10 + $0x8] sm:$0xff] %v1057_v61  ;;  %v1027_v0 = vmul.f32 %v1018_v26, %v979_v62 }
 0x131   : > { %v1047_v1 = vadd.f32 %v1038_v29, %v1027_v0 }
 0x133   : > { %v1055_v3 = vmax.f32 %v1047_v1, 0.0  ;;  %1070 = sbr.rel (!%p1719_p6) target bundleno = 320 (0x140), region = 71 }
 0x135   : > { %v1059_v4 = vpack.c.bf16 %v1055_v3, %v1054_v2 }
 0x136   : > { %v1091_v6 = vld [vmem:[%s2037_s10 + $0x8] sm:$0xff] (%p1719_p6) }
 0x137   : > { %1063 = vst [vmem:[%s2037_s10 + $0x18] sm:$0xff] %v1059_v4 }
 0x138   : > { %1092 = vst [vmem:[%s1076_s12 + $0x8] sm:$0xff] %v1091_v6 }
 0x13e   : > { %v1095_v8 = vld [vmem:[%s2037_s10 + $0x18] sm:$0xff] }
 0x13f   : > { %1096 = vst [vmem:[%s1076_s12 + $0x28] sm:$0xff] %v1095_v8 }
 0x140 PF: > { %s14_s19 = sadd.s32 1, %s1656_s19   ;;  %s2074_s15 = smov %s1644_s16 }
 0x141   : > { %p11_p11 = scmp.ge.s32.totalorder %s14_s19, 4   ;;  %s2075_s16 = smov %s1724_s25 }
 0x142   : > { %s2076_s17 = smov %s1652_s18  ;;  %s2077_s18 = smov %s2079_s20 }
 0x143   :  { %13 = sbr.rel (!%p11_p11) target bundleno = 3 (0x3), region = 134 }

// kernel: image_feature_extractor_bev_forward.41
= control target key start
LH: loop header
LB: loop body
LE: loop exit
PB: predicated region body
PF: predicated region fallthrough
CT: control target
= control target key end

     0   :  { %s1815_s18 = smov 0   ;;  %s1817_s19 = smov 0   ;;  %s2222_s0 = inlined_call_operand.vmem [shape: bf16[16,256], index: 0, kind: input, shape index: {}]   ;;  %s2223_s1 = inlined_call_operand.vmem [shape: bf16[256,1024], index: 1, kind: input, shape index: {}]   ;;  %s2224_s2 = inlined_call_operand.vmem [shape: f32[16,1], index: 2, kind: input, shape index: {}]   ;;  %s2225_s3 = inlined_call_operand.vmem [shape: f32[16,1], index: 3, kind: input, shape index: {}]   ;;  %s2226_s4 = inlined_call_operand.vmem [shape: bf16[16,1024], index: 4, kind: input, shape index: {}]   ;;  %s2227_s5 = inlined_call_operand.vmem [shape: bf16[16,1024], index: 5, kind: output, shape index: {}]  }
   0x1   :  { %s1819_s20 = smov 0   ;;  %s1821_s21 = smov 0  }
   0x2   :  { %s1823_s22 = smov 0  }
   0x3 LB: > { %s30_s23 = sadd.s32 1, %s1778_s21  ;;  %s1346_s24 = sadd.s32 4294967295, %s1782_s22   ;;  %s1782_s22 = sphi %s1823_s22, %s15_s22   ;;  %s1778_s21 = sphi %s1821_s21, %s2233_s21   ;;  %s1774_s20 = sphi %s1819_s20, %s2232_s20   ;;  %s1770_s19 = sphi %s1817_s19, %s2231_s19   ;;  %s1766_s18 = sphi %s1815_s18, %s2230_s18  }
   0x4   : > { %p32_p0 = scmp.ge.s32.totalorder %s30_s23, 2  ;;  %p78_p1 = scmp.ne.s32.totalorder %s1770_s19, %s1766_s18 }
   0x5   : > { %p79_p2 = scmp.eq.s32.totalorder %s1782_s22, 0  ;;  %p190_p4 = scmp.eq.s32.totalorder %s1346_s24, 1 }
   0x6   : > { %s2235_s23 = smov (%p32_p0, %s30_s23), 0  ;;  %s71_s27 = sadd.s32 1, %s1770_s19 }
   0x7   : > { %p1847_p3 = por %p79_p2, %p78_p1  ;;  %s67_s26 = ssub.s32 %s1778_s21, %s2235_s23 }
   0x8   : > { %p69_p5 = scmp.eq.s32.totalorder %s67_s26, 0  ;;  %p1854_p6 = por %p190_p4, %p78_p1 }
   0x9   : > { %p1352_p7 = scmp.ge.s32.totalorder %s1782_s22, 2 }
   0xa   : > { %s1859_s29 = scalar_select %p69_p5, %s1770_s19, %s71_s27  }
   0xb   : > { %245 = sbr.rel (%p1352_p7) target bundleno = 92 (0x5c), region = 28 }
  0x10   : > { %248 = sbr.rel (!%p1847_p3) target bundleno = 84 (0x54), region = 32  ;;  %s250_s30 = sand.u32 (%p1847_p3), 1, %s1770_s19  }
  0x11   : > { %s1632_s6 = sshll.u32 (%p1847_p3), %s1778_s21, 4  ;;  %s1353_s7 = sshll.u32 (%p1847_p3), %s250_s30, 9 }
  0x12   : > { %s1869_s10 = scalar_lea.vmem (%p1847_p3), %s2223_s1, %s1632_s6  ;;  %s1874_s11 = scalar_lea.vmem (%p1847_p3), [#allocation3], %s1353_s7 }
  0x13   : > { %v271_v0 = vld [vmem:[%s1869_s10] sm:$0xff] (%p1847_p3)  ;;  %v273_v1 = vld [vmem:[%s1869_s10 + $0x8] sm:$0xff] (%p1847_p3) }
  0x14   : > { %v275_v2 = vld [vmem:[%s1869_s10 + $0x20] sm:$0xff] (%p1847_p3)  ;;  %272 = vst [vmem:[%s1874_s11] sm:$0xff] (%p1847_p3), %v271_v0  ;;  %v277_v3 = vld [vmem:[%s1869_s10 + $0x28] sm:$0xff] (%p1847_p3) }
  0x15   : > { %274 = vst [vmem:[%s1874_s11 + $0x8] sm:$0xff] %v273_v1  ;;  %v279_v4 = vld [vmem:[%s1869_s10 + $0x40] sm:$0xff]  ;;  %v281_v5 = vld [vmem:[%s1869_s10 + $0x48] sm:$0xff] }
  0x16   : > { %276 = vst [vmem:[%s1874_s11 + $0x10] sm:$0xff] %v275_v2  ;;  %v283_v6 = vld [vmem:[%s1869_s10 + $0x60] sm:$0xff]  ;;  %v285_v7 = vld [vmem:[%s1869_s10 + $0x68] sm:$0xff] }
  0x17   : > { %278 = vst [vmem:[%s1874_s11 + $0x18] sm:$0xff] %v277_v3  ;;  %v287_v8 = vld [vmem:[%s1869_s10 + $0x80] sm:$0xff]  ;;  %v289_v9 = vld [vmem:[%s1869_s10 + $0x88] sm:$0xff] }
  0x18   : > { %280 = vst [vmem:[%s1874_s11 + $0x20] sm:$0xff] %v279_v4  ;;  %v291_v10 = vld [vmem:[%s1869_s10 + $0xa0] sm:$0xff]  ;;  %v293_v11 = vld [vmem:[%s1869_s10 + $0xa8] sm:$0xff] }
  0x19   : > { %282 = vst [vmem:[%s1874_s11 + $0x28] sm:$0xff] %v281_v5  ;;  %v295_v12 = vld [vmem:[%s1869_s10 + $0xc0] sm:$0xff]  ;;  %v297_v13 = vld [vmem:[%s1869_s10 + $0xc8] sm:$0xff] }
  0x1a   : > { %284 = vst [vmem:[%s1874_s11 + $0x30] sm:$0xff] %v283_v6  ;;  %v299_v14 = vld [vmem:[%s1869_s10 + $0xe0] sm:$0xff]  ;;  %v301_v15 = vld [vmem:[%s1869_s10 + $0xe8] sm:$0xff] }
  0x1b   : > { %286 = vst [vmem:[%s1874_s11 + $0x38] sm:$0xff] %v285_v7  ;;  %v303_v16 = vld [vmem:[%s1869_s10 + $0x100] sm:$0xff]  ;;  %v305_v17 = vld [vmem:[%s1869_s10 + $0x108] sm:$0xff] }
  0x1c   : > { %288 = vst [vmem:[%s1874_s11 + $0x40] sm:$0xff] %v287_v8  ;;  %v307_v18 = vld [vmem:[%s1869_s10 + $0x120] sm:$0xff]  ;;  %v309_v19 = vld [vmem:[%s1869_s10 + $0x128] sm:$0xff] }
  0x1d   : > { %290 = vst [vmem:[%s1874_s11 + $0x48] sm:$0xff] %v289_v9  ;;  %v311_v20 = vld [vmem:[%s1869_s10 + $0x140] sm:$0xff]  ;;  %v313_v21 = vld [vmem:[%s1869_s10 + $0x148] sm:$0xff] }
  0x1e   : > { %292 = vst [vmem:[%s1874_s11 + $0x50] sm:$0xff] %v291_v10  ;;  %v315_v22 = vld [vmem:[%s1869_s10 + $0x160] sm:$0xff]  ;;  %v317_v23 = vld [vmem:[%s1869_s10 + $0x168] sm:$0xff] }
  0x1f   : > { %294 = vst [vmem:[%s1874_s11 + $0x58] sm:$0xff] %v293_v11  ;;  %v319_v24 = vld [vmem:[%s1869_s10 + $0x180] sm:$0xff]  ;;  %v321_v25 = vld [vmem:[%s1869_s10 + $0x188] sm:$0xff] }
  0x20   : > { %296 = vst [vmem:[%s1874_s11 + $0x60] sm:$0xff] %v295_v12  ;;  %v323_v26 = vld [vmem:[%s1869_s10 + $0x1a0] sm:$0xff]  ;;  %v325_v27 = vld [vmem:[%s1869_s10 + $0x1a8] sm:$0xff] }
  0x21   : > { %298 = vst [vmem:[%s1874_s11 + $0x68] sm:$0xff] %v297_v13  ;;  %v327_v28 = vld [vmem:[%s1869_s10 + $0x1c0] sm:$0xff]  ;;  %v329_v29 = vld [vmem:[%s1869_s10 + $0x1c8] sm:$0xff] }
  0x22   : > { %300 = vst [vmem:[%s1874_s11 + $0x70] sm:$0xff] %v299_v14  ;;  %v331_v30 = vld [vmem:[%s1869_s10 + $0x1e0] sm:$0xff]  ;;  %v333_v31 = vld [vmem:[%s1869_s10 + $0x1e8] sm:$0xff] }
  0x23   : > { %302 = vst [vmem:[%s1874_s11 + $0x78] sm:$0xff] %v301_v15  ;;  %v335_v32 = vld [vmem:[%s1869_s10 + $0x200] sm:$0xff]  ;;  %v337_v33 = vld [vmem:[%s1869_s10 + $0x208] sm:$0xff] }
  0x24   : > { %304 = vst [vmem:[%s1874_s11 + $0x80] sm:$0xff] %v303_v16  ;;  %v339_v34 = vld [vmem:[%s1869_s10 + $0x220] sm:$0xff]  ;;  %v341_v35 = vld [vmem:[%s1869_s10 + $0x228] sm:$0xff] }
  0x25   : > { %306 = vst [vmem:[%s1874_s11 + $0x88] sm:$0xff] %v305_v17  ;;  %v343_v36 = vld [vmem:[%s1869_s10 + $0x240] sm:$0xff]  ;;  %v345_v37 = vld [vmem:[%s1869_s10 + $0x248] sm:$0xff] }
  0x26   : > { %308 = vst [vmem:[%s1874_s11 + $0x90] sm:$0xff] %v307_v18  ;;  %v347_v38 = vld [vmem:[%s1869_s10 + $0x260] sm:$0xff]  ;;  %v349_v39 = vld [vmem:[%s1869_s10 + $0x268] sm:$0xff] }
  0x27   : > { %310 = vst [vmem:[%s1874_s11 + $0x98] sm:$0xff] %v309_v19  ;;  %v351_v40 = vld [vmem:[%s1869_s10 + $0x280] sm:$0xff]  ;;  %v353_v41 = vld [vmem:[%s1869_s10 + $0x288] sm:$0xff] }
  0x28   : > { %312 = vst [vmem:[%s1874_s11 + $0xa0] sm:$0xff] %v311_v20  ;;  %v355_v42 = vld [vmem:[%s1869_s10 + $0x2a0] sm:$0xff]  ;;  %v357_v43 = vld [vmem:[%s1869_s10 + $0x2a8] sm:$0xff] }
  0x29   : > { %314 = vst [vmem:[%s1874_s11 + $0xa8] sm:$0xff] %v313_v21  ;;  %v359_v44 = vld [vmem:[%s1869_s10 + $0x2c0] sm:$0xff]  ;;  %v361_v45 = vld [vmem:[%s1869_s10 + $0x2c8] sm:$0xff] }
  0x2a   : > { %316 = vst [vmem:[%s1874_s11 + $0xb0] sm:$0xff] %v315_v22  ;;  %v363_v46 = vld [vmem:[%s1869_s10 + $0x2e0] sm:$0xff]  ;;  %v365_v47 = vld [vmem:[%s1869_s10 + $0x2e8] sm:$0xff] }
  0x2b   : > { %318 = vst [vmem:[%s1874_s11 + $0xb8] sm:$0xff] %v317_v23  ;;  %v367_v48 = vld [vmem:[%s1869_s10 + $0x300] sm:$0xff]  ;;  %v369_v49 = vld [vmem:[%s1869_s10 + $0x308] sm:$0xff] }
  0x2c   : > { %320 = vst [vmem:[%s1874_s11 + $0xc0] sm:$0xff] %v319_v24  ;;  %v371_v50 = vld [vmem:[%s1869_s10 + $0x320] sm:$0xff]  ;;  %v373_v51 = vld [vmem:[%s1869_s10 + $0x328] sm:$0xff] }
  0x2d   : > { %322 = vst [vmem:[%s1874_s11 + $0xc8] sm:$0xff] %v321_v25  ;;  %v375_v52 = vld [vmem:[%s1869_s10 + $0x340] sm:$0xff]  ;;  %v377_v53 = vld [vmem:[%s1869_s10 + $0x348] sm:$0xff] }
  0x2e   : > { %324 = vst [vmem:[%s1874_s11 + $0xd0] sm:$0xff] %v323_v26  ;;  %v379_v54 = vld [vmem:[%s1869_s10 + $0x360] sm:$0xff]  ;;  %v381_v55 = vld [vmem:[%s1869_s10 + $0x368] sm:$0xff] }
  0x2f   : > { %326 = vst [vmem:[%s1874_s11 + $0xd8] sm:$0xff] %v325_v27  ;;  %v383_v56 = vld [vmem:[%s1869_s10 + $0x380] sm:$0xff]  ;;  %v385_v57 = vld [vmem:[%s1869_s10 + $0x388] sm:$0xff] }
  0x30   : > { %328 = vst [vmem:[%s1874_s11 + $0xe0] sm:$0xff] %v327_v28  ;;  %v387_v58 = vld [vmem:[%s1869_s10 + $0x3a0] sm:$0xff]  ;;  %v389_v59 = vld [vmem:[%s1869_s10 + $0x3a8] sm:$0xff] }
  0x31   : > { %330 = vst [vmem:[%s1874_s11 + $0xe8] sm:$0xff] %v329_v29  ;;  %v391_v60 = vld [vmem:[%s1869_s10 + $0x3c0] sm:$0xff]  ;;  %v393_v61 = vld [vmem:[%s1869_s10 + $0x3c8] sm:$0xff] }
  0x32   : > { %332 = vst [vmem:[%s1874_s11 + $0xf0] sm:$0xff] %v331_v30  ;;  %v395_v62 = vld [vmem:[%s1869_s10 + $0x3e0] sm:$0xff]  ;;  %v397_v63 = vld [vmem:[%s1869_s10 + $0x3e8] sm:$0xff] }
  0x33   : > { %334 = vst [vmem:[%s1874_s11 + $0xf8] sm:$0xff] %v333_v31 }
  0x34   : > { %336 = vst [vmem:[%s1874_s11 + $0x100] sm:$0xff] %v335_v32 }
  0x35   : > { %338 = vst [vmem:[%s1874_s11 + $0x108] sm:$0xff] %v337_v33 }
  0x36   : > { %340 = vst [vmem:[%s1874_s11 + $0x110] sm:$0xff] %v339_v34 }
  0x37   : > { %342 = vst [vmem:[%s1874_s11 + $0x118] sm:$0xff] %v341_v35 }
  0x38   : > { %344 = vst [vmem:[%s1874_s11 + $0x120] sm:$0xff] %v343_v36 }
  0x39   : > { %346 = vst [vmem:[%s1874_s11 + $0x128] sm:$0xff] %v345_v37 }
  0x3a   : > { %348 = vst [vmem:[%s1874_s11 + $0x130] sm:$0xff] %v347_v38 }
  0x3b   : > { %350 = vst [vmem:[%s1874_s11 + $0x138] sm:$0xff] %v349_v39 }
  0x3c   : > { %352 = vst [vmem:[%s1874_s11 + $0x140] sm:$0xff] %v351_v40 }
  0x3d   : > { %354 = vst [vmem:[%s1874_s11 + $0x148] sm:$0xff] %v353_v41 }
  0x3e   : > { %356 = vst [vmem:[%s1874_s11 + $0x150] sm:$0xff] %v355_v42 }
  0x3f   : > { %358 = vst [vmem:[%s1874_s11 + $0x158] sm:$0xff] %v357_v43 }
  0x40   : > { %360 = vst [vmem:[%s1874_s11 + $0x160] sm:$0xff] %v359_v44 }
  0x41   : > { %362 = vst [vmem:[%s1874_s11 + $0x168] sm:$0xff] %v361_v45 }
  0x42   : > { %364 = vst [vmem:[%s1874_s11 + $0x170] sm:$0xff] %v363_v46 }
  0x43   : > { %366 = vst [vmem:[%s1874_s11 + $0x178] sm:$0xff] %v365_v47 }
  0x44   : > { %368 = vst [vmem:[%s1874_s11 + $0x180] sm:$0xff] %v367_v48 }
  0x45   : > { %370 = vst [vmem:[%s1874_s11 + $0x188] sm:$0xff] %v369_v49 }
  0x46   : > { %372 = vst [vmem:[%s1874_s11 + $0x190] sm:$0xff] %v371_v50 }
  0x47   : > { %374 = vst [vmem:[%s1874_s11 + $0x198] sm:$0xff] %v373_v51 }
  0x48   : > { %376 = vst [vmem:[%s1874_s11 + $0x1a0] sm:$0xff] %v375_v52 }
  0x49   : > { %378 = vst [vmem:[%s1874_s11 + $0x1a8] sm:$0xff] %v377_v53 }
  0x4a   : > { %380 = vst [vmem:[%s1874_s11 + $0x1b0] sm:$0xff] %v379_v54 }
  0x4b   : > { %382 = vst [vmem:[%s1874_s11 + $0x1b8] sm:$0xff] %v381_v55 }
  0x4c   : > { %384 = vst [vmem:[%s1874_s11 + $0x1c0] sm:$0xff] %v383_v56 }
  0x4d   : > { %386 = vst [vmem:[%s1874_s11 + $0x1c8] sm:$0xff] %v385_v57 }
  0x4e   : > { %388 = vst [vmem:[%s1874_s11 + $0x1d0] sm:$0xff] %v387_v58 }
  0x4f   : > { %390 = vst [vmem:[%s1874_s11 + $0x1d8] sm:$0xff] %v389_v59 }
  0x50   : > { %392 = vst [vmem:[%s1874_s11 + $0x1e0] sm:$0xff] %v391_v60 }
  0x51   : > { %394 = vst [vmem:[%s1874_s11 + $0x1e8] sm:$0xff] %v393_v61 }
  0x52   : > { %396 = vst [vmem:[%s1874_s11 + $0x1f0] sm:$0xff] %v395_v62 }
  0x53   : > { %398 = vst [vmem:[%s1874_s11 + $0x1f8] sm:$0xff] %v397_v63 }
  0x54 PF: > { %404 = sbr.rel (!%p1847_p3) target bundleno = 92 (0x5c), region = 55  ;;  %s406_s12 = sand.u32 (%p1847_p3), 1, %s1770_s19  }
  0x55   : > { %s1633_s13 = sshll.u32 (%p1847_p3), %s1778_s21, 4  ;;  %s1356_s14 = sshll.u32 (%p1847_p3), %s406_s12, 5 }
  0x56   : > { %s414_s17 = scalar_lea.vmem (%p1847_p3), %s2226_s4, %s1633_s13  ;;  %s408_s24 = scalar_lea.vmem (%p1847_p3), [#allocation4], %s1356_s14 }
  0x57   : > { %v427_v0 = vld [vmem:[%s414_s17] sm:$0xff] (%p1847_p3)  ;;  %v429_v1 = vld [vmem:[%s414_s17 + $0x8] sm:$0xff] (%p1847_p3) }
  0x58   : > { %v431_v2 = vld [vmem:[%s414_s17 + $0x20] sm:$0xff] (%p1847_p3)  ;;  %428 = vst [vmem:[%s408_s24] sm:$0xff] (%p1847_p3), %v427_v0  ;;  %v433_v3 = vld [vmem:[%s414_s17 + $0x28] sm:$0xff] (%p1847_p3) }
  0x59   : > { %430 = vst [vmem:[%s408_s24 + $0x8] sm:$0xff] %v429_v1 }
  0x5a   : > { %432 = vst [vmem:[%s408_s24 + $0x10] sm:$0xff] %v431_v2 }
  0x5b   : > { %434 = vst [vmem:[%s408_s24 + $0x18] sm:$0xff] %v433_v3 }
  0x5c PF: > { %p1359_p8 = scmp.ge.s32.totalorder %s1782_s22, 1  ;;  %p439_p9 = scmp.lt.s32.totalorder %s1782_s22, 3 }
  0x5e   : > { %p440_p10 = pnand %p1359_p8, %p439_p9 }
  0x5f   : > { %s446_s25 = sand.u32 (!%p440_p10), 1, %s1766_s18  }
  0x60   : > { %443 = sbr.rel (%p440_p10) target bundleno = 330 (0x14a), region = 78  ;;  %s1360_s26 = sshll.u32 (!%p440_p10), %s446_s25, 9 }
  0x61   : > { %s2013_s27 = scalar_lea.vmem (!%p440_p10), [#allocation3], %s1360_s26 }
  0x65   : > { %v1485_v4 = vld [vmem:[%s2013_s27 + $0xe0] sm:$0xf]  ;;  %v1666_v5 = vld [vmem:[%s2013_s27 + $0xec] sm:$0xf0]  ;;  %v1664_v9 = vld [vmem:[%s2013_s27 + $0xe4] sm:$0xf] }
  0x66   : > { %v1613_v6 = vld [vmem:[%s2013_s27 + $0x1e0] sm:$0xf]  ;;  %v1486_v7 = vor.u32 %v1666_v5, %v1485_v4  ;;  %v1698_v8 = vld [vmem:[%s2013_s27 + $0x1ec] sm:$0xf0]  ;;  %v1487_v10 = vld [vmem:[%s2013_s27 + $0xf0] sm:$0xf0] }
  0x67   : > { %v1614_v11 = vor.u32 %v1698_v8, %v1613_v6  ;;  %v1490_v12 = vor.u32 %v1664_v9, %v1487_v10  ;;  %v1696_v13 = vld [vmem:[%s2013_s27 + $0x1e4] sm:$0xf]  ;;  %v1615_v14 = vld [vmem:[%s2013_s27 + $0x1f0] sm:$0xf0]  ;;  %v1469_v15 = vld [vmem:[%s2013_s27 + $0xc0] sm:$0xf] }
  0x68   : > { %949 = vmatpush.bf16.msra.mxu0 %v1486_v7  ;;  %v1618_v16 = vor.u32 %v1696_v13, %v1615_v14  ;;  %v1662_v17 = vld [vmem:[%s2013_s27 + $0xcc] sm:$0xf0]  ;;  %v1597_v18 = vld [vmem:[%s2013_s27 + $0x1c0] sm:$0xf]  ;;  %v1660_v22 = vld [vmem:[%s2013_s27 + $0xc4] sm:$0xf] }
  0x69   : > { %v1694_v19 = vld [vmem:[%s2013_s27 + $0x1cc] sm:$0xf0]  ;;  %963 = vmatpush.bf16.msra.mxu1 %v1614_v11  ;;  %977 = vmatpush.bf16.msra.mxu2 %v1490_v12  ;;  %v1470_v20 = vor.u32 %v1662_v17, %v1469_v15  ;;  %v1471_v23 = vld [vmem:[%s2013_s27 + $0xd0] sm:$0xf0]  ;;  %v1692_v24 = vld [vmem:[%s2013_s27 + $0x1c4] sm:$0xf] }
  0x6a   : > { %v1598_v21 = vor.u32 %v1694_v19, %v1597_v18  ;;  %991 = vmatpush.bf16.msra.mxu3 %v1618_v16  ;;  %v1474_v25 = vor.u32 %v1660_v22, %v1471_v23  ;;  %v1599_v26 = vld [vmem:[%s2013_s27 + $0x1d0] sm:$0xf0]  ;;  %v1453_v27 = vld [vmem:[%s2013_s27 + $0xa0] sm:$0xf]  ;;  %v1658_v28 = vld [vmem:[%s2013_s27 + $0xac] sm:$0xf0] }
  0x6b   : > { %v1602_v29 = vor.u32 %v1692_v24, %v1599_v26  ;;  %v1581_v30 = vld [vmem:[%s2013_s27 + $0x1a0] sm:$0xf]  ;;  %v1690_v31 = vld [vmem:[%s2013_s27 + $0x1ac] sm:$0xf0]  ;;  %v1656_v32 = vld [vmem:[%s2013_s27 + $0xa4] sm:$0xf]  ;;  %v1454_v33 = vor.u32 %v1658_v28, %v1453_v27 }
  0x6c   : > { %950 = vmatpush.bf16.msra.mxu0 %v1470_v20  ;;  %v1455_v34 = vld [vmem:[%s2013_s27 + $0xb0] sm:$0xf0]  ;;  %v1688_v35 = vld [vmem:[%s2013_s27 + $0x1a4] sm:$0xf]  ;;  %v1582_v37 = vor.u32 %v1690_v31, %v1581_v30  ;;  %v1437_v39 = vld [vmem:[%s2013_s27 + $0x80] sm:$0xf] }
  0x6d   : > { %v1583_v36 = vld [vmem:[%s2013_s27 + $0x1b0] sm:$0xf0]  ;;  %964 = vmatpush.bf16.msra.mxu1 %v1598_v21  ;;  %978 = vmatpush.bf16.msra.mxu2 %v1474_v25  ;;  %v1458_v38 = vor.u32 %v1656_v32, %v1455_v34  ;;  %v1654_v40 = vld [vmem:[%s2013_s27 + $0x8c] sm:$0xf0]  ;;  %v1565_v41 = vld [vmem:[%s2013_s27 + $0x180] sm:$0xf] }
  0x6e   : > { %992 = vmatpush.bf16.msra.mxu3 %v1602_v29  ;;  %v1586_v42 = vor.u32 %v1688_v35, %v1583_v36  ;;  %v1686_v43 = vld [vmem:[%s2013_s27 + $0x18c] sm:$0xf0]  ;;  %v1652_v44 = vld [vmem:[%s2013_s27 + $0x84] sm:$0xf]  ;;  %v1439_v45 = vld [vmem:[%s2013_s27 + $0x90] sm:$0xf0]  ;;  %v1438_v48 = vor.u32 %v1654_v40, %v1437_v39 }
  0x6f   : > { %v1684_v46 = vld [vmem:[%s2013_s27 + $0x184] sm:$0xf]  ;;  %v1567_v47 = vld [vmem:[%s2013_s27 + $0x190] sm:$0xf0]  ;;  %v1566_v49 = vor.u32 %v1686_v43, %v1565_v41  ;;  %v1442_v50 = vor.u32 %v1652_v44, %v1439_v45  ;;  %v1421_v51 = vld [vmem:[%s2013_s27 + $0x60] sm:$0xf] }
  0x70   : > { %951 = vmatpush.bf16.msra.mxu0 %v1454_v33  ;;  %v1650_v52 = vld [vmem:[%s2013_s27 + $0x6c] sm:$0xf0]  ;;  %v1549_v53 = vld [vmem:[%s2013_s27 + $0x160] sm:$0xf]  ;;  %v1570_v54 = vor.u32 %v1684_v46, %v1567_v47  ;;  %v1648_v56 = vld [vmem:[%s2013_s27 + $0x64] sm:$0xf] }
  0x71   : > { %965 = vmatpush.bf16.msra.mxu1 %v1582_v37  ;;  %979 = vmatpush.bf16.msra.mxu2 %v1458_v38  ;;  %v1682_v55 = vld [vmem:[%s2013_s27 + $0x16c] sm:$0xf0]  ;;  %v1423_v57 = vld [vmem:[%s2013_s27 + $0x70] sm:$0xf0]  ;;  %v1680_v58 = vld [vmem:[%s2013_s27 + $0x164] sm:$0xf]  ;;  %v1422_v60 = vor.u32 %v1650_v52, %v1421_v51 }
  0x72   : > { %993 = vmatpush.bf16.msra.mxu3 %v1586_v42  ;;  %v1551_v59 = vld [vmem:[%s2013_s27 + $0x170] sm:$0xf0]  ;;  %v1550_v61 = vor.u32 %v1682_v55, %v1549_v53  ;;  %v1426_v62 = vor.u32 %v1648_v56, %v1423_v57  ;;  %v1405_v63 = vld [vmem:[%s2013_s27 + $0x40] sm:$0xf]  ;;  %v1646_v0 = vld [vmem:[%s2013_s27 + $0x4c] sm:$0xf0] }
  0x73   : > { %v1533_v1 = vld [vmem:[%s2013_s27 + $0x140] sm:$0xf]  ;;  %v1554_v2 = vor.u32 %v1680_v58, %v1551_v59  ;;  %v1678_v3 = vld [vmem:[%s2013_s27 + $0x14c] sm:$0xf0]  ;;  %v1644_v4 = vld [vmem:[%s2013_s27 + $0x44] sm:$0xf]  ;;  %v1406_v8 = vor.u32 %v1646_v0, %v1405_v63 }
  0x74   : > { %952 = vmatpush.bf16.msra.mxu0 %v1438_v48  ;;  %v1407_v5 = vld [vmem:[%s2013_s27 + $0x50] sm:$0xf0]  ;;  %v1676_v6 = vld [vmem:[%s2013_s27 + $0x144] sm:$0xf]  ;;  %v1534_v9 = vor.u32 %v1678_v3, %v1533_v1  ;;  %v1389_v11 = vld [vmem:[%s2013_s27 + $0x20] sm:$0xf] }
  0x75   : > { %966 = vmatpush.bf16.msra.mxu1 %v1566_v49  ;;  %980 = vmatpush.bf16.msra.mxu2 %v1442_v50  ;;  %v1535_v7 = vld [vmem:[%s2013_s27 + $0x150] sm:$0xf0]  ;;  %v1410_v10 = vor.u32 %v1644_v4, %v1407_v5  ;;  %v1642_v12 = vld [vmem:[%s2013_s27 + $0x2c] sm:$0xf0]  ;;  %v1517_v13 = vld [vmem:[%s2013_s27 + $0x120] sm:$0xf] }
  0x76   : > { %994 = vmatpush.bf16.msra.mxu3 %v1570_v54  ;;  %v1538_v14 = vor.u32 %v1676_v6, %v1535_v7  ;;  %v1674_v15 = vld [vmem:[%s2013_s27 + $0x12c] sm:$0xf0]  ;;  %v1640_v16 = vld [vmem:[%s2013_s27 + $0x24] sm:$0xf]  ;;  %v1391_v17 = vld [vmem:[%s2013_s27 + $0x30] sm:$0xf0]  ;;  %v1390_v20 = vor.u32 %v1642_v12, %v1389_v11 }
  0x77   : > { %v1672_v18 = vld [vmem:[%s2013_s27 + $0x124] sm:$0xf]  ;;  %v1519_v19 = vld [vmem:[%s2013_s27 + $0x130] sm:$0xf0]  ;;  %v1373_v21 = vld [vmem:[%s2013_s27] sm:$0xf]  ;;  %v1518_v24 = vor.u32 %v1674_v15, %v1517_v13  ;;  %v1394_v25 = vor.u32 %v1640_v16, %v1391_v17 }
  0x78   : > { %953 = vmatpush.bf16.msra.mxu0 %v1422_v60  ;;  %v1638_v22 = vld [vmem:[%s2013_s27 + $0xc] sm:$0xf0]  ;;  %v1501_v23 = vld [vmem:[%s2013_s27 + $0x100] sm:$0xf]  ;;  %v1636_v27 = vld [vmem:[%s2013_s27 + $0x4] sm:$0xf]  ;;  %v1522_v29 = vor.u32 %v1672_v18, %v1519_v19 }
  0x79   : > { %967 = vmatpush.bf16.msra.mxu1 %v1550_v61  ;;  %981 = vmatpush.bf16.msra.mxu2 %v1426_v62  ;;  %v1670_v26 = vld [vmem:[%s2013_s27 + $0x10c] sm:$0xf0]  ;;  %v1375_v28 = vld [vmem:[%s2013_s27 + $0x10] sm:$0xf0]  ;;  %v1668_v30 = vld [vmem:[%s2013_s27 + $0x104] sm:$0xf]  ;;  %v1374_v36 = vor.u32 %v1638_v22, %v1373_v21 }
  0x7a   : > { %995 = vmatpush.bf16.msra.mxu3 %v1554_v2  ;;  %v1503_v31 = vld [vmem:[%s2013_s27 + $0x110] sm:$0xf0]  ;;  %v1493_v32 = vld [vmem:[%s2013_s27 + $0xe8] sm:$0xf]  ;;  %v1667_v33 = vld [vmem:[%s2013_s27 + $0xf4] sm:$0xf0]  ;;  %v1502_v40 = vor.u32 %v1670_v26, %v1501_v23  ;;  %v1378_v41 = vor.u32 %v1636_v27, %v1375_v28 }
  0x7b   : > { %v1621_v34 = vld [vmem:[%s2013_s27 + $0x1e8] sm:$0xf]  ;;  %v1699_v35 = vld [vmem:[%s2013_s27 + $0x1f4] sm:$0xf0]  ;;  %v1665_v37 = vld [vmem:[%s2013_s27 + $0xec] sm:$0xf]  ;;  %v1506_v45 = vor.u32 %v1668_v30, %v1503_v31  ;;  %v1494_v46 = vor.u32 %v1667_v33, %v1493_v32 }
  0x7c   : > { %954 = vmatpush.bf16.msra.mxu0 %v1406_v8  ;;  %v1495_v38 = vld [vmem:[%s2013_s27 + $0xf8] sm:$0xf0]  ;;  %v1697_v39 = vld [vmem:[%s2013_s27 + $0x1ec] sm:$0xf]  ;;  %v1365_v43 = vld [vmem:[%s2222_s0] sm:$0xf]  ;;  %v1622_v49 = vor.u32 %v1699_v35, %v1621_v34 }
  0x7d   : > { %968 = vmatpush.bf16.msra.mxu1 %v1534_v9  ;;  %982 = vmatpush.bf16.msra.mxu2 %v1410_v10  ;;  %v1623_v42 = vld [vmem:[%s2013_s27 + $0x1f8] sm:$0xf0]  ;;  %v1635_v44 = vld [vmem:[%s2222_s0 + $0x4] sm:$0xf0]  ;;  %v1634_v47 = vld [vmem:[%s2222_s0 + $0x4] sm:$0xf]  ;;  %v1498_v50 = vor.u32 %v1665_v37, %v1495_v38 }
  0x7e   : > { %996 = vmatpush.bf16.msra.mxu3 %v1538_v14  ;;  %v1367_v48 = vld [vmem:[%s2222_s0 + $0x8] sm:$0xf0]  ;;  %v1477_v51 = vld [vmem:[%s2013_s27 + $0xc8] sm:$0xf]  ;;  %v1663_v52 = vld [vmem:[%s2013_s27 + $0xd4] sm:$0xf0]  ;;  %v1626_v54 = vor.u32 %v1697_v39, %v1623_v42  ;;  %v2105_v58 = vor.u32 %v1635_v44, %v1365_v43 }
  0x7f   : > { %v1605_v53 = vld [vmem:[%s2013_s27 + $0x1c8] sm:$0xf]  ;;  %v1695_v55 = vld [vmem:[%s2013_s27 + $0x1d4] sm:$0xf0]  ;;  %v1661_v56 = vld [vmem:[%s2013_s27 + $0xcc] sm:$0xf]  ;;  %v2109_v61 = vor.u32 %v1634_v47, %v1367_v48  ;;  %v1478_v62 = vor.u32 %v1663_v52, %v1477_v51 }
  0x80   : > { %955 = vmatpush.bf16.msra.mxu0 %v1390_v20  ;;  %v1479_v57 = vld [vmem:[%s2013_s27 + $0xd8] sm:$0xf0]  ;;  %v1693_v59 = vld [vmem:[%s2013_s27 + $0x1cc] sm:$0xf]  ;;  %v1606_v63 = vor.u32 %v1695_v55, %v1605_v53  ;;  %v1461_v1 = vld [vmem:[%s2013_s27 + $0xa8] sm:$0xf] }
  0x81   : > { %969 = vmatpush.bf16.msra.mxu1 %v1518_v24  ;;  %983 = vmatpush.bf16.msra.mxu2 %v1394_v25  ;;  %v1607_v60 = vld [vmem:[%s2013_s27 + $0x1d8] sm:$0xf0]  ;;  %v1482_v0 = vor.u32 %v1661_v56, %v1479_v57  ;;  %v1659_v2 = vld [vmem:[%s2013_s27 + $0xb4] sm:$0xf0]  ;;  %v1589_v3 = vld [vmem:[%s2013_s27 + $0x1a8] sm:$0xf] }
  0x82   : > { %997 = vmatpush.bf16.msra.mxu3 %v1522_v29  ;;  %v1610_v4 = vor.u32 %v1693_v59, %v1607_v60  ;;  %v1691_v5 = vld [vmem:[%s2013_s27 + $0x1b4] sm:$0xf0]  ;;  %v1657_v6 = vld [vmem:[%s2013_s27 + $0xac] sm:$0xf]  ;;  %v1463_v7 = vld [vmem:[%s2013_s27 + $0xb8] sm:$0xf0]  ;;  %v1462_v10 = vor.u32 %v1659_v2, %v1461_v1 }
  0x83   : > { %v1689_v8 = vld [vmem:[%s2013_s27 + $0x1ac] sm:$0xf]  ;;  %v1591_v9 = vld [vmem:[%s2013_s27 + $0x1b8] sm:$0xf0]  ;;  %v1590_v11 = vor.u32 %v1691_v5, %v1589_v3  ;;  %v1466_v12 = vor.u32 %v1657_v6, %v1463_v7  ;;  %v1445_v13 = vld [vmem:[%s2013_s27 + $0x88] sm:$0xf] }
  0x84   : > { %956 = vmatpush.bf16.msra.mxu0 %v1374_v36  ;;  %v1655_v14 = vld [vmem:[%s2013_s27 + $0x94] sm:$0xf0]  ;;  %v1573_v15 = vld [vmem:[%s2013_s27 + $0x188] sm:$0xf]  ;;  %v1594_v16 = vor.u32 %v1689_v8, %v1591_v9  ;;  %v1653_v18 = vld [vmem:[%s2013_s27 + $0x8c] sm:$0xf] }
  0x85   : > { %970 = vmatpush.bf16.msra.mxu1 %v1502_v40  ;;  %984 = vmatpush.bf16.msra.mxu2 %v1378_v41  ;;  %v1687_v17 = vld [vmem:[%s2013_s27 + $0x194] sm:$0xf0]  ;;  %v1447_v19 = vld [vmem:[%s2013_s27 + $0x98] sm:$0xf0]  ;;  %v1685_v20 = vld [vmem:[%s2013_s27 + $0x18c] sm:$0xf]  ;;  %v1446_v22 = vor.u32 %v1655_v14, %v1445_v13 }
  0x86   : > { %998 = vmatpush.bf16.msra.mxu3 %v1506_v45  ;;  %v1575_v21 = vld [vmem:[%s2013_s27 + $0x198] sm:$0xf0]  ;;  %v1429_v23 = vld [vmem:[%s2013_s27 + $0x68] sm:$0xf]  ;;  %v1088_v24 = vld [vmem:[%s2224_s2] sm:$0xff]  ;;  %v1574_v25 = vor.u32 %v1687_v17, %v1573_v15  ;;  %v1450_v26 = vor.u32 %v1653_v18, %v1447_v19  ;;  %v1784_v34 = vmov 0  }
  0x87   : > { %957 = vmatmul.bf16.vlgmr.msra.gmra.mxu0 %v2105_v58  ;;  %v1651_v27 = vld [vmem:[%s2013_s27 + $0x74] sm:$0xf0]  ;;  %v1557_v28 = vld [vmem:[%s2013_s27 + $0x168] sm:$0xf]  ;;  %v1108_v29 = vld [vmem:[%s2225_s3] sm:$0xff]  ;;  %v1578_v30 = vor.u32 %v1685_v20, %v1575_v21  ;;  %1742 = vset.pattern.permute.xlu0 %v1784_v34 }
  0x88   : > { %1005 = vmatpush.bf16.msrb.mxu0 %v1494_v46  ;;  %985 = vmatmul.bf16.vlgmr.msra.gmra.mxu2 %v2105_v58  ;;  %v1683_v31 = vld [vmem:[%s2013_s27 + $0x174] sm:$0xf0]  ;;  %v1649_v32 = vld [vmem:[%s2013_s27 + $0x6c] sm:$0xf]  ;;  %v1431_v33 = vld [vmem:[%s2013_s27 + $0x78] sm:$0xf0]  ;;  %v1430_v37 = vor.u32 %v1651_v27, %v1429_v23 }
  0x89   : > { %1019 = vmatpush.bf16.msrb.mxu1 %v1622_v49  ;;  %1033 = vmatpush.bf16.msrb.mxu2 %v1498_v50  ;;  %v1681_v35 = vld [vmem:[%s2013_s27 + $0x16c] sm:$0xf]  ;;  %v1559_v36 = vld [vmem:[%s2013_s27 + $0x178] sm:$0xf0]  ;;  %v1558_v38 = vor.u32 %v1683_v31, %v1557_v28  ;;  %v1434_v39 = vor.u32 %v1649_v32, %v1431_v33  ;;  %v1413_v40 = vld [vmem:[%s2013_s27 + $0x48] sm:$0xf] }
  0x8a   : > { %1047 = vmatpush.bf16.msrb.mxu3 %v1626_v54  ;;  %971 = vmatmul.bf16.vlgmr.msra.gmra.mxu1 %v2109_v61  ;;  %v1647_v41 = vld [vmem:[%s2013_s27 + $0x54] sm:$0xf0]  ;;  %v1541_v42 = vld [vmem:[%s2013_s27 + $0x148] sm:$0xf]  ;;  %v1562_v43 = vor.u32 %v1681_v35, %v1559_v36  ;;  %v1645_v45 = vld [vmem:[%s2013_s27 + $0x4c] sm:$0xf] }
  0x8b   : > { %999 = vmatmul.bf16.vlgmr.msra.gmra.mxu3 %v2109_v61  ;;  %1092 = vperm.xlu0 %1742, %v1088_v24   ;;  %v1679_v44 = vld [vmem:[%s2013_s27 + $0x154] sm:$0xf0]  ;;  %v1415_v46 = vld [vmem:[%s2013_s27 + $0x58] sm:$0xf0]  ;;  %v1677_v47 = vld [vmem:[%s2013_s27 + $0x14c] sm:$0xf]  ;;  %v1414_v49 = vor.u32 %v1647_v41, %v1413_v40 }
  0x8c   : > { %1006 = vmatpush.bf16.msrb.mxu0 %v1478_v62  ;;  %1743 = vset.pattern.permute.xlu1 %v1784_v34  ;;  %v1543_v48 = vld [vmem:[%s2013_s27 + $0x158] sm:$0xf0]  ;;  %v1397_v50 = vld [vmem:[%s2013_s27 + $0x28] sm:$0xf]  ;;  %v1542_v52 = vor.u32 %v1679_v44, %v1541_v42  ;;  %v1418_v53 = vor.u32 %v1645_v45, %v1415_v46  ;;  %v1643_v54 = vld [vmem:[%s2013_s27 + $0x34] sm:$0xf0] }
  0x8d   : > { %1020 = vmatpush.bf16.msrb.mxu1 %v1606_v63  ;;  %1034 = vmatpush.bf16.msrb.mxu2 %v1482_v0  ;;  %v1089_v51 = vld [vmem:[%s2224_s2 + $0x8] sm:$0xff]  ;;  %v1546_v57 = vor.u32 %v1677_v47, %v1543_v48  ;;  %v1675_v59 = vld [vmem:[%s2013_s27 + $0x134] sm:$0xf0]  ;;  %v1399_v62 = vld [vmem:[%s2013_s27 + $0x38] sm:$0xf0]  ;;  %v1398_v1 = vor.u32 %v1643_v54, %v1397_v50 }
  0x8e   : > { %1048 = vmatpush.bf16.msrb.mxu3 %v1610_v4  ;;  %1112 = vperm.xlu1 %1743, %v1108_v29   ;;  %v1525_v55 = vld [vmem:[%s2013_s27 + $0x128] sm:$0xf]  ;;  %v1641_v60 = vld [vmem:[%s2013_s27 + $0x2c] sm:$0xf]  ;;  %v1527_v0 = vld [vmem:[%s2013_s27 + $0x138] sm:$0xf0] }
  0x8f   : > { %v1109_v56 = vld [vmem:[%s2225_s3 + $0x8] sm:$0xff]  ;;  %v1526_v2 = vor.u32 %v1675_v59, %v1525_v55  ;;  %v1402_v3 = vor.u32 %v1641_v60, %v1399_v62  ;;  %v1639_v5 = vld [vmem:[%s2013_s27 + $0x14] sm:$0xf0] }
  0x90   : > { %1007 = vmatpush.bf16.msrb.mxu0 %v1462_v10  ;;  %v1673_v63 = vld [vmem:[%s2013_s27 + $0x12c] sm:$0xf]  ;;  %v1381_v4 = vld [vmem:[%s2013_s27 + $0x8] sm:$0xf]  ;;  %v1671_v8 = vld [vmem:[%s2013_s27 + $0x114] sm:$0xf0] }
  0x91   : > { %1021 = vmatpush.bf16.msrb.mxu1 %v1590_v11  ;;  %1035 = vmatpush.bf16.msrb.mxu2 %v1466_v12  ;;  %v1509_v6 = vld [vmem:[%s2013_s27 + $0x108] sm:$0xf]  ;;  %v1530_v7 = vor.u32 %v1673_v63, %v1527_v0  ;;  %v1637_v9 = vld [vmem:[%s2013_s27 + $0xc] sm:$0xf]  ;;  %v1383_v10 = vld [vmem:[%s2013_s27 + $0x18] sm:$0xf0]  ;;  %v1382_v13 = vor.u32 %v1639_v5, %v1381_v4 }
  0x92   : > { %1049 = vmatpush.bf16.msrb.mxu3 %v1594_v16  ;;  %v1669_v11 = vld [vmem:[%s2013_s27 + $0x10c] sm:$0xf]  ;;  %v1511_v12 = vld [vmem:[%s2013_s27 + $0x118] sm:$0xf0]  ;;  %v1510_v14 = vor.u32 %v1671_v8, %v1509_v6  ;;  %v1386_v15 = vor.u32 %v1637_v9, %v1383_v10  ;;  %s2181_s27 = sshll.u32 %s446_s25, 5  ;;  %s1700_s25 = sshll.u32 (%p1854_p6), %s1774_s20, 4 }
  0x93   : > { %1097 = vperm.xlu0 %1742, %v1089_v51   ;;  %v1514_v16 = vor.u32 %v1669_v11, %v1511_v12  ;;  %s2184_s6 = scalar_lea.vmem [#allocation4], %s2181_s27  ;;  %s2189_s18 = scalar_lea.vmem [#allocation5], %s2181_s27 }
  0x94   : > { %1008 = vmatpush.bf16.msrb.mxu0 %v1446_v22  ;;  %v1128_v22 = vld [vmem:[%s2184_s6] sm:$0xff]  ;;  %v1130_v34 = vld [vmem:[%s2184_s6 + $0x10] sm:$0xff]  ;;  %v1129_v60 = vld [vmem:[%s2184_s6 + $0x8] sm:$0xff]  ;;  %s1176_s9 = scalar_lea.vmem (%p1854_p6), %s2227_s5, %s1700_s25 }
  0x95   : > { %1022 = vmatpush.bf16.msrb.mxu1 %v1574_v25  ;;  %1036 = vmatpush.bf16.msrb.mxu2 %v1450_v26  ;;  %v1132_v25 = vunpack.c.l.bf16 %v1128_v22  ;;  %v1133_v29 = vunpack.c.h.bf16 %v1128_v22  ;;  %v1136_v41 = vunpack.c.l.bf16 %v1130_v34  ;;  %v1137_v48 = vunpack.c.h.bf16 %v1130_v34  ;;  %v1131_v11 = vld [vmem:[%s2184_s6 + $0x18] sm:$0xff] }
  0x96   : > { %1050 = vmatpush.bf16.msrb.mxu3 %v1578_v30  ;;  %1117 = vperm.xlu1 %1743, %v1109_v56   ;;  %v1134_v63 = vunpack.c.l.bf16 %v1129_v60  ;;  %v1135_v8 = vunpack.c.h.bf16 %v1129_v60 }
  0x98   : > { %1009 = vmatpush.bf16.msrb.mxu0 %v1430_v37 }
  0x99   : > { %1023 = vmatpush.bf16.msrb.mxu1 %v1558_v38  ;;  %1037 = vmatpush.bf16.msrb.mxu2 %v1434_v39 }
  0x9a   : > { %1051 = vmatpush.bf16.msrb.mxu3 %v1562_v43 }
  0x9c   : > { %1010 = vmatpush.bf16.msrb.mxu0 %v1414_v49 }
  0x9d   : > { %1024 = vmatpush.bf16.msrb.mxu1 %v1542_v52  ;;  %1038 = vmatpush.bf16.msrb.mxu2 %v1418_v53 }
  0x9e   : > { %1052 = vmatpush.bf16.msrb.mxu3 %v1546_v57 }
  0xa0   : > { %1011 = vmatpush.bf16.msrb.mxu0 %v1398_v1 }
  0xa1   : > { %1025 = vmatpush.bf16.msrb.mxu1 %v1526_v2  ;;  %1039 = vmatpush.bf16.msrb.mxu2 %v1402_v3 }
  0xa2   : > { %1053 = vmatpush.bf16.msrb.mxu3 %v1530_v7 }
  0xa4   : > { %1012 = vmatpush.bf16.msrb.mxu0 %v1382_v13 }
  0xa5   : > { %1026 = vmatpush.bf16.msrb.mxu1 %v1510_v14  ;;  %1040 = vmatpush.bf16.msrb.mxu2 %v1386_v15 }
  0xa6   : > { %1054 = vmatpush.bf16.msrb.mxu3 %v1514_v16 }
  0xa7   : > { %1013 = vmatmul.bf16.vlgmr.msrb.gmra.mxu0 %v2105_v58 }
  0xa8   : > { %1027 = vmatmul.bf16.vlgmr.msrb.gmra.mxu1 %v2109_v61  ;;  %1041 = vmatmul.bf16.vlgmr.msrb.gmra.mxu2 %v2105_v58 }
  0xa9   : > { %1055 = vmatmul.bf16.vlgmr.msrb.gmra.mxu3 %v2109_v61 }
  0xfd   : > { %v1093_v17 = vpop.permute.xlu0 %1092 }
 0x100   : > { %v1113_v20 = vpop.permute.xlu1 %1112 }
 0x104   : > { %v958_v18 = vpop.f32.mrf.mxu0 }
 0x105   : > { %v1098_v32 = vpop.permute.xlu0 %1097 }
 0x107   : > { %v972_v19 = vpop.f32.mrf.mxu1 }
 0x108   : > { %v973_v21 = vadd.f32 %v972_v19, %v958_v18  ;;  %v1118_v36 = vpop.permute.xlu1 %1117  ;;  %v1138_v19 = vunpack.c.l.bf16 %v1131_v11 }
 0x10a   : > { %v1100_v23 = vmul.f32 %v1093_v17, %v973_v21 }
 0x10b   : > { %v986_v24 = vpop.f32.mrf.mxu2 }
 0x10c   : > { %v1120_v26 = vadd.f32 %v1113_v20, %v1100_v23  ;;  %v960_v27 = vpop.f32.mrf.mxu0 }
 0x10e   : > { %v1000_v58 = vpop.f32.mrf.mxu3  ;;  %v1140_v30 = vadd.f32 %v1132_v25, %v1120_v26 }
 0x10f   : > { %v1001_v61 = vadd.f32 %v1000_v58, %v986_v24  ;;  %v974_v31 = vpop.f32.mrf.mxu1  ;;  %v1139_v24 = vunpack.c.h.bf16 %v1131_v11 }
 0x110   : > { %v975_v33 = vadd.f32 %v974_v31, %v960_v27  ;;  %v1148_v39 = vmax.f32 %v1140_v30, 0.0 }
 0x111   : > { %v1101_v28 = vmul.f32 %v1093_v17, %v1001_v61 }
 0x112   : > { %v1104_v37 = vmul.f32 %v1098_v32, %v975_v33 }
 0x113   : > { %v1121_v35 = vadd.f32 %v1113_v20, %v1101_v28  ;;  %v988_v40 = vpop.f32.mrf.mxu2 }
 0x114   : > { %v1124_v43 = vadd.f32 %v1118_v36, %v1104_v37 }
 0x115   : > { %v1141_v38 = vadd.f32 %v1133_v29, %v1121_v35 }
 0x116   : > { %v1002_v42 = vpop.f32.mrf.mxu3  ;;  %v1144_v49 = vadd.f32 %v1136_v41, %v1124_v43 }
 0x117   : > { %v1149_v44 = vmax.f32 %v1141_v38, 0.0  ;;  %v1003_v45 = vadd.f32 %v1002_v42, %v988_v40 }
 0x118   : > { %v1152_v52 = vmax.f32 %v1144_v49, 0.0 }
 0x119   : > { %v1156_v46 = vpack.c.bf16 %v1149_v44, %v1148_v39  ;;  %v1105_v47 = vmul.f32 %v1098_v32, %v1003_v45 }
 0x11b   : > { %1160 = vst [vmem:[%s2189_s18] sm:$0xff] %v1156_v46  ;;  %v1125_v50 = vadd.f32 %v1118_v36, %v1105_v47 }
 0x11d   : > { %v1145_v51 = vadd.f32 %v1137_v48, %v1125_v50 }
 0x11f   : > { %v1153_v53 = vmax.f32 %v1145_v51, 0.0 }
 0x121   : > { %v1158_v54 = vpack.c.bf16 %v1153_v53, %v1152_v52 }
 0x122   : > { %v1189_v27 = vld [vmem:[%s2189_s18] sm:$0xff] (%p1854_p6) }
 0x123   : > { %1162 = vst [vmem:[%s2189_s18 + $0x10] sm:$0xff] %v1158_v54 }
 0x124   : > { %v1014_v55 = vpop.f32.mrf.mxu0  ;;  %1190 = vst [vmem:[%s1176_s9] sm:$0xff] (%p1854_p6), %v1189_v27 }
 0x125   : > { %v1028_v56 = vpop.f32.mrf.mxu1 }
 0x126   : > { %v1029_v57 = vadd.f32 %v1028_v56, %v1014_v55 }
 0x128   : > { %v1102_v59 = vmul.f32 %v1093_v17, %v1029_v57 }
 0x12a   : > { %v1122_v62 = vadd.f32 %v1113_v20, %v1102_v59  ;;  %v1193_v29 = vld [vmem:[%s2189_s18 + $0x10] sm:$0xff] (%p1854_p6) }
 0x12b   : > { %v1042_v0 = vpop.f32.mrf.mxu2  ;;  %1194 = vst [vmem:[%s1176_s9 + $0x20] sm:$0xff] (%p1854_p6), %v1193_v29 }
 0x12c   : > { %v1056_v1 = vpop.f32.mrf.mxu3  ;;  %v1016_v2 = vpop.f32.mrf.mxu0  ;;  %v1142_v6 = vadd.f32 %v1134_v63, %v1122_v62 }
 0x12d   : > { %v1057_v3 = vadd.f32 %v1056_v1, %v1042_v0  ;;  %v1030_v4 = vpop.f32.mrf.mxu1 }
 0x12e   : > { %v1031_v5 = vadd.f32 %v1030_v4, %v1016_v2  ;;  %v1150_v12 = vmax.f32 %v1142_v6, 0.0 }
 0x12f   : > { %v1103_v7 = vmul.f32 %v1093_v17, %v1057_v3 }
 0x130   : > { %v1106_v10 = vmul.f32 %v1098_v32, %v1031_v5 }
 0x131   : > { %v1123_v9 = vadd.f32 %v1113_v20, %v1103_v7 }
 0x132   : > { %v1126_v18 = vadd.f32 %v1118_v36, %v1106_v10 }
 0x133   : > { %v1143_v13 = vadd.f32 %v1135_v8, %v1123_v9  ;;  %v1044_v14 = vpop.f32.mrf.mxu2 }
 0x134   : > { %v1058_v15 = vpop.f32.mrf.mxu3  ;;  %v1146_v25 = vadd.f32 %v1138_v19, %v1126_v18 }
 0x135   : > { %v1151_v16 = vmax.f32 %v1143_v13, 0.0  ;;  %v1059_v21 = vadd.f32 %v1058_v15, %v1044_v14 }
 0x136   : > { %v1154_v26 = vmax.f32 %v1146_v25, 0.0 }
 0x137   : > { %v1157_v22 = vpack.c.bf16 %v1151_v16, %v1150_v12  ;;  %v1107_v23 = vmul.f32 %v1098_v32, %v1059_v21 }
 0x139   : > { %1161 = vst [vmem:[%s2189_s18 + $0x8] sm:$0xff] %v1157_v22  ;;  %v1127_v17 = vadd.f32 %v1118_v36, %v1107_v23 }
 0x13b   : > { %v1147_v58 = vadd.f32 %v1139_v24, %v1127_v17 }
 0x13d   : > { %v1155_v20 = vmax.f32 %v1147_v58, 0.0  ;;  %1170 = sbr.rel (!%p1854_p6) target bundleno = 330 (0x14a), region = 98 }
 0x13f   : > { %v1159_v61 = vpack.c.bf16 %v1155_v20, %v1154_v26 }
 0x140   : > { %v1191_v28 = vld [vmem:[%s2189_s18 + $0x8] sm:$0xff] (%p1854_p6) }
 0x141   : > { %1163 = vst [vmem:[%s2189_s18 + $0x18] sm:$0xff] %v1159_v61 }
 0x142   : > { %1192 = vst [vmem:[%s1176_s9 + $0x8] sm:$0xff] %v1191_v28 }
 0x148   : > { %v1195_v30 = vld [vmem:[%s2189_s18 + $0x18] sm:$0xff] }
 0x149   : > { %1196 = vst [vmem:[%s1176_s9 + $0x28] sm:$0xff] %v1195_v30 }
 0x14a PF: > { %s15_s22 = sadd.s32 1, %s1782_s22   ;;  %s2230_s18 = smov %s1770_s19 }
 0x14b   : > { %p12_p11 = scmp.ge.s32.totalorder %s15_s22, 4   ;;  %s2231_s19 = smov %s1859_s29 }
 0x14c   : > { %s2232_s20 = smov %s1778_s21  ;;  %s2233_s21 = smov %s2235_s23 }
 0x14d   :  { %14 = sbr.rel (!%p12_p11) target bundleno = 3 (0x3), region = 169 }

// kernel: image_feature_extractor_bev_forward.46
= control target key start
LH: loop header
LB: loop body
LE: loop exit
PB: predicated region body
PF: predicated region fallthrough
CT: control target
= control target key end

     0   :  { %s902_s1 = inlined_call_operand.vmem [shape: bf16[256,256], index: 1, kind: input, shape index: {}]   ;;  %s903_s2 = inlined_call_operand.vmem [shape: f32[32,1], index: 2, kind: input, shape index: {}]   ;;  %s904_s0 = inlined_call_operand.vmem [shape: bf16[32,256], index: 0, kind: input, shape index: {}]   ;;  %s905_s3 = inlined_call_operand.vmem [shape: f32[32,1], index: 3, kind: input, shape index: {}]   ;;  %s906_s4 = inlined_call_operand.vmem [shape: bf16[32,256], index: 4, kind: output, shape index: {}]  }
   0x1   :  { %v514_v0 = vld [vmem:[%s902_s1 + $0x70] sm:$0xf]  ;;  %v603_v1 = vld [vmem:[%s902_s1 + $0x74] sm:$0xf0]  ;;  %v602_v5 = vld [vmem:[%s902_s1 + $0x74] sm:$0xf] }
   0x2   :  { %v578_v2 = vld [vmem:[%s902_s1 + $0xf0] sm:$0xf]  ;;  %v515_v3 = vor.u32 %v603_v1, %v514_v0  ;;  %v619_v4 = vld [vmem:[%s902_s1 + $0xf4] sm:$0xf0]  ;;  %v516_v6 = vld [vmem:[%s902_s1 + $0x78] sm:$0xf0] }
   0x3   :  { %v579_v7 = vor.u32 %v619_v4, %v578_v2  ;;  %v519_v8 = vor.u32 %v602_v5, %v516_v6  ;;  %v618_v9 = vld [vmem:[%s902_s1 + $0xf4] sm:$0xf]  ;;  %v580_v10 = vld [vmem:[%s902_s1 + $0xf8] sm:$0xf0]  ;;  %v506_v11 = vld [vmem:[%s902_s1 + $0x60] sm:$0xf] }
   0x4   :  { %253 = vmatpush.bf16.msra.mxu0 %v515_v3  ;;  %v583_v12 = vor.u32 %v618_v9, %v580_v10  ;;  %v601_v13 = vld [vmem:[%s902_s1 + $0x64] sm:$0xf0]  ;;  %v570_v14 = vld [vmem:[%s902_s1 + $0xe0] sm:$0xf]  ;;  %v600_v18 = vld [vmem:[%s902_s1 + $0x64] sm:$0xf] }
   0x5   :  { %v617_v15 = vld [vmem:[%s902_s1 + $0xe4] sm:$0xf0]  ;;  %272 = vmatpush.bf16.msra.mxu1 %v579_v7  ;;  %291 = vmatpush.bf16.msra.mxu2 %v519_v8  ;;  %v507_v16 = vor.u32 %v601_v13, %v506_v11  ;;  %v508_v19 = vld [vmem:[%s902_s1 + $0x68] sm:$0xf0]  ;;  %v616_v20 = vld [vmem:[%s902_s1 + $0xe4] sm:$0xf] }
   0x6   :  { %v571_v17 = vor.u32 %v617_v15, %v570_v14  ;;  %310 = vmatpush.bf16.msra.mxu3 %v583_v12  ;;  %v511_v21 = vor.u32 %v600_v18, %v508_v19  ;;  %v572_v22 = vld [vmem:[%s902_s1 + $0xe8] sm:$0xf0]  ;;  %v498_v23 = vld [vmem:[%s902_s1 + $0x50] sm:$0xf]  ;;  %v599_v24 = vld [vmem:[%s902_s1 + $0x54] sm:$0xf0] }
   0x7   :  { %v575_v25 = vor.u32 %v616_v20, %v572_v22  ;;  %v562_v26 = vld [vmem:[%s902_s1 + $0xd0] sm:$0xf]  ;;  %v615_v27 = vld [vmem:[%s902_s1 + $0xd4] sm:$0xf0]  ;;  %v598_v28 = vld [vmem:[%s902_s1 + $0x54] sm:$0xf]  ;;  %v499_v29 = vor.u32 %v599_v24, %v498_v23 }
   0x8   :  { %254 = vmatpush.bf16.msra.mxu0 %v507_v16  ;;  %v500_v30 = vld [vmem:[%s902_s1 + $0x58] sm:$0xf0]  ;;  %v614_v31 = vld [vmem:[%s902_s1 + $0xd4] sm:$0xf]  ;;  %v563_v33 = vor.u32 %v615_v27, %v562_v26  ;;  %v490_v35 = vld [vmem:[%s902_s1 + $0x40] sm:$0xf] }
   0x9   :  { %v564_v32 = vld [vmem:[%s902_s1 + $0xd8] sm:$0xf0]  ;;  %273 = vmatpush.bf16.msra.mxu1 %v571_v17  ;;  %292 = vmatpush.bf16.msra.mxu2 %v511_v21  ;;  %v503_v34 = vor.u32 %v598_v28, %v500_v30  ;;  %v597_v36 = vld [vmem:[%s902_s1 + $0x44] sm:$0xf0]  ;;  %v554_v37 = vld [vmem:[%s902_s1 + $0xc0] sm:$0xf] }
   0xa   :  { %311 = vmatpush.bf16.msra.mxu3 %v575_v25  ;;  %v567_v38 = vor.u32 %v614_v31, %v564_v32  ;;  %v613_v39 = vld [vmem:[%s902_s1 + $0xc4] sm:$0xf0]  ;;  %v596_v40 = vld [vmem:[%s902_s1 + $0x44] sm:$0xf]  ;;  %v492_v41 = vld [vmem:[%s902_s1 + $0x48] sm:$0xf0]  ;;  %v491_v44 = vor.u32 %v597_v36, %v490_v35 }
   0xb   :  { %v612_v42 = vld [vmem:[%s902_s1 + $0xc4] sm:$0xf]  ;;  %v556_v43 = vld [vmem:[%s902_s1 + $0xc8] sm:$0xf0]  ;;  %v555_v45 = vor.u32 %v613_v39, %v554_v37  ;;  %v495_v46 = vor.u32 %v596_v40, %v492_v41  ;;  %v482_v47 = vld [vmem:[%s902_s1 + $0x30] sm:$0xf] }
   0xc   :  { %255 = vmatpush.bf16.msra.mxu0 %v499_v29  ;;  %v595_v48 = vld [vmem:[%s902_s1 + $0x34] sm:$0xf0]  ;;  %v546_v49 = vld [vmem:[%s902_s1 + $0xb0] sm:$0xf]  ;;  %v559_v50 = vor.u32 %v612_v42, %v556_v43  ;;  %v594_v52 = vld [vmem:[%s902_s1 + $0x34] sm:$0xf] }
   0xd   :  { %274 = vmatpush.bf16.msra.mxu1 %v563_v33  ;;  %293 = vmatpush.bf16.msra.mxu2 %v503_v34  ;;  %v611_v51 = vld [vmem:[%s902_s1 + $0xb4] sm:$0xf0]  ;;  %v484_v53 = vld [vmem:[%s902_s1 + $0x38] sm:$0xf0]  ;;  %v610_v54 = vld [vmem:[%s902_s1 + $0xb4] sm:$0xf]  ;;  %v483_v56 = vor.u32 %v595_v48, %v482_v47 }
   0xe   :  { %312 = vmatpush.bf16.msra.mxu3 %v567_v38  ;;  %v548_v55 = vld [vmem:[%s902_s1 + $0xb8] sm:$0xf0]  ;;  %v547_v57 = vor.u32 %v611_v51, %v546_v49  ;;  %v487_v58 = vor.u32 %v594_v52, %v484_v53  ;;  %v474_v59 = vld [vmem:[%s902_s1 + $0x20] sm:$0xf]  ;;  %v593_v60 = vld [vmem:[%s902_s1 + $0x24] sm:$0xf0] }
   0xf   :  { %v538_v61 = vld [vmem:[%s902_s1 + $0xa0] sm:$0xf]  ;;  %v551_v62 = vor.u32 %v610_v54, %v548_v55  ;;  %v609_v63 = vld [vmem:[%s902_s1 + $0xa4] sm:$0xf0]  ;;  %v592_v0 = vld [vmem:[%s902_s1 + $0x24] sm:$0xf]  ;;  %v475_v4 = vor.u32 %v593_v60, %v474_v59 }
  0x10   :  { %256 = vmatpush.bf16.msra.mxu0 %v491_v44  ;;  %v476_v1 = vld [vmem:[%s902_s1 + $0x28] sm:$0xf0]  ;;  %v608_v2 = vld [vmem:[%s902_s1 + $0xa4] sm:$0xf]  ;;  %v539_v5 = vor.u32 %v609_v63, %v538_v61  ;;  %v466_v7 = vld [vmem:[%s902_s1 + $0x10] sm:$0xf] }
  0x11   :  { %275 = vmatpush.bf16.msra.mxu1 %v555_v45  ;;  %294 = vmatpush.bf16.msra.mxu2 %v495_v46  ;;  %v540_v3 = vld [vmem:[%s902_s1 + $0xa8] sm:$0xf0]  ;;  %v479_v6 = vor.u32 %v592_v0, %v476_v1  ;;  %v591_v8 = vld [vmem:[%s902_s1 + $0x14] sm:$0xf0]  ;;  %v530_v9 = vld [vmem:[%s902_s1 + $0x90] sm:$0xf] }
  0x12   :  { %313 = vmatpush.bf16.msra.mxu3 %v559_v50  ;;  %v543_v10 = vor.u32 %v608_v2, %v540_v3  ;;  %v607_v11 = vld [vmem:[%s902_s1 + $0x94] sm:$0xf0]  ;;  %v590_v12 = vld [vmem:[%s902_s1 + $0x14] sm:$0xf]  ;;  %v468_v13 = vld [vmem:[%s902_s1 + $0x18] sm:$0xf0]  ;;  %v467_v16 = vor.u32 %v591_v8, %v466_v7 }
  0x13   :  { %v606_v14 = vld [vmem:[%s902_s1 + $0x94] sm:$0xf]  ;;  %v532_v15 = vld [vmem:[%s902_s1 + $0x98] sm:$0xf0]  ;;  %v624_v17 = vmov 0   ;;  %v356_v19 = vld [vmem:[%s903_s2] sm:$0xff]  ;;  %v531_v20 = vor.u32 %v607_v11, %v530_v9  ;;  %v471_v21 = vor.u32 %v590_v12, %v468_v13 }
  0x14   :  { %257 = vmatpush.bf16.msra.mxu0 %v483_v56  ;;  %622 = vset.pattern.permute.xlu1 %v624_v17  ;;  %v358_v18 = vld [vmem:[%s903_s2 + $0x10] sm:$0xff]  ;;  %v458_v22 = vld [vmem:[%s902_s1] sm:$0xf]  ;;  %v589_v23 = vld [vmem:[%s902_s1 + $0x4] sm:$0xf0]  ;;  %v535_v25 = vor.u32 %v606_v14, %v532_v15 }
  0x15   :  { %276 = vmatpush.bf16.msra.mxu1 %v547_v57  ;;  %295 = vmatpush.bf16.msra.mxu2 %v487_v58  ;;  %v522_v24 = vld [vmem:[%s902_s1 + $0x80] sm:$0xf]  ;;  %v605_v26 = vld [vmem:[%s902_s1 + $0x84] sm:$0xf0]  ;;  %v588_v27 = vld [vmem:[%s902_s1 + $0x4] sm:$0xf]  ;;  %v459_v32 = vor.u32 %v589_v23, %v458_v22 }
  0x16   :  { %314 = vmatpush.bf16.msra.mxu3 %v551_v62  ;;  %v460_v28 = vld [vmem:[%s902_s1 + $0x8] sm:$0xf0]  ;;  %621 = vset.pattern.permute.xlu0 %v624_v17  ;;  %v604_v29 = vld [vmem:[%s902_s1 + $0x84] sm:$0xf]  ;;  %v442_v33 = vld [vmem:[%s904_s0] sm:$0xf]  ;;  %v523_v35 = vor.u32 %v605_v26, %v522_v24 }
  0x17   :  { %v524_v30 = vld [vmem:[%s902_s1 + $0x88] sm:$0xf0]  ;;  %372 = vperm.xlu1 %622, %v358_v18   ;;  %362 = vperm.xlu0 %621, %v356_v19   ;;  %v388_v31 = vld [vmem:[%s905_s3] sm:$0xff]  ;;  %v585_v34 = vld [vmem:[%s904_s0 + $0x4] sm:$0xf0]  ;;  %v463_v36 = vor.u32 %v588_v27, %v460_v28 }
  0x18   :  { %258 = vmatpush.bf16.msra.mxu0 %v475_v4  ;;  %623 = vset.pattern.permute.xlu2 %v624_v17  ;;  %v584_v37 = vld [vmem:[%s904_s0 + $0x4] sm:$0xf]  ;;  %v444_v38 = vld [vmem:[%s904_s0 + $0x8] sm:$0xf0]  ;;  %v527_v39 = vor.u32 %v604_v29, %v524_v30  ;;  %v443_v40 = vor.u32 %v585_v34, %v442_v33  ;;  %v359_v42 = vld [vmem:[%s903_s2 + $0x18] sm:$0xff] }
  0x19   :  { %277 = vmatpush.bf16.msra.mxu1 %v539_v5  ;;  %296 = vmatpush.bf16.msra.mxu2 %v479_v6  ;;  %v447_v41 = vor.u32 %v584_v37, %v444_v38  ;;  %v357_v43 = vld [vmem:[%s903_s2 + $0x8] sm:$0xff]  ;;  %v391_v45 = vld [vmem:[%s905_s3 + $0x18] sm:$0xff]  ;;  %v390_v46 = vld [vmem:[%s905_s3 + $0x10] sm:$0xff] }
  0x1a   :  { %315 = vmatpush.bf16.msra.mxu3 %v543_v10  ;;  %394 = vperm.xlu2 %623, %v388_v31   ;;  %v389_v44 = vld [vmem:[%s905_s3 + $0x8] sm:$0xff]  ;;  %v450_v47 = vld [vmem:[%s904_s0 + $0x10] sm:$0xf]  ;;  %v587_v48 = vld [vmem:[%s904_s0 + $0x14] sm:$0xf0] }
  0x1b   :  { %v586_v49 = vld [vmem:[%s904_s0 + $0x14] sm:$0xf]  ;;  %v452_v50 = vld [vmem:[%s904_s0 + $0x18] sm:$0xf0]  ;;  %v451_v51 = vor.u32 %v587_v48, %v450_v47 }
  0x1c   :  { %259 = vmatpush.bf16.msra.mxu0 %v467_v16  ;;  %v455_v52 = vor.u32 %v586_v49, %v452_v50 }
  0x1d   :  { %278 = vmatpush.bf16.msra.mxu1 %v531_v20  ;;  %297 = vmatpush.bf16.msra.mxu2 %v471_v21 }
  0x1e   :  { %316 = vmatpush.bf16.msra.mxu3 %v535_v25 }
  0x1f   :  { %377 = vperm.xlu1 %622, %v359_v42   ;;  %367 = vperm.xlu0 %621, %v357_v43  }
  0x20   :  { %260 = vmatpush.bf16.msra.mxu0 %v459_v32 }
  0x21   :  { %279 = vmatpush.bf16.msra.mxu1 %v523_v35  ;;  %298 = vmatpush.bf16.msra.mxu2 %v463_v36 }
  0x22   :  { %317 = vmatpush.bf16.msra.mxu3 %v527_v39  ;;  %399 = vperm.xlu2 %623, %v389_v44  }
  0x23   :  { %261 = vmatmul.bf16.vlgmr.msra.gmra.mxu0 %v443_v40 }
  0x24   :  { %280 = vmatmul.bf16.vlgmr.msra.gmra.mxu1 %v447_v41  ;;  %299 = vmatmul.bf16.vlgmr.msra.gmra.mxu2 %v443_v40 }
  0x25   :  { %318 = vmatmul.bf16.vlgmr.msra.gmra.mxu3 %v447_v41 }
  0x27   :  { %409 = vperm.xlu1 %622, %v391_v45   ;;  %404 = vperm.xlu0 %621, %v390_v46  }
  0x33   :  { %266 = vmatmul.bf16.gmra.mxu0 %v451_v51 }
  0x34   :  { %285 = vmatmul.bf16.gmra.mxu1 %v455_v52  ;;  %304 = vmatmul.bf16.gmra.mxu2 %v451_v51 }
  0x35   :  { %323 = vmatmul.bf16.gmra.mxu3 %v455_v52 }
  0x74   :  { %v395_v58 = vpop.permute.xlu2 %394 }
  0x7c   :  { %v400_v9 = vpop.permute.xlu2 %399 }
  0x89   :  { %v363_v56 = vpop.permute.xlu0 %362  ;;  %v373_v4 = vpop.permute.xlu1 %372 }
  0x91   :  { %v368_v3 = vpop.permute.xlu0 %367  ;;  %v378_v20 = vpop.permute.xlu1 %377 }
  0x99   :  { %v405_v30 = vpop.permute.xlu0 %404  ;;  %v410_v42 = vpop.permute.xlu1 %409 }
  0xa0   :  { %v262_v53 = vpop.f32.mrf.mxu0 }
  0xa1   :  { %v281_v54 = vpop.f32.mrf.mxu1 }
  0xa2   :  { %v282_v55 = vadd.f32 %v281_v54, %v262_v53 }
  0xa4   :  { %v380_v57 = vmul.f32 %v363_v56, %v282_v55 }
  0xa6   :  { %v412_v62 = vadd.f32 %v395_v58, %v380_v57 }
  0xa7   :  { %v300_v59 = vpop.f32.mrf.mxu2 }
  0xa8   :  { %v319_v60 = vpop.f32.mrf.mxu3  ;;  %v264_v61 = vpop.f32.mrf.mxu0  ;;  %v420_v5 = vmax.f32 %v412_v62, 0.0 }
  0xa9   :  { %v320_v63 = vadd.f32 %v319_v60, %v300_v59  ;;  %v283_v0 = vpop.f32.mrf.mxu1 }
  0xaa   :  { %v284_v2 = vadd.f32 %v283_v0, %v264_v61 }
  0xab   :  { %v381_v1 = vmul.f32 %v363_v56, %v320_v63 }
  0xac   :  { %v382_v8 = vmul.f32 %v368_v3, %v284_v2 }
  0xad   :  { %v413_v6 = vadd.f32 %v395_v58, %v381_v1 }
  0xae   :  { %v414_v16 = vadd.f32 %v400_v9, %v382_v8 }
  0xaf   :  { %v421_v7 = vmax.f32 %v413_v6, 0.0  ;;  %v302_v10 = vpop.f32.mrf.mxu2 }
  0xb0   :  { %v321_v11 = vpop.f32.mrf.mxu3  ;;  %v267_v12 = vpop.f32.mrf.mxu0  ;;  %v422_v21 = vmax.f32 %v414_v16, 0.0 }
  0xb1   :  { %v428_v13 = vpack.c.bf16 %v421_v7, %v420_v5  ;;  %v322_v14 = vadd.f32 %v321_v11, %v302_v10  ;;  %v286_v15 = vpop.f32.mrf.mxu1 }
  0xb2   :  { %v287_v18 = vadd.f32 %v286_v15, %v267_v12 }
  0xb3   :  { %432 = vst [vmem:[%s906_s4] sm:$0xff] %v428_v13  ;;  %v383_v17 = vmul.f32 %v368_v3, %v322_v14 }
  0xb4   :  { %v384_v23 = vmul.f32 %v373_v4, %v287_v18 }
  0xb5   :  { %v415_v19 = vadd.f32 %v400_v9, %v383_v17 }
  0xb6   :  { %v416_v31 = vadd.f32 %v405_v30, %v384_v23 }
  0xb7   :  { %v423_v22 = vmax.f32 %v415_v19, 0.0  ;;  %v305_v24 = vpop.f32.mrf.mxu2 }
  0xb8   :  { %v324_v25 = vpop.f32.mrf.mxu3  ;;  %v269_v26 = vpop.f32.mrf.mxu0  ;;  %v424_v35 = vmax.f32 %v416_v31, 0.0 }
  0xb9   :  { %v429_v27 = vpack.c.bf16 %v423_v22, %v422_v21  ;;  %v325_v28 = vadd.f32 %v324_v25, %v305_v24  ;;  %v288_v29 = vpop.f32.mrf.mxu1 }
  0xba   :  { %v289_v33 = vadd.f32 %v288_v29, %v269_v26 }
  0xbb   :  { %433 = vst [vmem:[%s906_s4 + $0x8] sm:$0xff] %v429_v27  ;;  %v385_v32 = vmul.f32 %v373_v4, %v325_v28 }
  0xbc   :  { %v386_v37 = vmul.f32 %v378_v20, %v289_v33 }
  0xbd   :  { %v417_v34 = vadd.f32 %v405_v30, %v385_v32 }
  0xbe   :  { %v418_v43 = vadd.f32 %v410_v42, %v386_v37 }
  0xbf   :  { %v425_v36 = vmax.f32 %v417_v34, 0.0  ;;  %v307_v38 = vpop.f32.mrf.mxu2 }
  0xc0   :  { %v326_v39 = vpop.f32.mrf.mxu3  ;;  %v426_v46 = vmax.f32 %v418_v43, 0.0 }
  0xc1   :  { %v430_v40 = vpack.c.bf16 %v425_v36, %v424_v35  ;;  %v327_v41 = vadd.f32 %v326_v39, %v307_v38 }
  0xc3   :  { %434 = vst [vmem:[%s906_s4 + $0x10] sm:$0xff] %v430_v40  ;;  %v387_v44 = vmul.f32 %v378_v20, %v327_v41 }
  0xc5   :  { %v419_v45 = vadd.f32 %v410_v42, %v387_v44 }
  0xc7   :  { %v427_v47 = vmax.f32 %v419_v45, 0.0 }
  0xc9   :  { %v431_v48 = vpack.c.bf16 %v427_v47, %v426_v46 }
  0xcb   :  { %435 = vst [vmem:[%s906_s4 + $0x18] sm:$0xff] %v431_v48 }

// kernel: image_feature_extractor_bev_forward.47
= control target key start
LH: loop header
LB: loop body
LE: loop exit
PB: predicated region body
PF: predicated region fallthrough
CT: control target
= control target key end

     0   :  { %v400_v3 = vmov 0   ;;  %s564_s1 = inlined_call_operand.vmem [shape: bf16[128,256], index: 1, kind: input, shape index: {}]   ;;  %s565_s2 = inlined_call_operand.vmem [shape: f32[32,1], index: 2, kind: input, shape index: {}]   ;;  %s566_s3 = inlined_call_operand.vmem [shape: f32[32,1], index: 3, kind: input, shape index: {}]   ;;  %s567_s0 = inlined_call_operand.vmem [shape: bf16[32,128], index: 0, kind: input, shape index: {}]   ;;  %s568_s4 = inlined_call_operand.vmem [shape: bf16[32,256], index: 4, kind: output, shape index: {}]  }
   0x1   :  { %v356_v0 = vld [vmem:[%s564_s1 + $0x70] sm:$0xf]  ;;  %v379_v1 = vld [vmem:[%s564_s1 + $0x74] sm:$0xf0]  ;;  %v378_v2 = vld [vmem:[%s564_s1 + $0x74] sm:$0xf]  ;;  %398 = vset.pattern.permute.xlu1 %v400_v3  ;;  %397 = vset.pattern.permute.xlu0 %v400_v3 }
   0x2   :  { %v357_v4 = vor.u32 %v379_v1, %v356_v0  ;;  %v358_v5 = vld [vmem:[%s564_s1 + $0x78] sm:$0xf0]  ;;  %v348_v6 = vld [vmem:[%s564_s1 + $0x60] sm:$0xf]  ;;  %v377_v7 = vld [vmem:[%s564_s1 + $0x64] sm:$0xf0]  ;;  %399 = vset.pattern.permute.xlu2 %v400_v3 }
   0x3   :  { %v361_v8 = vor.u32 %v378_v2, %v358_v5  ;;  %v376_v9 = vld [vmem:[%s564_s1 + $0x64] sm:$0xf]  ;;  %v350_v10 = vld [vmem:[%s564_s1 + $0x68] sm:$0xf0]  ;;  %v349_v11 = vor.u32 %v377_v7, %v348_v6  ;;  %v340_v13 = vld [vmem:[%s564_s1 + $0x50] sm:$0xf] }
   0x4   :  { %149 = vmatpush.bf16.msra.mxu0 %v357_v4  ;;  %380 = vmatpush.bf16.msra.mxu2 %v357_v4  ;;  %v353_v12 = vor.u32 %v376_v9, %v350_v10  ;;  %v375_v14 = vld [vmem:[%s564_s1 + $0x54] sm:$0xf0]  ;;  %v374_v15 = vld [vmem:[%s564_s1 + $0x54] sm:$0xf]  ;;  %v342_v16 = vld [vmem:[%s564_s1 + $0x58] sm:$0xf0] }
   0x5   :  { %168 = vmatpush.bf16.msra.mxu1 %v361_v8  ;;  %388 = vmatpush.bf16.msra.mxu3 %v361_v8  ;;  %v341_v17 = vor.u32 %v375_v14, %v340_v13  ;;  %v345_v18 = vor.u32 %v374_v15, %v342_v16  ;;  %v332_v19 = vld [vmem:[%s564_s1 + $0x40] sm:$0xf]  ;;  %v373_v20 = vld [vmem:[%s564_s1 + $0x44] sm:$0xf0]  ;;  %v372_v21 = vld [vmem:[%s564_s1 + $0x44] sm:$0xf] }
   0x6   :  { %v334_v22 = vld [vmem:[%s564_s1 + $0x48] sm:$0xf0]  ;;  %v216_v23 = vld [vmem:[%s565_s2 + $0x10] sm:$0xff]  ;;  %v214_v24 = vld [vmem:[%s565_s2] sm:$0xff]  ;;  %v333_v25 = vor.u32 %v373_v20, %v332_v19 }
   0x7   :  { %230 = vperm.xlu1 %398, %v216_v23   ;;  %220 = vperm.xlu0 %397, %v214_v24   ;;  %v337_v26 = vor.u32 %v372_v21, %v334_v22  ;;  %v324_v27 = vld [vmem:[%s564_s1 + $0x30] sm:$0xf]  ;;  %v371_v28 = vld [vmem:[%s564_s1 + $0x34] sm:$0xf0]  ;;  %v370_v29 = vld [vmem:[%s564_s1 + $0x34] sm:$0xf] }
   0x8   :  { %150 = vmatpush.bf16.msra.mxu0 %v349_v11  ;;  %381 = vmatpush.bf16.msra.mxu2 %v349_v11  ;;  %v326_v30 = vld [vmem:[%s564_s1 + $0x38] sm:$0xf0]  ;;  %v246_v31 = vld [vmem:[%s566_s3] sm:$0xff]  ;;  %v325_v32 = vor.u32 %v371_v28, %v324_v27  ;;  %v215_v34 = vld [vmem:[%s565_s2 + $0x8] sm:$0xff] }
   0x9   :  { %169 = vmatpush.bf16.msra.mxu1 %v353_v12  ;;  %389 = vmatpush.bf16.msra.mxu3 %v353_v12  ;;  %v217_v33 = vld [vmem:[%s565_s2 + $0x18] sm:$0xff]  ;;  %v329_v35 = vor.u32 %v370_v29, %v326_v30  ;;  %v316_v36 = vld [vmem:[%s564_s1 + $0x20] sm:$0xf]  ;;  %v369_v37 = vld [vmem:[%s564_s1 + $0x24] sm:$0xf0] }
   0xa   :  { %252 = vperm.xlu2 %399, %v246_v31   ;;  %v368_v38 = vld [vmem:[%s564_s1 + $0x24] sm:$0xf]  ;;  %v318_v39 = vld [vmem:[%s564_s1 + $0x28] sm:$0xf0]  ;;  %v317_v40 = vor.u32 %v369_v37, %v316_v36  ;;  %v308_v43 = vld [vmem:[%s564_s1 + $0x10] sm:$0xf] }
   0xb   :  { %v247_v41 = vld [vmem:[%s566_s3 + $0x8] sm:$0xff]  ;;  %v321_v42 = vor.u32 %v368_v38, %v318_v39  ;;  %v367_v44 = vld [vmem:[%s564_s1 + $0x14] sm:$0xf0]  ;;  %v366_v45 = vld [vmem:[%s564_s1 + $0x14] sm:$0xf] }
   0xc   :  { %151 = vmatpush.bf16.msra.mxu0 %v341_v17  ;;  %382 = vmatpush.bf16.msra.mxu2 %v341_v17  ;;  %v310_v46 = vld [vmem:[%s564_s1 + $0x18] sm:$0xf0]  ;;  %v309_v47 = vor.u32 %v367_v44, %v308_v43  ;;  %v248_v49 = vld [vmem:[%s566_s3 + $0x10] sm:$0xff]  ;;  %v300_v51 = vld [vmem:[%s564_s1] sm:$0xf] }
   0xd   :  { %170 = vmatpush.bf16.msra.mxu1 %v345_v18  ;;  %390 = vmatpush.bf16.msra.mxu3 %v345_v18  ;;  %v249_v48 = vld [vmem:[%s566_s3 + $0x18] sm:$0xff]  ;;  %v313_v50 = vor.u32 %v366_v45, %v310_v46  ;;  %v365_v52 = vld [vmem:[%s564_s1 + $0x4] sm:$0xf0]  ;;  %v364_v53 = vld [vmem:[%s564_s1 + $0x4] sm:$0xf] }
   0xe   :  { %v302_v54 = vld [vmem:[%s564_s1 + $0x8] sm:$0xf0]  ;;  %v301_v55 = vor.u32 %v365_v52, %v300_v51  ;;  %v362_v57 = vld [vmem:[%s567_s0] sm:$0xff] }
   0xf   :  { %235 = vperm.xlu1 %398, %v217_v33   ;;  %225 = vperm.xlu0 %397, %v215_v34   ;;  %v305_v56 = vor.u32 %v364_v53, %v302_v54  ;;  %v363_v58 = vld [vmem:[%s567_s0 + $0x8] sm:$0xff] }
  0x10   :  { %152 = vmatpush.bf16.msra.mxu0 %v333_v25  ;;  %383 = vmatpush.bf16.msra.mxu2 %v333_v25 }
  0x11   :  { %171 = vmatpush.bf16.msra.mxu1 %v337_v26  ;;  %391 = vmatpush.bf16.msra.mxu3 %v337_v26 }
  0x12   :  { %257 = vperm.xlu2 %399, %v247_v41  }
  0x14   :  { %153 = vmatpush.bf16.msra.mxu0 %v325_v32  ;;  %384 = vmatpush.bf16.msra.mxu2 %v325_v32 }
  0x15   :  { %172 = vmatpush.bf16.msra.mxu1 %v329_v35  ;;  %392 = vmatpush.bf16.msra.mxu3 %v329_v35 }
  0x17   :  { %267 = vperm.xlu1 %398, %v249_v48   ;;  %262 = vperm.xlu0 %397, %v248_v49  }
  0x18   :  { %154 = vmatpush.bf16.msra.mxu0 %v317_v40  ;;  %385 = vmatpush.bf16.msra.mxu2 %v317_v40 }
  0x19   :  { %173 = vmatpush.bf16.msra.mxu1 %v321_v42  ;;  %393 = vmatpush.bf16.msra.mxu3 %v321_v42 }
  0x1c   :  { %155 = vmatpush.bf16.msra.mxu0 %v309_v47  ;;  %386 = vmatpush.bf16.msra.mxu2 %v309_v47 }
  0x1d   :  { %174 = vmatpush.bf16.msra.mxu1 %v313_v50  ;;  %394 = vmatpush.bf16.msra.mxu3 %v313_v50 }
  0x20   :  { %156 = vmatpush.bf16.msra.mxu0 %v301_v55  ;;  %387 = vmatpush.bf16.msra.mxu2 %v301_v55 }
  0x21   :  { %175 = vmatpush.bf16.msra.mxu1 %v305_v56  ;;  %395 = vmatpush.bf16.msra.mxu3 %v305_v56 }
  0x23   :  { %157 = vmatmul.bf16.vlgmr.msra.gmra.mxu0 %v362_v57  ;;  %162 = vmatmul.bf16.vlgmr.msra.gmra.mxu2 %v363_v58 }
  0x24   :  { %176 = vmatmul.bf16.vlgmr.msra.gmra.mxu1 %v362_v57  ;;  %181 = vmatmul.bf16.vlgmr.msra.gmra.mxu3 %v363_v58 }
  0x64   :  { %v253_v62 = vpop.permute.xlu2 %252 }
  0x6c   :  { %v258_v17 = vpop.permute.xlu2 %257 }
  0x79   :  { %v221_v59 = vpop.permute.xlu0 %220  ;;  %v231_v60 = vpop.permute.xlu1 %230 }
  0x81   :  { %v226_v61 = vpop.permute.xlu0 %225  ;;  %v236_v5 = vpop.permute.xlu1 %235 }
  0x89   :  { %v263_v10 = vpop.permute.xlu0 %262  ;;  %v268_v26 = vpop.permute.xlu1 %267 }
  0xa0   :  { %v158_v63 = vpop.f32.mrf.mxu0 }
  0xa1   :  { %v238_v0 = vmul.f32 %v221_v59, %v158_v63  ;;  %v177_v1 = vpop.f32.mrf.mxu1 }
  0xa2   :  { %v239_v2 = vmul.f32 %v221_v59, %v177_v1 }
  0xa3   :  { %v270_v3 = vadd.f32 %v253_v62, %v238_v0 }
  0xa4   :  { %v271_v4 = vadd.f32 %v253_v62, %v239_v2 }
  0xa6   :  { %v278_v6 = vpack.c.bf16 %v271_v4, %v270_v3  ;;  %v163_v7 = vpop.f32.mrf.mxu2 }
  0xa7   :  { %v242_v8 = vmul.f32 %v231_v60, %v163_v7  ;;  %v182_v9 = vpop.f32.mrf.mxu3 }
  0xa8   :  { %282 = vst [vmem:[%s568_s4] sm:$0xff] %v278_v6  ;;  %v243_v11 = vmul.f32 %v231_v60, %v182_v9  ;;  %v160_v12 = vpop.f32.mrf.mxu0 }
  0xa9   :  { %v274_v13 = vadd.f32 %v263_v10, %v242_v8  ;;  %v240_v14 = vmul.f32 %v226_v61, %v160_v12  ;;  %v179_v15 = vpop.f32.mrf.mxu1 }
  0xaa   :  { %v275_v16 = vadd.f32 %v263_v10, %v243_v11  ;;  %v241_v18 = vmul.f32 %v226_v61, %v179_v15 }
  0xab   :  { %v272_v19 = vadd.f32 %v258_v17, %v240_v14 }
  0xac   :  { %v280_v20 = vpack.c.bf16 %v275_v16, %v274_v13  ;;  %v273_v21 = vadd.f32 %v258_v17, %v241_v18 }
  0xae   :  { %284 = vst [vmem:[%s568_s4 + $0x10] sm:$0xff] %v280_v20  ;;  %v279_v22 = vpack.c.bf16 %v273_v21, %v272_v19  ;;  %v165_v23 = vpop.f32.mrf.mxu2 }
  0xaf   :  { %v244_v24 = vmul.f32 %v236_v5, %v165_v23  ;;  %v184_v25 = vpop.f32.mrf.mxu3 }
  0xb0   :  { %283 = vst [vmem:[%s568_s4 + $0x8] sm:$0xff] %v279_v22  ;;  %v245_v27 = vmul.f32 %v236_v5, %v184_v25 }
  0xb1   :  { %v276_v28 = vadd.f32 %v268_v26, %v244_v24 }
  0xb2   :  { %v277_v29 = vadd.f32 %v268_v26, %v245_v27 }
  0xb4   :  { %v281_v30 = vpack.c.bf16 %v277_v29, %v276_v28 }
  0xb6   :  { %285 = vst [vmem:[%s568_s4 + $0x18] sm:$0xff] %v281_v30 }

// kernel: image_feature_extractor_bev_forward.48
= control target key start
LH: loop header
LB: loop body
LE: loop exit
PB: predicated region body
PF: predicated region fallthrough
CT: control target
= control target key end

     0   :  { %s1360_s18 = smov 0   ;;  %s1362_s19 = smov 0   ;;  %s1551_s0 = inlined_call_operand.vmem [shape: bf16[32,512], index: 0, kind: input, shape index: {}]   ;;  %s1552_s1 = inlined_call_operand.vmem [shape: bf16[512,256], index: 1, kind: input, shape index: {}]   ;;  %s1553_s2 = inlined_call_operand.vmem [shape: f32[32,1], index: 2, kind: input, shape index: {}]   ;;  %s1554_s3 = inlined_call_operand.vmem [shape: f32[32,1], index: 3, kind: input, shape index: {}]   ;;  %s1555_s4 = inlined_call_operand.vmem [shape: bf16[32,256], index: 4, kind: input, shape index: {}]   ;;  %s1556_s5 = inlined_call_operand.vmem [shape: bf16[32,256], index: 5, kind: output, shape index: {}]  }
   0x1   :  { %s1364_s20 = smov 0   ;;  %s1366_s21 = smov 0  }
   0x2   :  { %s1368_s22 = smov 0  }
   0x3 LB: > { %s27_s23 = sadd.s32 1, %s1322_s21  ;;  %p50_p1 = scmp.ne.s32.totalorder %s1314_s19, %s1310_s18  ;;  %s1326_s22 = sphi %s1368_s22, %s15_s22   ;;  %s1322_s21 = sphi %s1366_s21, %s1560_s21   ;;  %s1318_s20 = sphi %s1364_s20, %s1559_s20   ;;  %s1314_s19 = sphi %s1362_s19, %s1558_s19   ;;  %s1310_s18 = sphi %s1360_s18, %s1557_s18  }
   0x4   : > { %p28_p0 = scmp.ge.s32.totalorder %s27_s23, 2  ;;  %p51_p2 = scmp.eq.s32.totalorder %s1326_s22, 0 }
   0x5   : > { %s43_s25 = sadd.s32 1, %s1314_s19  ;;  %p1046_p5 = scmp.ge.s32.totalorder %s1326_s22, 2 }
   0x6   : > { %s1562_s23 = smov (%p28_p0, %s27_s23), 0  ;;  %p52_p3 = por %p51_p2, %p50_p1 }
   0x7   : > { %s39_s24 = ssub.s32 %s1322_s21, %s1562_s23  ;;  %245 = sbr.rel (%p1046_p5) target bundleno = 20 (0x14), region = 28 }
   0x8   : > { %p41_p4 = scmp.eq.s32.totalorder %s39_s24, 0 }
   0xa   : > { %s1395_s26 = scalar_select %p41_p4, %s1314_s19, %s43_s25  }
   0xc   : > { %248 = sbr.rel (!%p52_p3) target bundleno = 20 (0x14), region = 32  ;;  %s250_s27 = sand.u32 (%p52_p3), 1, %s1314_s19  }
   0xd   : > { %s1205_s28 = sshll.u32 (%p52_p3), %s1322_s21, 3  ;;  %s1047_s29 = sshll.u32 (%p52_p3), %s250_s27, 5 }
   0xe   : > { %s258_s7 = scalar_lea.vmem (%p52_p3), %s1551_s0, %s1205_s28  ;;  %s252_s8 = scalar_lea.vmem (%p52_p3), [#allocation3], %s1047_s29 }
   0xf   : > { %v293_v0 = vld [vmem:[%s258_s7] sm:$0xff] (%p52_p3)  ;;  %v295_v1 = vld [vmem:[%s258_s7 + $0x10] sm:$0xff] (%p52_p3) }
  0x10   : > { %v297_v2 = vld [vmem:[%s258_s7 + $0x20] sm:$0xff] (%p52_p3)  ;;  %294 = vst [vmem:[%s252_s8] sm:$0xff] (%p52_p3), %v293_v0  ;;  %v299_v3 = vld [vmem:[%s258_s7 + $0x30] sm:$0xff] (%p52_p3) }
  0x11   : > { %296 = vst [vmem:[%s252_s8 + $0x8] sm:$0xff] %v295_v1 }
  0x12   : > { %298 = vst [vmem:[%s252_s8 + $0x10] sm:$0xff] %v297_v2 }
  0x13   : > { %300 = vst [vmem:[%s252_s8 + $0x18] sm:$0xff] %v299_v3 }
  0x14 PF: > { %p1050_p6 = scmp.ge.s32.totalorder %s1326_s22, 1  ;;  %p320_p7 = scmp.lt.s32.totalorder %s1326_s22, 3 }
  0x16   : > { %p321_p8 = pnand %p1050_p6, %p320_p7 }
  0x17   : > { %s327_s9 = sand.u32 (!%p321_p8), 1, %s1310_s18   ;;  %s1052_s10 = sshll.u32 (!%p321_p8), %s1318_s20, 5 }
  0x18   : > { %324 = sbr.rel (%p321_p8) target bundleno = 383 (0x17f), region = 74  ;;  %s1051_s11 = sshll.u32 (!%p321_p8), %s327_s9, 5 }
  0x19   : > { %p393_p9 = scmp.lt.s32.totalorder (!%p321_p8), %s1052_s10, 63  ;;  %s1412_s16 = scalar_lea.vmem (!%p321_p8), [#allocation3], %s1051_s11 }
  0x1a   : > { %p1055_p10 = scmp.ne.s32.totalorder (!%p321_p8), %s1318_s20, 0 }
  0x1d   : > { %s1564_s10 = smov (!%p393_p9, %s1052_s10), 63  ;;  %442 = sbr.rel (%p1055_p10) target bundleno = 43 (0x2b), region = 82 }
  0x1e   : > { %s1206_s12 = sshll.u32 %s1564_s10, 3 }
  0x1f   : > { %s1410_s15 = scalar_lea.vmem %s1552_s1, %s1206_s12 }
  0x22   : > { %v1328_v4 = vmov 0.0  }
  0x23   : > { %443 = vst [vmem:[#allocation2 + $0x30] sm:$0xff] %v1328_v4 }
  0x24   : > { %444 = vst [vmem:[#allocation2] sm:$0xff] %v1328_v4 }
  0x25   : > { %445 = vst [vmem:[#allocation2 + $0x18] sm:$0xff] %v1328_v4 }
  0x26   : > { %446 = vst [vmem:[#allocation2 + $0x10] sm:$0xff] %v1328_v4 }
  0x27   : > { %447 = vst [vmem:[#allocation2 + $0x8] sm:$0xff] %v1328_v4 }
  0x28   : > { %448 = vst [vmem:[#allocation2 + $0x20] sm:$0xff] %v1328_v4 }
  0x29   : > { %449 = vst [vmem:[#allocation2 + $0x28] sm:$0xff] %v1328_v4 }
  0x2a   : > { %450 = vst [vmem:[#allocation2 + $0x38] sm:$0xff] %v1328_v4 }
  0x2b PF: > { %v1130_v5 = vld [vmem:[%s1410_s15 + $0x70] sm:$0xf]  ;;  %v1226_v6 = vld [vmem:[%s1410_s15 + $0x74] sm:$0xf0]  ;;  %v1225_v10 = vld [vmem:[%s1410_s15 + $0x74] sm:$0xf] }
  0x2c   : > { %v1194_v7 = vld [vmem:[%s1410_s15 + $0xf0] sm:$0xf]  ;;  %v1131_v8 = vor.u32 %v1226_v6, %v1130_v5  ;;  %v1242_v9 = vld [vmem:[%s1410_s15 + $0xf4] sm:$0xf0]  ;;  %v1132_v11 = vld [vmem:[%s1410_s15 + $0x78] sm:$0xf0] }
  0x2d   : > { %v1195_v12 = vor.u32 %v1242_v9, %v1194_v7  ;;  %v1135_v13 = vor.u32 %v1225_v10, %v1132_v11  ;;  %v1241_v14 = vld [vmem:[%s1410_s15 + $0xf4] sm:$0xf]  ;;  %v1196_v15 = vld [vmem:[%s1410_s15 + $0xf8] sm:$0xf0]  ;;  %v1122_v16 = vld [vmem:[%s1410_s15 + $0x60] sm:$0xf] }
  0x2e   : > { %675 = vmatpush.bf16.msra.mxu0 %v1131_v8  ;;  %v1199_v17 = vor.u32 %v1241_v14, %v1196_v15  ;;  %v1224_v18 = vld [vmem:[%s1410_s15 + $0x64] sm:$0xf0]  ;;  %v1186_v19 = vld [vmem:[%s1410_s15 + $0xe0] sm:$0xf]  ;;  %v1223_v23 = vld [vmem:[%s1410_s15 + $0x64] sm:$0xf] }
  0x2f   : > { %v1240_v20 = vld [vmem:[%s1410_s15 + $0xe4] sm:$0xf0]  ;;  %694 = vmatpush.bf16.msra.mxu1 %v1195_v12  ;;  %713 = vmatpush.bf16.msra.mxu2 %v1135_v13  ;;  %v1123_v21 = vor.u32 %v1224_v18, %v1122_v16  ;;  %v1124_v24 = vld [vmem:[%s1410_s15 + $0x68] sm:$0xf0]  ;;  %v1239_v25 = vld [vmem:[%s1410_s15 + $0xe4] sm:$0xf] }
  0x30   : > { %v1187_v22 = vor.u32 %v1240_v20, %v1186_v19  ;;  %732 = vmatpush.bf16.msra.mxu3 %v1199_v17  ;;  %v1127_v26 = vor.u32 %v1223_v23, %v1124_v24  ;;  %v1188_v27 = vld [vmem:[%s1410_s15 + $0xe8] sm:$0xf0]  ;;  %v1114_v28 = vld [vmem:[%s1410_s15 + $0x50] sm:$0xf]  ;;  %v1222_v29 = vld [vmem:[%s1410_s15 + $0x54] sm:$0xf0] }
  0x31   : > { %v1191_v30 = vor.u32 %v1239_v25, %v1188_v27  ;;  %v1178_v31 = vld [vmem:[%s1410_s15 + $0xd0] sm:$0xf]  ;;  %v1238_v32 = vld [vmem:[%s1410_s15 + $0xd4] sm:$0xf0]  ;;  %v1221_v33 = vld [vmem:[%s1410_s15 + $0x54] sm:$0xf]  ;;  %v1115_v34 = vor.u32 %v1222_v29, %v1114_v28 }
  0x32   : > { %676 = vmatpush.bf16.msra.mxu0 %v1123_v21  ;;  %v1116_v35 = vld [vmem:[%s1410_s15 + $0x58] sm:$0xf0]  ;;  %v1237_v36 = vld [vmem:[%s1410_s15 + $0xd4] sm:$0xf]  ;;  %v1179_v38 = vor.u32 %v1238_v32, %v1178_v31  ;;  %v1106_v40 = vld [vmem:[%s1410_s15 + $0x40] sm:$0xf] }
  0x33   : > { %v1180_v37 = vld [vmem:[%s1410_s15 + $0xd8] sm:$0xf0]  ;;  %695 = vmatpush.bf16.msra.mxu1 %v1187_v22  ;;  %714 = vmatpush.bf16.msra.mxu2 %v1127_v26  ;;  %v1119_v39 = vor.u32 %v1221_v33, %v1116_v35  ;;  %v1220_v41 = vld [vmem:[%s1410_s15 + $0x44] sm:$0xf0]  ;;  %v1170_v42 = vld [vmem:[%s1410_s15 + $0xc0] sm:$0xf] }
  0x34   : > { %733 = vmatpush.bf16.msra.mxu3 %v1191_v30  ;;  %v1183_v43 = vor.u32 %v1237_v36, %v1180_v37  ;;  %v1236_v44 = vld [vmem:[%s1410_s15 + $0xc4] sm:$0xf0]  ;;  %v1219_v45 = vld [vmem:[%s1410_s15 + $0x44] sm:$0xf]  ;;  %v1108_v46 = vld [vmem:[%s1410_s15 + $0x48] sm:$0xf0]  ;;  %v1107_v49 = vor.u32 %v1220_v41, %v1106_v40 }
  0x35   : > { %v1235_v47 = vld [vmem:[%s1410_s15 + $0xc4] sm:$0xf]  ;;  %v1172_v48 = vld [vmem:[%s1410_s15 + $0xc8] sm:$0xf0]  ;;  %v1171_v50 = vor.u32 %v1236_v44, %v1170_v42  ;;  %v1111_v51 = vor.u32 %v1219_v45, %v1108_v46  ;;  %v1098_v52 = vld [vmem:[%s1410_s15 + $0x30] sm:$0xf] }
  0x36   : > { %677 = vmatpush.bf16.msra.mxu0 %v1115_v34  ;;  %v1218_v53 = vld [vmem:[%s1410_s15 + $0x34] sm:$0xf0]  ;;  %v1162_v54 = vld [vmem:[%s1410_s15 + $0xb0] sm:$0xf]  ;;  %v1175_v55 = vor.u32 %v1235_v47, %v1172_v48  ;;  %v1217_v57 = vld [vmem:[%s1410_s15 + $0x34] sm:$0xf] }
  0x37   : > { %696 = vmatpush.bf16.msra.mxu1 %v1179_v38  ;;  %715 = vmatpush.bf16.msra.mxu2 %v1119_v39  ;;  %v1234_v56 = vld [vmem:[%s1410_s15 + $0xb4] sm:$0xf0]  ;;  %v1100_v58 = vld [vmem:[%s1410_s15 + $0x38] sm:$0xf0]  ;;  %v1233_v59 = vld [vmem:[%s1410_s15 + $0xb4] sm:$0xf]  ;;  %v1099_v61 = vor.u32 %v1218_v53, %v1098_v52 }
  0x38   : > { %734 = vmatpush.bf16.msra.mxu3 %v1183_v43  ;;  %v1164_v60 = vld [vmem:[%s1410_s15 + $0xb8] sm:$0xf0]  ;;  %v1163_v62 = vor.u32 %v1234_v56, %v1162_v54  ;;  %v1103_v63 = vor.u32 %v1217_v57, %v1100_v58  ;;  %v1090_v0 = vld [vmem:[%s1410_s15 + $0x20] sm:$0xf]  ;;  %v1216_v1 = vld [vmem:[%s1410_s15 + $0x24] sm:$0xf0] }
  0x39   : > { %v1154_v2 = vld [vmem:[%s1410_s15 + $0xa0] sm:$0xf]  ;;  %v1167_v3 = vor.u32 %v1233_v59, %v1164_v60  ;;  %v1232_v4 = vld [vmem:[%s1410_s15 + $0xa4] sm:$0xf0]  ;;  %v1215_v5 = vld [vmem:[%s1410_s15 + $0x24] sm:$0xf]  ;;  %v1091_v9 = vor.u32 %v1216_v1, %v1090_v0 }
  0x3a   : > { %678 = vmatpush.bf16.msra.mxu0 %v1107_v49  ;;  %v1092_v6 = vld [vmem:[%s1410_s15 + $0x28] sm:$0xf0]  ;;  %v1231_v7 = vld [vmem:[%s1410_s15 + $0xa4] sm:$0xf]  ;;  %v1155_v10 = vor.u32 %v1232_v4, %v1154_v2  ;;  %v1082_v12 = vld [vmem:[%s1410_s15 + $0x10] sm:$0xf] }
  0x3b   : > { %697 = vmatpush.bf16.msra.mxu1 %v1171_v50  ;;  %716 = vmatpush.bf16.msra.mxu2 %v1111_v51  ;;  %v1156_v8 = vld [vmem:[%s1410_s15 + $0xa8] sm:$0xf0]  ;;  %v1095_v11 = vor.u32 %v1215_v5, %v1092_v6  ;;  %v1214_v13 = vld [vmem:[%s1410_s15 + $0x14] sm:$0xf0]  ;;  %v1146_v14 = vld [vmem:[%s1410_s15 + $0x90] sm:$0xf] }
  0x3c   : > { %735 = vmatpush.bf16.msra.mxu3 %v1175_v55  ;;  %v1159_v15 = vor.u32 %v1231_v7, %v1156_v8  ;;  %v1230_v16 = vld [vmem:[%s1410_s15 + $0x94] sm:$0xf0]  ;;  %v1213_v17 = vld [vmem:[%s1410_s15 + $0x14] sm:$0xf]  ;;  %v1084_v18 = vld [vmem:[%s1410_s15 + $0x18] sm:$0xf0]  ;;  %v1083_v21 = vor.u32 %v1214_v13, %v1082_v12 }
  0x3d   : > { %v1229_v19 = vld [vmem:[%s1410_s15 + $0x94] sm:$0xf]  ;;  %v1148_v20 = vld [vmem:[%s1410_s15 + $0x98] sm:$0xf0]  ;;  %v1147_v22 = vor.u32 %v1230_v16, %v1146_v14  ;;  %v1087_v23 = vor.u32 %v1213_v17, %v1084_v18  ;;  %v1074_v24 = vld [vmem:[%s1410_s15] sm:$0xf] }
  0x3e   : > { %679 = vmatpush.bf16.msra.mxu0 %v1099_v61  ;;  %v1212_v25 = vld [vmem:[%s1410_s15 + $0x4] sm:$0xf0]  ;;  %v1138_v26 = vld [vmem:[%s1410_s15 + $0x80] sm:$0xf]  ;;  %v1151_v27 = vor.u32 %v1229_v19, %v1148_v20  ;;  %v1211_v29 = vld [vmem:[%s1410_s15 + $0x4] sm:$0xf] }
  0x3f   : > { %698 = vmatpush.bf16.msra.mxu1 %v1163_v62  ;;  %717 = vmatpush.bf16.msra.mxu2 %v1103_v63  ;;  %v1228_v28 = vld [vmem:[%s1410_s15 + $0x84] sm:$0xf0]  ;;  %v1076_v30 = vld [vmem:[%s1410_s15 + $0x8] sm:$0xf0]  ;;  %v1227_v31 = vld [vmem:[%s1410_s15 + $0x84] sm:$0xf]  ;;  %v1075_v33 = vor.u32 %v1212_v25, %v1074_v24 }
  0x40   : > { %736 = vmatpush.bf16.msra.mxu3 %v1167_v3  ;;  %v1140_v32 = vld [vmem:[%s1410_s15 + $0x88] sm:$0xf0]  ;;  %v1058_v34 = vld [vmem:[%s1412_s16] sm:$0xf]  ;;  %v1208_v35 = vld [vmem:[%s1412_s16 + $0x4] sm:$0xf0]  ;;  %v1139_v36 = vor.u32 %v1228_v28, %v1138_v26  ;;  %v1079_v37 = vor.u32 %v1211_v29, %v1076_v30 }
  0x41   : > { %v1207_v38 = vld [vmem:[%s1412_s16 + $0x4] sm:$0xf]  ;;  %v1060_v39 = vld [vmem:[%s1412_s16 + $0x8] sm:$0xf0]  ;;  %v1143_v40 = vor.u32 %v1227_v31, %v1140_v32  ;;  %v1059_v41 = vor.u32 %v1208_v35, %v1058_v34  ;;  %v1066_v43 = vld [vmem:[%s1412_s16 + $0x10] sm:$0xf] }
  0x42   : > { %680 = vmatpush.bf16.msra.mxu0 %v1091_v9  ;;  %v1063_v42 = vor.u32 %v1207_v38, %v1060_v39  ;;  %v1210_v44 = vld [vmem:[%s1412_s16 + $0x14] sm:$0xf0]  ;;  %v1209_v45 = vld [vmem:[%s1412_s16 + $0x14] sm:$0xf]  ;;  %v1068_v46 = vld [vmem:[%s1412_s16 + $0x18] sm:$0xf0] }
  0x43   : > { %699 = vmatpush.bf16.msra.mxu1 %v1155_v10  ;;  %718 = vmatpush.bf16.msra.mxu2 %v1095_v11  ;;  %v1067_v47 = vor.u32 %v1210_v44, %v1066_v43  ;;  %v1071_v48 = vor.u32 %v1209_v45, %v1068_v46  ;;  %v451_v50 = vld [vmem:[#allocation2 + $0x30] sm:$0xff]  ;;  %v452_v55 = vld [vmem:[#allocation2] sm:$0xff]  ;;  %v453_v59 = vld [vmem:[#allocation2 + $0x18] sm:$0xff]  ;;  %p1200_p11 = scmp.ne.s32.totalorder %s1318_s20, 1 }
  0x44   : > { %737 = vmatpush.bf16.msra.mxu3 %v1159_v15  ;;  %v454_v1 = vld [vmem:[#allocation2 + $0x10] sm:$0xff]  ;;  %v455_v5 = vld [vmem:[#allocation2 + $0x8] sm:$0xff]  ;;  %v456_v11 = vld [vmem:[#allocation2 + $0x20] sm:$0xff] }
  0x45   : > { %v457_v15 = vld [vmem:[#allocation2 + $0x28] sm:$0xff] }
  0x46   : > { %681 = vmatpush.bf16.msra.mxu0 %v1083_v21  ;;  %v458_v21 = vld [vmem:[#allocation2 + $0x38] sm:$0xff] }
  0x47   : > { %700 = vmatpush.bf16.msra.mxu1 %v1147_v22  ;;  %719 = vmatpush.bf16.msra.mxu2 %v1087_v23 }
  0x48   : > { %738 = vmatpush.bf16.msra.mxu3 %v1151_v27 }
  0x4a   : > { %682 = vmatpush.bf16.msra.mxu0 %v1075_v33 }
  0x4b   : > { %701 = vmatpush.bf16.msra.mxu1 %v1139_v36  ;;  %720 = vmatpush.bf16.msra.mxu2 %v1079_v37 }
  0x4c   : > { %739 = vmatpush.bf16.msra.mxu3 %v1143_v40 }
  0x4d   : > { %683 = vmatmul.bf16.vlgmr.msra.gmra.mxu0 %v1059_v41 }
  0x4e   : > { %702 = vmatmul.bf16.vlgmr.msra.gmra.mxu1 %v1063_v42  ;;  %721 = vmatmul.bf16.vlgmr.msra.gmra.mxu2 %v1059_v41 }
  0x4f   : > { %740 = vmatmul.bf16.vlgmr.msra.gmra.mxu3 %v1063_v42 }
  0x5d   : > { %688 = vmatmul.bf16.gmra.mxu0 %v1067_v47 }
  0x5e   : > { %707 = vmatmul.bf16.gmra.mxu1 %v1071_v48  ;;  %726 = vmatmul.bf16.gmra.mxu2 %v1067_v47 }
  0x5f   : > { %745 = vmatmul.bf16.gmra.mxu3 %v1071_v48 }
  0xca   : > { %v684_v49 = vpop.f32.mrf.mxu0 }
  0xcb   : > { %v703_v51 = vpop.f32.mrf.mxu1 }
  0xcc   : > { %v704_v52 = vadd.f32 %v703_v51, %v684_v49 }
  0xce   : > { %v751_v53 = vadd.f32 %v704_v52, %v451_v50 }
  0xd0   : > { %759 = vst [vmem:[#allocation2 + $0x30] sm:$0xff] %v751_v53 }
  0xd1   : > { %v722_v54 = vpop.f32.mrf.mxu2 }
  0xd2   : > { %v741_v56 = vpop.f32.mrf.mxu3  ;;  %v686_v57 = vpop.f32.mrf.mxu0 }
  0xd3   : > { %v742_v58 = vadd.f32 %v741_v56, %v722_v54  ;;  %v705_v60 = vpop.f32.mrf.mxu1 }
  0xd4   : > { %v706_v61 = vadd.f32 %v705_v60, %v686_v57 }
  0xd5   : > { %v752_v62 = vadd.f32 %v742_v58, %v452_v55 }
  0xd6   : > { %v753_v63 = vadd.f32 %v706_v61, %v453_v59 }
  0xd7   : > { %760 = vst [vmem:[#allocation2] sm:$0xff] %v752_v62 }
  0xd8   : > { %761 = vst [vmem:[#allocation2 + $0x18] sm:$0xff] %v753_v63 }
  0xd9   : > { %v724_v0 = vpop.f32.mrf.mxu2 }
  0xda   : > { %v743_v2 = vpop.f32.mrf.mxu3  ;;  %v689_v3 = vpop.f32.mrf.mxu0 }
  0xdb   : > { %v744_v4 = vadd.f32 %v743_v2, %v724_v0  ;;  %v708_v6 = vpop.f32.mrf.mxu1 }
  0xdc   : > { %v709_v7 = vadd.f32 %v708_v6, %v689_v3 }
  0xdd   : > { %v754_v8 = vadd.f32 %v744_v4, %v454_v1 }
  0xde   : > { %v755_v9 = vadd.f32 %v709_v7, %v455_v5 }
  0xdf   : > { %762 = vst [vmem:[#allocation2 + $0x10] sm:$0xff] %v754_v8 }
  0xe0   : > { %763 = vst [vmem:[#allocation2 + $0x8] sm:$0xff] %v755_v9 }
  0xe1   : > { %v727_v10 = vpop.f32.mrf.mxu2 }
  0xe2   : > { %v746_v12 = vpop.f32.mrf.mxu3  ;;  %v691_v13 = vpop.f32.mrf.mxu0 }
  0xe3   : > { %v747_v14 = vadd.f32 %v746_v12, %v727_v10  ;;  %v710_v16 = vpop.f32.mrf.mxu1 }
  0xe4   : > { %v711_v17 = vadd.f32 %v710_v16, %v691_v13 }
  0xe5   : > { %v756_v18 = vadd.f32 %v747_v14, %v456_v11 }
  0xe6   : > { %v757_v19 = vadd.f32 %v711_v17, %v457_v15 }
  0xe7   : > { %764 = vst [vmem:[#allocation2 + $0x20] sm:$0xff] %v756_v18 }
  0xe8   : > { %765 = vst [vmem:[#allocation2 + $0x28] sm:$0xff] %v757_v19 }
  0xe9   : > { %v729_v20 = vpop.f32.mrf.mxu2 }
  0xea   : > { %v748_v22 = vpop.f32.mrf.mxu3 }
  0xeb   : > { %v749_v23 = vadd.f32 %v748_v22, %v729_v20  ;;  %770 = sbr.rel (%p1200_p11) target bundleno = 383 (0x17f), region = 86 }
  0xed   : > { %v758_v24 = vadd.f32 %v749_v23, %v458_v21 }
  0xef   : > { %766 = vst [vmem:[#allocation2 + $0x38] sm:$0xff] %v758_v24 }
  0xf0   : > { %v781_v25 = vld [vmem:[%s1553_s2 + $0x10] sm:$0xff]  ;;  %v779_v26 = vld [vmem:[%s1553_s2] sm:$0xff]  ;;  %v1329_v27 = vmov 0   ;;  %v782_v29 = vld [vmem:[%s1553_s2 + $0x18] sm:$0xff] }
  0xf1   : > { %1286 = vset.pattern.permute.xlu1 %v1329_v27  ;;  %1285 = vset.pattern.permute.xlu0 %v1329_v27  ;;  %v811_v28 = vld [vmem:[%s1554_s3] sm:$0xff]  ;;  %v780_v30 = vld [vmem:[%s1553_s2 + $0x8] sm:$0xff]  ;;  %v814_v32 = vld [vmem:[%s1554_s3 + $0x18] sm:$0xff] }
  0xf2   : > { %795 = vperm.xlu1 %1286, %v781_v25   ;;  %785 = vperm.xlu0 %1285, %v779_v26   ;;  %v812_v31 = vld [vmem:[%s1554_s3 + $0x8] sm:$0xff]  ;;  %v813_v33 = vld [vmem:[%s1554_s3 + $0x10] sm:$0xff]  ;;  %v843_v34 = vld [vmem:[%s1555_s4] sm:$0xff] }
  0xf3   : > { %1287 = vset.pattern.permute.xlu2 %v1329_v27  ;;  %v771_v35 = vld [vmem:[#allocation2 + $0x30] sm:$0xff]  ;;  %v772_v36 = vld [vmem:[#allocation2] sm:$0xff]  ;;  %v847_v40 = vunpack.c.l.bf16 %v843_v34  ;;  %v848_v41 = vunpack.c.h.bf16 %v843_v34  ;;  %v844_v48 = vld [vmem:[%s1555_s4 + $0x8] sm:$0xff] }
  0xf4   : > { %817 = vperm.xlu2 %1287, %v811_v28   ;;  %v773_v49 = vld [vmem:[#allocation2 + $0x18] sm:$0xff]  ;;  %v774_v52 = vld [vmem:[#allocation2 + $0x10] sm:$0xff]  ;;  %v849_v56 = vunpack.c.l.bf16 %v844_v48  ;;  %v850_v59 = vunpack.c.h.bf16 %v844_v48  ;;  %v775_v62 = vld [vmem:[#allocation2 + $0x8] sm:$0xff] }
  0xf5   : > { %v846_v61 = vld [vmem:[%s1555_s4 + $0x18] sm:$0xff]  ;;  %v845_v0 = vld [vmem:[%s1555_s4 + $0x10] sm:$0xff]  ;;  %v776_v1 = vld [vmem:[#allocation2 + $0x20] sm:$0xff] }
  0xf6   : > { %v777_v2 = vld [vmem:[#allocation2 + $0x28] sm:$0xff]  ;;  %v778_v3 = vld [vmem:[#allocation2 + $0x38] sm:$0xff]  ;;  %v853_v6 = vunpack.c.l.bf16 %v846_v61  ;;  %v854_v7 = vunpack.c.h.bf16 %v846_v61  ;;  %v851_v10 = vunpack.c.l.bf16 %v845_v0  ;;  %v852_v11 = vunpack.c.h.bf16 %v845_v0 }
  0xfa   : > { %800 = vperm.xlu1 %1286, %v782_v29   ;;  %790 = vperm.xlu0 %1285, %v780_v30  }
  0xfc   : > { %822 = vperm.xlu2 %1287, %v812_v31  }
 0x102   : > { %832 = vperm.xlu1 %1286, %v814_v32   ;;  %827 = vperm.xlu0 %1285, %v813_v33  }
 0x14e   : > { %v818_v37 = vpop.permute.xlu2 %817 }
 0x156   : > { %v823_v58 = vpop.permute.xlu2 %822 }
 0x164   : > { %v796_v38 = vpop.permute.xlu1 %795  ;;  %v786_v39 = vpop.permute.xlu0 %785 }
 0x165   : > { %v803_v42 = vmul.f32 %v786_v39, %v771_v35  ;;  %v804_v43 = vmul.f32 %v786_v39, %v772_v36  ;;  %v807_v8 = vmul.f32 %v796_v38, %v775_v62  ;;  %v808_v12 = vmul.f32 %v796_v38, %v776_v1 }
 0x167   : > { %v835_v44 = vadd.f32 %v818_v37, %v803_v42  ;;  %v836_v45 = vadd.f32 %v818_v37, %v804_v43 }
 0x169   : > { %v855_v46 = vadd.f32 %v847_v40, %v835_v44  ;;  %v856_v47 = vadd.f32 %v848_v41, %v836_v45 }
 0x16b   : > { %v863_v50 = vmax.f32 %v855_v46, 0.0  ;;  %v864_v51 = vmax.f32 %v856_v47, 0.0 }
 0x16c   : > { %v801_v53 = vpop.permute.xlu1 %800  ;;  %v791_v54 = vpop.permute.xlu0 %790 }
 0x16d   : > { %v871_v55 = vpack.c.bf16 %v864_v51, %v863_v50  ;;  %v805_v57 = vmul.f32 %v791_v54, %v773_v49  ;;  %v806_v60 = vmul.f32 %v791_v54, %v774_v52  ;;  %v809_v13 = vmul.f32 %v801_v53, %v777_v2 }
 0x16e   : > { %v810_v14 = vmul.f32 %v801_v53, %v778_v3 }
 0x16f   : > { %875 = vst [vmem:[%s1556_s5] sm:$0xff] %v871_v55  ;;  %v837_v63 = vadd.f32 %v823_v58, %v805_v57  ;;  %v838_v4 = vadd.f32 %v823_v58, %v806_v60 }
 0x171   : > { %v857_v5 = vadd.f32 %v849_v56, %v837_v63  ;;  %v858_v9 = vadd.f32 %v850_v59, %v838_v4 }
 0x173   : > { %v865_v15 = vmax.f32 %v857_v5, 0.0  ;;  %v866_v16 = vmax.f32 %v858_v9, 0.0 }
 0x174   : > { %v833_v17 = vpop.permute.xlu1 %832  ;;  %v828_v18 = vpop.permute.xlu0 %827 }
 0x175   : > { %v841_v19 = vadd.f32 %v833_v17, %v809_v13  ;;  %v842_v20 = vadd.f32 %v833_v17, %v810_v14  ;;  %v839_v21 = vadd.f32 %v828_v18, %v807_v8  ;;  %v840_v22 = vadd.f32 %v828_v18, %v808_v12 }
 0x176   : > { %v872_v23 = vpack.c.bf16 %v866_v16, %v865_v15 }
 0x177   : > { %v861_v24 = vadd.f32 %v853_v6, %v841_v19  ;;  %v862_v25 = vadd.f32 %v854_v7, %v842_v20  ;;  %v859_v26 = vadd.f32 %v851_v10, %v839_v21  ;;  %v860_v27 = vadd.f32 %v852_v11, %v840_v22 }
 0x178   : > { %876 = vst [vmem:[%s1556_s5 + $0x8] sm:$0xff] %v872_v23 }
 0x179   : > { %v869_v28 = vmax.f32 %v861_v24, 0.0  ;;  %v870_v29 = vmax.f32 %v862_v25, 0.0  ;;  %v867_v30 = vmax.f32 %v859_v26, 0.0  ;;  %v868_v31 = vmax.f32 %v860_v27, 0.0 }
 0x17b   : > { %v874_v32 = vpack.c.bf16 %v870_v29, %v869_v28  ;;  %v873_v33 = vpack.c.bf16 %v868_v31, %v867_v30 }
 0x17d   : > { %878 = vst [vmem:[%s1556_s5 + $0x18] sm:$0xff] %v874_v32 }
 0x17e   : > { %877 = vst [vmem:[%s1556_s5 + $0x10] sm:$0xff] %v873_v33 }
 0x17f PF: > { %s15_s22 = sadd.s32 1, %s1326_s22   ;;  %s1557_s18 = smov %s1314_s19 }
 0x180   : > { %p12_p12 = scmp.ge.s32.totalorder %s15_s22, 4   ;;  %s1558_s19 = smov %s1395_s26 }
 0x181   : > { %s1559_s20 = smov %s1322_s21  ;;  %s1560_s21 = smov %s1562_s23 }
 0x182   :  { %14 = sbr.rel (!%p12_p12) target bundleno = 3 (0x3), region = 133 }

// kernel: image_feature_extractor_bev_forward.49
= control target key start
LH: loop header
LB: loop body
LE: loop exit
PB: predicated region body
PF: predicated region fallthrough
CT: control target
= control target key end

     0   :  { %s1245_s15 = smov 0   ;;  %s1247_s16 = smov 0   ;;  %s1424_s0 = inlined_call_operand.vmem [shape: bf16[32,512], index: 0, kind: input, shape index: {}]   ;;  %s1425_s1 = inlined_call_operand.vmem [shape: bf16[512,256], index: 1, kind: input, shape index: {}]   ;;  %s1426_s2 = inlined_call_operand.vmem [shape: f32[32,1], index: 2, kind: input, shape index: {}]   ;;  %s1427_s3 = inlined_call_operand.vmem [shape: f32[32,1], index: 3, kind: input, shape index: {}]   ;;  %s1428_s4 = inlined_call_operand.vmem [shape: bf16[32,256], index: 4, kind: output, shape index: {}]  }
   0x1   :  { %s1249_s17 = smov 0   ;;  %s1251_s18 = smov 0  }
   0x2   :  { %s1253_s19 = smov 0  }
   0x3 LB: > { %s26_s20 = sadd.s32 1, %s1212_s18  ;;  %p49_p1 = scmp.ne.s32.totalorder %s1204_s16, %s1200_s15  ;;  %s1216_s19 = sphi %s1253_s19, %s14_s19   ;;  %s1212_s18 = sphi %s1251_s18, %s1432_s18   ;;  %s1208_s17 = sphi %s1249_s17, %s1431_s17   ;;  %s1204_s16 = sphi %s1247_s16, %s1430_s16   ;;  %s1200_s15 = sphi %s1245_s15, %s1429_s15  }
   0x4   : > { %p27_p0 = scmp.ge.s32.totalorder %s26_s20, 2  ;;  %p50_p2 = scmp.eq.s32.totalorder %s1216_s19, 0 }
   0x5   : > { %s42_s22 = sadd.s32 1, %s1204_s16  ;;  %p936_p5 = scmp.ge.s32.totalorder %s1216_s19, 2 }
   0x6   : > { %s1434_s20 = smov (%p27_p0, %s26_s20), 0  ;;  %p51_p3 = por %p50_p2, %p49_p1 }
   0x7   : > { %s38_s21 = ssub.s32 %s1212_s18, %s1434_s20  ;;  %201 = sbr.rel (%p936_p5) target bundleno = 20 (0x14), region = 24 }
   0x8   : > { %p40_p4 = scmp.eq.s32.totalorder %s38_s21, 0 }
   0xa   : > { %s1280_s23 = scalar_select %p40_p4, %s1204_s16, %s42_s22  }
   0xc   : > { %204 = sbr.rel (!%p51_p3) target bundleno = 20 (0x14), region = 28  ;;  %s206_s24 = sand.u32 (%p51_p3), 1, %s1204_s16  }
   0xd   : > { %s1095_s25 = sshll.u32 (%p51_p3), %s1212_s18, 3  ;;  %s937_s26 = sshll.u32 (%p51_p3), %s206_s24, 5 }
   0xe   : > { %s214_s29 = scalar_lea.vmem (%p51_p3), %s1424_s0, %s1095_s25  ;;  %s208_s30 = scalar_lea.vmem (%p51_p3), [#allocation3], %s937_s26 }
   0xf   : > { %v249_v0 = vld [vmem:[%s214_s29] sm:$0xff] (%p51_p3)  ;;  %v251_v1 = vld [vmem:[%s214_s29 + $0x10] sm:$0xff] (%p51_p3) }
  0x10   : > { %v253_v2 = vld [vmem:[%s214_s29 + $0x20] sm:$0xff] (%p51_p3)  ;;  %250 = vst [vmem:[%s208_s30] sm:$0xff] (%p51_p3), %v249_v0  ;;  %v255_v3 = vld [vmem:[%s214_s29 + $0x30] sm:$0xff] (%p51_p3) }
  0x11   : > { %252 = vst [vmem:[%s208_s30 + $0x8] sm:$0xff] %v251_v1 }
  0x12   : > { %254 = vst [vmem:[%s208_s30 + $0x10] sm:$0xff] %v253_v2 }
  0x13   : > { %256 = vst [vmem:[%s208_s30 + $0x18] sm:$0xff] %v255_v3 }
  0x14 PF: > { %p940_p6 = scmp.ge.s32.totalorder %s1216_s19, 1  ;;  %p276_p7 = scmp.lt.s32.totalorder %s1216_s19, 3 }
  0x16   : > { %p277_p8 = pnand %p940_p6, %p276_p7 }
  0x17   : > { %s283_s5 = sand.u32 (!%p277_p8), 1, %s1200_s15   ;;  %s942_s6 = sshll.u32 (!%p277_p8), %s1208_s17, 5 }
  0x18   : > { %280 = sbr.rel (%p277_p8) target bundleno = 381 (0x17d), region = 70  ;;  %s941_s7 = sshll.u32 (!%p277_p8), %s283_s5, 5 }
  0x19   : > { %p337_p9 = scmp.lt.s32.totalorder (!%p277_p8), %s942_s6, 63  ;;  %s1297_s12 = scalar_lea.vmem (!%p277_p8), [#allocation3], %s941_s7 }
  0x1a   : > { %p945_p10 = scmp.ne.s32.totalorder (!%p277_p8), %s1208_s17, 0 }
  0x1d   : > { %s1436_s6 = smov (!%p337_p9, %s942_s6), 63  ;;  %374 = sbr.rel (%p945_p10) target bundleno = 43 (0x2b), region = 78 }
  0x1e   : > { %s1096_s8 = sshll.u32 %s1436_s6, 3 }
  0x1f   : > { %s1295_s11 = scalar_lea.vmem %s1425_s1, %s1096_s8 }
  0x22   : > { %v1218_v4 = vmov 0.0  }
  0x23   : > { %375 = vst [vmem:[#allocation2 + $0x30] sm:$0xff] %v1218_v4 }
  0x24   : > { %376 = vst [vmem:[#allocation2] sm:$0xff] %v1218_v4 }
  0x25   : > { %377 = vst [vmem:[#allocation2 + $0x18] sm:$0xff] %v1218_v4 }
  0x26   : > { %378 = vst [vmem:[#allocation2 + $0x10] sm:$0xff] %v1218_v4 }
  0x27   : > { %379 = vst [vmem:[#allocation2 + $0x8] sm:$0xff] %v1218_v4 }
  0x28   : > { %380 = vst [vmem:[#allocation2 + $0x20] sm:$0xff] %v1218_v4 }
  0x29   : > { %381 = vst [vmem:[#allocation2 + $0x28] sm:$0xff] %v1218_v4 }
  0x2a   : > { %382 = vst [vmem:[#allocation2 + $0x38] sm:$0xff] %v1218_v4 }
  0x2b PF: > { %v1020_v5 = vld [vmem:[%s1295_s11 + $0x70] sm:$0xf]  ;;  %v1116_v6 = vld [vmem:[%s1295_s11 + $0x74] sm:$0xf0]  ;;  %v1115_v10 = vld [vmem:[%s1295_s11 + $0x74] sm:$0xf] }
  0x2c   : > { %v1084_v7 = vld [vmem:[%s1295_s11 + $0xf0] sm:$0xf]  ;;  %v1021_v8 = vor.u32 %v1116_v6, %v1020_v5  ;;  %v1132_v9 = vld [vmem:[%s1295_s11 + $0xf4] sm:$0xf0]  ;;  %v1022_v11 = vld [vmem:[%s1295_s11 + $0x78] sm:$0xf0] }
  0x2d   : > { %v1085_v12 = vor.u32 %v1132_v9, %v1084_v7  ;;  %v1025_v13 = vor.u32 %v1115_v10, %v1022_v11  ;;  %v1131_v14 = vld [vmem:[%s1295_s11 + $0xf4] sm:$0xf]  ;;  %v1086_v15 = vld [vmem:[%s1295_s11 + $0xf8] sm:$0xf0]  ;;  %v1012_v16 = vld [vmem:[%s1295_s11 + $0x60] sm:$0xf] }
  0x2e   : > { %607 = vmatpush.bf16.msra.mxu0 %v1021_v8  ;;  %v1089_v17 = vor.u32 %v1131_v14, %v1086_v15  ;;  %v1114_v18 = vld [vmem:[%s1295_s11 + $0x64] sm:$0xf0]  ;;  %v1076_v19 = vld [vmem:[%s1295_s11 + $0xe0] sm:$0xf]  ;;  %v1113_v23 = vld [vmem:[%s1295_s11 + $0x64] sm:$0xf] }
  0x2f   : > { %v1130_v20 = vld [vmem:[%s1295_s11 + $0xe4] sm:$0xf0]  ;;  %626 = vmatpush.bf16.msra.mxu1 %v1085_v12  ;;  %645 = vmatpush.bf16.msra.mxu2 %v1025_v13  ;;  %v1013_v21 = vor.u32 %v1114_v18, %v1012_v16  ;;  %v1014_v24 = vld [vmem:[%s1295_s11 + $0x68] sm:$0xf0]  ;;  %v1129_v25 = vld [vmem:[%s1295_s11 + $0xe4] sm:$0xf] }
  0x30   : > { %v1077_v22 = vor.u32 %v1130_v20, %v1076_v19  ;;  %664 = vmatpush.bf16.msra.mxu3 %v1089_v17  ;;  %v1017_v26 = vor.u32 %v1113_v23, %v1014_v24  ;;  %v1078_v27 = vld [vmem:[%s1295_s11 + $0xe8] sm:$0xf0]  ;;  %v1004_v28 = vld [vmem:[%s1295_s11 + $0x50] sm:$0xf]  ;;  %v1112_v29 = vld [vmem:[%s1295_s11 + $0x54] sm:$0xf0] }
  0x31   : > { %v1081_v30 = vor.u32 %v1129_v25, %v1078_v27  ;;  %v1068_v31 = vld [vmem:[%s1295_s11 + $0xd0] sm:$0xf]  ;;  %v1128_v32 = vld [vmem:[%s1295_s11 + $0xd4] sm:$0xf0]  ;;  %v1111_v33 = vld [vmem:[%s1295_s11 + $0x54] sm:$0xf]  ;;  %v1005_v34 = vor.u32 %v1112_v29, %v1004_v28 }
  0x32   : > { %608 = vmatpush.bf16.msra.mxu0 %v1013_v21  ;;  %v1006_v35 = vld [vmem:[%s1295_s11 + $0x58] sm:$0xf0]  ;;  %v1127_v36 = vld [vmem:[%s1295_s11 + $0xd4] sm:$0xf]  ;;  %v1069_v38 = vor.u32 %v1128_v32, %v1068_v31  ;;  %v996_v40 = vld [vmem:[%s1295_s11 + $0x40] sm:$0xf] }
  0x33   : > { %v1070_v37 = vld [vmem:[%s1295_s11 + $0xd8] sm:$0xf0]  ;;  %627 = vmatpush.bf16.msra.mxu1 %v1077_v22  ;;  %646 = vmatpush.bf16.msra.mxu2 %v1017_v26  ;;  %v1009_v39 = vor.u32 %v1111_v33, %v1006_v35  ;;  %v1110_v41 = vld [vmem:[%s1295_s11 + $0x44] sm:$0xf0]  ;;  %v1060_v42 = vld [vmem:[%s1295_s11 + $0xc0] sm:$0xf] }
  0x34   : > { %665 = vmatpush.bf16.msra.mxu3 %v1081_v30  ;;  %v1073_v43 = vor.u32 %v1127_v36, %v1070_v37  ;;  %v1126_v44 = vld [vmem:[%s1295_s11 + $0xc4] sm:$0xf0]  ;;  %v1109_v45 = vld [vmem:[%s1295_s11 + $0x44] sm:$0xf]  ;;  %v998_v46 = vld [vmem:[%s1295_s11 + $0x48] sm:$0xf0]  ;;  %v997_v49 = vor.u32 %v1110_v41, %v996_v40 }
  0x35   : > { %v1125_v47 = vld [vmem:[%s1295_s11 + $0xc4] sm:$0xf]  ;;  %v1062_v48 = vld [vmem:[%s1295_s11 + $0xc8] sm:$0xf0]  ;;  %v1061_v50 = vor.u32 %v1126_v44, %v1060_v42  ;;  %v1001_v51 = vor.u32 %v1109_v45, %v998_v46  ;;  %v988_v52 = vld [vmem:[%s1295_s11 + $0x30] sm:$0xf] }
  0x36   : > { %609 = vmatpush.bf16.msra.mxu0 %v1005_v34  ;;  %v1108_v53 = vld [vmem:[%s1295_s11 + $0x34] sm:$0xf0]  ;;  %v1052_v54 = vld [vmem:[%s1295_s11 + $0xb0] sm:$0xf]  ;;  %v1065_v55 = vor.u32 %v1125_v47, %v1062_v48  ;;  %v1107_v57 = vld [vmem:[%s1295_s11 + $0x34] sm:$0xf] }
  0x37   : > { %628 = vmatpush.bf16.msra.mxu1 %v1069_v38  ;;  %647 = vmatpush.bf16.msra.mxu2 %v1009_v39  ;;  %v1124_v56 = vld [vmem:[%s1295_s11 + $0xb4] sm:$0xf0]  ;;  %v990_v58 = vld [vmem:[%s1295_s11 + $0x38] sm:$0xf0]  ;;  %v1123_v59 = vld [vmem:[%s1295_s11 + $0xb4] sm:$0xf]  ;;  %v989_v61 = vor.u32 %v1108_v53, %v988_v52 }
  0x38   : > { %666 = vmatpush.bf16.msra.mxu3 %v1073_v43  ;;  %v1054_v60 = vld [vmem:[%s1295_s11 + $0xb8] sm:$0xf0]  ;;  %v1053_v62 = vor.u32 %v1124_v56, %v1052_v54  ;;  %v993_v63 = vor.u32 %v1107_v57, %v990_v58  ;;  %v980_v0 = vld [vmem:[%s1295_s11 + $0x20] sm:$0xf]  ;;  %v1106_v1 = vld [vmem:[%s1295_s11 + $0x24] sm:$0xf0] }
  0x39   : > { %v1044_v2 = vld [vmem:[%s1295_s11 + $0xa0] sm:$0xf]  ;;  %v1057_v3 = vor.u32 %v1123_v59, %v1054_v60  ;;  %v1122_v4 = vld [vmem:[%s1295_s11 + $0xa4] sm:$0xf0]  ;;  %v1105_v5 = vld [vmem:[%s1295_s11 + $0x24] sm:$0xf]  ;;  %v981_v9 = vor.u32 %v1106_v1, %v980_v0 }
  0x3a   : > { %610 = vmatpush.bf16.msra.mxu0 %v997_v49  ;;  %v982_v6 = vld [vmem:[%s1295_s11 + $0x28] sm:$0xf0]  ;;  %v1121_v7 = vld [vmem:[%s1295_s11 + $0xa4] sm:$0xf]  ;;  %v1045_v10 = vor.u32 %v1122_v4, %v1044_v2  ;;  %v972_v12 = vld [vmem:[%s1295_s11 + $0x10] sm:$0xf] }
  0x3b   : > { %629 = vmatpush.bf16.msra.mxu1 %v1061_v50  ;;  %648 = vmatpush.bf16.msra.mxu2 %v1001_v51  ;;  %v1046_v8 = vld [vmem:[%s1295_s11 + $0xa8] sm:$0xf0]  ;;  %v985_v11 = vor.u32 %v1105_v5, %v982_v6  ;;  %v1104_v13 = vld [vmem:[%s1295_s11 + $0x14] sm:$0xf0]  ;;  %v1036_v14 = vld [vmem:[%s1295_s11 + $0x90] sm:$0xf] }
  0x3c   : > { %667 = vmatpush.bf16.msra.mxu3 %v1065_v55  ;;  %v1049_v15 = vor.u32 %v1121_v7, %v1046_v8  ;;  %v1120_v16 = vld [vmem:[%s1295_s11 + $0x94] sm:$0xf0]  ;;  %v1103_v17 = vld [vmem:[%s1295_s11 + $0x14] sm:$0xf]  ;;  %v974_v18 = vld [vmem:[%s1295_s11 + $0x18] sm:$0xf0]  ;;  %v973_v21 = vor.u32 %v1104_v13, %v972_v12 }
  0x3d   : > { %v1119_v19 = vld [vmem:[%s1295_s11 + $0x94] sm:$0xf]  ;;  %v1038_v20 = vld [vmem:[%s1295_s11 + $0x98] sm:$0xf0]  ;;  %v1037_v22 = vor.u32 %v1120_v16, %v1036_v14  ;;  %v977_v23 = vor.u32 %v1103_v17, %v974_v18  ;;  %v964_v24 = vld [vmem:[%s1295_s11] sm:$0xf] }
  0x3e   : > { %611 = vmatpush.bf16.msra.mxu0 %v989_v61  ;;  %v1102_v25 = vld [vmem:[%s1295_s11 + $0x4] sm:$0xf0]  ;;  %v1028_v26 = vld [vmem:[%s1295_s11 + $0x80] sm:$0xf]  ;;  %v1041_v27 = vor.u32 %v1119_v19, %v1038_v20  ;;  %v1101_v29 = vld [vmem:[%s1295_s11 + $0x4] sm:$0xf] }
  0x3f   : > { %630 = vmatpush.bf16.msra.mxu1 %v1053_v62  ;;  %649 = vmatpush.bf16.msra.mxu2 %v993_v63  ;;  %v1118_v28 = vld [vmem:[%s1295_s11 + $0x84] sm:$0xf0]  ;;  %v966_v30 = vld [vmem:[%s1295_s11 + $0x8] sm:$0xf0]  ;;  %v1117_v31 = vld [vmem:[%s1295_s11 + $0x84] sm:$0xf]  ;;  %v965_v33 = vor.u32 %v1102_v25, %v964_v24 }
  0x40   : > { %668 = vmatpush.bf16.msra.mxu3 %v1057_v3  ;;  %v1030_v32 = vld [vmem:[%s1295_s11 + $0x88] sm:$0xf0]  ;;  %v948_v34 = vld [vmem:[%s1297_s12] sm:$0xf]  ;;  %v1098_v35 = vld [vmem:[%s1297_s12 + $0x4] sm:$0xf0]  ;;  %v1029_v36 = vor.u32 %v1118_v28, %v1028_v26  ;;  %v969_v37 = vor.u32 %v1101_v29, %v966_v30 }
  0x41   : > { %v1097_v38 = vld [vmem:[%s1297_s12 + $0x4] sm:$0xf]  ;;  %v950_v39 = vld [vmem:[%s1297_s12 + $0x8] sm:$0xf0]  ;;  %v1033_v40 = vor.u32 %v1117_v31, %v1030_v32  ;;  %v949_v41 = vor.u32 %v1098_v35, %v948_v34  ;;  %v956_v43 = vld [vmem:[%s1297_s12 + $0x10] sm:$0xf] }
  0x42   : > { %612 = vmatpush.bf16.msra.mxu0 %v981_v9  ;;  %v953_v42 = vor.u32 %v1097_v38, %v950_v39  ;;  %v1100_v44 = vld [vmem:[%s1297_s12 + $0x14] sm:$0xf0]  ;;  %v1099_v45 = vld [vmem:[%s1297_s12 + $0x14] sm:$0xf]  ;;  %v958_v46 = vld [vmem:[%s1297_s12 + $0x18] sm:$0xf0] }
  0x43   : > { %631 = vmatpush.bf16.msra.mxu1 %v1045_v10  ;;  %650 = vmatpush.bf16.msra.mxu2 %v985_v11  ;;  %v957_v47 = vor.u32 %v1100_v44, %v956_v43  ;;  %v961_v48 = vor.u32 %v1099_v45, %v958_v46  ;;  %v383_v50 = vld [vmem:[#allocation2 + $0x30] sm:$0xff]  ;;  %v384_v55 = vld [vmem:[#allocation2] sm:$0xff]  ;;  %v385_v59 = vld [vmem:[#allocation2 + $0x18] sm:$0xff]  ;;  %p1090_p11 = scmp.ne.s32.totalorder %s1208_s17, 1 }
  0x44   : > { %669 = vmatpush.bf16.msra.mxu3 %v1049_v15  ;;  %v386_v1 = vld [vmem:[#allocation2 + $0x10] sm:$0xff]  ;;  %v387_v5 = vld [vmem:[#allocation2 + $0x8] sm:$0xff]  ;;  %v388_v11 = vld [vmem:[#allocation2 + $0x20] sm:$0xff] }
  0x45   : > { %v389_v15 = vld [vmem:[#allocation2 + $0x28] sm:$0xff] }
  0x46   : > { %613 = vmatpush.bf16.msra.mxu0 %v973_v21  ;;  %v390_v21 = vld [vmem:[#allocation2 + $0x38] sm:$0xff] }
  0x47   : > { %632 = vmatpush.bf16.msra.mxu1 %v1037_v22  ;;  %651 = vmatpush.bf16.msra.mxu2 %v977_v23 }
  0x48   : > { %670 = vmatpush.bf16.msra.mxu3 %v1041_v27 }
  0x4a   : > { %614 = vmatpush.bf16.msra.mxu0 %v965_v33 }
  0x4b   : > { %633 = vmatpush.bf16.msra.mxu1 %v1029_v36  ;;  %652 = vmatpush.bf16.msra.mxu2 %v969_v37 }
  0x4c   : > { %671 = vmatpush.bf16.msra.mxu3 %v1033_v40 }
  0x4d   : > { %615 = vmatmul.bf16.vlgmr.msra.gmra.mxu0 %v949_v41 }
  0x4e   : > { %634 = vmatmul.bf16.vlgmr.msra.gmra.mxu1 %v953_v42  ;;  %653 = vmatmul.bf16.vlgmr.msra.gmra.mxu2 %v949_v41 }
  0x4f   : > { %672 = vmatmul.bf16.vlgmr.msra.gmra.mxu3 %v953_v42 }
  0x5d   : > { %620 = vmatmul.bf16.gmra.mxu0 %v957_v47 }
  0x5e   : > { %639 = vmatmul.bf16.gmra.mxu1 %v961_v48  ;;  %658 = vmatmul.bf16.gmra.mxu2 %v957_v47 }
  0x5f   : > { %677 = vmatmul.bf16.gmra.mxu3 %v961_v48 }
  0xca   : > { %v616_v49 = vpop.f32.mrf.mxu0 }
  0xcb   : > { %v635_v51 = vpop.f32.mrf.mxu1 }
  0xcc   : > { %v636_v52 = vadd.f32 %v635_v51, %v616_v49 }
  0xce   : > { %v683_v53 = vadd.f32 %v636_v52, %v383_v50 }
  0xd0   : > { %691 = vst [vmem:[#allocation2 + $0x30] sm:$0xff] %v683_v53 }
  0xd1   : > { %v654_v54 = vpop.f32.mrf.mxu2 }
  0xd2   : > { %v673_v56 = vpop.f32.mrf.mxu3  ;;  %v618_v57 = vpop.f32.mrf.mxu0 }
  0xd3   : > { %v674_v58 = vadd.f32 %v673_v56, %v654_v54  ;;  %v637_v60 = vpop.f32.mrf.mxu1 }
  0xd4   : > { %v638_v61 = vadd.f32 %v637_v60, %v618_v57 }
  0xd5   : > { %v684_v62 = vadd.f32 %v674_v58, %v384_v55 }
  0xd6   : > { %v685_v63 = vadd.f32 %v638_v61, %v385_v59 }
  0xd7   : > { %692 = vst [vmem:[#allocation2] sm:$0xff] %v684_v62 }
  0xd8   : > { %693 = vst [vmem:[#allocation2 + $0x18] sm:$0xff] %v685_v63 }
  0xd9   : > { %v656_v0 = vpop.f32.mrf.mxu2 }
  0xda   : > { %v675_v2 = vpop.f32.mrf.mxu3  ;;  %v621_v3 = vpop.f32.mrf.mxu0 }
  0xdb   : > { %v676_v4 = vadd.f32 %v675_v2, %v656_v0  ;;  %v640_v6 = vpop.f32.mrf.mxu1 }
  0xdc   : > { %v641_v7 = vadd.f32 %v640_v6, %v621_v3 }
  0xdd   : > { %v686_v8 = vadd.f32 %v676_v4, %v386_v1 }
  0xde   : > { %v687_v9 = vadd.f32 %v641_v7, %v387_v5 }
  0xdf   : > { %694 = vst [vmem:[#allocation2 + $0x10] sm:$0xff] %v686_v8 }
  0xe0   : > { %695 = vst [vmem:[#allocation2 + $0x8] sm:$0xff] %v687_v9 }
  0xe1   : > { %v659_v10 = vpop.f32.mrf.mxu2 }
  0xe2   : > { %v678_v12 = vpop.f32.mrf.mxu3  ;;  %v623_v13 = vpop.f32.mrf.mxu0 }
  0xe3   : > { %v679_v14 = vadd.f32 %v678_v12, %v659_v10  ;;  %v642_v16 = vpop.f32.mrf.mxu1 }
  0xe4   : > { %v643_v17 = vadd.f32 %v642_v16, %v623_v13 }
  0xe5   : > { %v688_v18 = vadd.f32 %v679_v14, %v388_v11 }
  0xe6   : > { %v689_v19 = vadd.f32 %v643_v17, %v389_v15 }
  0xe7   : > { %696 = vst [vmem:[#allocation2 + $0x20] sm:$0xff] %v688_v18 }
  0xe8   : > { %697 = vst [vmem:[#allocation2 + $0x28] sm:$0xff] %v689_v19 }
  0xe9   : > { %v661_v20 = vpop.f32.mrf.mxu2 }
  0xea   : > { %v680_v22 = vpop.f32.mrf.mxu3 }
  0xeb   : > { %v681_v23 = vadd.f32 %v680_v22, %v661_v20  ;;  %702 = sbr.rel (%p1090_p11) target bundleno = 381 (0x17d), region = 82 }
  0xed   : > { %v690_v24 = vadd.f32 %v681_v23, %v390_v21 }
  0xef   : > { %698 = vst [vmem:[#allocation2 + $0x38] sm:$0xff] %v690_v24 }
  0xf0   : > { %v713_v25 = vld [vmem:[%s1426_s2 + $0x10] sm:$0xff]  ;;  %v711_v26 = vld [vmem:[%s1426_s2] sm:$0xff]  ;;  %v1219_v27 = vmov 0   ;;  %v714_v29 = vld [vmem:[%s1426_s2 + $0x18] sm:$0xff] }
  0xf1   : > { %1176 = vset.pattern.permute.xlu1 %v1219_v27  ;;  %1175 = vset.pattern.permute.xlu0 %v1219_v27  ;;  %v743_v28 = vld [vmem:[%s1427_s3] sm:$0xff]  ;;  %v712_v30 = vld [vmem:[%s1426_s2 + $0x8] sm:$0xff]  ;;  %v746_v32 = vld [vmem:[%s1427_s3 + $0x18] sm:$0xff] }
  0xf2   : > { %727 = vperm.xlu1 %1176, %v713_v25   ;;  %717 = vperm.xlu0 %1175, %v711_v26   ;;  %v744_v31 = vld [vmem:[%s1427_s3 + $0x8] sm:$0xff]  ;;  %v745_v33 = vld [vmem:[%s1427_s3 + $0x10] sm:$0xff]  ;;  %v704_v35 = vld [vmem:[#allocation2] sm:$0xff] }
  0xf3   : > { %1177 = vset.pattern.permute.xlu2 %v1219_v27  ;;  %v703_v34 = vld [vmem:[#allocation2 + $0x30] sm:$0xff]  ;;  %v705_v45 = vld [vmem:[#allocation2 + $0x18] sm:$0xff]  ;;  %v707_v53 = vld [vmem:[#allocation2 + $0x8] sm:$0xff] }
  0xf4   : > { %749 = vperm.xlu2 %1177, %v743_v28   ;;  %v706_v46 = vld [vmem:[#allocation2 + $0x10] sm:$0xff]  ;;  %v708_v56 = vld [vmem:[#allocation2 + $0x20] sm:$0xff]  ;;  %v709_v57 = vld [vmem:[#allocation2 + $0x28] sm:$0xff] }
  0xf6   : > { %v710_v58 = vld [vmem:[#allocation2 + $0x38] sm:$0xff] }
  0xfa   : > { %732 = vperm.xlu1 %1176, %v714_v29   ;;  %722 = vperm.xlu0 %1175, %v712_v30  }
  0xfc   : > { %754 = vperm.xlu2 %1177, %v744_v31  }
 0x102   : > { %764 = vperm.xlu1 %1176, %v746_v32   ;;  %759 = vperm.xlu0 %1175, %v745_v33  }
 0x14e   : > { %v750_v36 = vpop.permute.xlu2 %749 }
 0x156   : > { %v755_v52 = vpop.permute.xlu2 %754 }
 0x164   : > { %v728_v37 = vpop.permute.xlu1 %727  ;;  %v718_v38 = vpop.permute.xlu0 %717 }
 0x165   : > { %v735_v39 = vmul.f32 %v718_v38, %v703_v34  ;;  %v736_v40 = vmul.f32 %v718_v38, %v704_v35  ;;  %v739_v61 = vmul.f32 %v728_v37, %v707_v53  ;;  %v740_v62 = vmul.f32 %v728_v37, %v708_v56 }
 0x167   : > { %v767_v41 = vadd.f32 %v750_v36, %v735_v39  ;;  %v768_v42 = vadd.f32 %v750_v36, %v736_v40 }
 0x169   : > { %v775_v43 = vmax.f32 %v767_v41, 0.0  ;;  %v776_v44 = vmax.f32 %v768_v42, 0.0 }
 0x16b   : > { %v783_v47 = vpack.c.bf16 %v776_v44, %v775_v43 }
 0x16c   : > { %v733_v48 = vpop.permute.xlu1 %732  ;;  %v723_v49 = vpop.permute.xlu0 %722 }
 0x16d   : > { %787 = vst [vmem:[%s1428_s4] sm:$0xff] %v783_v47  ;;  %v737_v50 = vmul.f32 %v723_v49, %v705_v45  ;;  %v738_v51 = vmul.f32 %v723_v49, %v706_v46  ;;  %v741_v63 = vmul.f32 %v733_v48, %v709_v57  ;;  %v742_v0 = vmul.f32 %v733_v48, %v710_v58 }
 0x16f   : > { %v769_v54 = vadd.f32 %v755_v52, %v737_v50  ;;  %v770_v55 = vadd.f32 %v755_v52, %v738_v51 }
 0x171   : > { %v777_v59 = vmax.f32 %v769_v54, 0.0  ;;  %v778_v60 = vmax.f32 %v770_v55, 0.0 }
 0x173   : > { %v784_v1 = vpack.c.bf16 %v778_v60, %v777_v59 }
 0x174   : > { %v765_v2 = vpop.permute.xlu1 %764  ;;  %v760_v3 = vpop.permute.xlu0 %759 }
 0x175   : > { %788 = vst [vmem:[%s1428_s4 + $0x8] sm:$0xff] %v784_v1  ;;  %v773_v4 = vadd.f32 %v765_v2, %v741_v63  ;;  %v774_v5 = vadd.f32 %v765_v2, %v742_v0  ;;  %v771_v6 = vadd.f32 %v760_v3, %v739_v61  ;;  %v772_v7 = vadd.f32 %v760_v3, %v740_v62 }
 0x177   : > { %v781_v8 = vmax.f32 %v773_v4, 0.0  ;;  %v782_v9 = vmax.f32 %v774_v5, 0.0  ;;  %v779_v10 = vmax.f32 %v771_v6, 0.0  ;;  %v780_v11 = vmax.f32 %v772_v7, 0.0 }
 0x179   : > { %v786_v12 = vpack.c.bf16 %v782_v9, %v781_v8  ;;  %v785_v13 = vpack.c.bf16 %v780_v11, %v779_v10 }
 0x17b   : > { %790 = vst [vmem:[%s1428_s4 + $0x18] sm:$0xff] %v786_v12 }
 0x17c   : > { %789 = vst [vmem:[%s1428_s4 + $0x10] sm:$0xff] %v785_v13 }
 0x17d PF: > { %s14_s19 = sadd.s32 1, %s1216_s19   ;;  %s1429_s15 = smov %s1204_s16 }
 0x17e   : > { %p11_p12 = scmp.ge.s32.totalorder %s14_s19, 4   ;;  %s1430_s16 = smov %s1280_s23 }
 0x17f   : > { %s1431_s17 = smov %s1212_s18  ;;  %s1432_s18 = smov %s1434_s20 }
 0x180   :  { %13 = sbr.rel (!%p11_p12) target bundleno = 3 (0x3), region = 126 }

// kernel: image_feature_extractor_bev_forward.55
= control target key start
LH: loop header
LB: loop body
LE: loop exit
PB: predicated region body
PF: predicated region fallthrough
CT: control target
= control target key end

     0   :  { %s318_s6 = smov 0   ;;  %s320_s7 = smov 0   ;;  %s360_s0 = inlined_call_operand.vmem [shape: bf16[8,16,128], index: 0, kind: input, shape index: {}]   ;;  %s361_s1 = inlined_call_operand.vmem [shape: bf16[16,128], index: 1, kind: output, shape index: {}]  }
   0x1   :  { %s322_s8 = smov 0  }
   0x2 LB: > { %s20_s9 = sadd.s32 1, %s302_s7  ;;  %p241_p0 = scmp.ge.s32.totalorder %s306_s8, 1  ;;  %s306_s8 = sphi %s322_s8, %s11_s8   ;;  %s302_s7 = sphi %s320_s7, %s363_s7   ;;  %s298_s6 = sphi %s318_s6, %s362_s6  }
   0x3   : > { %p21_p1 = scmp.ge.s32.totalorder %s20_s9, 8  ;;  %p106_p2 = scmp.lt.s32.totalorder %s306_s8, 9 }
   0x5   : > { %s365_s9 = smov (%p21_p1, %s20_s9), 0  ;;  %p107_p3 = pnand %p241_p0, %p106_p2 }
   0x6   : > { %p131_p4 = scmp.lt.s32.totalorder (!%p107_p3), %s298_s6, 7  ;;  %p244_p5 = scmp.ne.s32.totalorder (!%p107_p3), %s298_s6, 0 }
   0x7   : > { %110 = sbr.rel (%p107_p3) target bundleno = 35 (0x23), region = 24 }
   0xc   : > { %s132_s10 = scalar_select %p131_p4, %s298_s6, 7 }
   0xd   : > { %151 = sbr.rel (%p244_p5) target bundleno = 20 (0x14), region = 28 }
   0xe   : > { %s250_s11 = sshll.u32 %s132_s10, 3 }
   0xf   : > { %s138_s14 = scalar_lea.vmem %s360_s0, %s250_s11 }
  0x10   : > { %v146_v0 = vld [vmem:[%s138_s14] sm:$0xf]  ;;  %v147_v1 = vld [vmem:[%s138_s14 + $0x4] sm:$0xf] }
  0x12   : > { %152 = vst [vmem:[%s361_s1] sm:$0xf] %v146_v0 }
  0x13   : > { %153 = vst [vmem:[%s361_s1 + $0x4] sm:$0xf] %v147_v1 }
  0x14 PF: > { %p245_p6 = scmp.le.s32.totalorder %s298_s6, 0 }
  0x16   : > { %157 = sbr.rel (%p245_p6) target bundleno = 35 (0x23), region = 32 }
  0x1b   : > { %v252_v2 = vld [vmem:[%s361_s1] sm:$0xff]   ;;  %v162_v3 = vunpack.c.l.bf16 %v146_v0  ;;  %v163_v4 = vunpack.c.l.bf16 %v147_v1 }
  0x1c   : > { %v253_v5 = vunpack.c.l.bf16 %v252_v2  ;;  %v254_v6 = vunpack.c.h.bf16 %v252_v2 }
  0x1e   : > { %v164_v7 = vmax.f32 %v253_v5, %v162_v3  ;;  %v165_v8 = vmax.f32 %v254_v6, %v163_v4 }
  0x20   : > { %v258_v9 = vpack.c.bf16 %v165_v8, %v164_v7 }
  0x22   : > { %259 = vst [vmem:[%s361_s1] sm:$0xff] %v258_v9  }
  0x23 PF: > { %s11_s8 = sadd.s32 1, %s306_s8   ;;  %s362_s6 = smov %s302_s7 }
  0x24   : > { %p8_p7 = scmp.ge.s32.totalorder %s11_s8, 10   ;;  %s363_s7 = smov %s365_s9 }
  0x26   :  { %10 = sbr.rel (!%p8_p7) target bundleno = 2 (0x2), region = 62 }

// kernel: image_feature_extractor_bev_forward.56
= control target key start
LH: loop header
LB: loop body
LE: loop exit
PB: predicated region body
PF: predicated region fallthrough
CT: control target
= control target key end

     0   :  { %s373_s6 = smov 0   ;;  %s375_s7 = smov 0   ;;  %s410_s0 = inlined_call_operand.vmem [shape: f32[2,32,128], index: 0, kind: input, shape index: {}]   ;;  %s411_s1 = inlined_call_operand.vmem [shape: bf16[2,32,128], index: 1, kind: output, shape index: {}]  }
   0x1   :  { %s377_s8 = smov 0  }
   0x2 LB: > { %s23_s9 = sadd.s32 1, %s357_s7  ;;  %p291_p0 = scmp.ge.s32.totalorder %s361_s8, 1  ;;  %s361_s8 = sphi %s377_s8, %s11_s8   ;;  %s357_s7 = sphi %s375_s7, %s413_s7   ;;  %s353_s6 = sphi %s373_s6, %s412_s6  }
   0x3   : > { %p25_p1 = scmp.ge.s32.totalorder %s23_s9, 2  ;;  %p106_p2 = scmp.lt.s32.totalorder %s361_s8, 3 }
   0x5   : > { %s415_s9 = smov (%p25_p1, %s23_s9), 0  ;;  %p107_p3 = pnand %p291_p0, %p106_p2 }
   0x6   : > { %p132_p4 = scmp.lt.s32.totalorder (!%p107_p3), %s353_s6, 1 }
   0x7   : > { %110 = sbr.rel (%p107_p3) target bundleno = 82 (0x52), region = 24 }
   0xc   : > { %s417_s6 = smov (!%p132_p4, %s353_s6), 1 }
   0xd   : > { %s298_s10 = sshll.u32 %s417_s6, 5  ;;  %s299_s14 = sshll.u32 %s417_s6, 4 }
   0xe   : > { %s139_s13 = scalar_lea.vmem %s410_s0, %s298_s10  ;;  %s147_s17 = scalar_lea.vmem %s411_s1, %s299_s14 }
   0xf   : > { %v148_v0 = vld [vmem:[%s139_s13] sm:$0xff]  ;;  %v149_v1 = vld [vmem:[%s139_s13 + $0x8] sm:$0xff]  ;;  %v150_v2 = vld [vmem:[%s139_s13 + $0x10] sm:$0xff] }
  0x10   : > { %v151_v3 = vld [vmem:[%s139_s13 + $0x18] sm:$0xff]  ;;  %v152_v4 = vmul.f32 %v148_v0, %v148_v0  ;;  %v153_v5 = vmul.f32 %v149_v1, %v149_v1  ;;  %v154_v6 = vmul.f32 %v150_v2, %v150_v2 }
  0x11   : > { %v155_v7 = vmul.f32 %v151_v3, %v151_v3 }
  0x12   : > { %v156_v8 = vadd.f32 %v153_v5, %v152_v4 }
  0x14   : > { %v157_v9 = vadd.f32 %v156_v8, %v154_v6 }
  0x16   : > { %v158_v10 = vadd.f32 %v157_v9, %v155_v7 }
  0x18   : > { %v159_v11 = vrot.slane %v158_v10, 4 }
  0x1a   : > { %v160_v12 = vadd.f32 %v159_v11, %v158_v10 }
  0x1c   : > { %v161_v13 = vrot.slane %v160_v12, 2 }
  0x1e   : > { %v162_v14 = vadd.f32 %v161_v13, %v160_v12 }
  0x20   : > { %v163_v15 = vrot.slane %v162_v14, 1 }
  0x22   : > { %v164_v16 = vadd.f32 %v163_v15, %v162_v14 }
  0x24   : > { %335 = vrsqrt.f32 %v164_v16  ;;  %vm172_vm0 = vcmp.eq.f32.partialorder %v164_v16, inf  ;;  %v175_v23 = vand.u32 2147483648, %v164_v16  ;;  %vm174_vm1 = vcmp.eq.f32.partialorder %v164_v16, 0.0 }
  0x2a   : > { %v336_v17 = vpop.eup %335 }
  0x2b   : > { %v166_v18 = vmul.f32 %v336_v17, %v164_v16 }
  0x2d   : > { %v167_v19 = vmul.f32 %v336_v17, %v166_v18 }
  0x2f   : > { %v168_v20 = vmul.f32 0.5, %v167_v19 }
  0x31   : > { %v169_v21 = vsub.f32 1.5, %v168_v20 }
  0x33   : > { %v170_v22 = vmul.f32 %v336_v17, %v169_v21 }
  0x35   : > { %v171_v24 = vmul.f32 %v170_v22, %v164_v16 }
  0x37   : > { %v173_v25 = vsel %vm172_vm0, %v164_v16, %v171_v24 }
  0x38   : > { %v176_v26 = vsel %vm174_vm1, %v175_v23, %v173_v25 }
  0x39   : > { %v177_v27 = vmax.f32 %v176_v26, 1e-12 }
  0x3b   : > { %337 = vrcp.f32 %v177_v27  ;;  %v189_v30 = vand.u32 2147483648, %v177_v27  ;;  %vm183_vm2 = vweird.f32 %v177_v27  ;;  %v187_v32 = vand.u32 2147483647, %v177_v27 }
  0x3d   : > { %v190_v34 = vor.u32 1.1754944e-38, %v189_v30  ;;  %vm188_vm5 = vcmp.eq.f32.partialorder %v187_v32, 8.507059e+37 }
  0x41   : > { %v338_v28 = vpop.eup %337 }
  0x42   : > { %v179_v29 = vmul.f32 %v338_v28, %v177_v27  ;;  %vm184_vm3 = vweird.f32 %v338_v28 }
  0x43   : > { %vm185_vm4 = vmor %vm183_vm2, %vm184_vm3 }
  0x44   : > { %v180_v31 = vsub.f32 1.0, %v179_v29 }
  0x46   : > { %v181_v33 = vmul.f32 %v338_v28, %v180_v31 }
  0x48   : > { %v182_v35 = vadd.f32 %v338_v28, %v181_v33 }
  0x4a   : > { %v186_v36 = vsel %vm185_vm4, %v338_v28, %v182_v35 }
  0x4b   : > { %v191_v37 = vsel %vm188_vm5, %v190_v34, %v186_v36 }
  0x4c   : > { %v192_v38 = vmul.f32 %v191_v37, %v148_v0  ;;  %v193_v39 = vmul.f32 %v191_v37, %v149_v1  ;;  %v194_v40 = vmul.f32 %v191_v37, %v150_v2  ;;  %v195_v41 = vmul.f32 %v191_v37, %v151_v3 }
  0x4e   : > { %v303_v42 = vpack.c.bf16 %v193_v39, %v192_v38  ;;  %v308_v43 = vpack.c.bf16 %v195_v41, %v194_v40 }
  0x50   : > { %304 = vst [vmem:[%s147_s17] sm:$0xff] %v303_v42  }
  0x51   : > { %310 = vst [vmem:[%s147_s17 + $0x8] sm:$0xff] %v308_v43  }
  0x52 PF: > { %s11_s8 = sadd.s32 1, %s361_s8   ;;  %s412_s6 = smov %s357_s7 }
  0x53   : > { %p8_p5 = scmp.ge.s32.totalorder %s11_s8, 4   ;;  %s413_s7 = smov %s415_s9 }
  0x55   :  { %10 = sbr.rel (!%p8_p5) target bundleno = 2 (0x2), region = 54 }

// kernel: image_feature_extractor_bev_forward.57
= control target key start
LH: loop header
LB: loop body
LE: loop exit
PB: predicated region body
PF: predicated region fallthrough
CT: control target
= control target key end

     0   :  { %s924_s15 = smov 0   ;;  %s926_s16 = smov 0   ;;  %s1030_s0 = inlined_call_operand.vmem [shape: bf16[16,512], index: 0, kind: input, shape index: {}]   ;;  %s1031_s1 = inlined_call_operand.vmem [shape: bf16[512,128], index: 1, kind: input, shape index: {}]   ;;  %s1032_s2 = inlined_call_operand.vmem [shape: f32[16,1], index: 2, kind: input, shape index: {}]   ;;  %s1033_s3 = inlined_call_operand.vmem [shape: f32[16,1], index: 3, kind: input, shape index: {}]   ;;  %s1034_s4 = inlined_call_operand.vmem [shape: bf16[16,128], index: 4, kind: output, shape index: {}]  }
   0x1   :  { %s928_s17 = smov 0   ;;  %s930_s18 = smov 0  }
   0x2   :  { %s932_s19 = smov 0  }
   0x3 LB: > { %s26_s20 = sadd.s32 1, %s891_s18  ;;  %p49_p1 = scmp.ne.s32.totalorder %s883_s16, %s879_s15  ;;  %s895_s19 = sphi %s932_s19, %s14_s19   ;;  %s891_s18 = sphi %s930_s18, %s1038_s18   ;;  %s887_s17 = sphi %s928_s17, %s1037_s17   ;;  %s883_s16 = sphi %s926_s16, %s1036_s16   ;;  %s879_s15 = sphi %s924_s15, %s1035_s15  }
   0x4   : > { %p27_p0 = scmp.ge.s32.totalorder %s26_s20, 2  ;;  %p50_p2 = scmp.eq.s32.totalorder %s895_s19, 0 }
   0x5   : > { %s42_s22 = sadd.s32 1, %s883_s16  ;;  %p703_p5 = scmp.ge.s32.totalorder %s895_s19, 2 }
   0x6   : > { %s1040_s20 = smov (%p27_p0, %s26_s20), 0  ;;  %p51_p3 = por %p50_p2, %p49_p1 }
   0x7   : > { %s38_s21 = ssub.s32 %s891_s18, %s1040_s20  ;;  %201 = sbr.rel (%p703_p5) target bundleno = 18 (0x12), region = 24 }
   0x8   : > { %p40_p4 = scmp.eq.s32.totalorder %s38_s21, 0 }
   0xa   : > { %s959_s23 = scalar_select %p40_p4, %s883_s16, %s42_s22  }
   0xc   : > { %204 = sbr.rel (!%p51_p3) target bundleno = 18 (0x12), region = 28  ;;  %s206_s24 = sand.u32 (%p51_p3), 1, %s883_s16  }
   0xd   : > { %s789_s25 = sshll.u32 (%p51_p3), %s891_s18, 3  ;;  %s704_s26 = sshll.u32 (%p51_p3), %s206_s24, 4 }
   0xe   : > { %s214_s29 = scalar_lea.vmem (%p51_p3), %s1030_s0, %s789_s25  ;;  %s208_s30 = scalar_lea.vmem (%p51_p3), [#allocation3], %s704_s26 }
   0xf   : > { %v245_v0 = vld [vmem:[%s214_s29] sm:$0xff] (%p51_p3)  ;;  %v247_v1 = vld [vmem:[%s214_s29 + $0x10] sm:$0xff] (%p51_p3) }
  0x10   : > { %246 = vst [vmem:[%s208_s30] sm:$0xff] (%p51_p3), %v245_v0 }
  0x11   : > { %248 = vst [vmem:[%s208_s30 + $0x8] sm:$0xff] %v247_v1 }
  0x12 PF: > { %p707_p6 = scmp.ge.s32.totalorder %s895_s19, 1  ;;  %p265_p7 = scmp.lt.s32.totalorder %s895_s19, 3 }
  0x14   : > { %p266_p8 = pnand %p707_p6, %p265_p7 }
  0x15   : > { %s272_s5 = sand.u32 (!%p266_p8), 1, %s879_s15   ;;  %s709_s6 = sshll.u32 (!%p266_p8), %s887_s17, 5 }
  0x16   : > { %269 = sbr.rel (%p266_p8) target bundleno = 341 (0x155), region = 70  ;;  %s708_s7 = sshll.u32 (!%p266_p8), %s272_s5, 4 }
  0x17   : > { %p321_p9 = scmp.lt.s32.totalorder (!%p266_p8), %s709_s6, 63  ;;  %s976_s12 = scalar_lea.vmem (!%p266_p8), [#allocation3], %s708_s7 }
  0x18   : > { %p711_p10 = scmp.ne.s32.totalorder (!%p266_p8), %s887_s17, 0 }
  0x1b   : > { %s1042_s6 = smov (!%p321_p9, %s709_s6), 63  ;;  %353 = sbr.rel (%p711_p10) target bundleno = 35 (0x23), region = 78 }
  0x1c   : > { %s710_s8 = sshll.u32 %s1042_s6, 2 }
  0x1d   : > { %s974_s11 = scalar_lea.vmem %s1031_s1, %s710_s8 }
  0x20   : > { %v897_v2 = vmov 0.0  }
  0x21   : > { %354 = vst [vmem:[#allocation2] sm:$0xff] %v897_v2 }
  0x22   : > { %355 = vst [vmem:[#allocation2 + $0x8] sm:$0xff] %v897_v2 }
  0x23 PF: > { %v799_v3 = vld [vmem:[%s974_s11 + $0x38] sm:$0xff]  ;;  %v798_v5 = vld [vmem:[%s974_s11 + $0x30] sm:$0xff]  ;;  %v797_v7 = vld [vmem:[%s974_s11 + $0x28] sm:$0xff]  ;;  %p784_p11 = scmp.ne.s32.totalorder %s887_s17, 1 }
  0x24   : > { %v807_v4 = vld [vmem:[%s974_s11 + $0x78] sm:$0xff]  ;;  %498 = vmatpush.bf16.msra.mxu0 %v799_v3  ;;  %v806_v6 = vld [vmem:[%s974_s11 + $0x70] sm:$0xff]  ;;  %v805_v8 = vld [vmem:[%s974_s11 + $0x68] sm:$0xff] }
  0x25   : > { %512 = vmatpush.bf16.msra.mxu1 %v807_v4  ;;  %v796_v9 = vld [vmem:[%s974_s11 + $0x20] sm:$0xff]  ;;  %v795_v11 = vld [vmem:[%s974_s11 + $0x18] sm:$0xff]  ;;  %v794_v13 = vld [vmem:[%s974_s11 + $0x10] sm:$0xff] }
  0x26   : > { %v804_v10 = vld [vmem:[%s974_s11 + $0x60] sm:$0xff]  ;;  %v803_v12 = vld [vmem:[%s974_s11 + $0x58] sm:$0xff]  ;;  %v802_v14 = vld [vmem:[%s974_s11 + $0x50] sm:$0xff] }
  0x27   : > { %v793_v15 = vld [vmem:[%s974_s11 + $0x8] sm:$0xff]  ;;  %v792_v17 = vld [vmem:[%s974_s11] sm:$0xff] }
  0x28   : > { %499 = vmatpush.bf16.msra.mxu0 %v798_v5  ;;  %v801_v16 = vld [vmem:[%s974_s11 + $0x48] sm:$0xff]  ;;  %v800_v18 = vld [vmem:[%s974_s11 + $0x40] sm:$0xff] }
  0x29   : > { %513 = vmatpush.bf16.msra.mxu1 %v806_v6  ;;  %v714_v19 = vld [vmem:[%s976_s12] sm:$0xf]  ;;  %v791_v20 = vld [vmem:[%s976_s12 + $0x4] sm:$0xf0]  ;;  %v790_v21 = vld [vmem:[%s976_s12 + $0x4] sm:$0xf] }
  0x2a   : > { %v716_v22 = vld [vmem:[%s976_s12 + $0x8] sm:$0xf0]  ;;  %v715_v23 = vor.u32 %v791_v20, %v714_v19  ;;  %v356_v26 = vld [vmem:[#allocation2] sm:$0xff] }
  0x2b   : > { %v719_v24 = vor.u32 %v790_v21, %v716_v22  ;;  %v357_v31 = vld [vmem:[#allocation2 + $0x8] sm:$0xff] }
  0x2c   : > { %500 = vmatpush.bf16.msra.mxu0 %v797_v7 }
  0x2d   : > { %514 = vmatpush.bf16.msra.mxu1 %v805_v8 }
  0x30   : > { %501 = vmatpush.bf16.msra.mxu0 %v796_v9 }
  0x31   : > { %515 = vmatpush.bf16.msra.mxu1 %v804_v10 }
  0x34   : > { %502 = vmatpush.bf16.msra.mxu0 %v795_v11 }
  0x35   : > { %516 = vmatpush.bf16.msra.mxu1 %v803_v12 }
  0x38   : > { %503 = vmatpush.bf16.msra.mxu0 %v794_v13 }
  0x39   : > { %517 = vmatpush.bf16.msra.mxu1 %v802_v14 }
  0x3c   : > { %504 = vmatpush.bf16.msra.mxu0 %v793_v15 }
  0x3d   : > { %518 = vmatpush.bf16.msra.mxu1 %v801_v16 }
  0x40   : > { %505 = vmatpush.bf16.msra.mxu0 %v792_v17 }
  0x41   : > { %519 = vmatpush.bf16.msra.mxu1 %v800_v18 }
  0x43   : > { %506 = vmatmul.bf16.vlgmr.msra.gmra.mxu0 %v715_v23 }
  0x44   : > { %520 = vmatmul.bf16.vlgmr.msra.gmra.mxu1 %v719_v24 }
  0xc0   : > { %v507_v25 = vpop.f32.mrf.mxu0 }
  0xc1   : > { %v521_v27 = vpop.f32.mrf.mxu1 }
  0xc2   : > { %v522_v28 = vadd.f32 %v521_v27, %v507_v25 }
  0xc4   : > { %v526_v29 = vadd.f32 %v522_v28, %v356_v26 }
  0xc6   : > { %528 = vst [vmem:[#allocation2] sm:$0xff] %v526_v29 }
  0xc8   : > { %v509_v30 = vpop.f32.mrf.mxu0 }
  0xc9   : > { %v523_v32 = vpop.f32.mrf.mxu1 }
  0xca   : > { %v524_v33 = vadd.f32 %v523_v32, %v509_v30  ;;  %533 = sbr.rel (%p784_p11) target bundleno = 341 (0x155), region = 82 }
  0xcc   : > { %v527_v34 = vadd.f32 %v524_v33, %v357_v31 }
  0xce   : > { %529 = vst [vmem:[#allocation2 + $0x8] sm:$0xff] %v527_v34 }
  0xcf   : > { %v550_v35 = vld [vmem:[%s1033_s3] sm:$0xff]  ;;  %v898_v37 = vmov 0   ;;  %v551_v38 = vld [vmem:[%s1033_s3 + $0x8] sm:$0xff] }
  0xd0   : > { %v536_v36 = vld [vmem:[%s1032_s2] sm:$0xff]  ;;  %856 = vset.pattern.permute.xlu1 %v898_v37  ;;  %855 = vset.pattern.permute.xlu0 %v898_v37  ;;  %v537_v39 = vld [vmem:[%s1032_s2 + $0x8] sm:$0xff] }
  0xd1   : > { %554 = vperm.xlu1 %856, %v550_v35   ;;  %540 = vperm.xlu0 %855, %v536_v36   ;;  %v534_v42 = vld [vmem:[#allocation2] sm:$0xff] }
  0xd5   : > { %v535_v44 = vld [vmem:[#allocation2 + $0x8] sm:$0xff] }
  0xd9   : > { %559 = vperm.xlu1 %856, %v551_v38   ;;  %545 = vperm.xlu0 %855, %v537_v39  }
 0x143   : > { %v555_v40 = vpop.permute.xlu1 %554  ;;  %v541_v41 = vpop.permute.xlu0 %540 }
 0x144   : > { %v548_v43 = vmul.f32 %v541_v41, %v534_v42 }
 0x146   : > { %v562_v46 = vadd.f32 %v555_v40, %v548_v43 }
 0x148   : > { %v564_v50 = vmax.f32 %v562_v46, 0.0 }
 0x14b   : > { %v546_v45 = vpop.permute.xlu0 %545  ;;  %v560_v48 = vpop.permute.xlu1 %559 }
 0x14c   : > { %v549_v47 = vmul.f32 %v546_v45, %v535_v44 }
 0x14e   : > { %v563_v49 = vadd.f32 %v560_v48, %v549_v47 }
 0x150   : > { %v565_v51 = vmax.f32 %v563_v49, 0.0 }
 0x152   : > { %v811_v52 = vpack.c.bf16 %v565_v51, %v564_v50 }
 0x154   : > { %812 = vst [vmem:[%s1034_s4] sm:$0xff] %v811_v52  }
 0x155 PF: > { %s14_s19 = sadd.s32 1, %s895_s19   ;;  %s1035_s15 = smov %s883_s16 }
 0x156   : > { %p11_p12 = scmp.ge.s32.totalorder %s14_s19, 4   ;;  %s1036_s16 = smov %s959_s23 }
 0x157   : > { %s1037_s17 = smov %s891_s18  ;;  %s1038_s18 = smov %s1040_s20 }
 0x158   :  { %13 = sbr.rel (!%p11_p12) target bundleno = 3 (0x3), region = 126 }

// kernel: image_feature_extractor_bev_forward.58
= control target key start
LH: loop header
LB: loop body
LE: loop exit
PB: predicated region body
PF: predicated region fallthrough
CT: control target
= control target key end

     0   :  { %v211_v2 = vmov 0   ;;  %s279_s1 = inlined_call_operand.vmem [shape: bf16[128,128], index: 1, kind: input, shape index: {}]   ;;  %s280_s2 = inlined_call_operand.vmem [shape: f32[16,1], index: 2, kind: input, shape index: {}]   ;;  %s281_s3 = inlined_call_operand.vmem [shape: f32[16,1], index: 3, kind: input, shape index: {}]   ;;  %s282_s0 = inlined_call_operand.vmem [shape: bf16[16,128], index: 0, kind: input, shape index: {}]   ;;  %s283_s4 = inlined_call_operand.vmem [shape: bf16[16,128], index: 4, kind: output, shape index: {}]  }
   0x1   :  { %v202_v0 = vld [vmem:[%s279_s1 + $0x38] sm:$0xff]  ;;  %v201_v1 = vld [vmem:[%s279_s1 + $0x30] sm:$0xff]  ;;  %209 = vset.pattern.permute.xlu0 %v211_v2  ;;  %v120_v3 = vld [vmem:[%s280_s2] sm:$0xff]  ;;  %210 = vset.pattern.permute.xlu1 %v211_v2 }
   0x2   :  { %97 = vmatpush.bf16.msra.mxu0 %v202_v0  ;;  %v134_v4 = vld [vmem:[%s281_s3] sm:$0xff]  ;;  %124 = vperm.xlu0 %209, %v120_v3   ;;  %v200_v5 = vld [vmem:[%s279_s1 + $0x28] sm:$0xff]  ;;  %v198_v9 = vld [vmem:[%s279_s1 + $0x18] sm:$0xff] }
   0x3   :  { %138 = vperm.xlu1 %210, %v134_v4   ;;  %v121_v6 = vld [vmem:[%s280_s2 + $0x8] sm:$0xff]  ;;  %v199_v8 = vld [vmem:[%s279_s1 + $0x20] sm:$0xff]  ;;  %v197_v10 = vld [vmem:[%s279_s1 + $0x10] sm:$0xff] }
   0x4   :  { %v135_v7 = vld [vmem:[%s281_s3 + $0x8] sm:$0xff]  ;;  %v195_v12 = vld [vmem:[%s279_s1] sm:$0xff] }
   0x5   :  { %v196_v11 = vld [vmem:[%s279_s1 + $0x8] sm:$0xff]  ;;  %v194_v13 = vld [vmem:[%s282_s0] sm:$0xff] }
   0x6   :  { %98 = vmatpush.bf16.msra.mxu0 %v201_v1 }
   0xa   :  { %99 = vmatpush.bf16.msra.mxu0 %v200_v5  ;;  %129 = vperm.xlu0 %209, %v121_v6  }
   0xb   :  { %143 = vperm.xlu1 %210, %v135_v7  }
   0xe   :  { %100 = vmatpush.bf16.msra.mxu0 %v199_v8 }
  0x12   :  { %101 = vmatpush.bf16.msra.mxu0 %v198_v9 }
  0x16   :  { %102 = vmatpush.bf16.msra.mxu0 %v197_v10 }
  0x1a   :  { %103 = vmatpush.bf16.msra.mxu0 %v196_v11 }
  0x1e   :  { %104 = vmatpush.bf16.msra.mxu0 %v195_v12 }
  0x21   :  { %105 = vmatmul.bf16.vlgmr.msra.gmra.mxu0 %v194_v13 }
  0x74   :  { %v125_v14 = vpop.permute.xlu0 %124 }
  0x75   :  { %v139_v15 = vpop.permute.xlu1 %138 }
  0x7c   :  { %v130_v18 = vpop.permute.xlu0 %129 }
  0x7d   :  { %v144_v22 = vpop.permute.xlu1 %143 }
  0x9e   :  { %v106_v16 = vpop.f32.mrf.mxu0 }
  0x9f   :  { %v132_v17 = vmul.f32 %v125_v14, %v106_v16 }
  0xa1   :  { %v146_v20 = vadd.f32 %v139_v15, %v132_v17 }
  0xa3   :  { %v148_v24 = vmax.f32 %v146_v20, 0.0 }
  0xa6   :  { %v108_v19 = vpop.f32.mrf.mxu0 }
  0xa7   :  { %v133_v21 = vmul.f32 %v130_v18, %v108_v19 }
  0xa9   :  { %v147_v23 = vadd.f32 %v144_v22, %v133_v21 }
  0xab   :  { %v149_v25 = vmax.f32 %v147_v23, 0.0 }
  0xad   :  { %v206_v26 = vpack.c.bf16 %v149_v25, %v148_v24 }
  0xaf   :  { %207 = vst [vmem:[%s283_s4] sm:$0xff] %v206_v26  }

// kernel: image_feature_extractor_bev_forward.59
= control target key start
LH: loop header
LB: loop body
LE: loop exit
PB: predicated region body
PF: predicated region fallthrough
CT: control target
= control target key end

     0   :  { %v437_v2 = vmov 0   ;;  %s565_s1 = inlined_call_operand.vmem [shape: bf16[256,128], index: 1, kind: input, shape index: {}]   ;;  %s566_s2 = inlined_call_operand.vmem [shape: f32[32,1], index: 2, kind: input, shape index: {}]   ;;  %s567_s3 = inlined_call_operand.vmem [shape: f32[32,1], index: 3, kind: input, shape index: {}]   ;;  %s568_s0 = inlined_call_operand.vmem [shape: bf16[32,256], index: 0, kind: input, shape index: {}]   ;;  %s569_s4 = inlined_call_operand.vmem [shape: bf16[32,128], index: 4, kind: output, shape index: {}]  }
   0x1   :  { %v397_v0 = vld [vmem:[%s565_s1 + $0x38] sm:$0xff]  ;;  %435 = vset.pattern.permute.xlu1 %v437_v2  ;;  %434 = vset.pattern.permute.xlu0 %v437_v2  ;;  %v396_v3 = vld [vmem:[%s565_s1 + $0x30] sm:$0xff]  ;;  %v234_v6 = vld [vmem:[%s566_s2] sm:$0xff] }
   0x2   :  { %v405_v1 = vld [vmem:[%s565_s1 + $0x78] sm:$0xff]  ;;  %436 = vset.pattern.permute.xlu2 %v437_v2  ;;  %181 = vmatpush.bf16.msra.mxu0 %v397_v0  ;;  %v404_v4 = vld [vmem:[%s565_s1 + $0x70] sm:$0xff]  ;;  %v395_v7 = vld [vmem:[%s565_s1 + $0x28] sm:$0xff] }
   0x3   :  { %417 = vmatpush.bf16.msra.mxu2 %v397_v0  ;;  %200 = vmatpush.bf16.msra.mxu1 %v405_v1  ;;  %v236_v5 = vld [vmem:[%s566_s2 + $0x10] sm:$0xff]  ;;  %v403_v8 = vld [vmem:[%s565_s1 + $0x68] sm:$0xff]  ;;  %v394_v9 = vld [vmem:[%s565_s1 + $0x20] sm:$0xff] }
   0x4   :  { %425 = vmatpush.bf16.msra.mxu3 %v405_v1  ;;  %250 = vperm.xlu1 %435, %v236_v5   ;;  %v237_v10 = vld [vmem:[%s566_s2 + $0x18] sm:$0xff]  ;;  %v262_v11 = vld [vmem:[%s567_s3] sm:$0xff]  ;;  %v235_v13 = vld [vmem:[%s566_s2 + $0x8] sm:$0xff] }
   0x5   :  { %240 = vperm.xlu0 %434, %v234_v6   ;;  %v402_v12 = vld [vmem:[%s565_s1 + $0x60] sm:$0xff]  ;;  %268 = vperm.xlu2 %436, %v262_v11   ;;  %v393_v14 = vld [vmem:[%s565_s1 + $0x18] sm:$0xff]  ;;  %v263_v16 = vld [vmem:[%s567_s3 + $0x8] sm:$0xff] }
   0x6   :  { %182 = vmatpush.bf16.msra.mxu0 %v396_v3  ;;  %v401_v15 = vld [vmem:[%s565_s1 + $0x58] sm:$0xff]  ;;  %v392_v17 = vld [vmem:[%s565_s1 + $0x10] sm:$0xff]  ;;  %v391_v21 = vld [vmem:[%s565_s1 + $0x8] sm:$0xff] }
   0x7   :  { %418 = vmatpush.bf16.msra.mxu2 %v396_v3  ;;  %201 = vmatpush.bf16.msra.mxu1 %v404_v4  ;;  %v265_v18 = vld [vmem:[%s567_s3 + $0x18] sm:$0xff]  ;;  %v400_v19 = vld [vmem:[%s565_s1 + $0x50] sm:$0xff]  ;;  %v399_v22 = vld [vmem:[%s565_s1 + $0x48] sm:$0xff] }
   0x8   :  { %426 = vmatpush.bf16.msra.mxu3 %v404_v4  ;;  %v264_v20 = vld [vmem:[%s567_s3 + $0x10] sm:$0xff]  ;;  %v390_v23 = vld [vmem:[%s565_s1] sm:$0xff]  ;;  %v387_v26 = vld [vmem:[%s568_s0 + $0x4] sm:$0xf0] }
   0x9   :  { %v398_v24 = vld [vmem:[%s565_s1 + $0x40] sm:$0xff]  ;;  %v316_v27 = vld [vmem:[%s568_s0 + $0x10] sm:$0xf]  ;;  %v389_v28 = vld [vmem:[%s568_s0 + $0x14] sm:$0xf0] }
   0xa   :  { %183 = vmatpush.bf16.msra.mxu0 %v395_v7  ;;  %v308_v25 = vld [vmem:[%s568_s0] sm:$0xf]  ;;  %v386_v29 = vld [vmem:[%s568_s0 + $0x4] sm:$0xf]  ;;  %v310_v30 = vld [vmem:[%s568_s0 + $0x8] sm:$0xf0]  ;;  %v317_v34 = vor.u32 %v389_v28, %v316_v27 }
   0xb   :  { %419 = vmatpush.bf16.msra.mxu2 %v395_v7  ;;  %202 = vmatpush.bf16.msra.mxu1 %v403_v8  ;;  %v388_v31 = vld [vmem:[%s568_s0 + $0x14] sm:$0xf]  ;;  %v318_v32 = vld [vmem:[%s568_s0 + $0x18] sm:$0xf0]  ;;  %v309_v33 = vor.u32 %v387_v26, %v308_v25  ;;  %v313_v35 = vor.u32 %v386_v29, %v310_v30 }
   0xc   :  { %427 = vmatpush.bf16.msra.mxu3 %v403_v8  ;;  %255 = vperm.xlu1 %435, %v237_v10   ;;  %v321_v36 = vor.u32 %v388_v31, %v318_v32 }
   0xd   :  { %245 = vperm.xlu0 %434, %v235_v13   ;;  %273 = vperm.xlu2 %436, %v263_v16  }
   0xe   :  { %184 = vmatpush.bf16.msra.mxu0 %v394_v9 }
   0xf   :  { %420 = vmatpush.bf16.msra.mxu2 %v394_v9  ;;  %203 = vmatpush.bf16.msra.mxu1 %v402_v12 }
  0x10   :  { %428 = vmatpush.bf16.msra.mxu3 %v402_v12 }
  0x12   :  { %185 = vmatpush.bf16.msra.mxu0 %v393_v14 }
  0x13   :  { %421 = vmatpush.bf16.msra.mxu2 %v393_v14  ;;  %204 = vmatpush.bf16.msra.mxu1 %v401_v15 }
  0x14   :  { %429 = vmatpush.bf16.msra.mxu3 %v401_v15  ;;  %283 = vperm.xlu1 %435, %v265_v18  }
  0x15   :  { %278 = vperm.xlu0 %434, %v264_v20  }
  0x16   :  { %186 = vmatpush.bf16.msra.mxu0 %v392_v17 }
  0x17   :  { %422 = vmatpush.bf16.msra.mxu2 %v392_v17  ;;  %205 = vmatpush.bf16.msra.mxu1 %v400_v19 }
  0x18   :  { %430 = vmatpush.bf16.msra.mxu3 %v400_v19 }
  0x1a   :  { %187 = vmatpush.bf16.msra.mxu0 %v391_v21 }
  0x1b   :  { %423 = vmatpush.bf16.msra.mxu2 %v391_v21  ;;  %206 = vmatpush.bf16.msra.mxu1 %v399_v22 }
  0x1c   :  { %431 = vmatpush.bf16.msra.mxu3 %v399_v22 }
  0x1e   :  { %188 = vmatpush.bf16.msra.mxu0 %v390_v23 }
  0x1f   :  { %424 = vmatpush.bf16.msra.mxu2 %v390_v23  ;;  %207 = vmatpush.bf16.msra.mxu1 %v398_v24 }
  0x20   :  { %432 = vmatpush.bf16.msra.mxu3 %v398_v24 }
  0x21   :  { %189 = vmatmul.bf16.vlgmr.msra.gmra.mxu0 %v309_v33 }
  0x22   :  { %194 = vmatmul.bf16.vlgmr.msra.gmra.mxu2 %v317_v34  ;;  %208 = vmatmul.bf16.vlgmr.msra.gmra.mxu1 %v313_v35 }
  0x23   :  { %213 = vmatmul.bf16.vlgmr.msra.gmra.mxu3 %v321_v36 }
  0x5f   :  { %v269_v41 = vpop.permute.xlu2 %268 }
  0x67   :  { %v274_v54 = vpop.permute.xlu2 %273 }
  0x76   :  { %v251_v38 = vpop.permute.xlu1 %250 }
  0x77   :  { %v241_v37 = vpop.permute.xlu0 %240 }
  0x7e   :  { %v256_v48 = vpop.permute.xlu1 %255 }
  0x7f   :  { %v246_v44 = vpop.permute.xlu0 %245 }
  0x86   :  { %v284_v2 = vpop.permute.xlu1 %283 }
  0x87   :  { %v279_v62 = vpop.permute.xlu0 %278 }
  0x9e   :  { %v190_v39 = vpop.f32.mrf.mxu0 }
  0x9f   :  { %v209_v40 = vpop.f32.mrf.mxu1 }
  0xa0   :  { %v210_v42 = vadd.f32 %v209_v40, %v190_v39 }
  0xa2   :  { %v258_v46 = vmul.f32 %v241_v37, %v210_v42 }
  0xa4   :  { %v286_v52 = vadd.f32 %v269_v41, %v258_v46 }
  0xa5   :  { %v195_v43 = vpop.f32.mrf.mxu2 }
  0xa6   :  { %v214_v45 = vpop.f32.mrf.mxu3  ;;  %v192_v47 = vpop.f32.mrf.mxu0  ;;  %v290_v59 = vmax.f32 %v286_v52, 0.0 }
  0xa7   :  { %v211_v49 = vpop.f32.mrf.mxu1  ;;  %v215_v50 = vadd.f32 %v214_v45, %v195_v43 }
  0xa8   :  { %v212_v51 = vadd.f32 %v211_v49, %v192_v47 }
  0xa9   :  { %v260_v55 = vmul.f32 %v251_v38, %v215_v50 }
  0xaa   :  { %v259_v53 = vmul.f32 %v246_v44, %v212_v51 }
  0xab   :  { %v288_v63 = vadd.f32 %v279_v62, %v260_v55 }
  0xac   :  { %v287_v56 = vadd.f32 %v274_v54, %v259_v53 }
  0xad   :  { %v197_v57 = vpop.f32.mrf.mxu2  ;;  %v292_v4 = vmax.f32 %v288_v63, 0.0 }
  0xae   :  { %v216_v58 = vpop.f32.mrf.mxu3  ;;  %v291_v60 = vmax.f32 %v287_v56, 0.0 }
  0xaf   :  { %v217_v61 = vadd.f32 %v216_v58, %v197_v57 }
  0xb0   :  { %v409_v0 = vpack.c.bf16 %v291_v60, %v290_v59 }
  0xb1   :  { %v261_v1 = vmul.f32 %v256_v48, %v217_v61 }
  0xb2   :  { %410 = vst [vmem:[%s569_s4] sm:$0xff] %v409_v0  }
  0xb3   :  { %v289_v3 = vadd.f32 %v284_v2, %v261_v1 }
  0xb5   :  { %v293_v5 = vmax.f32 %v289_v3, 0.0 }
  0xb7   :  { %v414_v6 = vpack.c.bf16 %v293_v5, %v292_v4 }
  0xb9   :  { %416 = vst [vmem:[%s569_s4 + $0x8] sm:$0xff] %v414_v6  }

// kernel: image_feature_extractor_bev_forward.60
= control target key start
LH: loop header
LB: loop body
LE: loop exit
PB: predicated region body
PF: predicated region fallthrough
CT: control target
= control target key end

     0   :  { %s1172_s15 = smov 0   ;;  %s1174_s16 = smov 0   ;;  %s1347_s0 = inlined_call_operand.vmem [shape: bf16[64,512], index: 0, kind: input, shape index: {}]   ;;  %s1348_s1 = inlined_call_operand.vmem [shape: bf16[512,128], index: 1, kind: input, shape index: {}]   ;;  %s1349_s2 = inlined_call_operand.vmem [shape: f32[64,1], index: 2, kind: input, shape index: {}]   ;;  %s1350_s3 = inlined_call_operand.vmem [shape: f32[64,1], index: 3, kind: input, shape index: {}]   ;;  %s1351_s4 = inlined_call_operand.vmem [shape: f32[64,128], index: 4, kind: output, shape index: {}]  }
   0x1   :  { %s1176_s17 = smov 0   ;;  %s1178_s18 = smov 0  }
   0x2   :  { %s1180_s19 = smov 0  }
   0x3 LB: > { %s26_s20 = sadd.s32 1, %s1139_s18  ;;  %p49_p1 = scmp.ne.s32.totalorder %s1131_s16, %s1127_s15  ;;  %s1143_s19 = sphi %s1180_s19, %s14_s19   ;;  %s1139_s18 = sphi %s1178_s18, %s1355_s18   ;;  %s1135_s17 = sphi %s1176_s17, %s1354_s17   ;;  %s1131_s16 = sphi %s1174_s16, %s1353_s16   ;;  %s1127_s15 = sphi %s1172_s15, %s1352_s15  }
   0x4   : > { %p27_p0 = scmp.ge.s32.totalorder %s26_s20, 2  ;;  %p50_p2 = scmp.eq.s32.totalorder %s1143_s19, 0 }
   0x5   : > { %s42_s22 = sadd.s32 1, %s1131_s16  ;;  %p909_p5 = scmp.ge.s32.totalorder %s1143_s19, 2 }
   0x6   : > { %s1357_s20 = smov (%p27_p0, %s26_s20), 0  ;;  %p51_p3 = por %p50_p2, %p49_p1 }
   0x7   : > { %s38_s21 = ssub.s32 %s1139_s18, %s1357_s20  ;;  %201 = sbr.rel (%p909_p5) target bundleno = 24 (0x18), region = 24 }
   0x8   : > { %p40_p4 = scmp.eq.s32.totalorder %s38_s21, 0 }
   0xa   : > { %s1207_s23 = scalar_select %p40_p4, %s1131_s16, %s42_s22  }
   0xc   : > { %204 = sbr.rel (!%p51_p3) target bundleno = 24 (0x18), region = 28  ;;  %s206_s24 = sand.u32 (%p51_p3), 1, %s1131_s16  }
   0xd   : > { %s1019_s25 = sshll.u32 (%p51_p3), %s1139_s18, 3  ;;  %s910_s26 = sshll.u32 (%p51_p3), %s206_s24, 6 }
   0xe   : > { %s214_s29 = scalar_lea.vmem (%p51_p3), %s1347_s0, %s1019_s25  ;;  %s208_s30 = scalar_lea.vmem (%p51_p3), [#allocation3], %s910_s26 }
   0xf   : > { %v257_v0 = vld [vmem:[%s214_s29] sm:$0xff] (%p51_p3)  ;;  %v259_v1 = vld [vmem:[%s214_s29 + $0x10] sm:$0xff] (%p51_p3) }
  0x10   : > { %v261_v2 = vld [vmem:[%s214_s29 + $0x20] sm:$0xff] (%p51_p3)  ;;  %258 = vst [vmem:[%s208_s30] sm:$0xff] (%p51_p3), %v257_v0  ;;  %v263_v3 = vld [vmem:[%s214_s29 + $0x30] sm:$0xff] (%p51_p3) }
  0x11   : > { %260 = vst [vmem:[%s208_s30 + $0x8] sm:$0xff] %v259_v1  ;;  %v265_v4 = vld [vmem:[%s214_s29 + $0x40] sm:$0xff]  ;;  %v267_v5 = vld [vmem:[%s214_s29 + $0x50] sm:$0xff] }
  0x12   : > { %262 = vst [vmem:[%s208_s30 + $0x10] sm:$0xff] %v261_v2  ;;  %v269_v6 = vld [vmem:[%s214_s29 + $0x60] sm:$0xff]  ;;  %v271_v7 = vld [vmem:[%s214_s29 + $0x70] sm:$0xff] }
  0x13   : > { %264 = vst [vmem:[%s208_s30 + $0x18] sm:$0xff] %v263_v3 }
  0x14   : > { %266 = vst [vmem:[%s208_s30 + $0x20] sm:$0xff] %v265_v4 }
  0x15   : > { %268 = vst [vmem:[%s208_s30 + $0x28] sm:$0xff] %v267_v5 }
  0x16   : > { %270 = vst [vmem:[%s208_s30 + $0x30] sm:$0xff] %v269_v6 }
  0x17   : > { %272 = vst [vmem:[%s208_s30 + $0x38] sm:$0xff] %v271_v7 }
  0x18 PF: > { %p913_p6 = scmp.ge.s32.totalorder %s1143_s19, 1  ;;  %p289_p7 = scmp.lt.s32.totalorder %s1143_s19, 3 }
  0x1a   : > { %p290_p8 = pnand %p913_p6, %p289_p7 }
  0x1b   : > { %s296_s5 = sand.u32 (!%p290_p8), 1, %s1127_s15   ;;  %s915_s6 = sshll.u32 (!%p290_p8), %s1135_s17, 5 }
  0x1c   : > { %293 = sbr.rel (%p290_p8) target bundleno = 402 (0x192), region = 70  ;;  %s914_s7 = sshll.u32 (!%p290_p8), %s296_s5, 6 }
  0x1d   : > { %p345_p9 = scmp.lt.s32.totalorder (!%p290_p8), %s915_s6, 63  ;;  %s1224_s12 = scalar_lea.vmem (!%p290_p8), [#allocation3], %s914_s7 }
  0x1e   : > { %p917_p10 = scmp.ne.s32.totalorder (!%p290_p8), %s1135_s17, 0 }
  0x21   : > { %s1359_s6 = smov (!%p345_p9, %s915_s6), 63  ;;  %377 = sbr.rel (%p917_p10) target bundleno = 47 (0x2f), region = 78 }
  0x22   : > { %s916_s8 = sshll.u32 %s1359_s6, 2 }
  0x23   : > { %s1222_s11 = scalar_lea.vmem %s1348_s1, %s916_s8 }
  0x26   : > { %v1145_v8 = vmov 0.0  }
  0x27   : > { %378 = vst [vmem:[#allocation2 + $0x30] sm:$0xff] %v1145_v8 }
  0x28   : > { %379 = vst [vmem:[#allocation2] sm:$0xff] %v1145_v8 }
  0x29   : > { %380 = vst [vmem:[#allocation2 + $0x18] sm:$0xff] %v1145_v8 }
  0x2a   : > { %381 = vst [vmem:[#allocation2 + $0x10] sm:$0xff] %v1145_v8 }
  0x2b   : > { %382 = vst [vmem:[#allocation2 + $0x8] sm:$0xff] %v1145_v8 }
  0x2c   : > { %383 = vst [vmem:[#allocation2 + $0x20] sm:$0xff] %v1145_v8 }
  0x2d   : > { %384 = vst [vmem:[#allocation2 + $0x28] sm:$0xff] %v1145_v8 }
  0x2e   : > { %385 = vst [vmem:[#allocation2 + $0x38] sm:$0xff] %v1145_v8 }
  0x2f PF: > { %v1035_v9 = vld [vmem:[%s1222_s11 + $0x38] sm:$0xff]  ;;  %v1034_v11 = vld [vmem:[%s1222_s11 + $0x30] sm:$0xff]  ;;  %v1033_v13 = vld [vmem:[%s1222_s11 + $0x28] sm:$0xff]  ;;  %p1014_p11 = scmp.ne.s32.totalorder %s1135_s17, 1 }
  0x30   : > { %v1043_v10 = vld [vmem:[%s1222_s11 + $0x78] sm:$0xff]  ;;  %570 = vmatpush.bf16.msra.mxu0 %v1035_v9  ;;  %1044 = vmatpush.bf16.msra.mxu2 %v1035_v9  ;;  %v1042_v12 = vld [vmem:[%s1222_s11 + $0x70] sm:$0xff]  ;;  %v1041_v14 = vld [vmem:[%s1222_s11 + $0x68] sm:$0xff] }
  0x31   : > { %599 = vmatpush.bf16.msra.mxu1 %v1043_v10  ;;  %1052 = vmatpush.bf16.msra.mxu3 %v1043_v10  ;;  %v1032_v15 = vld [vmem:[%s1222_s11 + $0x20] sm:$0xff]  ;;  %v1031_v17 = vld [vmem:[%s1222_s11 + $0x18] sm:$0xff]  ;;  %v1030_v19 = vld [vmem:[%s1222_s11 + $0x10] sm:$0xff] }
  0x32   : > { %v1040_v16 = vld [vmem:[%s1222_s11 + $0x60] sm:$0xff]  ;;  %v1039_v18 = vld [vmem:[%s1222_s11 + $0x58] sm:$0xff]  ;;  %v1038_v20 = vld [vmem:[%s1222_s11 + $0x50] sm:$0xff] }
  0x33   : > { %v1029_v21 = vld [vmem:[%s1222_s11 + $0x8] sm:$0xff]  ;;  %v1028_v23 = vld [vmem:[%s1222_s11] sm:$0xff]  ;;  %v928_v37 = vld [vmem:[%s1224_s12 + $0x10] sm:$0xf] }
  0x34   : > { %571 = vmatpush.bf16.msra.mxu0 %v1034_v11  ;;  %1045 = vmatpush.bf16.msra.mxu2 %v1034_v11  ;;  %v1037_v22 = vld [vmem:[%s1222_s11 + $0x48] sm:$0xff]  ;;  %v1036_v24 = vld [vmem:[%s1222_s11 + $0x40] sm:$0xff]  ;;  %v1023_v38 = vld [vmem:[%s1224_s12 + $0x14] sm:$0xf0] }
  0x35   : > { %600 = vmatpush.bf16.msra.mxu1 %v1042_v12  ;;  %1053 = vmatpush.bf16.msra.mxu3 %v1042_v12  ;;  %v920_v25 = vld [vmem:[%s1224_s12] sm:$0xf]  ;;  %v1021_v26 = vld [vmem:[%s1224_s12 + $0x4] sm:$0xf0]  ;;  %v1020_v29 = vld [vmem:[%s1224_s12 + $0x4] sm:$0xf]  ;;  %v929_v45 = vor.u32 %v1023_v38, %v928_v37 }
  0x36   : > { %v936_v27 = vld [vmem:[%s1224_s12 + $0x20] sm:$0xf]  ;;  %v1025_v28 = vld [vmem:[%s1224_s12 + $0x24] sm:$0xf0]  ;;  %v922_v30 = vld [vmem:[%s1224_s12 + $0x8] sm:$0xf0]  ;;  %v921_v33 = vor.u32 %v1021_v26, %v920_v25 }
  0x37   : > { %v1024_v31 = vld [vmem:[%s1224_s12 + $0x24] sm:$0xf]  ;;  %v938_v32 = vld [vmem:[%s1224_s12 + $0x28] sm:$0xf0]  ;;  %v937_v34 = vor.u32 %v1025_v28, %v936_v27  ;;  %v925_v35 = vor.u32 %v1020_v29, %v922_v30  ;;  %v944_v39 = vld [vmem:[%s1224_s12 + $0x30] sm:$0xf] }
  0x38   : > { %572 = vmatpush.bf16.msra.mxu0 %v1033_v13  ;;  %1046 = vmatpush.bf16.msra.mxu2 %v1033_v13  ;;  %v941_v36 = vor.u32 %v1024_v31, %v938_v32  ;;  %v1027_v40 = vld [vmem:[%s1224_s12 + $0x34] sm:$0xf0]  ;;  %v1022_v41 = vld [vmem:[%s1224_s12 + $0x14] sm:$0xf]  ;;  %v930_v42 = vld [vmem:[%s1224_s12 + $0x18] sm:$0xf0] }
  0x39   : > { %601 = vmatpush.bf16.msra.mxu1 %v1041_v14  ;;  %1054 = vmatpush.bf16.msra.mxu3 %v1041_v14  ;;  %v1026_v43 = vld [vmem:[%s1224_s12 + $0x34] sm:$0xf]  ;;  %v946_v44 = vld [vmem:[%s1224_s12 + $0x38] sm:$0xf0]  ;;  %v945_v46 = vor.u32 %v1027_v40, %v944_v39  ;;  %v933_v47 = vor.u32 %v1022_v41, %v930_v42  ;;  %v390_v55 = vld [vmem:[#allocation2 + $0x8] sm:$0xff] }
  0x3a   : > { %v949_v48 = vor.u32 %v1026_v43, %v946_v44  ;;  %v386_v50 = vld [vmem:[#allocation2 + $0x30] sm:$0xff]  ;;  %v387_v59 = vld [vmem:[#allocation2] sm:$0xff]  ;;  %v388_v5 = vld [vmem:[#allocation2 + $0x18] sm:$0xff] }
  0x3b   : > { %v391_v1 = vld [vmem:[#allocation2 + $0x20] sm:$0xff]  ;;  %v392_v11 = vld [vmem:[#allocation2 + $0x28] sm:$0xff] }
  0x3c   : > { %573 = vmatpush.bf16.msra.mxu0 %v1032_v15  ;;  %1047 = vmatpush.bf16.msra.mxu2 %v1032_v15  ;;  %v389_v15 = vld [vmem:[#allocation2 + $0x10] sm:$0xff] }
  0x3d   : > { %602 = vmatpush.bf16.msra.mxu1 %v1040_v16  ;;  %1055 = vmatpush.bf16.msra.mxu3 %v1040_v16 }
  0x40   : > { %574 = vmatpush.bf16.msra.mxu0 %v1031_v17  ;;  %1048 = vmatpush.bf16.msra.mxu2 %v1031_v17 }
  0x41   : > { %603 = vmatpush.bf16.msra.mxu1 %v1039_v18  ;;  %1056 = vmatpush.bf16.msra.mxu3 %v1039_v18 }
  0x44   : > { %575 = vmatpush.bf16.msra.mxu0 %v1030_v19  ;;  %1049 = vmatpush.bf16.msra.mxu2 %v1030_v19 }
  0x45   : > { %604 = vmatpush.bf16.msra.mxu1 %v1038_v20  ;;  %1057 = vmatpush.bf16.msra.mxu3 %v1038_v20 }
  0x48   : > { %576 = vmatpush.bf16.msra.mxu0 %v1029_v21  ;;  %1050 = vmatpush.bf16.msra.mxu2 %v1029_v21  ;;  %v393_v21 = vld [vmem:[#allocation2 + $0x38] sm:$0xff] }
  0x49   : > { %605 = vmatpush.bf16.msra.mxu1 %v1037_v22  ;;  %1058 = vmatpush.bf16.msra.mxu3 %v1037_v22 }
  0x4c   : > { %577 = vmatpush.bf16.msra.mxu0 %v1028_v23  ;;  %1051 = vmatpush.bf16.msra.mxu2 %v1028_v23 }
  0x4d   : > { %606 = vmatpush.bf16.msra.mxu1 %v1036_v24  ;;  %1059 = vmatpush.bf16.msra.mxu3 %v1036_v24 }
  0x4f   : > { %578 = vmatmul.bf16.vlgmr.msra.gmra.mxu0 %v921_v33  ;;  %588 = vmatmul.bf16.vlgmr.msra.gmra.mxu2 %v937_v34 }
  0x50   : > { %607 = vmatmul.bf16.vlgmr.msra.gmra.mxu1 %v925_v35  ;;  %617 = vmatmul.bf16.vlgmr.msra.gmra.mxu3 %v941_v36 }
  0x5f   : > { %583 = vmatmul.bf16.gmra.mxu0 %v929_v45  ;;  %593 = vmatmul.bf16.gmra.mxu2 %v945_v46 }
  0x60   : > { %612 = vmatmul.bf16.gmra.mxu1 %v933_v47  ;;  %622 = vmatmul.bf16.gmra.mxu3 %v949_v48 }
  0xcc   : > { %v579_v49 = vpop.f32.mrf.mxu0 }
  0xcd   : > { %v608_v51 = vpop.f32.mrf.mxu1 }
  0xce   : > { %v609_v52 = vadd.f32 %v608_v51, %v579_v49 }
  0xd0   : > { %v628_v53 = vadd.f32 %v609_v52, %v386_v50 }
  0xd2   : > { %636 = vst [vmem:[#allocation2 + $0x30] sm:$0xff] %v628_v53  ;;  %v589_v54 = vpop.f32.mrf.mxu2 }
  0xd3   : > { %v618_v56 = vpop.f32.mrf.mxu3 }
  0xd4   : > { %v619_v57 = vadd.f32 %v618_v56, %v589_v54  ;;  %v581_v58 = vpop.f32.mrf.mxu0 }
  0xd5   : > { %v610_v60 = vpop.f32.mrf.mxu1 }
  0xd6   : > { %v632_v61 = vadd.f32 %v619_v57, %v390_v55  ;;  %v611_v62 = vadd.f32 %v610_v60, %v581_v58 }
  0xd8   : > { %640 = vst [vmem:[#allocation2 + $0x8] sm:$0xff] %v632_v61  ;;  %v629_v63 = vadd.f32 %v611_v62, %v387_v59 }
  0xda   : > { %637 = vst [vmem:[#allocation2] sm:$0xff] %v629_v63  ;;  %v591_v0 = vpop.f32.mrf.mxu2 }
  0xdb   : > { %v620_v2 = vpop.f32.mrf.mxu3 }
  0xdc   : > { %v621_v3 = vadd.f32 %v620_v2, %v591_v0  ;;  %v584_v4 = vpop.f32.mrf.mxu0 }
  0xdd   : > { %v613_v6 = vpop.f32.mrf.mxu1 }
  0xde   : > { %v633_v7 = vadd.f32 %v621_v3, %v391_v1  ;;  %v614_v8 = vadd.f32 %v613_v6, %v584_v4 }
  0xe0   : > { %641 = vst [vmem:[#allocation2 + $0x20] sm:$0xff] %v633_v7  ;;  %v630_v9 = vadd.f32 %v614_v8, %v388_v5 }
  0xe2   : > { %638 = vst [vmem:[#allocation2 + $0x18] sm:$0xff] %v630_v9  ;;  %v594_v10 = vpop.f32.mrf.mxu2 }
  0xe3   : > { %v623_v12 = vpop.f32.mrf.mxu3 }
  0xe4   : > { %v624_v13 = vadd.f32 %v623_v12, %v594_v10  ;;  %v586_v14 = vpop.f32.mrf.mxu0 }
  0xe5   : > { %v615_v16 = vpop.f32.mrf.mxu1 }
  0xe6   : > { %v634_v17 = vadd.f32 %v624_v13, %v392_v11  ;;  %v616_v18 = vadd.f32 %v615_v16, %v586_v14 }
  0xe8   : > { %642 = vst [vmem:[#allocation2 + $0x28] sm:$0xff] %v634_v17  ;;  %v631_v19 = vadd.f32 %v616_v18, %v389_v15 }
  0xea   : > { %639 = vst [vmem:[#allocation2 + $0x10] sm:$0xff] %v631_v19  ;;  %v596_v20 = vpop.f32.mrf.mxu2 }
  0xeb   : > { %v625_v22 = vpop.f32.mrf.mxu3 }
  0xec   : > { %v626_v23 = vadd.f32 %v625_v22, %v596_v20  ;;  %647 = sbr.rel (%p1014_p11) target bundleno = 402 (0x192), region = 82 }
  0xee   : > { %v635_v24 = vadd.f32 %v626_v23, %v393_v21 }
  0xf0   : > { %643 = vst [vmem:[#allocation2 + $0x38] sm:$0xff] %v635_v24 }
  0xf1   : > { %v660_v25 = vld [vmem:[%s1349_s2 + $0x20] sm:$0xff]  ;;  %v658_v26 = vld [vmem:[%s1349_s2 + $0x10] sm:$0xff]  ;;  %v1146_v28 = vmov 0   ;;  %v661_v29 = vld [vmem:[%s1349_s2 + $0x28] sm:$0xff] }
  0xf2   : > { %v656_v27 = vld [vmem:[%s1349_s2] sm:$0xff]  ;;  %1104 = vset.pattern.permute.xlu2 %v1146_v28  ;;  %1103 = vset.pattern.permute.xlu1 %v1146_v28  ;;  %v659_v30 = vld [vmem:[%s1349_s2 + $0x18] sm:$0xff]  ;;  %v657_v31 = vld [vmem:[%s1349_s2 + $0x8] sm:$0xff] }
  0xf3   : > { %1102 = vset.pattern.permute.xlu0 %v1146_v28  ;;  %686 = vperm.xlu2 %1104, %v660_v25   ;;  %v712_v32 = vld [vmem:[%s1350_s3] sm:$0xff]  ;;  %v663_v33 = vld [vmem:[%s1349_s2 + $0x38] sm:$0xff]  ;;  %v662_v34 = vld [vmem:[%s1349_s2 + $0x30] sm:$0xff] }
  0xf4   : > { %676 = vperm.xlu1 %1103, %v658_v26   ;;  %666 = vperm.xlu0 %1102, %v656_v27   ;;  %v715_v35 = vld [vmem:[%s1350_s3 + $0x18] sm:$0xff]  ;;  %v714_v36 = vld [vmem:[%s1350_s3 + $0x10] sm:$0xff]  ;;  %v713_v37 = vld [vmem:[%s1350_s3 + $0x8] sm:$0xff] }
  0xf5   : > { %v718_v38 = vld [vmem:[%s1350_s3 + $0x30] sm:$0xff]  ;;  %v717_v39 = vld [vmem:[%s1350_s3 + $0x28] sm:$0xff]  ;;  %v716_v40 = vld [vmem:[%s1350_s3 + $0x20] sm:$0xff] }
  0xf6   : > { %v719_v41 = vld [vmem:[%s1350_s3 + $0x38] sm:$0xff]  ;;  %v648_v45 = vld [vmem:[#allocation2 + $0x30] sm:$0xff]  ;;  %v654_v56 = vld [vmem:[#allocation2 + $0x28] sm:$0xff] }
  0xf7   : > { %v651_v50 = vld [vmem:[#allocation2 + $0x10] sm:$0xff]  ;;  %v650_v62 = vld [vmem:[#allocation2 + $0x18] sm:$0xff]  ;;  %v649_v63 = vld [vmem:[#allocation2] sm:$0xff] }
  0xf8   : > { %v652_v6 = vld [vmem:[#allocation2 + $0x8] sm:$0xff]  ;;  %v653_v7 = vld [vmem:[#allocation2 + $0x20] sm:$0xff]  ;;  %v655_v14 = vld [vmem:[#allocation2 + $0x38] sm:$0xff] }
  0xfb   : > { %691 = vperm.xlu2 %1104, %v661_v29  }
  0xfc   : > { %681 = vperm.xlu1 %1103, %v659_v30   ;;  %671 = vperm.xlu0 %1102, %v657_v31  }
 0x103   : > { %722 = vperm.xlu2 %1104, %v712_v32  }
 0x104   : > { %701 = vperm.xlu1 %1103, %v663_v33   ;;  %696 = vperm.xlu0 %1102, %v662_v34  }
 0x10b   : > { %737 = vperm.xlu2 %1104, %v715_v35  }
 0x10c   : > { %732 = vperm.xlu1 %1103, %v714_v36   ;;  %727 = vperm.xlu0 %1102, %v713_v37  }
 0x113   : > { %752 = vperm.xlu2 %1104, %v718_v38  }
 0x114   : > { %747 = vperm.xlu1 %1103, %v717_v39   ;;  %742 = vperm.xlu0 %1102, %v716_v40  }
 0x11c   : > { %757 = vperm.xlu0 %1102, %v719_v41  }
 0x14d   : > { %v687_v42 = vpop.permute.xlu2 %686 }
 0x14e   : > { %v708_v8 = vmul.f32 %v687_v42, %v652_v6 }
 0x155   : > { %v692_v43 = vpop.permute.xlu2 %691 }
 0x156   : > { %v709_v9 = vmul.f32 %v692_v43, %v653_v7 }
 0x15d   : > { %v723_v44 = vpop.permute.xlu2 %722 }
 0x165   : > { %v738_v51 = vpop.permute.xlu2 %737 }
 0x166   : > { %v677_v46 = vpop.permute.xlu1 %676  ;;  %v667_v47 = vpop.permute.xlu0 %666 }
 0x167   : > { %v704_v48 = vmul.f32 %v667_v47, %v648_v45  ;;  %v706_v0 = vmul.f32 %v677_v46, %v650_v62 }
 0x169   : > { %v760_v49 = vadd.f32 %v723_v44, %v704_v48 }
 0x16b   : > { %768 = vst [vmem:[%s1351_s4] sm:$0xff] %v760_v49 }
 0x16d   : > { %v753_v60 = vpop.permute.xlu2 %752 }
 0x16e   : > { %v682_v52 = vpop.permute.xlu1 %681  ;;  %v672_v53 = vpop.permute.xlu0 %671 }
 0x16f   : > { %v707_v54 = vmul.f32 %v682_v52, %v651_v50  ;;  %v705_v1 = vmul.f32 %v672_v53, %v649_v63 }
 0x171   : > { %v763_v55 = vadd.f32 %v738_v51, %v707_v54 }
 0x173   : > { %771 = vst [vmem:[%s1351_s4 + $0x18] sm:$0xff] %v763_v55 }
 0x176   : > { %v702_v57 = vpop.permute.xlu1 %701  ;;  %v697_v58 = vpop.permute.xlu0 %696 }
 0x177   : > { %v710_v59 = vmul.f32 %v697_v58, %v654_v56  ;;  %v711_v15 = vmul.f32 %v702_v57, %v655_v14 }
 0x179   : > { %v766_v61 = vadd.f32 %v753_v60, %v710_v59 }
 0x17b   : > { %774 = vst [vmem:[%s1351_s4 + $0x30] sm:$0xff] %v766_v61 }
 0x17e   : > { %v733_v2 = vpop.permute.xlu1 %732  ;;  %v728_v3 = vpop.permute.xlu0 %727 }
 0x17f   : > { %v762_v4 = vadd.f32 %v733_v2, %v706_v0  ;;  %v761_v5 = vadd.f32 %v728_v3, %v705_v1 }
 0x181   : > { %770 = vst [vmem:[%s1351_s4 + $0x10] sm:$0xff] %v762_v4 }
 0x182   : > { %769 = vst [vmem:[%s1351_s4 + $0x8] sm:$0xff] %v761_v5 }
 0x186   : > { %v748_v10 = vpop.permute.xlu1 %747  ;;  %v743_v11 = vpop.permute.xlu0 %742 }
 0x187   : > { %v765_v12 = vadd.f32 %v748_v10, %v709_v9  ;;  %v764_v13 = vadd.f32 %v743_v11, %v708_v8 }
 0x189   : > { %773 = vst [vmem:[%s1351_s4 + $0x28] sm:$0xff] %v765_v12 }
 0x18a   : > { %772 = vst [vmem:[%s1351_s4 + $0x20] sm:$0xff] %v764_v13 }
 0x18e   : > { %v758_v16 = vpop.permute.xlu0 %757 }
 0x18f   : > { %v767_v17 = vadd.f32 %v758_v16, %v711_v15 }
 0x191   : > { %775 = vst [vmem:[%s1351_s4 + $0x38] sm:$0xff] %v767_v17 }
 0x192 PF: > { %s14_s19 = sadd.s32 1, %s1143_s19   ;;  %s1352_s15 = smov %s1131_s16 }
 0x193   : > { %p11_p12 = scmp.ge.s32.totalorder %s14_s19, 4   ;;  %s1353_s16 = smov %s1207_s23 }
 0x194   : > { %s1354_s17 = smov %s1139_s18  ;;  %s1355_s18 = smov %s1357_s20 }
 0x195   :  { %13 = sbr.rel (!%p11_p12) target bundleno = 3 (0x3), region = 126 }

// kernel: image_feature_extractor_bev_forward.61
= control target key start
LH: loop header
LB: loop body
LE: loop exit
PB: predicated region body
PF: predicated region fallthrough
CT: control target
= control target key end

     0   :  { %vm16_vm0 = vcmask 523264   ;;  %v98_v4 = vmov 64.0   ;;  %vm82_vm6 = vcmask 519168   ;;  %s141_s0 = inlined_call_operand.vmem [shape: f32[16,64], index: 0, kind: input, shape index: {}]   ;;  %s142_s1 = inlined_call_operand.vmem [shape: f32[1,64], index: 1, kind: input, shape index: {}]   ;;  %s143_s2 = inlined_call_operand.vmem [shape: f32[1,64], index: 2, kind: input, shape index: {}]   ;;  %s144_s3 = inlined_call_operand.vmem [shape: bf16[16,64], index: 3, kind: output, shape index: {}]  }
   0x1   :  { %v14_v0 = vld [vmem:[%s141_s0] sm:$0xff]  ;;  %v15_v2 = vld [vmem:[%s141_s0 + $0x8] sm:$0xff]  ;;  %92 = vrcp.f32 %v98_v4 }
   0x2   :  { %v17_v1 = vsel %vm16_vm0, %v14_v0, 0.0  ;;  %v20_v3 = vsel %vm16_vm0, %v15_v2, 0.0  ;;  %v90_v35 = vld [vmem:[%s142_s1] ss:$0 sm:$0xff] }
   0x3   :  { %18 = vadd.xlane.f32.xlu0 %v17_v1  ;;  %v91_v38 = vld [vmem:[%s143_s2] ss:$0 sm:$0xff] }
   0x7   :  { %v93_v5 = vpop.eup %92 }
   0x8   :  { %v24_v6 = vmul.f32 64.0, %v93_v5  ;;  %vm28_vm1 = vweird.f32 %v93_v5 }
   0xa   :  { %v25_v7 = vsub.f32 1.0, %v24_v6 }
   0xb   :  { %21 = vadd.xlane.f32.xlu0 %v20_v3 }
   0xc   :  { %v26_v8 = vmul.f32 %v93_v5, %v25_v7 }
   0xe   :  { %v27_v9 = vadd.f32 %v93_v5, %v26_v8 }
  0x10   :  { %v29_v10 = vsel %vm28_vm1, %v93_v5, %v27_v9 }
  0x76   :  { %v19_v11 = vpop.xlane.xlu0 %18 }
  0x77   :  { %v30_v12 = vmul.f32 %v29_v10, %v19_v11 }
  0x79   :  { %v32_v13 = vsub.f32 %v14_v0, %v30_v12 }
  0x7b   :  { %v34_v14 = vmul.f32 %v32_v13, %v32_v13 }
  0x7d   :  { %v36_v15 = vsel %vm16_vm0, %v34_v14, 0.0 }
  0x7e   :  { %37 = vadd.xlane.f32.xlu1 %v36_v15  ;;  %v22_v16 = vpop.xlane.xlu0 %21 }
  0x7f   :  { %v31_v17 = vmul.f32 %v29_v10, %v22_v16 }
  0x81   :  { %v33_v18 = vsub.f32 %v15_v2, %v31_v17 }
  0x83   :  { %v35_v19 = vmul.f32 %v33_v18, %v33_v18 }
  0x85   :  { %v39_v20 = vsel %vm16_vm0, %v35_v19, 0.0 }
  0x86   :  { %40 = vadd.xlane.f32.xlu1 %v39_v20 }
  0xf1   :  { %v38_v21 = vpop.xlane.xlu1 %37 }
  0xf2   :  { %v42_v22 = vmul.f32 %v38_v21, %v29_v10 }
  0xf4   :  { %v44_v23 = vadd.f32 1e-06, %v42_v22 }
  0xf6   :  { %94 = vrsqrt.f32 %v44_v23  ;;  %vm52_vm3 = vweird.f32 %v44_v23 }
  0xf9   :  { %v41_v24 = vpop.xlane.xlu1 %40 }
  0xfa   :  { %v43_v25 = vmul.f32 %v41_v24, %v29_v10 }
  0xfc   :  { %v95_v26 = vpop.eup %94  ;;  %v45_v27 = vadd.f32 1e-06, %v43_v25 }
  0xfd   :  { %v47_v28 = vmul.f32 %v95_v26, %v44_v23  ;;  %vm53_vm2 = vweird.f32 %v95_v26 }
  0xfe   :  { %96 = vrsqrt.f32 %v45_v27  ;;  %vm54_vm4 = vmor %vm52_vm3, %vm53_vm2  ;;  %vm62_vm7 = vweird.f32 %v45_v27 }
  0xff   :  { %v48_v29 = vmul.f32 %v95_v26, %v47_v28 }
 0x101   :  { %v49_v30 = vmul.f32 0.5, %v48_v29 }
 0x103   :  { %v50_v31 = vsub.f32 1.5, %v49_v30 }
 0x104   :  { %v97_v32 = vpop.eup %96 }
 0x105   :  { %v51_v33 = vmul.f32 %v95_v26, %v50_v31  ;;  %v57_v34 = vmul.f32 %v97_v32, %v45_v27  ;;  %vm63_vm5 = vweird.f32 %v97_v32 }
 0x106   :  { %vm64_vm8 = vmor %vm62_vm7, %vm63_vm5 }
 0x107   :  { %v55_v36 = vsel %vm54_vm4, %v95_v26, %v51_v33  ;;  %v58_v37 = vmul.f32 %v97_v32, %v57_v34 }
 0x108   :  { %v66_v39 = vmul.f32 %v55_v36, %v32_v13 }
 0x109   :  { %v59_v40 = vmul.f32 0.5, %v58_v37 }
 0x10a   :  { %v72_v41 = vmul.f32 %v90_v35, %v66_v39 }
 0x10b   :  { %v60_v42 = vsub.f32 1.5, %v59_v40 }
 0x10c   :  { %v78_v43 = vadd.f32 %v91_v38, %v72_v41 }
 0x10d   :  { %v61_v44 = vmul.f32 %v97_v32, %v60_v42 }
 0x10e   :  { %v80_v45 = vpack.c.bf16 %v78_v43, %v78_v43 }
 0x10f   :  { %v65_v46 = vsel %vm64_vm8, %v97_v32, %v61_v44 }
 0x110   :  { %83 = vst.msk [vmem:[%s144_s3] sm:$0xf] %vm82_vm6, %v80_v45  ;;  %v67_v47 = vmul.f32 %v65_v46, %v33_v18 }
 0x112   :  { %v73_v48 = vmul.f32 %v90_v35, %v67_v47 }
 0x114   :  { %v79_v49 = vadd.f32 %v91_v38, %v73_v48 }
 0x116   :  { %v81_v50 = vpack.c.bf16 %v79_v49, %v79_v49 }
 0x118   :  { %84 = vst.msk [vmem:[%s144_s3 + $0x4] sm:$0xf] %vm82_vm6, %v81_v50 }

// kernel: image_feature_extractor_bev_forward.62
= control target key start
LH: loop header
LB: loop body
LE: loop exit
PB: predicated region body
PF: predicated region fallthrough
CT: control target
= control target key end

     0   :  { %s425_s1 = inlined_call_operand.vmem [shape: bf16[128,256], index: 1, kind: input, shape index: {}]   ;;  %s426_s0 = inlined_call_operand.vmem [shape: bf16[16,128], index: 0, kind: input, shape index: {}]   ;;  %s427_s2 = inlined_call_operand.vmem [shape: f32[1,256], index: 2, kind: input, shape index: {}]   ;;  %s428_s3 = inlined_call_operand.vmem [shape: f32[1,256], index: 3, kind: input, shape index: {}]   ;;  %s429_s4 = inlined_call_operand.vmem [shape: bf16[16,256], index: 4, kind: output, shape index: {}]  }
   0x1   :  { %v266_v0 = vld [vmem:[%s425_s1 + $0x70] sm:$0xf]  ;;  %v288_v1 = vld [vmem:[%s425_s1 + $0x74] sm:$0xf0]  ;;  %v287_v2 = vld [vmem:[%s425_s1 + $0x74] sm:$0xf] }
   0x2   :  { %v267_v3 = vor.u32 %v288_v1, %v266_v0  ;;  %v268_v4 = vld [vmem:[%s425_s1 + $0x78] sm:$0xf0]  ;;  %v258_v5 = vld [vmem:[%s425_s1 + $0x60] sm:$0xf]  ;;  %v286_v6 = vld [vmem:[%s425_s1 + $0x64] sm:$0xf0] }
   0x3   :  { %v271_v7 = vor.u32 %v287_v2, %v268_v4  ;;  %v285_v8 = vld [vmem:[%s425_s1 + $0x64] sm:$0xf]  ;;  %v260_v9 = vld [vmem:[%s425_s1 + $0x68] sm:$0xf0]  ;;  %v259_v10 = vor.u32 %v286_v6, %v258_v5  ;;  %v250_v12 = vld [vmem:[%s425_s1 + $0x50] sm:$0xf] }
   0x4   :  { %133 = vmatpush.bf16.msra.mxu0 %v267_v3  ;;  %v263_v11 = vor.u32 %v285_v8, %v260_v9  ;;  %v284_v13 = vld [vmem:[%s425_s1 + $0x54] sm:$0xf0]  ;;  %v283_v14 = vld [vmem:[%s425_s1 + $0x54] sm:$0xf]  ;;  %v252_v15 = vld [vmem:[%s425_s1 + $0x58] sm:$0xf0] }
   0x5   :  { %147 = vmatpush.bf16.msra.mxu1 %v271_v7  ;;  %v251_v16 = vor.u32 %v284_v13, %v250_v12  ;;  %v255_v17 = vor.u32 %v283_v14, %v252_v15  ;;  %v242_v18 = vld [vmem:[%s425_s1 + $0x40] sm:$0xf]  ;;  %v282_v19 = vld [vmem:[%s425_s1 + $0x44] sm:$0xf0]  ;;  %v281_v20 = vld [vmem:[%s425_s1 + $0x44] sm:$0xf] }
   0x6   :  { %v244_v21 = vld [vmem:[%s425_s1 + $0x48] sm:$0xf0]  ;;  %v243_v22 = vor.u32 %v282_v19, %v242_v18  ;;  %v234_v24 = vld [vmem:[%s425_s1 + $0x30] sm:$0xf]  ;;  %v280_v25 = vld [vmem:[%s425_s1 + $0x34] sm:$0xf0] }
   0x7   :  { %v247_v23 = vor.u32 %v281_v20, %v244_v21  ;;  %v279_v26 = vld [vmem:[%s425_s1 + $0x34] sm:$0xf]  ;;  %v236_v27 = vld [vmem:[%s425_s1 + $0x38] sm:$0xf0]  ;;  %v235_v28 = vor.u32 %v280_v25, %v234_v24  ;;  %v226_v30 = vld [vmem:[%s425_s1 + $0x20] sm:$0xf] }
   0x8   :  { %134 = vmatpush.bf16.msra.mxu0 %v259_v10  ;;  %v239_v29 = vor.u32 %v279_v26, %v236_v27  ;;  %v278_v31 = vld [vmem:[%s425_s1 + $0x24] sm:$0xf0]  ;;  %v277_v32 = vld [vmem:[%s425_s1 + $0x24] sm:$0xf]  ;;  %v228_v33 = vld [vmem:[%s425_s1 + $0x28] sm:$0xf0] }
   0x9   :  { %148 = vmatpush.bf16.msra.mxu1 %v263_v11  ;;  %v227_v34 = vor.u32 %v278_v31, %v226_v30  ;;  %v231_v35 = vor.u32 %v277_v32, %v228_v33  ;;  %v218_v36 = vld [vmem:[%s425_s1 + $0x10] sm:$0xf]  ;;  %v276_v37 = vld [vmem:[%s425_s1 + $0x14] sm:$0xf0]  ;;  %v275_v38 = vld [vmem:[%s425_s1 + $0x14] sm:$0xf] }
   0xa   :  { %v220_v39 = vld [vmem:[%s425_s1 + $0x18] sm:$0xf0]  ;;  %v219_v40 = vor.u32 %v276_v37, %v218_v36  ;;  %v210_v42 = vld [vmem:[%s425_s1] sm:$0xf]  ;;  %v274_v43 = vld [vmem:[%s425_s1 + $0x4] sm:$0xf0] }
   0xb   :  { %v223_v41 = vor.u32 %v275_v38, %v220_v39  ;;  %v273_v44 = vld [vmem:[%s425_s1 + $0x4] sm:$0xf]  ;;  %v212_v45 = vld [vmem:[%s425_s1 + $0x8] sm:$0xf0]  ;;  %v211_v46 = vor.u32 %v274_v43, %v210_v42  ;;  %v176_v49 = vld [vmem:[%s427_s2] sm:$0x3] }
   0xc   :  { %135 = vmatpush.bf16.msra.mxu0 %v251_v16  ;;  %v215_v47 = vor.u32 %v273_v44, %v212_v45  ;;  %v272_v48 = vld [vmem:[%s426_s0] sm:$0xff]  ;;  %v178_v51 = vperm.slane %v176_v49, 0  ;;  %v179_v52 = vperm.slane %v176_v49, 1 }
   0xd   :  { %149 = vmatpush.bf16.msra.mxu1 %v255_v17  ;;  %v186_v50 = vld [vmem:[%s428_s3] sm:$0x3] }
   0xe   :  { %v188_v53 = vperm.slane %v186_v50, 0  ;;  %v189_v55 = vperm.slane %v186_v50, 1 }
  0x10   :  { %136 = vmatpush.bf16.msra.mxu0 %v243_v22 }
  0x11   :  { %150 = vmatpush.bf16.msra.mxu1 %v247_v23 }
  0x14   :  { %137 = vmatpush.bf16.msra.mxu0 %v235_v28 }
  0x15   :  { %151 = vmatpush.bf16.msra.mxu1 %v239_v29 }
  0x18   :  { %138 = vmatpush.bf16.msra.mxu0 %v227_v34 }
  0x19   :  { %152 = vmatpush.bf16.msra.mxu1 %v231_v35 }
  0x1c   :  { %139 = vmatpush.bf16.msra.mxu0 %v219_v40 }
  0x1d   :  { %153 = vmatpush.bf16.msra.mxu1 %v223_v41 }
  0x20   :  { %140 = vmatpush.bf16.msra.mxu0 %v211_v46 }
  0x21   :  { %154 = vmatpush.bf16.msra.mxu1 %v215_v47 }
  0x23   :  { %141 = vmatmul.bf16.vlgmr.msra.gmra.mxu0 %v272_v48 }
  0x24   :  { %155 = vmatmul.bf16.vlgmr.msra.gmra.mxu1 %v272_v48 }
  0xa0   :  { %v142_v54 = vpop.f32.mrf.mxu0 }
  0xa1   :  { %v182_v56 = vmul.f32 %v178_v51, %v142_v54  ;;  %v156_v57 = vpop.f32.mrf.mxu1 }
  0xa2   :  { %v183_v58 = vmul.f32 %v179_v52, %v156_v57 }
  0xa3   :  { %v192_v59 = vadd.f32 %v188_v53, %v182_v56 }
  0xa4   :  { %v193_v60 = vadd.f32 %v189_v55, %v183_v58 }
  0xa6   :  { %v196_v61 = vpack.c.bf16 %v193_v60, %v192_v59 }
  0xa8   :  { %198 = vst [vmem:[%s429_s4] sm:$0xff] %v196_v61  ;;  %v144_v62 = vpop.f32.mrf.mxu0 }
  0xa9   :  { %v184_v63 = vmul.f32 %v178_v51, %v144_v62  ;;  %v158_v0 = vpop.f32.mrf.mxu1 }
  0xaa   :  { %v185_v1 = vmul.f32 %v179_v52, %v158_v0 }
  0xab   :  { %v194_v2 = vadd.f32 %v188_v53, %v184_v63 }
  0xac   :  { %v195_v3 = vadd.f32 %v189_v55, %v185_v1 }
  0xae   :  { %v197_v4 = vpack.c.bf16 %v195_v3, %v194_v2 }
  0xb0   :  { %199 = vst [vmem:[%s429_s4 + $0x8] sm:$0xff] %v197_v4 }

// kernel: image_feature_extractor_bev_forward.63
= control target key start
LH: loop header
LB: loop body
LE: loop exit
PB: predicated region body
PF: predicated region fallthrough
CT: control target
= control target key end

     0   :  { %s670_s12 = smov 0   ;;  %s747_s0 = inlined_call_operand.vmem [shape: bf16[8,5,16], index: 0, kind: input, shape index: {}]   ;;  %s748_s1 = inlined_call_operand.vmem [shape: bf16[8,5,16], index: 1, kind: input, shape index: {}]   ;;  %s749_s2 = inlined_call_operand.vmem [shape: bf16[8,5,16], index: 2, kind: input, shape index: {}]   ;;  %s750_s3 = inlined_call_operand.vmem [shape: bf16[8,5,16], index: 3, kind: output, shape index: {}]  }
   0x1 LB: > { %s593_s13 = sadd.s32 4294967295, %s647_s12   ;;  %p597_p0 = scmp.ge.s32.totalorder %s647_s12, 1  ;;  %s647_s12 = sphi %s670_s12, %s13_s12  }
   0x2   : > { %p160_p1 = scmp.lt.s32.totalorder %s647_s12, 3 }
   0x4   : > { %p161_p2 = pnand %p597_p0, %p160_p1 }
   0x5   : > { %s598_s14 = sshll.u32 (!%p161_p2), %s593_s13, 2 }
   0x6   : > { %164 = sbr.rel (%p161_p2) target bundleno = 571 (0x23b), region = 32  ;;  %p195_p3 = scmp.lt.s32.totalorder (!%p161_p2), %s598_s14, 7 }
   0xb   : > { %s754_s14 = smov (!%p195_p3, %s598_s14), 7  ;;  %vm231_vm0 = vcmask 130048   ;;  %vm312_vm1 = vcmask 36864   ;;  %vm417_vm2 = vcmask 1041408   ;;  %vm418_vm3 = vcmask 1042432  }
   0xc   : > { %s678_s15 = sshll.u32 %s754_s14, 2  ;;  %v649_v49 = vmov 65535   ;;  %vm413_vm10 = vcmask 39936  }
   0xd   : > { %s204_s18 = scalar_lea.vmem %s748_s1, %s678_s15  ;;  %s198_s21 = scalar_lea.vmem %s747_s0, %s678_s15  ;;  %v419_v50 = vsel %vm417_vm2, 4294967295, %v649_v49 }
   0xe   : > { %v223_v0 = vld [vmem:[%s204_s18] sm:$0x7]  ;;  %v225_v1 = vld [vmem:[%s204_s18 + $0x8] sm:$0x7]  ;;  %v224_v2 = vld [vmem:[%s204_s18 + $0x4] sm:$0x7]  ;;  %s210_s24 = scalar_lea.vmem %s749_s2, %s678_s15  ;;  %s216_s27 = scalar_lea.vmem %s750_s3, %s678_s15 }
   0xf   : > { %v236_v3 = vsel %vm231_vm0, %v223_v0, 0  ;;  %v274_v4 = vsel %vm231_vm0, %v225_v1, 0  ;;  %v255_v5 = vsel %vm231_vm0, %v224_v2, 0  ;;  %v226_v6 = vld [vmem:[%s204_s18 + $0xc] sm:$0x7]  ;;  %v420_v51 = vsel %vm418_vm3, %v419_v50, 0 }
  0x10   : > { %245 = vmatpush.bf16.xpose.msra.mxu0 %v236_v3  ;;  %283 = vmatpush.bf16.xpose.msra.mxu2 %v274_v4  ;;  %v293_v7 = vsel %vm231_vm0, %v226_v6, 0  ;;  %v219_v8 = vld [vmem:[%s198_s21] sm:$0x7]  ;;  %v221_v9 = vld [vmem:[%s198_s21 + $0x8] sm:$0x7] }
  0x11   : > { %264 = vmatpush.bf16.xpose.msra.mxu1 %v255_v5  ;;  %302 = vmatpush.bf16.xpose.msra.mxu3 %v293_v7  ;;  %v220_v10 = vld [vmem:[%s198_s21 + $0x4] sm:$0x7]  ;;  %v222_v11 = vld [vmem:[%s198_s21 + $0xc] sm:$0x7]  ;;  %v227_v48 = vld [vmem:[%s210_s24] sm:$0x7] }
  0x12   : > { %v422_v52 = vand.u32 %v420_v51, %v227_v48  ;;  %v229_v53 = vld [vmem:[%s210_s24 + $0x8] sm:$0x7]  ;;  %v228_v55 = vld [vmem:[%s210_s24 + $0x4] sm:$0x7]  ;;  %v230_v57 = vld [vmem:[%s210_s24 + $0xc] sm:$0x7] }
  0x13   : > { %v460_v54 = vand.u32 %v420_v51, %v229_v53  ;;  %v441_v56 = vand.u32 %v420_v51, %v228_v55  ;;  %v479_v59 = vand.u32 %v420_v51, %v230_v57  ;;  %v501_v50 = vld [vmem:[%s216_s27] sm:$0x7]  ;;  %v504_v55 = vld [vmem:[%s216_s27 + $0x4] sm:$0x7] }
  0x17   : > { %606 = vmatmul.msk.bf16.vlgmr.msra.gmra.mxu0 %vm231_vm0, %v219_v8  ;;  %608 = vmatmul.msk.bf16.vlgmr.msra.gmra.mxu2 %vm231_vm0, %v221_v9 }
  0x18   : > { %607 = vmatmul.msk.bf16.vlgmr.msra.gmra.mxu1 %vm231_vm0, %v220_v10  ;;  %609 = vmatmul.msk.bf16.vlgmr.msra.gmra.mxu3 %vm231_vm0, %v222_v11 }
  0x19   : > { %431 = vmatpush.bf16.msrb.mxu0 %v422_v52  ;;  %469 = vmatpush.bf16.msrb.mxu2 %v460_v54 }
  0x1a   : > { %450 = vmatpush.bf16.msrb.mxu1 %v441_v56  ;;  %488 = vmatpush.bf16.msrb.mxu3 %v479_v59 }
  0x94   : > { %v247_v12 = vpop.f32.mrf.mxu0 }
  0x95   : > { %v308_v13 = vmul.f32 0.25, %v247_v12  ;;  %v266_v14 = vpop.f32.mrf.mxu1 }
  0x96   : > { %v309_v16 = vmul.f32 0.25, %v266_v14 }
  0x97   : > { %v313_v15 = vsel %vm312_vm1, %v308_v13, -inf }
  0x98   : > { %314 = vmax.xlane.f32.xlu0 %v313_v15  ;;  %v316_v23 = vsel %vm312_vm1, %v309_v16, -inf }
  0x9a   : > { %v285_v17 = vpop.f32.mrf.mxu2 }
  0x9b   : > { %v310_v18 = vmul.f32 0.25, %v285_v17  ;;  %v304_v19 = vpop.f32.mrf.mxu3 }
  0x9c   : > { %v249_v20 = vpop.f32.mrf.mxu0  ;;  %v311_v24 = vmul.f32 0.25, %v304_v19 }
  0x9d   : > { %v268_v21 = vpop.f32.mrf.mxu1  ;;  %v319_v22 = vsel %vm312_vm1, %v310_v18, -inf }
  0x9e   : > { %320 = vmax.xlane.f32.xlu1 %v319_v22  ;;  %v322_v27 = vsel %vm312_vm1, %v311_v24, -inf }
  0xa0   : > { %317 = vmax.xlane.f32.xlu0 %v316_v23 }
  0xa2   : > { %v287_v25 = vpop.f32.mrf.mxu2 }
  0xa3   : > { %v306_v26 = vpop.f32.mrf.mxu3 }
  0xa6   : > { %323 = vmax.xlane.f32.xlu1 %v322_v27 }
 0x10b   : > { %v315_v28 = vpop.xlane.xlu0 %314 }
 0x10c   : > { %v325_v29 = vsub.f32 %v308_v13, %v315_v28 }
 0x10e   : > { %v329_v30 = vmul.f32 1.442695, %v325_v29 }
 0x110   : > { %625 = vpow2.f32 %v329_v30 }
 0x111   : > { %v321_v31 = vpop.xlane.xlu1 %320 }
 0x112   : > { %v327_v32 = vsub.f32 %v310_v18, %v321_v31 }
 0x113   : > { %v318_v33 = vpop.xlane.xlu0 %317 }
 0x114   : > { %v333_v34 = vmul.f32 1.442695, %v327_v32  ;;  %v326_v35 = vsub.f32 %v309_v16, %v318_v33 }
 0x116   : > { %v700_v36 = vpop.eup %625  ;;  %627 = vpow2.f32 %v333_v34  ;;  %v331_v37 = vmul.f32 1.442695, %v326_v35 }
 0x117   : > { %v337_v38 = vsel %vm312_vm1, %v700_v36, 0.0 }
 0x118   : > { %629 = vpow2.f32 %v331_v37  ;;  %338 = vadd.xlane.f32.xlu2 %v337_v38 }
 0x119   : > { %v324_v39 = vpop.xlane.xlu1 %323 }
 0x11a   : > { %v328_v40 = vsub.f32 %v311_v24, %v324_v39 }
 0x11c   : > { %v704_v41 = vpop.eup %627  ;;  %v335_v42 = vmul.f32 1.442695, %v328_v40 }
 0x11d   : > { %v343_v43 = vsel %vm312_vm1, %v704_v41, 0.0 }
 0x11e   : > { %v708_v44 = vpop.eup %629  ;;  %631 = vpow2.f32 %v335_v42  ;;  %344 = vadd.xlane.f32.xlu0 %v343_v43 }
 0x11f   : > { %v340_v45 = vsel %vm312_vm1, %v708_v44, 0.0 }
 0x120   : > { %341 = vadd.xlane.f32.xlu2 %v340_v45 }
 0x124   : > { %v712_v46 = vpop.eup %631 }
 0x125   : > { %v346_v47 = vsel %vm312_vm1, %v712_v46, 0.0 }
 0x126   : > { %347 = vadd.xlane.f32.xlu1 %v346_v47 }
 0x18b   : > { %v339_v58 = vpop.xlane.xlu2 %338 }
 0x18c   : > { %633 = vrcp.f32 %v339_v58  ;;  %v360_v1 = vand.u32 2147483648, %v339_v58  ;;  %v358_v3 = vand.u32 2147483647, %v339_v58  ;;  %vm354_vm5 = vweird.f32 %v339_v58 }
 0x18e   : > { %v361_v9 = vor.u32 1.1754944e-38, %v360_v1  ;;  %vm359_vm7 = vcmp.eq.f32.partialorder %v358_v3, 8.507059e+37 }
 0x191   : > { %v345_v60 = vpop.xlane.xlu0 %344 }
 0x192   : > { %v634_v61 = vpop.eup %633  ;;  %635 = vrcp.f32 %v345_v60  ;;  %v388_v13 = vand.u32 2147483647, %v345_v60  ;;  %v390_v14 = vand.u32 2147483648, %v345_v60  ;;  %vm384_vm9 = vweird.f32 %v345_v60 }
 0x193   : > { %v350_v62 = vmul.f32 %v634_v61, %v339_v58  ;;  %v342_v63 = vpop.xlane.xlu2 %341  ;;  %vm355_vm4 = vweird.f32 %v634_v61 }
 0x194   : > { %637 = vrcp.f32 %v342_v63  ;;  %vm356_vm6 = vmor %vm354_vm5, %vm355_vm4  ;;  %v373_v19 = vand.u32 2147483647, %v342_v63  ;;  %v375_v20 = vand.u32 2147483648, %v342_v63  ;;  %vm389_vm13 = vcmp.eq.f32.partialorder %v388_v13, 8.507059e+37 }
 0x195   : > { %v351_v0 = vsub.f32 1.0, %v350_v62  ;;  %v391_v25 = vor.u32 1.1754944e-38, %v390_v14  ;;  %vm369_vm14 = vweird.f32 %v342_v63  ;;  %vm498_vm5 = vcmask 124928  }
 0x196   : > { %v376_v30 = vor.u32 1.1754944e-38, %v375_v20  ;;  %vm374_vm0 = vcmp.eq.f32.partialorder %v373_v19, 8.507059e+37 }
 0x197   : > { %v352_v2 = vmul.f32 %v634_v61, %v351_v0 }
 0x198   : > { %v636_v4 = vpop.eup %635 }
 0x199   : > { %v353_v5 = vadd.f32 %v634_v61, %v352_v2  ;;  %v380_v6 = vmul.f32 %v636_v4, %v345_v60  ;;  %v348_v7 = vpop.xlane.xlu1 %347  ;;  %vm385_vm8 = vweird.f32 %v636_v4  ;;  %v507_v60 = vld [vmem:[%s216_s27 + $0x8] sm:$0x7]  ;;  %v510_v2 = vld [vmem:[%s216_s27 + $0xc] sm:$0x7] }
 0x19a   : > { %v638_v8 = vpop.eup %637  ;;  %639 = vrcp.f32 %v348_v7  ;;  %vm386_vm12 = vmor %vm384_vm9, %vm385_vm8  ;;  %v403_v35 = vand.u32 2147483647, %v348_v7  ;;  %vm399_vm2 = vweird.f32 %v348_v7 }
 0x19b   : > { %v381_v10 = vsub.f32 1.0, %v380_v6  ;;  %v365_v11 = vmul.f32 %v638_v8, %v342_v63  ;;  %v357_v12 = vsel %vm356_vm6, %v634_v61, %v353_v5  ;;  %vm370_vm11 = vweird.f32 %v638_v8 }
 0x19c   : > { %v362_v15 = vsel %vm359_vm7, %v361_v9, %v357_v12  ;;  %vm371_vm15 = vmor %vm369_vm14, %vm370_vm11  ;;  %vm404_vm4 = vcmp.eq.f32.partialorder %v403_v35, 8.507059e+37  ;;  %vm499_vm6 = vsmask.f32 2304 }
 0x19d   : > { %v382_v16 = vmul.f32 %v636_v4, %v381_v10  ;;  %v366_v17 = vsub.f32 1.0, %v365_v11  ;;  %v363_v18 = vmul.f32 %v700_v36, %v362_v15  ;;  %v405_v36 = vand.u32 2147483648, %v348_v7  ;;  %vm732_vm7 = vmand %vm498_vm5, %vm499_vm6 }
 0x19f   : > { %v383_v21 = vadd.f32 %v636_v4, %v382_v16  ;;  %v367_v22 = vmul.f32 %v638_v8, %v366_v17  ;;  %v409_v23 = vpack.c.bf16 %v363_v18, %v363_v18  ;;  %v406_v43 = vor.u32 1.1754944e-38, %v405_v36 }
 0x1a0   : > { %v640_v24 = vpop.eup %639 }
 0x1a1   : > { %v387_v26 = vsel %vm386_vm12, %v636_v4, %v383_v21  ;;  %v368_v27 = vadd.f32 %v638_v8, %v367_v22  ;;  %v395_v28 = vmul.f32 %v640_v24, %v348_v7  ;;  %610 = vmatmul.msk.bf16.vlgmr.msrb.gmra.mxu0 %vm413_vm10, %v409_v23  ;;  %vm400_vm1 = vweird.f32 %v640_v24 }
 0x1a2   : > { %v392_v29 = vsel %vm389_vm13, %v391_v25, %v387_v26  ;;  %vm401_vm3 = vmor %vm399_vm2, %vm400_vm1 }
 0x1a3   : > { %v372_v31 = vsel %vm371_vm15, %v638_v8, %v368_v27  ;;  %v396_v32 = vsub.f32 1.0, %v395_v28  ;;  %v393_v33 = vmul.f32 %v704_v41, %v392_v29 }
 0x1a4   : > { %v377_v34 = vsel %vm374_vm0, %v376_v30, %v372_v31 }
 0x1a5   : > { %v397_v37 = vmul.f32 %v640_v24, %v396_v32  ;;  %v411_v38 = vpack.c.bf16 %v393_v33, %v393_v33  ;;  %v378_v39 = vmul.f32 %v708_v44, %v377_v34 }
 0x1a7   : > { %v398_v40 = vadd.f32 %v640_v24, %v397_v37  ;;  %612 = vmatmul.msk.bf16.vlgmr.msrb.gmra.mxu2 %vm413_vm10, %v411_v38  ;;  %v410_v42 = vpack.c.bf16 %v378_v39, %v378_v39 }
 0x1a9   : > { %v402_v45 = vsel %vm401_vm3, %v640_v24, %v398_v40  ;;  %611 = vmatmul.msk.bf16.vlgmr.msrb.gmra.mxu1 %vm413_vm10, %v410_v42 }
 0x1aa   : > { %v407_v41 = vsel %vm404_vm4, %v406_v43, %v402_v45 }
 0x1ab   : > { %v408_v47 = vmul.f32 %v712_v46, %v407_v41 }
 0x1ad   : > { %v412_v48 = vpack.c.bf16 %v408_v47, %v408_v47 }
 0x1af   : > { %613 = vmatmul.msk.bf16.vlgmr.msrb.gmra.mxu3 %vm413_vm10, %v412_v48 }
 0x21e   : > { %v433_v44 = vpop.f32.mrf.mxu0 }
 0x21f   : > { %v494_v51 = vpack.c.bf16 %v433_v44, %v433_v44 }
 0x221   : > { %v502_v52 = vsel %vm732_vm7, %v494_v51, %v501_v50 }
 0x222   : > { %503 = vst [vmem:[%s216_s27] sm:$0x7] %v502_v52 }
 0x226   : > { %v435_v46 = vpop.f32.mrf.mxu0  ;;  %v452_v53 = vpop.f32.mrf.mxu1 }
 0x227   : > { %v495_v54 = vpack.c.bf16 %v452_v53, %v452_v53 }
 0x229   : > { %v505_v56 = vsel %vm732_vm7, %v495_v54, %v504_v55 }
 0x22a   : > { %v471_v57 = vpop.f32.mrf.mxu2  ;;  %506 = vst [vmem:[%s216_s27 + $0x4] sm:$0x7] %v505_v56 }
 0x22b   : > { %v496_v59 = vpack.c.bf16 %v471_v57, %v471_v57 }
 0x22d   : > { %v508_v63 = vsel %vm732_vm7, %v496_v59, %v507_v60 }
 0x22e   : > { %v454_v58 = vpop.f32.mrf.mxu1  ;;  %509 = vst [vmem:[%s216_s27 + $0x8] sm:$0x7] %v508_v63 }
 0x232   : > { %v473_v61 = vpop.f32.mrf.mxu2  ;;  %v490_v62 = vpop.f32.mrf.mxu3 }
 0x233   : > { %v497_v0 = vpack.c.bf16 %v490_v62, %v490_v62 }
 0x235   : > { %v511_v3 = vsel %vm732_vm7, %v497_v0, %v510_v2 }
 0x236   : > { %512 = vst [vmem:[%s216_s27 + $0xc] sm:$0x7] %v511_v3 }
 0x23a   : > { %v492_v1 = vpop.f32.mrf.mxu3 }
 0x23b PF: > { %s13_s12 = sadd.s32 1, %s647_s12  }
 0x23c   : > { %p10_p4 = scmp.ge.s32.totalorder %s13_s12, 4  }
 0x23e   :  { %12 = sbr.rel (!%p10_p4) target bundleno = 1 (0x1), region = 68 }

// kernel: image_feature_extractor_bev_forward.66
= control target key start
LH: loop header
LB: loop body
LE: loop exit
PB: predicated region body
PF: predicated region fallthrough
CT: control target
= control target key end

     0   :  { %s660_s1 = inlined_call_operand.vmem [shape: bf16[128,256], index: 1, kind: input, shape index: {}]   ;;  %s661_s0 = inlined_call_operand.vmem [shape: bf16[16,128], index: 0, kind: input, shape index: {}]   ;;  %s662_s2 = inlined_call_operand.vmem [shape: f32[1,256], index: 2, kind: input, shape index: {}]   ;;  %s663_s3 = inlined_call_operand.vmem [shape: f32[1,256], index: 3, kind: input, shape index: {}]   ;;  %s664_s4 = inlined_call_operand.vmem [shape: bf16[16,256], index: 4, kind: output, shape index: {}]  }
   0x1   :  { %v426_v0 = vld [vmem:[%s660_s1 + $0x70] sm:$0xf]  ;;  %v448_v1 = vld [vmem:[%s660_s1 + $0x74] sm:$0xf0]  ;;  %v447_v2 = vld [vmem:[%s660_s1 + $0x74] sm:$0xf] }
   0x2   :  { %v427_v3 = vor.u32 %v448_v1, %v426_v0  ;;  %v428_v4 = vld [vmem:[%s660_s1 + $0x78] sm:$0xf0]  ;;  %v418_v5 = vld [vmem:[%s660_s1 + $0x60] sm:$0xf]  ;;  %v446_v6 = vld [vmem:[%s660_s1 + $0x64] sm:$0xf0] }
   0x3   :  { %v431_v7 = vor.u32 %v447_v2, %v428_v4  ;;  %v445_v8 = vld [vmem:[%s660_s1 + $0x64] sm:$0xf]  ;;  %v420_v9 = vld [vmem:[%s660_s1 + $0x68] sm:$0xf0]  ;;  %v419_v10 = vor.u32 %v446_v6, %v418_v5  ;;  %v410_v12 = vld [vmem:[%s660_s1 + $0x50] sm:$0xf] }
   0x4   :  { %133 = vmatpush.bf16.msra.mxu0 %v427_v3  ;;  %v423_v11 = vor.u32 %v445_v8, %v420_v9  ;;  %v444_v13 = vld [vmem:[%s660_s1 + $0x54] sm:$0xf0]  ;;  %v443_v14 = vld [vmem:[%s660_s1 + $0x54] sm:$0xf]  ;;  %v412_v15 = vld [vmem:[%s660_s1 + $0x58] sm:$0xf0] }
   0x5   :  { %147 = vmatpush.bf16.msra.mxu1 %v431_v7  ;;  %v411_v16 = vor.u32 %v444_v13, %v410_v12  ;;  %v415_v17 = vor.u32 %v443_v14, %v412_v15  ;;  %v402_v18 = vld [vmem:[%s660_s1 + $0x40] sm:$0xf]  ;;  %v442_v19 = vld [vmem:[%s660_s1 + $0x44] sm:$0xf0]  ;;  %v441_v20 = vld [vmem:[%s660_s1 + $0x44] sm:$0xf] }
   0x6   :  { %v404_v21 = vld [vmem:[%s660_s1 + $0x48] sm:$0xf0]  ;;  %v403_v22 = vor.u32 %v442_v19, %v402_v18  ;;  %v394_v24 = vld [vmem:[%s660_s1 + $0x30] sm:$0xf]  ;;  %v440_v25 = vld [vmem:[%s660_s1 + $0x34] sm:$0xf0] }
   0x7   :  { %v407_v23 = vor.u32 %v441_v20, %v404_v21  ;;  %v439_v26 = vld [vmem:[%s660_s1 + $0x34] sm:$0xf]  ;;  %v396_v27 = vld [vmem:[%s660_s1 + $0x38] sm:$0xf0]  ;;  %v395_v28 = vor.u32 %v440_v25, %v394_v24  ;;  %v386_v30 = vld [vmem:[%s660_s1 + $0x20] sm:$0xf] }
   0x8   :  { %134 = vmatpush.bf16.msra.mxu0 %v419_v10  ;;  %v399_v29 = vor.u32 %v439_v26, %v396_v27  ;;  %v438_v31 = vld [vmem:[%s660_s1 + $0x24] sm:$0xf0]  ;;  %v437_v32 = vld [vmem:[%s660_s1 + $0x24] sm:$0xf]  ;;  %v388_v33 = vld [vmem:[%s660_s1 + $0x28] sm:$0xf0] }
   0x9   :  { %148 = vmatpush.bf16.msra.mxu1 %v423_v11  ;;  %v387_v34 = vor.u32 %v438_v31, %v386_v30  ;;  %v391_v35 = vor.u32 %v437_v32, %v388_v33  ;;  %v378_v36 = vld [vmem:[%s660_s1 + $0x10] sm:$0xf]  ;;  %v436_v37 = vld [vmem:[%s660_s1 + $0x14] sm:$0xf0]  ;;  %v435_v38 = vld [vmem:[%s660_s1 + $0x14] sm:$0xf] }
   0xa   :  { %v380_v39 = vld [vmem:[%s660_s1 + $0x18] sm:$0xf0]  ;;  %v379_v40 = vor.u32 %v436_v37, %v378_v36  ;;  %v370_v42 = vld [vmem:[%s660_s1] sm:$0xf]  ;;  %v434_v43 = vld [vmem:[%s660_s1 + $0x4] sm:$0xf0] }
   0xb   :  { %v383_v41 = vor.u32 %v435_v38, %v380_v39  ;;  %v433_v44 = vld [vmem:[%s660_s1 + $0x4] sm:$0xf]  ;;  %v372_v45 = vld [vmem:[%s660_s1 + $0x8] sm:$0xf0]  ;;  %v371_v46 = vor.u32 %v434_v43, %v370_v42  ;;  %v176_v49 = vld [vmem:[%s662_s2] sm:$0x3] }
   0xc   :  { %135 = vmatpush.bf16.msra.mxu0 %v411_v16  ;;  %v375_v47 = vor.u32 %v433_v44, %v372_v45  ;;  %v432_v48 = vld [vmem:[%s661_s0] sm:$0xff]  ;;  %v178_v51 = vperm.slane %v176_v49, 0  ;;  %v179_v52 = vperm.slane %v176_v49, 1 }
   0xd   :  { %149 = vmatpush.bf16.msra.mxu1 %v415_v17  ;;  %v186_v50 = vld [vmem:[%s663_s3] sm:$0x3] }
   0xe   :  { %v188_v53 = vperm.slane %v186_v50, 0  ;;  %v189_v55 = vperm.slane %v186_v50, 1 }
  0x10   :  { %136 = vmatpush.bf16.msra.mxu0 %v403_v22 }
  0x11   :  { %150 = vmatpush.bf16.msra.mxu1 %v407_v23 }
  0x14   :  { %137 = vmatpush.bf16.msra.mxu0 %v395_v28 }
  0x15   :  { %151 = vmatpush.bf16.msra.mxu1 %v399_v29 }
  0x18   :  { %138 = vmatpush.bf16.msra.mxu0 %v387_v34 }
  0x19   :  { %152 = vmatpush.bf16.msra.mxu1 %v391_v35 }
  0x1c   :  { %139 = vmatpush.bf16.msra.mxu0 %v379_v40 }
  0x1d   :  { %153 = vmatpush.bf16.msra.mxu1 %v383_v41 }
  0x20   :  { %140 = vmatpush.bf16.msra.mxu0 %v371_v46 }
  0x21   :  { %154 = vmatpush.bf16.msra.mxu1 %v375_v47 }
  0x23   :  { %141 = vmatmul.bf16.vlgmr.msra.gmra.mxu0 %v432_v48 }
  0x24   :  { %155 = vmatmul.bf16.vlgmr.msra.gmra.mxu1 %v432_v48 }
  0xa0   :  { %v142_v54 = vpop.f32.mrf.mxu0 }
  0xa1   :  { %v182_v56 = vmul.f32 %v178_v51, %v142_v54  ;;  %v156_v57 = vpop.f32.mrf.mxu1 }
  0xa2   :  { %v183_v58 = vmul.f32 %v179_v52, %v156_v57 }
  0xa3   :  { %v597_v59 = vadd.f32 %v188_v53, %v182_v56 }
  0xa4   :  { %v599_v60 = vadd.f32 %v189_v55, %v183_v58 }
  0xa5   :  { %v602_v61 = vmul.f32 0.70710677, %v597_v59 }
  0xa6   :  { %v605_v62 = vmul.f32 0.70710677, %v599_v60 }
  0xa7   :  { %v212_v63 = vand.u32 2147483647, %v602_v61 }
  0xa8   :  { %v213_v0 = vand.u32 2147483647, %v605_v62  ;;  %v144_v1 = vpop.f32.mrf.mxu0 }
  0xa9   :  { %v216_v2 = vmul.f32 0.3275911, %v212_v63  ;;  %v184_v3 = vmul.f32 %v178_v51, %v144_v1  ;;  %v158_v4 = vpop.f32.mrf.mxu1  ;;  %v320_v13 = vsub.f32 0.0, %v212_v63 }
  0xaa   :  { %v217_v5 = vmul.f32 0.3275911, %v213_v0  ;;  %v185_v6 = vmul.f32 %v179_v52, %v158_v4  ;;  %v321_v24 = vsub.f32 0.0, %v213_v0 }
  0xab   :  { %v220_v7 = vadd.f32 1.0, %v216_v2  ;;  %v609_v9 = vadd.f32 %v188_v53, %v184_v3  ;;  %v324_v23 = vmul.f32 %v320_v13, %v212_v63 }
  0xac   :  { %v221_v8 = vadd.f32 1.0, %v217_v5  ;;  %v611_v10 = vadd.f32 %v189_v55, %v185_v6  ;;  %v325_v39 = vmul.f32 %v321_v24, %v213_v0 }
  0xad   :  { %450 = vrcp.f32 %v220_v7  ;;  %v614_v11 = vmul.f32 0.70710677, %v609_v9  ;;  %v233_v26 = vand.u32 2147483647, %v220_v7  ;;  %v235_v27 = vand.u32 2147483648, %v220_v7 }
  0xae   :  { %452 = vrcp.f32 %v221_v8  ;;  %v617_v12 = vmul.f32 0.70710677, %v611_v10  ;;  %v250_v31 = vand.u32 2147483648, %v221_v8  ;;  %v248_v33 = vand.u32 2147483647, %v221_v8 }
  0xaf   :  { %v620_v14 = vand.u32 2147483647, %v614_v11  ;;  %vm229_vm2 = vweird.f32 %v220_v7  ;;  %v236_v35 = vor.u32 1.1754944e-38, %v235_v27  ;;  %vm244_vm4 = vweird.f32 %v221_v8 }
  0xb0   :  { %v623_v16 = vand.u32 2147483647, %v617_v12  ;;  %vm234_vm5 = vcmp.eq.f32.partialorder %v233_v26, 8.507059e+37  ;;  %v251_v38 = vor.u32 1.1754944e-38, %v250_v31  ;;  %v328_v41 = vmul.f32 1.442695, %v324_v23 }
  0xb1   :  { %v218_v19 = vmul.f32 0.3275911, %v620_v14  ;;  %vm249_vm7 = vcmp.eq.f32.partialorder %v248_v33, 8.507059e+37  ;;  %v330_v52 = vmul.f32 1.442695, %v325_v39  ;;  %v322_v6 = vsub.f32 0.0, %v620_v14 }
  0xb2   :  { %v219_v21 = vmul.f32 0.3275911, %v623_v16  ;;  %v323_v26 = vsub.f32 0.0, %v623_v16 }
  0xb3   :  { %v451_v15 = vpop.eup %450  ;;  %v627_v25 = vadd.f32 1.0, %v218_v19 }
  0xb4   :  { %v453_v17 = vpop.eup %452  ;;  %v225_v18 = vmul.f32 %v451_v15, %v220_v7  ;;  %v629_v29 = vadd.f32 1.0, %v219_v21  ;;  %vm230_vm0 = vweird.f32 %v451_v15 }
  0xb5   :  { %v240_v20 = vmul.f32 %v453_v17, %v221_v8  ;;  %454 = vrcp.f32 %v627_v25  ;;  %vm245_vm1 = vweird.f32 %v453_v17  ;;  %vm231_vm3 = vmor %vm229_vm2, %vm230_vm0  ;;  %v263_v55 = vand.u32 2147483647, %v627_v25 }
  0xb6   :  { %v226_v22 = vsub.f32 1.0, %v225_v18  ;;  %456 = vrcp.f32 %v629_v29  ;;  %vm246_vm6 = vmor %vm244_vm4, %vm245_vm1  ;;  %v265_v56 = vand.u32 2147483648, %v627_v25  ;;  %v280_v0 = vand.u32 2147483648, %v629_v29 }
  0xb7   :  { %v241_v28 = vsub.f32 1.0, %v240_v20  ;;  %458 = vpow2.f32 %v328_v41  ;;  %v278_v3 = vand.u32 2147483647, %v629_v29  ;;  %vm259_vm10 = vweird.f32 %v627_v25 }
  0xb8   :  { %v227_v30 = vmul.f32 %v451_v15, %v226_v22  ;;  %v266_v8 = vor.u32 1.1754944e-38, %v265_v56  ;;  %vm274_vm12 = vweird.f32 %v629_v29  ;;  %vm264_vm13 = vcmp.eq.f32.partialorder %v263_v55, 8.507059e+37 }
  0xb9   :  { %v242_v32 = vmul.f32 %v453_v17, %v241_v28  ;;  %v281_v19 = vor.u32 1.1754944e-38, %v280_v0  ;;  %vm279_vm15 = vcmp.eq.f32.partialorder %v278_v3, 8.507059e+37  ;;  %460 = vpow2.f32 %v330_v52 }
  0xba   :  { %v228_v34 = vadd.f32 %v451_v15, %v227_v30  ;;  %vm204_vm0 = vcmp.ge.f32.partialorder %v602_v61, 0.0  ;;  %vm205_vm1 = vcmp.ge.f32.partialorder %v605_v62, 0.0  ;;  %v196_v56 = vmul.f32 0.5, %v597_v59 }
  0xbb   :  { %v243_v36 = vadd.f32 %v453_v17, %v242_v32  ;;  %v455_v43 = vpop.eup %454  ;;  %v326_v32 = vmul.f32 %v322_v6, %v620_v14  ;;  %vm206_vm2 = vcmp.ge.f32.partialorder %v614_v11, 0.0 }
  0xbc   :  { %v232_v37 = vsel %vm231_vm3, %v451_v15, %v228_v34  ;;  %v457_v46 = vpop.eup %456  ;;  %v255_v48 = vmul.f32 %v455_v43, %v627_v25  ;;  %vm260_vm8 = vweird.f32 %v455_v43  ;;  %vm207_vm3 = vcmp.ge.f32.partialorder %v617_v12, 0.0 }
  0xbd   :  { %v237_v40 = vsel %vm234_vm5, %v236_v35, %v232_v37  ;;  %v247_v42 = vsel %vm246_vm6, %v453_v17, %v243_v36  ;;  %v270_v50 = vmul.f32 %v457_v46, %v629_v29  ;;  %vm275_vm9 = vweird.f32 %v457_v46  ;;  %vm261_vm11 = vmor %vm259_vm10, %vm260_vm8  ;;  %v459_v15 = vpop.eup %458 }
  0xbe   :  { %v284_v44 = vmul.f32 1.0614054, %v237_v40  ;;  %v252_v45 = vsel %vm249_vm7, %v251_v38, %v247_v42  ;;  %v256_v53 = vsub.f32 1.0, %v255_v48  ;;  %vm276_vm14 = vmor %vm274_vm12, %vm275_vm9  ;;  %v327_v36 = vmul.f32 %v323_v26, %v623_v16 }
  0xbf   :  { %v285_v47 = vmul.f32 1.0614054, %v252_v45  ;;  %v271_v57 = vsub.f32 1.0, %v270_v50  ;;  %v461_v42 = vpop.eup %460 }
  0xc0   :  { %v288_v49 = vadd.f32 -1.4531521, %v284_v44  ;;  %v257_v63 = vmul.f32 %v455_v43, %v256_v53  ;;  %v332_v44 = vmul.f32 1.442695, %v326_v32  ;;  %v334_v14 = vmul.f32 1.442695, %v327_v36 }
  0xc1   :  { %v289_v51 = vadd.f32 -1.4531521, %v285_v47  ;;  %v272_v2 = vmul.f32 %v457_v46, %v271_v57 }
  0xc2   :  { %v292_v54 = vmul.f32 %v288_v49, %v237_v40  ;;  %v258_v5 = vadd.f32 %v455_v43, %v257_v63  ;;  %462 = vpow2.f32 %v332_v44 }
  0xc3   :  { %v293_v58 = vmul.f32 %v289_v51, %v252_v45  ;;  %v273_v13 = vadd.f32 %v457_v46, %v272_v2  ;;  %v466_v51 = vmov -1.0   ;;  %464 = vpow2.f32 %v334_v14 }
  0xc4   :  { %v296_v1 = vadd.f32 1.4214138, %v292_v54  ;;  %v262_v18 = vsel %vm261_vm11, %v455_v43, %v258_v5  ;;  %v208_v52 = vsel %vm204_vm0, 1.0, %v466_v51 }
  0xc5   :  { %v297_v4 = vadd.f32 1.4214138, %v293_v58  ;;  %v267_v21 = vsel %vm264_vm13, %v266_v8, %v262_v18  ;;  %v277_v22 = vsel %vm276_vm14, %v457_v46, %v273_v13  ;;  %v197_v58 = vmul.f32 0.5, %v599_v60 }
  0xc6   :  { %v300_v7 = vmul.f32 %v296_v1, %v237_v40  ;;  %v286_v24 = vmul.f32 1.0614054, %v267_v21  ;;  %v282_v25 = vsel %vm279_vm15, %v281_v19, %v277_v22  ;;  %v211_v19 = vsel %vm207_vm3, 1.0, %v466_v51 }
  0xc7   :  { %v301_v17 = vmul.f32 %v297_v4, %v252_v45  ;;  %v287_v28 = vmul.f32 1.0614054, %v282_v25 }
  0xc8   :  { %v304_v20 = vadd.f32 -0.28449672, %v300_v7  ;;  %v290_v30 = vadd.f32 -1.4531521, %v286_v24  ;;  %v463_v5 = vpop.eup %462 }
  0xc9   :  { %v305_v23 = vadd.f32 -0.28449672, %v301_v17  ;;  %v291_v33 = vadd.f32 -1.4531521, %v287_v28  ;;  %v465_v7 = vpop.eup %464 }
  0xca   :  { %v308_v27 = vmul.f32 %v304_v20, %v237_v40  ;;  %v294_v35 = vmul.f32 %v290_v30, %v267_v21 }
  0xcb   :  { %v309_v29 = vmul.f32 %v305_v23, %v252_v45  ;;  %v295_v38 = vmul.f32 %v291_v33, %v282_v25  ;;  %v199_v23 = vmul.f32 0.5, %v611_v10 }
  0xcc   :  { %v312_v31 = vadd.f32 0.2548296, %v308_v27  ;;  %v298_v41 = vadd.f32 1.4214138, %v294_v35 }
  0xcd   :  { %v313_v34 = vadd.f32 0.2548296, %v309_v29  ;;  %v299_v46 = vadd.f32 1.4214138, %v295_v38 }
  0xce   :  { %v316_v37 = vmul.f32 %v312_v31, %v237_v40  ;;  %v302_v48 = vmul.f32 %v298_v41, %v267_v21 }
  0xcf   :  { %v317_v39 = vmul.f32 %v313_v34, %v252_v45  ;;  %v303_v50 = vmul.f32 %v299_v46, %v282_v25  ;;  %v209_v45 = vsel %vm205_vm1, 1.0, %v466_v51 }
  0xd0   :  { %v336_v43 = vmul.f32 %v459_v15, %v316_v37  ;;  %v306_v40 = vadd.f32 -0.28449672, %v302_v48  ;;  %v210_v15 = vsel %vm206_vm2, 1.0, %v466_v51 }
  0xd1   :  { %v337_v47 = vmul.f32 %v461_v42, %v317_v39  ;;  %v307_v54 = vadd.f32 -0.28449672, %v303_v50 }
  0xd2   :  { %v340_v49 = vsub.f32 1.0, %v336_v43  ;;  %v310_v61 = vmul.f32 %v306_v40, %v267_v21 }
  0xd3   :  { %v341_v16 = vsub.f32 1.0, %v337_v47  ;;  %v311_v62 = vmul.f32 %v307_v54, %v282_v25 }
  0xd4   :  { %v344_v53 = vmul.f32 %v340_v49, %v208_v52  ;;  %v314_v0 = vadd.f32 0.2548296, %v310_v61 }
  0xd5   :  { %v345_v55 = vmul.f32 %v341_v16, %v209_v45  ;;  %v315_v2 = vadd.f32 0.2548296, %v311_v62 }
  0xd6   :  { %v348_v57 = vadd.f32 1.0, %v344_v53  ;;  %v318_v4 = vmul.f32 %v314_v0, %v267_v21  ;;  %v198_v21 = vmul.f32 0.5, %v609_v9 }
  0xd7   :  { %v349_v63 = vadd.f32 1.0, %v345_v55  ;;  %v319_v6 = vmul.f32 %v315_v2, %v282_v25 }
  0xd8   :  { %v352_v1 = vmul.f32 %v348_v57, %v196_v56  ;;  %v338_v13 = vmul.f32 %v463_v5, %v318_v4 }
  0xd9   :  { %v353_v3 = vmul.f32 %v349_v63, %v197_v58  ;;  %v339_v59 = vmul.f32 %v465_v7, %v319_v6 }
  0xda   :  { %v342_v60 = vsub.f32 1.0, %v338_v13 }
  0xdb   :  { %v356_v8 = vpack.c.bf16 %v353_v3, %v352_v1  ;;  %v343_v17 = vsub.f32 1.0, %v339_v59 }
  0xdc   :  { %v346_v18 = vmul.f32 %v342_v60, %v210_v15 }
  0xdd   :  { %358 = vst [vmem:[%s664_s4] sm:$0xff] %v356_v8  ;;  %v347_v20 = vmul.f32 %v343_v17, %v211_v19 }
  0xde   :  { %v350_v22 = vadd.f32 1.0, %v346_v18 }
  0xdf   :  { %v351_v11 = vadd.f32 1.0, %v347_v20 }
  0xe0   :  { %v354_v24 = vmul.f32 %v350_v22, %v198_v21 }
  0xe1   :  { %v355_v25 = vmul.f32 %v351_v11, %v199_v23 }
  0xe3   :  { %v357_v12 = vpack.c.bf16 %v355_v25, %v354_v24 }
  0xe5   :  { %359 = vst [vmem:[%s664_s4 + $0x8] sm:$0xff] %v357_v12 }

// kernel: image_feature_extractor_bev_forward.64
= control target key start
LH: loop header
LB: loop body
LE: loop exit
PB: predicated region body
PF: predicated region fallthrough
CT: control target
= control target key end

     0   :  { %s267_s1 = inlined_call_operand.vmem [shape: bf16[128,128], index: 1, kind: input, shape index: {}]   ;;  %s268_s2 = inlined_call_operand.vmem [shape: f32[1,128], index: 2, kind: input, shape index: {}]   ;;  %s269_s3 = inlined_call_operand.vmem [shape: f32[1,128], index: 3, kind: input, shape index: {}]   ;;  %s270_s0 = inlined_call_operand.vmem [shape: bf16[16,128], index: 0, kind: input, shape index: {}]   ;;  %s271_s4 = inlined_call_operand.vmem [shape: f32[16,128], index: 4, kind: input, shape index: {}]   ;;  %s272_s5 = inlined_call_operand.vmem [shape: f32[16,128], index: 5, kind: output, shape index: {}]  }
   0x1   :  { %v189_v0 = vld [vmem:[%s267_s1 + $0x38] sm:$0xff]  ;;  %v188_v1 = vld [vmem:[%s267_s1 + $0x30] sm:$0xff]  ;;  %v187_v2 = vld [vmem:[%s267_s1 + $0x28] sm:$0xff] }
   0x2   :  { %100 = vmatpush.bf16.msra.mxu0 %v189_v0  ;;  %v186_v3 = vld [vmem:[%s267_s1 + $0x20] sm:$0xff]  ;;  %v185_v4 = vld [vmem:[%s267_s1 + $0x18] sm:$0xff]  ;;  %v184_v5 = vld [vmem:[%s267_s1 + $0x10] sm:$0xff] }
   0x3   :  { %v183_v6 = vld [vmem:[%s267_s1 + $0x8] sm:$0xff]  ;;  %v182_v7 = vld [vmem:[%s267_s1] sm:$0xff] }
   0x4   :  { %v181_v8 = vld [vmem:[%s270_s0] sm:$0xff]  ;;  %v136_v18 = vld [vmem:[%s271_s4 + $0x8] sm:$0xff] }
   0x5   :  { %v190_v9 = vld [vmem:[%s268_s2] ss:$0 sm:$0xff] }
   0x6   :  { %101 = vmatpush.bf16.msra.mxu0 %v188_v1  ;;  %v191_v10 = vld [vmem:[%s269_s3] ss:$0 sm:$0xff] }
   0x7   :  { %v135_v13 = vld [vmem:[%s271_s4] sm:$0xff] }
   0xa   :  { %102 = vmatpush.bf16.msra.mxu0 %v187_v2 }
   0xe   :  { %103 = vmatpush.bf16.msra.mxu0 %v186_v3 }
  0x12   :  { %104 = vmatpush.bf16.msra.mxu0 %v185_v4 }
  0x16   :  { %105 = vmatpush.bf16.msra.mxu0 %v184_v5 }
  0x1a   :  { %106 = vmatpush.bf16.msra.mxu0 %v183_v6 }
  0x1e   :  { %107 = vmatpush.bf16.msra.mxu0 %v182_v7 }
  0x21   :  { %108 = vmatmul.bf16.vlgmr.msra.gmra.mxu0 %v181_v8 }
  0x9e   :  { %v109_v11 = vpop.f32.mrf.mxu0 }
  0x9f   :  { %v127_v12 = vmul.f32 %v190_v9, %v109_v11 }
  0xa1   :  { %v133_v14 = vadd.f32 %v191_v10, %v127_v12 }
  0xa3   :  { %v137_v15 = vadd.f32 %v135_v13, %v133_v14 }
  0xa5   :  { %139 = vst [vmem:[%s272_s5] sm:$0xff] %v137_v15 }
  0xa6   :  { %v111_v16 = vpop.f32.mrf.mxu0 }
  0xa7   :  { %v128_v17 = vmul.f32 %v190_v9, %v111_v16 }
  0xa9   :  { %v134_v19 = vadd.f32 %v191_v10, %v128_v17 }
  0xab   :  { %v138_v20 = vadd.f32 %v136_v18, %v134_v19 }
  0xad   :  { %140 = vst [vmem:[%s272_s5 + $0x8] sm:$0xff] %v138_v20 }

// kernel: image_feature_extractor_bev_forward.68
= control target key start
LH: loop header
LB: loop body
LE: loop exit
PB: predicated region body
PF: predicated region fallthrough
CT: control target
= control target key end

     0   :  { %8 = vsyncpa [#allocation3], 0  ;;  %s140_s15 = smov [#allocation2]   ;;  %s184_s0 = inlined_call_operand.vmem [shape: f32[16,64], index: 0, kind: input, shape index: {}]   ;;  %s185_s1 = inlined_call_operand.vmem [shape: f32[1,64], index: 1, kind: input, shape index: {}]   ;;  %s186_s2 = inlined_call_operand.hbm [shape: f32[1,64], index: 2, kind: input, shape index: {}]   ;;  %s187_s3 = inlined_call_operand.vmem [shape: bf16[16,64], index: 3, kind: output, shape index: {}]  }
   0x1   :  { %s18_s14 = sshll.u32 %s186_s2, 4  ;;  %s20_s16 = sshll.u32 %s140_s15, 4  ;;  %s19_s14 = int_to_ptr.hbm [resolvable:$true] %s18_s14  ;;  %s21_s16 = int_to_ptr.vmem [resolvable:$true] %s20_s16 }
   0x2   :  { %23 = dma.hbm_to_vmem [thread:$0]  %s19_s14, 16, %s21_s16, [#allocation3]  }
   0x3   :  { %138 = dma.done.wait [#allocation3], 16  }
   0x4   :  { %139 = vsyncadd [#allocation3], 4294967280  ;;  %vm30_vm0 = vcmask 523264   ;;  %v28_v0 = vld [vmem:[%s184_s0] sm:$0xff]  ;;  %v29_v2 = vld [vmem:[%s184_s0 + $0x8] sm:$0xff]  ;;  %v141_v4 = vmov 64.0  }
   0x5   :  { %v31_v1 = vsel %vm30_vm0, %v28_v0, 0.0  ;;  %v34_v3 = vsel %vm30_vm0, %v29_v2, 0.0  ;;  %108 = vrcp.f32 %v141_v4  ;;  %v106_v35 = vld [vmem:[%s185_s1] ss:$0 sm:$0xff]  ;;  %vm96_vm6 = vcmask 519168  }
   0x6   :  { %32 = vadd.xlane.f32.xlu0 %v31_v1  ;;  %v107_v38 = vld [vmem:[#allocation2] ss:$0 sm:$0xff] }
   0xb   :  { %v109_v5 = vpop.eup %108 }
   0xc   :  { %v38_v6 = vmul.f32 64.0, %v109_v5  ;;  %vm42_vm1 = vweird.f32 %v109_v5 }
   0xe   :  { %35 = vadd.xlane.f32.xlu0 %v34_v3  ;;  %v39_v7 = vsub.f32 1.0, %v38_v6 }
  0x10   :  { %v40_v8 = vmul.f32 %v109_v5, %v39_v7 }
  0x12   :  { %v41_v9 = vadd.f32 %v109_v5, %v40_v8 }
  0x14   :  { %v43_v10 = vsel %vm42_vm1, %v109_v5, %v41_v9 }
  0x79   :  { %v33_v11 = vpop.xlane.xlu0 %32 }
  0x7a   :  { %v44_v12 = vmul.f32 %v43_v10, %v33_v11 }
  0x7c   :  { %v46_v13 = vsub.f32 %v28_v0, %v44_v12 }
  0x7e   :  { %v48_v14 = vmul.f32 %v46_v13, %v46_v13 }
  0x80   :  { %v50_v15 = vsel %vm30_vm0, %v48_v14, 0.0 }
  0x81   :  { %51 = vadd.xlane.f32.xlu1 %v50_v15  ;;  %v36_v16 = vpop.xlane.xlu0 %35 }
  0x82   :  { %v45_v17 = vmul.f32 %v43_v10, %v36_v16 }
  0x84   :  { %v47_v18 = vsub.f32 %v29_v2, %v45_v17 }
  0x86   :  { %v49_v19 = vmul.f32 %v47_v18, %v47_v18 }
  0x88   :  { %v53_v20 = vsel %vm30_vm0, %v49_v19, 0.0 }
  0x89   :  { %54 = vadd.xlane.f32.xlu1 %v53_v20 }
  0xf4   :  { %v52_v21 = vpop.xlane.xlu1 %51 }
  0xf5   :  { %v56_v22 = vmul.f32 %v52_v21, %v43_v10 }
  0xf7   :  { %v58_v23 = vadd.f32 1e-06, %v56_v22 }
  0xf9   :  { %110 = vrsqrt.f32 %v58_v23  ;;  %vm66_vm3 = vweird.f32 %v58_v23 }
  0xfc   :  { %v55_v24 = vpop.xlane.xlu1 %54 }
  0xfd   :  { %v57_v25 = vmul.f32 %v55_v24, %v43_v10 }
  0xff   :  { %v111_v26 = vpop.eup %110  ;;  %v59_v27 = vadd.f32 1e-06, %v57_v25 }
 0x100   :  { %v61_v28 = vmul.f32 %v111_v26, %v58_v23  ;;  %vm67_vm2 = vweird.f32 %v111_v26 }
 0x101   :  { %112 = vrsqrt.f32 %v59_v27  ;;  %vm68_vm4 = vmor %vm66_vm3, %vm67_vm2  ;;  %vm76_vm7 = vweird.f32 %v59_v27 }
 0x102   :  { %v62_v29 = vmul.f32 %v111_v26, %v61_v28 }
 0x104   :  { %v63_v30 = vmul.f32 0.5, %v62_v29 }
 0x106   :  { %v64_v31 = vsub.f32 1.5, %v63_v30 }
 0x107   :  { %v113_v32 = vpop.eup %112 }
 0x108   :  { %v65_v33 = vmul.f32 %v111_v26, %v64_v31  ;;  %v71_v34 = vmul.f32 %v113_v32, %v59_v27  ;;  %vm77_vm5 = vweird.f32 %v113_v32 }
 0x109   :  { %vm78_vm8 = vmor %vm76_vm7, %vm77_vm5 }
 0x10a   :  { %v69_v36 = vsel %vm68_vm4, %v111_v26, %v65_v33  ;;  %v72_v37 = vmul.f32 %v113_v32, %v71_v34 }
 0x10b   :  { %v80_v39 = vmul.f32 %v69_v36, %v46_v13 }
 0x10c   :  { %v73_v40 = vmul.f32 0.5, %v72_v37 }
 0x10d   :  { %v86_v41 = vmul.f32 %v106_v35, %v80_v39 }
 0x10e   :  { %v74_v42 = vsub.f32 1.5, %v73_v40 }
 0x10f   :  { %v92_v43 = vadd.f32 %v107_v38, %v86_v41 }
 0x110   :  { %v75_v44 = vmul.f32 %v113_v32, %v74_v42 }
 0x111   :  { %v94_v45 = vpack.c.bf16 %v92_v43, %v92_v43 }
 0x112   :  { %v79_v46 = vsel %vm78_vm8, %v113_v32, %v75_v44 }
 0x113   :  { %97 = vst.msk [vmem:[%s187_s3] sm:$0xf] %vm96_vm6, %v94_v45  ;;  %v81_v47 = vmul.f32 %v79_v46, %v47_v18 }
 0x115   :  { %v87_v48 = vmul.f32 %v106_v35, %v81_v47 }
 0x117   :  { %v93_v49 = vadd.f32 %v107_v38, %v87_v48 }
 0x119   :  { %v95_v50 = vpack.c.bf16 %v93_v49, %v93_v49 }
 0x11b   :  { %98 = vst.msk [vmem:[%s187_s3 + $0x4] sm:$0xf] %vm96_vm6, %v95_v50 }
 0x11c   :  { %103 = vsyncpa [#allocation3], 1 }

// kernel: image_feature_extractor_bev_forward.67
= control target key start
LH: loop header
LB: loop body
LE: loop exit
PB: predicated region body
PF: predicated region fallthrough
CT: control target
= control target key end

     0   :  { %s427_s1 = inlined_call_operand.vmem [shape: bf16[256,128], index: 1, kind: input, shape index: {}]   ;;  %s428_s0 = inlined_call_operand.vmem [shape: bf16[16,256], index: 0, kind: input, shape index: {}]   ;;  %s429_s2 = inlined_call_operand.vmem [shape: f32[1,128], index: 2, kind: input, shape index: {}]   ;;  %s430_s3 = inlined_call_operand.vmem [shape: f32[1,128], index: 3, kind: input, shape index: {}]   ;;  %s431_s4 = inlined_call_operand.vmem [shape: f32[16,128], index: 4, kind: input, shape index: {}]   ;;  %s432_s5 = inlined_call_operand.vmem [shape: f32[16,128], index: 5, kind: output, shape index: {}]  }
   0x1   :  { %v308_v0 = vld [vmem:[%s427_s1 + $0x38] sm:$0xff]  ;;  %v307_v2 = vld [vmem:[%s427_s1 + $0x30] sm:$0xff]  ;;  %v306_v4 = vld [vmem:[%s427_s1 + $0x28] sm:$0xff] }
   0x2   :  { %v316_v1 = vld [vmem:[%s427_s1 + $0x78] sm:$0xff]  ;;  %168 = vmatpush.bf16.msra.mxu0 %v308_v0  ;;  %v315_v3 = vld [vmem:[%s427_s1 + $0x70] sm:$0xff]  ;;  %v314_v5 = vld [vmem:[%s427_s1 + $0x68] sm:$0xff] }
   0x3   :  { %182 = vmatpush.bf16.msra.mxu1 %v316_v1  ;;  %v305_v6 = vld [vmem:[%s427_s1 + $0x20] sm:$0xff]  ;;  %v304_v8 = vld [vmem:[%s427_s1 + $0x18] sm:$0xff]  ;;  %v303_v10 = vld [vmem:[%s427_s1 + $0x10] sm:$0xff] }
   0x4   :  { %v313_v7 = vld [vmem:[%s427_s1 + $0x60] sm:$0xff]  ;;  %v312_v9 = vld [vmem:[%s427_s1 + $0x58] sm:$0xff]  ;;  %v311_v11 = vld [vmem:[%s427_s1 + $0x50] sm:$0xff] }
   0x5   :  { %v302_v12 = vld [vmem:[%s427_s1 + $0x8] sm:$0xff]  ;;  %v301_v14 = vld [vmem:[%s427_s1] sm:$0xff] }
   0x6   :  { %169 = vmatpush.bf16.msra.mxu0 %v307_v2  ;;  %v310_v13 = vld [vmem:[%s427_s1 + $0x48] sm:$0xff]  ;;  %v309_v15 = vld [vmem:[%s427_s1 + $0x40] sm:$0xff] }
   0x7   :  { %183 = vmatpush.bf16.msra.mxu1 %v315_v3  ;;  %v229_v16 = vld [vmem:[%s428_s0] sm:$0xf]  ;;  %v300_v17 = vld [vmem:[%s428_s0 + $0x4] sm:$0xf0]  ;;  %v299_v18 = vld [vmem:[%s428_s0 + $0x4] sm:$0xf] }
   0x8   :  { %v231_v19 = vld [vmem:[%s428_s0 + $0x8] sm:$0xf0]  ;;  %v230_v20 = vor.u32 %v300_v17, %v229_v16  ;;  %v317_v22 = vld [vmem:[%s429_s2] ss:$0 sm:$0xff] }
   0x9   :  { %v234_v21 = vor.u32 %v299_v18, %v231_v19  ;;  %v318_v26 = vld [vmem:[%s430_s3] ss:$0 sm:$0xff]  ;;  %v218_v35 = vld [vmem:[%s431_s4 + $0x8] sm:$0xff] }
   0xa   :  { %170 = vmatpush.bf16.msra.mxu0 %v306_v4  ;;  %v217_v28 = vld [vmem:[%s431_s4] sm:$0xff] }
   0xb   :  { %184 = vmatpush.bf16.msra.mxu1 %v314_v5 }
   0xe   :  { %171 = vmatpush.bf16.msra.mxu0 %v305_v6 }
   0xf   :  { %185 = vmatpush.bf16.msra.mxu1 %v313_v7 }
  0x12   :  { %172 = vmatpush.bf16.msra.mxu0 %v304_v8 }
  0x13   :  { %186 = vmatpush.bf16.msra.mxu1 %v312_v9 }
  0x16   :  { %173 = vmatpush.bf16.msra.mxu0 %v303_v10 }
  0x17   :  { %187 = vmatpush.bf16.msra.mxu1 %v311_v11 }
  0x1a   :  { %174 = vmatpush.bf16.msra.mxu0 %v302_v12 }
  0x1b   :  { %188 = vmatpush.bf16.msra.mxu1 %v310_v13 }
  0x1e   :  { %175 = vmatpush.bf16.msra.mxu0 %v301_v14 }
  0x1f   :  { %189 = vmatpush.bf16.msra.mxu1 %v309_v15 }
  0x21   :  { %176 = vmatmul.bf16.vlgmr.msra.gmra.mxu0 %v230_v20 }
  0x22   :  { %190 = vmatmul.bf16.vlgmr.msra.gmra.mxu1 %v234_v21 }
  0x9e   :  { %v177_v23 = vpop.f32.mrf.mxu0 }
  0x9f   :  { %v191_v24 = vpop.f32.mrf.mxu1 }
  0xa0   :  { %v192_v25 = vadd.f32 %v191_v24, %v177_v23 }
  0xa2   :  { %v209_v27 = vmul.f32 %v317_v22, %v192_v25 }
  0xa4   :  { %v215_v29 = vadd.f32 %v318_v26, %v209_v27 }
  0xa6   :  { %v219_v30 = vadd.f32 %v217_v28, %v215_v29  ;;  %v179_v31 = vpop.f32.mrf.mxu0 }
  0xa7   :  { %v193_v32 = vpop.f32.mrf.mxu1 }
  0xa8   :  { %221 = vst [vmem:[%s432_s5] sm:$0xff] %v219_v30  ;;  %v194_v33 = vadd.f32 %v193_v32, %v179_v31 }
  0xaa   :  { %v210_v34 = vmul.f32 %v317_v22, %v194_v33 }
  0xac   :  { %v216_v36 = vadd.f32 %v318_v26, %v210_v34 }
  0xae   :  { %v220_v37 = vadd.f32 %v218_v35, %v216_v36 }
  0xb0   :  { %222 = vst [vmem:[%s432_s5 + $0x8] sm:$0xff] %v220_v37 }

// kernel: image_feature_extractor_bev_forward.72
= control target key start
LH: loop header
LB: loop body
LE: loop exit
PB: predicated region body
PF: predicated region fallthrough
CT: control target
= control target key end

     0   :  { %8 = vsyncpa [#allocation3], 0  ;;  %s227_s0 = inlined_call_operand.vmem [shape: f32[16,64], index: 0, kind: input, shape index: {}]   ;;  %s228_s1 = inlined_call_operand.hbm [shape: f32[1,64], index: 1, kind: input, shape index: {}]   ;;  %s229_s2 = inlined_call_operand.hbm [shape: f32[1,64], index: 2, kind: input, shape index: {}]   ;;  %s230_s3 = inlined_call_operand.vmem [shape: bf16[16,64], index: 3, kind: output, shape index: {}]  }
   0x1   :  { %s17_s14 = sshll.u32 %s228_s1, 4  ;;  %s18_s14 = int_to_ptr.hbm [resolvable:$true] %s17_s14 }
   0x2   :  { %9 = vsyncpa [#allocation5], 0  ;;  %s182_s15 = smov [#allocation2]   ;;  %s28_s19 = sshll.u32 %s229_s2, 4  ;;  %s29_s19 = int_to_ptr.hbm [resolvable:$true] %s28_s19 }
   0x3   :  { %s19_s16 = sshll.u32 %s182_s15, 4  ;;  %s183_s20 = smov [#allocation4]   ;;  %s20_s16 = int_to_ptr.vmem [resolvable:$true] %s19_s16 }
   0x4   :  { %22 = dma.hbm_to_vmem [thread:$0]  %s18_s14, 16, %s20_s16, [#allocation3]  }
   0x5   :  { %s30_s21 = sshll.u32 %s183_s20, 4  ;;  %s31_s21 = int_to_ptr.vmem [resolvable:$true] %s30_s21 }
   0x6   :  { %33 = dma.hbm_to_vmem [thread:$0]  %s29_s19, 16, %s31_s21, [#allocation5]  }
   0x7   :  { %178 = dma.done.wait [#allocation3], 16  }
   0x8   :  { %179 = vsyncadd [#allocation3], 4294967280 }
   0x9   :  { %180 = dma.done.wait [#allocation5], 16  }
   0xa   :  { %181 = vsyncadd [#allocation5], 4294967280  ;;  %vm44_vm0 = vcmask 523264   ;;  %v42_v0 = vld [vmem:[%s227_s0] sm:$0xff]  ;;  %v43_v2 = vld [vmem:[%s227_s0 + $0x8] sm:$0xff]  ;;  %v184_v4 = vmov 64.0  }
   0xb   :  { %v45_v1 = vsel %vm44_vm0, %v42_v0, 0.0  ;;  %v48_v3 = vsel %vm44_vm0, %v43_v2, 0.0  ;;  %124 = vrcp.f32 %v184_v4  ;;  %v122_v35 = vld [vmem:[#allocation2] ss:$0 sm:$0xff]  ;;  %v123_v38 = vld [vmem:[#allocation4] ss:$0 sm:$0xff] }
   0xc   :  { %46 = vadd.xlane.f32.xlu0 %v45_v1  ;;  %vm110_vm6 = vcmask 519168  }
  0x11   :  { %v125_v5 = vpop.eup %124 }
  0x12   :  { %v52_v6 = vmul.f32 64.0, %v125_v5  ;;  %vm56_vm1 = vweird.f32 %v125_v5 }
  0x14   :  { %49 = vadd.xlane.f32.xlu0 %v48_v3  ;;  %v53_v7 = vsub.f32 1.0, %v52_v6 }
  0x16   :  { %v54_v8 = vmul.f32 %v125_v5, %v53_v7 }
  0x18   :  { %v55_v9 = vadd.f32 %v125_v5, %v54_v8 }
  0x1a   :  { %v57_v10 = vsel %vm56_vm1, %v125_v5, %v55_v9 }
  0x7f   :  { %v47_v11 = vpop.xlane.xlu0 %46 }
  0x80   :  { %v58_v12 = vmul.f32 %v57_v10, %v47_v11 }
  0x82   :  { %v60_v13 = vsub.f32 %v42_v0, %v58_v12 }
  0x84   :  { %v62_v14 = vmul.f32 %v60_v13, %v60_v13 }
  0x86   :  { %v64_v15 = vsel %vm44_vm0, %v62_v14, 0.0 }
  0x87   :  { %65 = vadd.xlane.f32.xlu1 %v64_v15  ;;  %v50_v16 = vpop.xlane.xlu0 %49 }
  0x88   :  { %v59_v17 = vmul.f32 %v57_v10, %v50_v16 }
  0x8a   :  { %v61_v18 = vsub.f32 %v43_v2, %v59_v17 }
  0x8c   :  { %v63_v19 = vmul.f32 %v61_v18, %v61_v18 }
  0x8e   :  { %v67_v20 = vsel %vm44_vm0, %v63_v19, 0.0 }
  0x8f   :  { %68 = vadd.xlane.f32.xlu1 %v67_v20 }
  0xfa   :  { %v66_v21 = vpop.xlane.xlu1 %65 }
  0xfb   :  { %v70_v22 = vmul.f32 %v66_v21, %v57_v10 }
  0xfd   :  { %v72_v23 = vadd.f32 1e-06, %v70_v22 }
  0xff   :  { %126 = vrsqrt.f32 %v72_v23  ;;  %vm80_vm3 = vweird.f32 %v72_v23 }
 0x102   :  { %v69_v24 = vpop.xlane.xlu1 %68 }
 0x103   :  { %v71_v25 = vmul.f32 %v69_v24, %v57_v10 }
 0x105   :  { %v127_v26 = vpop.eup %126  ;;  %v73_v27 = vadd.f32 1e-06, %v71_v25 }
 0x106   :  { %v75_v28 = vmul.f32 %v127_v26, %v72_v23  ;;  %vm81_vm2 = vweird.f32 %v127_v26 }
 0x107   :  { %128 = vrsqrt.f32 %v73_v27  ;;  %vm82_vm4 = vmor %vm80_vm3, %vm81_vm2  ;;  %vm90_vm7 = vweird.f32 %v73_v27 }
 0x108   :  { %v76_v29 = vmul.f32 %v127_v26, %v75_v28 }
 0x10a   :  { %v77_v30 = vmul.f32 0.5, %v76_v29 }
 0x10c   :  { %v78_v31 = vsub.f32 1.5, %v77_v30 }
 0x10d   :  { %v129_v32 = vpop.eup %128 }
 0x10e   :  { %v79_v33 = vmul.f32 %v127_v26, %v78_v31  ;;  %v85_v34 = vmul.f32 %v129_v32, %v73_v27  ;;  %vm91_vm5 = vweird.f32 %v129_v32 }
 0x10f   :  { %vm92_vm8 = vmor %vm90_vm7, %vm91_vm5 }
 0x110   :  { %v83_v36 = vsel %vm82_vm4, %v127_v26, %v79_v33  ;;  %v86_v37 = vmul.f32 %v129_v32, %v85_v34 }
 0x111   :  { %v94_v39 = vmul.f32 %v83_v36, %v60_v13 }
 0x112   :  { %v87_v40 = vmul.f32 0.5, %v86_v37 }
 0x113   :  { %v100_v41 = vmul.f32 %v122_v35, %v94_v39 }
 0x114   :  { %v88_v42 = vsub.f32 1.5, %v87_v40 }
 0x115   :  { %v106_v43 = vadd.f32 %v123_v38, %v100_v41 }
 0x116   :  { %v89_v44 = vmul.f32 %v129_v32, %v88_v42 }
 0x117   :  { %v108_v45 = vpack.c.bf16 %v106_v43, %v106_v43 }
 0x118   :  { %v93_v46 = vsel %vm92_vm8, %v129_v32, %v89_v44 }
 0x119   :  { %111 = vst.msk [vmem:[%s230_s3] sm:$0xf] %vm110_vm6, %v108_v45  ;;  %v95_v47 = vmul.f32 %v93_v46, %v61_v18 }
 0x11b   :  { %v101_v48 = vmul.f32 %v122_v35, %v95_v47 }
 0x11d   :  { %v107_v49 = vadd.f32 %v123_v38, %v101_v48 }
 0x11f   :  { %v109_v50 = vpack.c.bf16 %v107_v49, %v107_v49 }
 0x121   :  { %112 = vst.msk [vmem:[%s230_s3 + $0x4] sm:$0xf] %vm110_vm6, %v109_v50 }
 0x122   :  { %117 = vsyncpa [#allocation3], 1 }
 0x123   :  { %118 = vsyncpa [#allocation5], 1 }

// kernel: image_feature_extractor_bev_forward.75
= control target key start
LH: loop header
LB: loop body
LE: loop exit
PB: predicated region body
PF: predicated region fallthrough
CT: control target
= control target key end

     0   :  { %8 = vsyncpa [#allocation3], 0  ;;  %s226_s0 = inlined_call_operand.vmem [shape: f32[16,64], index: 0, kind: input, shape index: {}]   ;;  %s227_s1 = inlined_call_operand.hbm [shape: f32[1,64], index: 1, kind: input, shape index: {}]   ;;  %s228_s2 = inlined_call_operand.hbm [shape: f32[1,64], index: 2, kind: input, shape index: {}]   ;;  %s229_s3 = inlined_call_operand.vmem [shape: f32[16,64], index: 3, kind: output, shape index: {}]  }
   0x1   :  { %s17_s14 = sshll.u32 %s227_s1, 4  ;;  %s18_s14 = int_to_ptr.hbm [resolvable:$true] %s17_s14 }
   0x2   :  { %9 = vsyncpa [#allocation5], 0  ;;  %s179_s15 = smov [#allocation2]   ;;  %s28_s19 = sshll.u32 %s228_s2, 4  ;;  %s29_s19 = int_to_ptr.hbm [resolvable:$true] %s28_s19 }
   0x3   :  { %s19_s16 = sshll.u32 %s179_s15, 4  ;;  %s180_s20 = smov [#allocation4]   ;;  %s20_s16 = int_to_ptr.vmem [resolvable:$true] %s19_s16 }
   0x4   :  { %22 = dma.hbm_to_vmem [thread:$0]  %s18_s14, 16, %s20_s16, [#allocation3]  }
   0x5   :  { %s30_s21 = sshll.u32 %s180_s20, 4  ;;  %s31_s21 = int_to_ptr.vmem [resolvable:$true] %s30_s21 }
   0x6   :  { %33 = dma.hbm_to_vmem [thread:$0]  %s29_s19, 16, %s31_s21, [#allocation5]  }
   0x7   :  { %175 = dma.done.wait [#allocation3], 16  }
   0x8   :  { %176 = vsyncadd [#allocation3], 4294967280 }
   0x9   :  { %177 = dma.done.wait [#allocation5], 16  }
   0xa   :  { %178 = vsyncadd [#allocation5], 4294967280  ;;  %vm44_vm0 = vcmask 523264   ;;  %v42_v0 = vld [vmem:[%s226_s0] sm:$0xff]  ;;  %v43_v2 = vld [vmem:[%s226_s0 + $0x8] sm:$0xff]  ;;  %v181_v4 = vmov 64.0  }
   0xb   :  { %v45_v1 = vsel %vm44_vm0, %v42_v0, 0.0  ;;  %v48_v3 = vsel %vm44_vm0, %v43_v2, 0.0  ;;  %121 = vrcp.f32 %v181_v4  ;;  %v119_v35 = vld [vmem:[#allocation2] ss:$0 sm:$0xff]  ;;  %v120_v38 = vld [vmem:[#allocation4] ss:$0 sm:$0xff] }
   0xc   :  { %46 = vadd.xlane.f32.xlu0 %v45_v1 }
  0x11   :  { %v122_v5 = vpop.eup %121 }
  0x12   :  { %v52_v6 = vmul.f32 64.0, %v122_v5  ;;  %vm56_vm1 = vweird.f32 %v122_v5 }
  0x14   :  { %49 = vadd.xlane.f32.xlu0 %v48_v3  ;;  %v53_v7 = vsub.f32 1.0, %v52_v6 }
  0x16   :  { %v54_v8 = vmul.f32 %v122_v5, %v53_v7 }
  0x18   :  { %v55_v9 = vadd.f32 %v122_v5, %v54_v8 }
  0x1a   :  { %v57_v10 = vsel %vm56_vm1, %v122_v5, %v55_v9 }
  0x7f   :  { %v47_v11 = vpop.xlane.xlu0 %46 }
  0x80   :  { %v58_v12 = vmul.f32 %v57_v10, %v47_v11 }
  0x82   :  { %v60_v13 = vsub.f32 %v42_v0, %v58_v12 }
  0x84   :  { %v62_v14 = vmul.f32 %v60_v13, %v60_v13 }
  0x86   :  { %v64_v15 = vsel %vm44_vm0, %v62_v14, 0.0 }
  0x87   :  { %65 = vadd.xlane.f32.xlu1 %v64_v15  ;;  %v50_v16 = vpop.xlane.xlu0 %49 }
  0x88   :  { %v59_v17 = vmul.f32 %v57_v10, %v50_v16 }
  0x8a   :  { %v61_v18 = vsub.f32 %v43_v2, %v59_v17 }
  0x8c   :  { %v63_v19 = vmul.f32 %v61_v18, %v61_v18 }
  0x8e   :  { %v67_v20 = vsel %vm44_vm0, %v63_v19, 0.0 }
  0x8f   :  { %68 = vadd.xlane.f32.xlu1 %v67_v20 }
  0xfa   :  { %v66_v21 = vpop.xlane.xlu1 %65 }
  0xfb   :  { %v70_v22 = vmul.f32 %v66_v21, %v57_v10 }
  0xfd   :  { %v72_v23 = vadd.f32 1e-06, %v70_v22 }
  0xff   :  { %123 = vrsqrt.f32 %v72_v23  ;;  %vm80_vm3 = vweird.f32 %v72_v23 }
 0x102   :  { %v69_v24 = vpop.xlane.xlu1 %68 }
 0x103   :  { %v71_v25 = vmul.f32 %v69_v24, %v57_v10 }
 0x105   :  { %v124_v26 = vpop.eup %123  ;;  %v73_v27 = vadd.f32 1e-06, %v71_v25 }
 0x106   :  { %v75_v28 = vmul.f32 %v124_v26, %v72_v23  ;;  %vm81_vm2 = vweird.f32 %v124_v26 }
 0x107   :  { %125 = vrsqrt.f32 %v73_v27  ;;  %vm82_vm4 = vmor %vm80_vm3, %vm81_vm2  ;;  %vm90_vm6 = vweird.f32 %v73_v27 }
 0x108   :  { %v76_v29 = vmul.f32 %v124_v26, %v75_v28 }
 0x10a   :  { %v77_v30 = vmul.f32 0.5, %v76_v29 }
 0x10c   :  { %v78_v31 = vsub.f32 1.5, %v77_v30 }
 0x10d   :  { %v126_v32 = vpop.eup %125 }
 0x10e   :  { %v79_v33 = vmul.f32 %v124_v26, %v78_v31  ;;  %v85_v34 = vmul.f32 %v126_v32, %v73_v27  ;;  %vm91_vm5 = vweird.f32 %v126_v32 }
 0x10f   :  { %vm92_vm7 = vmor %vm90_vm6, %vm91_vm5 }
 0x110   :  { %v83_v36 = vsel %vm82_vm4, %v124_v26, %v79_v33  ;;  %v86_v37 = vmul.f32 %v126_v32, %v85_v34 }
 0x111   :  { %v94_v39 = vmul.f32 %v83_v36, %v60_v13 }
 0x112   :  { %v87_v40 = vmul.f32 0.5, %v86_v37 }
 0x113   :  { %v100_v41 = vmul.f32 %v119_v35, %v94_v39 }
 0x114   :  { %v88_v42 = vsub.f32 1.5, %v87_v40 }
 0x115   :  { %v106_v43 = vadd.f32 %v120_v38, %v100_v41 }
 0x116   :  { %v89_v44 = vmul.f32 %v126_v32, %v88_v42 }
 0x117   :  { %108 = vst.msk [vmem:[%s229_s3] sm:$0xff] %vm44_vm0, %v106_v43 }
 0x118   :  { %v93_v45 = vsel %vm92_vm7, %v126_v32, %v89_v44 }
 0x119   :  { %v95_v46 = vmul.f32 %v93_v45, %v61_v18 }
 0x11b   :  { %v101_v47 = vmul.f32 %v119_v35, %v95_v46 }
 0x11d   :  { %v107_v48 = vadd.f32 %v120_v38, %v101_v47 }
 0x11f   :  { %109 = vst.msk [vmem:[%s229_s3 + $0x8] sm:$0xff] %vm44_vm0, %v107_v48 }
 0x120   :  { %114 = vsyncpa [#allocation3], 1 }
 0x121   :  { %115 = vsyncpa [#allocation5], 1 }

// kernel: image_feature_extractor_bev_forward.76
= control target key start
LH: loop header
LB: loop body
LE: loop exit
PB: predicated region body
PF: predicated region fallthrough
CT: control target
= control target key end

     0   :  { %9 = vsyncpa [#allocation4], 0  ;;  %s227_s18 = smov [#allocation3]   ;;  %s292_s0 = inlined_call_operand.vmem [shape: bf16[16,128], index: 0, kind: input, shape index: {}]   ;;  %s293_s1 = inlined_call_operand.vmem [shape: bf16[128,128], index: 1, kind: input, shape index: {}]   ;;  %s294_s2 = inlined_call_operand.hbm [shape: f32[1,128], index: 2, kind: input, shape index: {}]   ;;  %s295_s3 = inlined_call_operand.vmem [shape: f32[1,128], index: 3, kind: input, shape index: {}]   ;;  %s296_s4 = inlined_call_operand.vmem [shape: f32[16,128], index: 4, kind: output, shape index: {}]  }
   0x1   :  { %s19_s17 = sshll.u32 %s294_s2, 4  ;;  %s21_s19 = sshll.u32 %s227_s18, 4  ;;  %s20_s17 = int_to_ptr.hbm [resolvable:$true] %s19_s17  ;;  %s22_s19 = int_to_ptr.vmem [resolvable:$true] %s21_s19 }
   0x2   :  { %24 = dma.hbm_to_vmem [thread:$0]  %s20_s17, 16, %s22_s19, [#allocation4]  }
   0x3   :  { %225 = dma.done.wait [#allocation4], 16  }
   0x4   :  { %226 = vsyncadd [#allocation4], 4294967280  ;;  %v197_v0 = vld [vmem:[%s293_s1 + $0x38] sm:$0xff]  ;;  %v196_v1 = vld [vmem:[%s293_s1 + $0x30] sm:$0xff] }
   0x5   :  { %111 = vmatpush.bf16.msra.mxu0 %v197_v0  ;;  %v195_v2 = vld [vmem:[%s293_s1 + $0x28] sm:$0xff]  ;;  %v194_v3 = vld [vmem:[%s293_s1 + $0x20] sm:$0xff]  ;;  %v193_v4 = vld [vmem:[%s293_s1 + $0x18] sm:$0xff] }
   0x6   :  { %v192_v5 = vld [vmem:[%s293_s1 + $0x10] sm:$0xff]  ;;  %v191_v6 = vld [vmem:[%s293_s1 + $0x8] sm:$0xff]  ;;  %v190_v7 = vld [vmem:[%s293_s1] sm:$0xff] }
   0x7   :  { %v189_v8 = vld [vmem:[%s292_s0] sm:$0xff] }
   0x8   :  { %v199_v9 = vld [vmem:[#allocation3] ss:$0 sm:$0xff] }
   0x9   :  { %112 = vmatpush.bf16.msra.mxu0 %v196_v1  ;;  %v200_v10 = vld [vmem:[%s295_s3] ss:$0 sm:$0xff] }
   0xd   :  { %113 = vmatpush.bf16.msra.mxu0 %v195_v2 }
  0x11   :  { %114 = vmatpush.bf16.msra.mxu0 %v194_v3 }
  0x15   :  { %115 = vmatpush.bf16.msra.mxu0 %v193_v4 }
  0x19   :  { %116 = vmatpush.bf16.msra.mxu0 %v192_v5 }
  0x1d   :  { %117 = vmatpush.bf16.msra.mxu0 %v191_v6 }
  0x21   :  { %118 = vmatpush.bf16.msra.mxu0 %v190_v7 }
  0x24   :  { %119 = vmatmul.bf16.vlgmr.msra.gmra.mxu0 %v189_v8 }
  0xa1   :  { %v120_v11 = vpop.f32.mrf.mxu0 }
  0xa2   :  { %v138_v12 = vmul.f32 %v199_v9, %v120_v11 }
  0xa4   :  { %v144_v13 = vadd.f32 %v200_v10, %v138_v12 }
  0xa6   :  { %146 = vst [vmem:[%s296_s4] sm:$0xff] %v144_v13 }
  0xa9   :  { %v122_v14 = vpop.f32.mrf.mxu0 }
  0xaa   :  { %v139_v15 = vmul.f32 %v199_v9, %v122_v14 }
  0xac   :  { %v145_v16 = vadd.f32 %v200_v10, %v139_v15 }
  0xae   :  { %147 = vst [vmem:[%s296_s4 + $0x8] sm:$0xff] %v145_v16 }
  0xaf   :  { %152 = vsyncpa [#allocation4], 1 }

// kernel: image_feature_extractor_bev_forward.77
= control target key start
LH: loop header
LB: loop body
LE: loop exit
PB: predicated region body
PF: predicated region fallthrough
CT: control target
= control target key end

     0   :  { %7 = vsyncpa [#allocation3], 0  ;;  %s506_s0 = inlined_call_operand.vmem [shape: f32[2,4,64], index: 0, kind: input, shape index: {}]   ;;  %s507_s1 = inlined_call_operand.vmem [shape: f32[2,4,1], index: 1, kind: input, shape index: {}]   ;;  %s508_s2 = inlined_call_operand.hbm [shape: f32[2,1,64], index: 2, kind: output, shape index: {}]  }
   0x1   :  { %9 = vsyncpa [#allocation3 + $0x1], 0  ;;  %s418_s9 = smov 0   ;;  %s420_s10 = smov 0  }
   0x2   :  { %s422_s11 = smov 0   ;;  %s424_s12 = smov 0  }
   0x3 LB: > { %s439_s13 = sadd.s32 4294967295, %s399_s12   ;;  %s281_s14 = sadd.s32 4294967294, %s399_s12   ;;  %s399_s12 = sphi %s424_s12, %s514_s12   ;;  %s395_s11 = sphi %s422_s11, %s513_s11   ;;  %s391_s10 = sphi %s420_s10, %s512_s10   ;;  %s387_s9 = sphi %s418_s9, %s511_s9  }
   0x4   : > { %s443_s15 = sadd.s32 1, %s399_s12   ;;  %s74_s16 = sadd.s32 1, %s395_s11 }
   0x5   : > { %s71_s17 = ssub.s32 %s399_s12, %s443_s15  ;;  %p84_p0 = scmp.ne.s32.totalorder %s395_s11, %s391_s10 }
   0x6   : > { %p72_p1 = scmp.eq.s32.totalorder %s71_s17, 0  ;;  %p85_p2 = scmp.eq.s32.totalorder %s439_s13, 1 }
   0x7   : > { %p90_p3 = scmp.ne.s32.totalorder %s391_s10, %s387_s9  ;;  %p91_p4 = scmp.eq.s32.totalorder %s281_s14, 1 }
   0x8   : > { %s454_s18 = scalar_select %p72_p1, %s395_s11, %s74_s16  }
   0x9   : > { %p456_p5 = por %p85_p2, %p84_p0  ;;  %p460_p6 = por %p91_p4, %p90_p3 }
   0xa   : > { %p284_p7 = scmp.ge.s32.totalorder %s399_s12, 1  ;;  %p123_p8 = scmp.lt.s32.totalorder %s399_s12, 3 }
   0xc   : > { %p124_p9 = pnand %p284_p7, %p123_p8 }
   0xd   : > { %p147_p10 = scmp.lt.s32.totalorder (!%p124_p9), %s439_s13, 1  ;;  %s145_s29 = sand.u32 (!%p124_p9), 1, %s391_s10  }
   0xe   : > { %127 = sbr.rel (%p124_p9) target bundleno = 191 (0xbf), region = 28  ;;  %s210_s4 = scalar_lea.hbm (!%p124_p9), %s508_s2, %s439_s13 }
   0xf   : > { %s146_s5 = scalar_lea.vmem (!%p124_p9), [#allocation2], %s145_s29  ;;  %s214_s7 = sshll.u32 (!%p124_p9), %s210_s4, 4  ;;  %s215_s7 = int_to_ptr.hbm [resolvable:$true] %s214_s7 }
  0x10   : > { %s212_s6 = sshll.u32 (!%p124_p9), %s146_s5, 4  ;;  %s202_s8 = scalar_lea.sflag (!%p124_p9), [#allocation3], %s145_s29  ;;  %s213_s6 = int_to_ptr.vmem [resolvable:$true] %s212_s6 }
  0x11   : > { %s351_s14 = sshra.s32 (!%p124_p9), %s215_s7, 4  ;;  %s352_s14 = int_to_ptr.hbm [resolvable:$true] %s351_s14 }
  0x12   : > { %s353_s16 = scalar_lea.hbm (!%p124_p9), %s352_s14, 1  ;;  %p358_p0 = scmp.lt.s32.totalorder (!%p124_p9), %s352_s14, %s508_s2 }
  0x13   : > { %v401_v0 = vmov 0   ;;  %s148_s21 = scalar_select %p147_p10, %s439_s13, 1  ;;  %v402_v16 = vmov 4.0   ;;  %vm183_vm4 = vcmask 519168   ;;  %vm199_vm6 = vcmask 516096  }
  0x14   : > { %330 = vset.pattern.permute.xlu0 %v401_v0  ;;  %p354_p11 = scmp.ne.s32.totalorder %s352_s14, %s353_s16 }
  0x15   : > { %s285_s22 = sshll.u32 %s148_s21, 2  ;;  %s357_s21 = scalar_lea.hbm %s508_s2, 2 }
  0x16   : > { %s154_s25 = scalar_lea.vmem %s507_s1, %s285_s22  ;;  %s150_s28 = scalar_lea.vmem %s506_s0, %s285_s22 }
  0x17   : > { %v156_v1 = vld [vmem:[%s154_s25] sm:$0xf]  ;;  %p355_p12 = pnand %p354_p11, %p456_p5  ;;  %p359_p1 = scmp.lt.s32.totalorder %s357_s21, %s353_s16 }
  0x18   : > { %v157_v2 = vsub.f32 0.0, %v156_v1  ;;  %v155_v18 = vld [vmem:[%s150_s28] sm:$0xf] }
  0x19   : > { %p356_p13 = pneg %p355_p12  ;;  %p360_p2 = por %p359_p1, %p358_p0 }
  0x1a   : > { %v158_v3 = vmul.f32 1.442695, %v157_v2 }
  0x1b   : > { %p361_p3 = pnand %p360_p2, %p356_p13 }
  0x1c   : > { %331 = vpow2.f32 %v158_v3 }
  0x22   : > { %v332_v4 = vpop.eup %331 }
  0x23   : > { %v160_v5 = vadd.f32 1.0, %v332_v4 }
  0x25   : > { %333 = vrcp.f32 %v160_v5  ;;  %v172_v8 = vand.u32 2147483648, %v160_v5  ;;  %vm166_vm0 = vweird.f32 %v160_v5  ;;  %v170_v10 = vand.u32 2147483647, %v160_v5 }
  0x26   : > { %335 = vrcp.f32 %v402_v16 }
  0x27   : > { %v173_v12 = vor.u32 1.1754944e-38, %v172_v8  ;;  %vm171_vm3 = vcmp.eq.f32.partialorder %v170_v10, 8.507059e+37 }
  0x2b   : > { %v334_v6 = vpop.eup %333 }
  0x2c   : > { %v162_v7 = vmul.f32 %v334_v6, %v160_v5  ;;  %vm167_vm1 = vweird.f32 %v334_v6  ;;  %v336_v17 = vpop.eup %335 }
  0x2d   : > { %vm168_vm2 = vmor %vm166_vm0, %vm167_vm1  ;;  %v192_v19 = vmul.f32 4.0, %v336_v17  ;;  %vm196_vm5 = vweird.f32 %v336_v17 }
  0x2e   : > { %v163_v9 = vsub.f32 1.0, %v162_v7 }
  0x2f   : > { %v193_v23 = vsub.f32 1.0, %v192_v19 }
  0x30   : > { %v164_v11 = vmul.f32 %v334_v6, %v163_v9 }
  0x31   : > { %v194_v26 = vmul.f32 %v336_v17, %v193_v23 }
  0x32   : > { %v165_v13 = vadd.f32 %v334_v6, %v164_v11 }
  0x33   : > { %v195_v29 = vadd.f32 %v336_v17, %v194_v26 }
  0x34   : > { %v169_v14 = vsel %vm168_vm2, %v334_v6, %v165_v13 }
  0x35   : > { %v174_v15 = vsel %vm171_vm3, %v173_v12, %v169_v14  ;;  %v197_v32 = vsel %vm196_vm5, %v336_v17, %v195_v29 }
  0x36   : > { %178 = vperm.xlu0 %330, %v174_v15  }
  0xa8   : > { %v179_v20 = vpop.permute.xlu0 %178 }
  0xa9   : > { %v181_v21 = vmul.f32 %v179_v20, %v155_v18 }
  0xab   : > { %v182_v22 = vadd.f32 %v181_v21, %v155_v18 }
  0xad   : > { %v184_v24 = vsel %vm183_vm4, %v182_v22, 0.0 }
  0xae   : > { %v185_v25 = vrot.slane %v184_v24, 4 }
  0xb0   : > { %v186_v27 = vadd.f32 %v185_v25, %v184_v24 }
  0xb2   : > { %v187_v28 = vrot.slane %v186_v27, 2 }
  0xb4   : > { %v188_v30 = vadd.f32 %v187_v28, %v186_v27 }
  0xb6   : > { %v189_v31 = vrot.slane %v188_v30, 1 }
  0xb8   : > { %v190_v33 = vadd.f32 %v189_v31, %v188_v30 }
  0xba   : > { %v198_v34 = vmul.f32 %v197_v32, %v190_v33 }
  0xbc   : > { %200 = vst.msk [vmem:[%s146_s5] sm:$0x1] %vm199_vm6, %v198_v34 }
  0xbd   : > { %364 = shalt.err (!%p361_p3)
}
  0xbe   : > { %289 = dma.vmem_to_hbm [thread:$0]  (%p456_p5), %s213_s6, 16, %s215_s7, %s202_s8  }
  0xbf PF: > { %p295_p4 = scmp.ge.s32.totalorder %s399_s12, 2  ;;  %s226_s24 = sand.u32 1, %s387_s9  }
  0xc0   : > { %s227_s25 = scalar_lea.sflag [#allocation3], %s226_s24 }
  0xc1   : > { %p292_p7 = pnand %p295_p4, %p460_p6 }
  0xc3   : > { %p293_p8 = pneg %p292_p7 }
  0xc5   : > { %382 = dma.done.wait (%p293_p8), %s227_s25, 16  }
  0xc6   : > { %384 = vsyncadd (%p293_p8), %s227_s25, 4294967280  ;;  %p12_p9 = scmp.ge.s32.totalorder %s443_s15, 4   ;;  %s511_s9 = smov %s391_s10 }
  0xc7   : > { %s512_s10 = smov %s395_s11  ;;  %s513_s11 = smov %s454_s18 }
  0xc8   : > { %s514_s12 = smov %s443_s15  ;;  %14 = sbr.rel (!%p12_p9) target bundleno = 3 (0x3), region = 66 }
  0xcd   :  { %232 = vsyncpa [#allocation3], 1 }
  0xce   :  { %234 = vsyncpa [#allocation3 + $0x1], 1 }

</bundles_post_ra>
